<compile_context>
chip_gen: v5e
topology: v5e:2x2
jax: 0.10.0
libtpu: 0.0.40
codegen_flags: <defaults>
</compile_context>

<pallas_src>
import functools

import jax
import jax.numpy as jnp
import numpy as np
from jax import lax
from jax.experimental import pallas as pl
from jax.experimental.pallas import tpu as pltpu

_VMEM_LIMIT_BYTES = 64 * 1024 * 1024


def _round_up(x, m):
    return ((x + m - 1) // m) * m


# ----------------------------------------------------------------------------
# Kernel 1: grouped Conv3d (flat-correlation taps) + bias + ReLU + fused GAP.
#   x_ref:    (Cin, Lx_pad)        bf16   flat zero-padded input
#   w_ref:    (radix, KK, C, Cin)  bf16   per-tap per-radix dense weights
#   b_ref:    (radix, C, 1)        f32
#   mask_ref: (1, L_pad)           f32    1.0 at valid output lanes
#   y_ref:    (radix, C, L_pad)    bf16   conv+bias+ReLU output (masked)
#   gap_ref:  (C, 1)               f32    mean over S of the radix-sum
# ----------------------------------------------------------------------------
def conv_bias_relu_gap_kernel(x_ref, w_ref, b_ref, mask_ref, y_ref, gap_ref,
                              *, radix, tap_offsets, l_pad, inv_s):
    C = y_ref.shape[1]
    wv = w_ref[...]                                   # small, keep resident
    bv = b_ref[...]
    accs = [jnp.zeros((C, l_pad), jnp.float32) for _ in range(radix)]
    for t, off in enumerate(tap_offsets):             # static offsets -> static slices
        x_t = x_ref[:, off:off + l_pad]               # (Cin, l_pad) bf16
        for r in range(radix):
            accs[r] = accs[r] + jnp.dot(wv[r, t], x_t,
                                        preferred_element_type=jnp.float32)
    maskv = mask_ref[...]                             # (1, l_pad)
    gsum = None
    for r in range(radix):
        yv = jnp.maximum(accs[r] + bv[r], 0.0) * maskv
        y_ref[r] = yv.astype(y_ref.dtype)
        gsum = yv if gsum is None else gsum + yv
    gap_ref[...] = jnp.sum(gsum, axis=1, keepdims=True) * inv_s


# ----------------------------------------------------------------------------
# Kernel 2: apply split-attention weights, streaming lane tiles.
#   y_ref: (radix, C, tile_l) bf16    a_ref: (radix, C, 1) f32
#   o_ref: (C, tile_l) f32
# ----------------------------------------------------------------------------
def apply_attn_kernel(y_ref, a_ref, o_ref, *, radix):
    av = a_ref[...]
    out = None
    for r in range(radix):
        v = y_ref[r].astype(jnp.float32) * av[r]
        out = v if out is None else out + v
    o_ref[...] = out.astype(o_ref.dtype)


# ----------------------------------------------------------------------------
# Helpers
# ----------------------------------------------------------------------------
def grouped_1x1_dense(w, groups):
    """Grouped 1x1 conv weight (O, I_g) -> dense block-diagonal (O, I)."""
    O, Ig = w.shape
    Og = O // groups
    dense = jnp.zeros((O, Ig * groups), dtype=w.dtype)
    for g in range(groups):
        dense = dense.at[g * Og:(g + 1) * Og, g * Ig:(g + 1) * Ig].set(
            w[g * Og:(g + 1) * Og])
    return dense


def conv3d_bias_relu_gap(x, conv_w, conv_b, *, radix, cardinality,
                         stride, padding, dilation):
    """Grouped Conv3d + bias + ReLU + fused GAP.  Returns (y, gap, geom)."""
    B, Cin, D, H, W = x.shape
    Cout, Cin_g, kd, kh, kw = conv_w.shape
    groups = cardinality * radix
    C = Cout // radix
    sd, sh, sw = stride
    pd, ph, pw = padding
    dd, dh, dw = dilation
    Dp, Hp, Wp = D + 2 * pd, H + 2 * ph, W + 2 * pw
    Do = (D + 2 * pd - dd * (kd - 1) - 1) // sd + 1
    Ho = (H + 2 * ph - dh * (kh - 1) - 1) // sh + 1
    Wo = (W + 2 * pw - dw * (kw - 1) - 1) // sw + 1
    S = Do * Ho * Wo
    HpWp = Hp * Wp
    Lp = Dp * HpWp

    # flat-correlation geometry (lane-dense, 128-multiple)
    L_need = ((Do - 1) * sd + 1) * HpWp
    tile_l = min(_round_up(L_need, 128), 2048)
    L_pad = _round_up(L_need, tile_l)
    tap_offsets = tuple(i * dd * HpWp + j * dh * Wp + k * dw
                        for i in range(kd) for j in range(kh) for k in range(kw))
    Lx_pad = _round_up(max(max(tap_offsets) + L_pad, Lp), 128)

    # bf16 flat zero-padded input: x read from HBM exactly once, no im2col
    xp = jnp.pad(x.astype(jnp.bfloat16),
                 ((0, 0), (0, 0), (pd, pd), (ph, ph), (pw, pw)))
    xflat = jnp.pad(xp.reshape(B, Cin, Lp), ((0, 0), (0, 0), (0, Lx_pad - Lp)))

    # per-tap per-radix dense weights (block-diagonal over the conv groups)
    KK = kd * kh * kw
    Cout_g = Cout // groups
    w3 = conv_w.reshape(Cout, Cin_g, KK)
    dense = jnp.zeros((Cout, Cin, KK), conv_w.dtype)
    for g in range(groups):
        dense = dense.at[g * Cout_g:(g + 1) * Cout_g,
                         g * Cin_g:(g + 1) * Cin_g, :].set(
            w3[g * Cout_g:(g + 1) * Cout_g])
    wd = dense.reshape(radix, C, Cin, KK).transpose(0, 3, 1, 2).astype(jnp.bfloat16)
    b_r = conv_b.reshape(radix, C, 1).astype(jnp.float32)

    # validity mask: 1.0 at lanes that correspond to real output positions
    mask_np = np.zeros((1, L_pad), np.float32)
    dpos = np.arange(Do) * sd
    hpos = np.arange(Ho) * sh
    wpos = np.arange(Wo) * sw
    valid = (dpos[:, None, None] * HpWp + hpos[None, :, None] * Wp
             + wpos[None, None, :]).reshape(-1)
    mask_np[0, valid] = 1.0
    mask = jnp.asarray(mask_np)

    kern = functools.partial(conv_bias_relu_gap_kernel, radix=radix,
                             tap_offsets=tap_offsets, l_pad=L_pad, inv_s=1.0 / S)
    y, gap = pl.pallas_call(
        kern,
        out_shape=(jax.ShapeDtypeStruct((B, radix, C, L_pad), jnp.bfloat16),
                   jax.ShapeDtypeStruct((B, C, 1), jnp.float32)),
        grid_spec=pltpu.PrefetchScalarGridSpec(
            num_scalar_prefetch=0,
            grid=(B,),
            in_specs=[
                pl.BlockSpec((None, Cin, Lx_pad), lambda b: (b, 0, 0)),
                pl.BlockSpec((radix, KK, C, Cin), lambda b: (0, 0, 0, 0)),
                pl.BlockSpec((radix, C, 1), lambda b: (0, 0, 0)),
                pl.BlockSpec((1, L_pad), lambda b: (0, 0)),
            ],
            out_specs=(
                pl.BlockSpec((None, radix, C, L_pad), lambda b: (b, 0, 0, 0)),
                pl.BlockSpec((None, C, 1), lambda b: (b, 0, 0)),
            ),
        ),
        compiler_params=pltpu.CompilerParams(
            dimension_semantics=("parallel",),
            vmem_limit_bytes=_VMEM_LIMIT_BYTES),
    )(xflat, wd, b_r, mask)

    geom = dict(Do=Do, Ho=Ho, Wo=Wo, Hp=Hp, Wp=Wp, tile_l=tile_l)
    return y, gap[:, :, 0], geom


def apply_split_attention(y, attn, *, radix, tile_l):
    """y (B, radix, C, L_pad) bf16, attn (B, radix*C) -> out (B, C, L_pad) f32."""
    B, _, C, L_pad = y.shape
    n_lt = L_pad // tile_l
    a4 = attn.reshape(B, radix, C, 1).astype(jnp.float32)
    kern = functools.partial(apply_attn_kernel, radix=radix)
    out = pl.pallas_call(
        kern,
        out_shape=jax.ShapeDtypeStruct((B, C, L_pad), jnp.float32),
        grid_spec=pltpu.PrefetchScalarGridSpec(
            num_scalar_prefetch=0,
            grid=(B, n_lt),
            in_specs=[
                pl.BlockSpec((None, radix, C, tile_l), lambda b, q: (b, 0, 0, q)),
                pl.BlockSpec((None, radix, C, 1), lambda b, q: (b, 0, 0, 0)),
            ],
            out_specs=pl.BlockSpec((None, C, tile_l), lambda b, q: (b, 0, q)),
        ),
        compiler_params=pltpu.CompilerParams(
            dimension_semantics=("parallel", "parallel"),
            vmem_limit_bytes=_VMEM_LIMIT_BYTES),
    )(y, a4)
    return out


def splat_conv3d_forward(x, params, *, radix, cardinality, channels,
                         stride, padding, dilation):
    conv_w, conv_b, fc1_w, fc1_b, fc2_w, fc2_b = params
    C = channels
    B = x.shape[0]
    sd, sh, sw = stride

    # 1) grouped conv + bias + ReLU + fused GAP   (Pallas, in-kernel taps)
    y, gap, geom = conv3d_bias_relu_gap(
        x, conv_w, conv_b, radix=radix, cardinality=cardinality,
        stride=stride, padding=padding, dilation=dilation)

    # 2) tiny fc1 + ReLU + fc2 + rSoftMax   (plain JAX; B x (radix*C) scalars)
    d1 = grouped_1x1_dense(fc1_w[..., 0, 0, 0], cardinality)    # (inter, C)
    d2 = grouped_1x1_dense(fc2_w[..., 0, 0, 0], cardinality)    # (R*C, inter)
    z = jnp.maximum(gap @ d1.T + fc1_b, 0.0)                    # (B, inter)
    logits = z @ d2.T + fc2_b                                   # (B, R*C)
    if radix > 1:
        a = logits.reshape(B, cardinality, radix, -1).transpose(0, 2, 1, 3)
        a = jax.nn.softmax(a, axis=1)
        attn = a.reshape(B, -1)
    else:
        attn = jax.nn.sigmoid(logits)

    # 3) apply attention   (Pallas, lane-tiled, lane-dense output)
    out_flat = apply_split_attention(y, attn, radix=radix, tile_l=geom["tile_l"])

    # 4) extract valid output positions from the flat-correlation layout
    Do, Ho, Wo = geom["Do"], geom["Ho"], geom["Wo"]
    Hp, Wp = geom["Hp"], geom["Wp"]
    D_span = (Do - 1) * sd + 1
    out = out_flat[:, :, :D_span * Hp * Wp].reshape(B, C, D_span, Hp, Wp)
    out = out[:, :, ::sd, :(Ho - 1) * sh + 1:sh, :(Wo - 1) * sw + 1:sw]
    return out                                                  # (B, C, Do, Ho, Wo)


# ----------------------------------------------------------------------------
# Pure-JAX f32 reference (mirrors the PyTorch forward exactly) for validation.
# ----------------------------------------------------------------------------
def reference_forward(x, params, *, radix, cardinality, channels,
                      stride, padding, dilation):
    conv_w, conv_b, fc1_w, fc1_b, fc2_w, fc2_b = params
    G2 = cardinality * radix
    y = lax.conv_general_dilated(
        x, conv_w, window_strides=stride,
        padding=[(p, p) for p in padding], rhs_dilation=dilation,
        dimension_numbers=('NCDHW', 'OIDHW', 'NCDHW'),
        feature_group_count=G2)
    y = jnp.maximum(y + conv_b[None, :, None, None, None], 0.0)
    B = y.shape[0]
    splits = jnp.split(y, radix, axis=1)
    gap = sum(splits)
    gap = jnp.mean(gap, axis=(2, 3, 4))                         # (B, C)
    d1 = grouped_1x1_dense(fc1_w[..., 0, 0, 0], cardinality)
    z = jnp.maximum(gap @ d1.T + fc1_b, 0.0)
    d2 = grouped_1x1_dense(fc2_w[..., 0, 0, 0], cardinality)
    att = z @ d2.T + fc2_b                                      # (B, R*C)
    if radix > 1:
        att = att.reshape(B, cardinality, radix, -1).transpose(0, 2, 1, 3)
        att = jax.nn.softmax(att, axis=1)
        att = att.reshape(B, -1)
    else:
        att = jax.nn.sigmoid(att)
    attens = jnp.split(att, radix, axis=1)
    out = sum(a[:, :, None, None, None] * s for a, s in zip(attens, splits))
    return out


if __name__ == "__main__":
    # SplAtConv3d defaults: radix=2, groups=1, reduction_factor=4, bias=True,
    # norm_layer=None (no BN), dropblock_prob=0.
    B = 2
    in_channels = 4
    channels = 8
    radix = 2
    cardinality = 1
    reduction_factor = 4
    inter_channels = max(in_channels * radix // reduction_factor, 32)  # = 32
    ks = (3, 3, 3)
    stride = (1, 1, 1)
    padding = (1, 1, 1)
    dilation = (1, 1, 1)
    D = H = W = 8
    G2 = cardinality * radix

    key = jax.random.PRNGKey(0)
    k = jax.random.split(key, 7)
    x = jax.random.normal(k[0], (B, in_channels, D, H, W), jnp.float32)
    conv_w = 0.1 * jax.random.normal(
        k[1], (channels * radix, in_channels // G2) + ks, jnp.float32)
    conv_b = 0.1 * jax.random.normal(k[2], (channels * radix,), jnp.float32)
    fc1_w = 0.1 * jax.random.normal(
        k[3], (inter_channels, channels // cardinality, 1, 1, 1), jnp.float32)
    fc1_b = 0.1 * jax.random.normal(k[4], (inter_channels,), jnp.float32)
    fc2_w = 0.1 * jax.random.normal(
        k[5], (channels * radix, inter_channels // cardinality, 1, 1, 1),
        jnp.float32)
    fc2_b = 0.1 * jax.random.normal(k[6], (channels * radix,), jnp.float32)
    params = (conv_w, conv_b, fc1_w, fc1_b, fc2_w, fc2_b)

    fwd = jax.jit(functools.partial(
        splat_conv3d_forward, radix=radix, cardinality=cardinality,
        channels=channels, stride=stride, padding=padding, dilation=dilation))
    out = jax.block_until_ready(fwd(x, params))

    ref = jax.block_until_ready(reference_forward(
        x, params, radix=radix, cardinality=cardinality, channels=channels,
        stride=stride, padding=padding, dilation=dilation))

    # Tolerance sized for the bf16 input/weight MXU path (f32 accumulation);
    # structural errors would be O(1), so this still validates correctness.
    np.testing.assert_allclose(np.asarray(out), np.asarray(ref),
                               rtol=2e-2, atol=2e-2)
    print("KERNEL_OK")
</pallas_src>

<mosaic_0001>
module attributes {stable_mosaic.version = 11 : i64} {
  func.func @conv_bias_relu_gap_kernel(%arg0: i32, %arg1: memref<1x4x1152xbf16, #tpu.memory_space<vmem>>, %arg2: memref<2x27x8x4xbf16, #tpu.memory_space<vmem>>, %arg3: memref<2x8x1xf32, #tpu.memory_space<vmem>>, %arg4: memref<1x896xf32, #tpu.memory_space<vmem>>, %arg5: memref<1x2x8x896xbf16, #tpu.memory_space<vmem>>, %arg6: memref<1x8x1xf32, #tpu.memory_space<vmem>>) attributes {dimension_semantics = [#tpu.dimension_semantics<parallel>], iteration_bounds = array<i64: 2>, scalar_prefetch = 0 : i64, scratch_operands = 0 : i64, tpu.core_type = #tpu.core_type<tc>, window_params = [{transform_indices = @transform_0, window_bounds = array<i64: 1, 4, 1152>}, {pipeline_mode = #tpu.pipeline_mode<synchronous>, transform_indices = @transform_1, window_bounds = array<i64: 2, 27, 8, 4>}, {pipeline_mode = #tpu.pipeline_mode<synchronous>, transform_indices = @transform_2, window_bounds = array<i64: 2, 8, 1>}, {pipeline_mode = #tpu.pipeline_mode<synchronous>, transform_indices = @transform_3, window_bounds = array<i64: 1, 896>}, {transform_indices = @transform_4, window_bounds = array<i64: 1, 2, 8, 896>}, {transform_indices = @transform_5, window_bounds = array<i64: 1, 8, 1>}]} {
    %c0 = arith.constant 0 : index
    %c0_0 = arith.constant 0 : index
    %c0_1 = arith.constant 0 : index
    %c0_2 = arith.constant 0 : index
    %0 = vector.load %arg2[%c0, %c0_0, %c0_1, %c0_2] : memref<2x27x8x4xbf16, #tpu.memory_space<vmem>>, vector<2x27x8x4xbf16>
    %c0_3 = arith.constant 0 : index
    %c0_4 = arith.constant 0 : index
    %c0_5 = arith.constant 0 : index
    %1 = vector.load %arg3[%c0_3, %c0_4, %c0_5] : memref<2x8x1xf32, #tpu.memory_space<vmem>>, vector<2x8x1xf32>
    %cst = arith.constant 0.000000e+00 : f32
    %2 = vector.broadcast %cst : f32 to vector<8x896xf32>
    %cst_6 = arith.constant 0.000000e+00 : f32
    %3 = vector.broadcast %cst_6 : f32 to vector<8x896xf32>
    %c0_7 = arith.constant 0 : index
    %c0_8 = arith.constant 0 : index
    %c0_9 = arith.constant 0 : index
    %4 = vector.load %arg1[%c0_7, %c0_8, %c0_9] : memref<1x4x1152xbf16, #tpu.memory_space<vmem>>, vector<1x4x896xbf16>
    %5 = vector.shape_cast %4 : vector<1x4x896xbf16> to vector<4x896xbf16>
    %6 = vector.extract_strided_slice %0 {offsets = [0, 0, 0, 0], sizes = [1, 1, 8, 4], strides = [1, 1, 1, 1]} : vector<2x27x8x4xbf16> to vector<1x1x8x4xbf16>
    %7 = vector.shape_cast %6 : vector<1x1x8x4xbf16> to vector<8x4xbf16>
    %cst_10 = arith.constant dense<0.000000e+00> : vector<8x896xf32>
    %8 = tpu.matmul %7, %5, %cst_10 {dimension_numbers = #tpu.dot_dimension_numbers<[1], [0], [0], [1], [0, 0, 1, 1], [], []>} : vector<8x4xbf16>, vector<4x896xbf16>, vector<8x896xf32> -> vector<8x896xf32>
    %9 = arith.addf %2, %8 : vector<8x896xf32>
    %10 = vector.extract_strided_slice %0 {offsets = [1, 0, 0, 0], sizes = [1, 1, 8, 4], strides = [1, 1, 1, 1]} : vector<2x27x8x4xbf16> to vector<1x1x8x4xbf16>
    %11 = vector.shape_cast %10 : vector<1x1x8x4xbf16> to vector<8x4xbf16>
    %cst_11 = arith.constant dense<0.000000e+00> : vector<8x896xf32>
    %12 = tpu.matmul %11, %5, %cst_11 {dimension_numbers = #tpu.dot_dimension_numbers<[1], [0], [0], [1], [0, 0, 1, 1], [], []>} : vector<8x4xbf16>, vector<4x896xbf16>, vector<8x896xf32> -> vector<8x896xf32>
    %13 = arith.addf %3, %12 : vector<8x896xf32>
    %c0_12 = arith.constant 0 : index
    %c0_13 = arith.constant 0 : index
    %c1 = arith.constant 1 : index
    %14 = vector.load %arg1[%c0_12, %c0_13, %c1] : memref<1x4x1152xbf16, #tpu.memory_space<vmem>>, vector<1x4x896xbf16>
    %15 = vector.shape_cast %14 : vector<1x4x896xbf16> to vector<4x896xbf16>
    %16 = vector.extract_strided_slice %0 {offsets = [0, 1, 0, 0], sizes = [1, 1, 8, 4], strides = [1, 1, 1, 1]} : vector<2x27x8x4xbf16> to vector<1x1x8x4xbf16>
    %17 = vector.shape_cast %16 : vector<1x1x8x4xbf16> to vector<8x4xbf16>
    %cst_14 = arith.constant dense<0.000000e+00> : vector<8x896xf32>
    %18 = tpu.matmul %17, %15, %cst_14 {dimension_numbers = #tpu.dot_dimension_numbers<[1], [0], [0], [1], [0, 0, 1, 1], [], []>} : vector<8x4xbf16>, vector<4x896xbf16>, vector<8x896xf32> -> vector<8x896xf32>
    %19 = arith.addf %9, %18 : vector<8x896xf32>
    %20 = vector.extract_strided_slice %0 {offsets = [1, 1, 0, 0], sizes = [1, 1, 8, 4], strides = [1, 1, 1, 1]} : vector<2x27x8x4xbf16> to vector<1x1x8x4xbf16>
    %21 = vector.shape_cast %20 : vector<1x1x8x4xbf16> to vector<8x4xbf16>
    %cst_15 = arith.constant dense<0.000000e+00> : vector<8x896xf32>
    %22 = tpu.matmul %21, %15, %cst_15 {dimension_numbers = #tpu.dot_dimension_numbers<[1], [0], [0], [1], [0, 0, 1, 1], [], []>} : vector<8x4xbf16>, vector<4x896xbf16>, vector<8x896xf32> -> vector<8x896xf32>
    %23 = arith.addf %13, %22 : vector<8x896xf32>
    %c0_16 = arith.constant 0 : index
    %c0_17 = arith.constant 0 : index
    %c2 = arith.constant 2 : index
    %24 = vector.load %arg1[%c0_16, %c0_17, %c2] : memref<1x4x1152xbf16, #tpu.memory_space<vmem>>, vector<1x4x896xbf16>
    %25 = vector.shape_cast %24 : vector<1x4x896xbf16> to vector<4x896xbf16>
    %26 = vector.extract_strided_slice %0 {offsets = [0, 2, 0, 0], sizes = [1, 1, 8, 4], strides = [1, 1, 1, 1]} : vector<2x27x8x4xbf16> to vector<1x1x8x4xbf16>
    %27 = vector.shape_cast %26 : vector<1x1x8x4xbf16> to vector<8x4xbf16>
    %cst_18 = arith.constant dense<0.000000e+00> : vector<8x896xf32>
    %28 = tpu.matmul %27, %25, %cst_18 {dimension_numbers = #tpu.dot_dimension_numbers<[1], [0], [0], [1], [0, 0, 1, 1], [], []>} : vector<8x4xbf16>, vector<4x896xbf16>, vector<8x896xf32> -> vector<8x896xf32>
    %29 = arith.addf %19, %28 : vector<8x896xf32>
    %30 = vector.extract_strided_slice %0 {offsets = [1, 2, 0, 0], sizes = [1, 1, 8, 4], strides = [1, 1, 1, 1]} : vector<2x27x8x4xbf16> to vector<1x1x8x4xbf16>
    %31 = vector.shape_cast %30 : vector<1x1x8x4xbf16> to vector<8x4xbf16>
    %cst_19 = arith.constant dense<0.000000e+00> : vector<8x896xf32>
    %32 = tpu.matmul %31, %25, %cst_19 {dimension_numbers = #tpu.dot_dimension_numbers<[1], [0], [0], [1], [0, 0, 1, 1], [], []>} : vector<8x4xbf16>, vector<4x896xbf16>, vector<8x896xf32> -> vector<8x896xf32>
    %33 = arith.addf %23, %32 : vector<8x896xf32>
    %c0_20 = arith.constant 0 : index
    %c0_21 = arith.constant 0 : index
    %c10 = arith.constant 10 : index
    %34 = vector.load %arg1[%c0_20, %c0_21, %c10] : memref<1x4x1152xbf16, #tpu.memory_space<vmem>>, vector<1x4x896xbf16>
    %35 = vector.shape_cast %34 : vector<1x4x896xbf16> to vector<4x896xbf16>
    %36 = vector.extract_strided_slice %0 {offsets = [0, 3, 0, 0], sizes = [1, 1, 8, 4], strides = [1, 1, 1, 1]} : vector<2x27x8x4xbf16> to vector<1x1x8x4xbf16>
    %37 = vector.shape_cast %36 : vector<1x1x8x4xbf16> to vector<8x4xbf16>
    %cst_22 = arith.constant dense<0.000000e+00> : vector<8x896xf32>
    %38 = tpu.matmul %37, %35, %cst_22 {dimension_numbers = #tpu.dot_dimension_numbers<[1], [0], [0], [1], [0, 0, 1, 1], [], []>} : vector<8x4xbf16>, vector<4x896xbf16>, vector<8x896xf32> -> vector<8x896xf32>
    %39 = arith.addf %29, %38 : vector<8x896xf32>
    %40 = vector.extract_strided_slice %0 {offsets = [1, 3, 0, 0], sizes = [1, 1, 8, 4], strides = [1, 1, 1, 1]} : vector<2x27x8x4xbf16> to vector<1x1x8x4xbf16>
    %41 = vector.shape_cast %40 : vector<1x1x8x4xbf16> to vector<8x4xbf16>
    %cst_23 = arith.constant dense<0.000000e+00> : vector<8x896xf32>
    %42 = tpu.matmul %41, %35, %cst_23 {dimension_numbers = #tpu.dot_dimension_numbers<[1], [0], [0], [1], [0, 0, 1, 1], [], []>} : vector<8x4xbf16>, vector<4x896xbf16>, vector<8x896xf32> -> vector<8x896xf32>
    %43 = arith.addf %33, %42 : vector<8x896xf32>
    %c0_24 = arith.constant 0 : index
    %c0_25 = arith.constant 0 : index
    %c11 = arith.constant 11 : index
    %44 = vector.load %arg1[%c0_24, %c0_25, %c11] : memref<1x4x1152xbf16, #tpu.memory_space<vmem>>, vector<1x4x896xbf16>
    %45 = vector.shape_cast %44 : vector<1x4x896xbf16> to vector<4x896xbf16>
    %46 = vector.extract_strided_slice %0 {offsets = [0, 4, 0, 0], sizes = [1, 1, 8, 4], strides = [1, 1, 1, 1]} : vector<2x27x8x4xbf16> to vector<1x1x8x4xbf16>
    %47 = vector.shape_cast %46 : vector<1x1x8x4xbf16> to vector<8x4xbf16>
    %cst_26 = arith.constant dense<0.000000e+00> : vector<8x896xf32>
    %48 = tpu.matmul %47, %45, %cst_26 {dimension_numbers = #tpu.dot_dimension_numbers<[1], [0], [0], [1], [0, 0, 1, 1], [], []>} : vector<8x4xbf16>, vector<4x896xbf16>, vector<8x896xf32> -> vector<8x896xf32>
    %49 = arith.addf %39, %48 : vector<8x896xf32>
    %50 = vector.extract_strided_slice %0 {offsets = [1, 4, 0, 0], sizes = [1, 1, 8, 4], strides = [1, 1, 1, 1]} : vector<2x27x8x4xbf16> to vector<1x1x8x4xbf16>
    %51 = vector.shape_cast %50 : vector<1x1x8x4xbf16> to vector<8x4xbf16>
    %cst_27 = arith.constant dense<0.000000e+00> : vector<8x896xf32>
    %52 = tpu.matmul %51, %45, %cst_27 {dimension_numbers = #tpu.dot_dimension_numbers<[1], [0], [0], [1], [0, 0, 1, 1], [], []>} : vector<8x4xbf16>, vector<4x896xbf16>, vector<8x896xf32> -> vector<8x896xf32>
    %53 = arith.addf %43, %52 : vector<8x896xf32>
    %c0_28 = arith.constant 0 : index
    %c0_29 = arith.constant 0 : index
    %c12 = arith.constant 12 : index
    %54 = vector.load %arg1[%c0_28, %c0_29, %c12] : memref<1x4x1152xbf16, #tpu.memory_space<vmem>>, vector<1x4x896xbf16>
    %55 = vector.shape_cast %54 : vector<1x4x896xbf16> to vector<4x896xbf16>
    %56 = vector.extract_strided_slice %0 {offsets = [0, 5, 0, 0], sizes = [1, 1, 8, 4], strides = [1, 1, 1, 1]} : vector<2x27x8x4xbf16> to vector<1x1x8x4xbf16>
    %57 = vector.shape_cast %56 : vector<1x1x8x4xbf16> to vector<8x4xbf16>
    %cst_30 = arith.constant dense<0.000000e+00> : vector<8x896xf32>
    %58 = tpu.matmul %57, %55, %cst_30 {dimension_numbers = #tpu.dot_dimension_numbers<[1], [0], [0], [1], [0, 0, 1, 1], [], []>} : vector<8x4xbf16>, vector<4x896xbf16>, vector<8x896xf32> -> vector<8x896xf32>
    %59 = arith.addf %49, %58 : vector<8x896xf32>
    %60 = vector.extract_strided_slice %0 {offsets = [1, 5, 0, 0], sizes = [1, 1, 8, 4], strides = [1, 1, 1, 1]} : vector<2x27x8x4xbf16> to vector<1x1x8x4xbf16>
    %61 = vector.shape_cast %60 : vector<1x1x8x4xbf16> to vector<8x4xbf16>
    %cst_31 = arith.constant dense<0.000000e+00> : vector<8x896xf32>
    %62 = tpu.matmul %61, %55, %cst_31 {dimension_numbers = #tpu.dot_dimension_numbers<[1], [0], [0], [1], [0, 0, 1, 1], [], []>} : vector<8x4xbf16>, vector<4x896xbf16>, vector<8x896xf32> -> vector<8x896xf32>
    %63 = arith.addf %53, %62 : vector<8x896xf32>
    %c0_32 = arith.constant 0 : index
    %c0_33 = arith.constant 0 : index
    %c20 = arith.constant 20 : index
    %64 = vector.load %arg1[%c0_32, %c0_33, %c20] : memref<1x4x1152xbf16, #tpu.memory_space<vmem>>, vector<1x4x896xbf16>
    %65 = vector.shape_cast %64 : vector<1x4x896xbf16> to vector<4x896xbf16>
    %66 = vector.extract_strided_slice %0 {offsets = [0, 6, 0, 0], sizes = [1, 1, 8, 4], strides = [1, 1, 1, 1]} : vector<2x27x8x4xbf16> to vector<1x1x8x4xbf16>
    %67 = vector.shape_cast %66 : vector<1x1x8x4xbf16> to vector<8x4xbf16>
    %cst_34 = arith.constant dense<0.000000e+00> : vector<8x896xf32>
    %68 = tpu.matmul %67, %65, %cst_34 {dimension_numbers = #tpu.dot_dimension_numbers<[1], [0], [0], [1], [0, 0, 1, 1], [], []>} : vector<8x4xbf16>, vector<4x896xbf16>, vector<8x896xf32> -> vector<8x896xf32>
    %69 = arith.addf %59, %68 : vector<8x896xf32>
    %70 = vector.extract_strided_slice %0 {offsets = [1, 6, 0, 0], sizes = [1, 1, 8, 4], strides = [1, 1, 1, 1]} : vector<2x27x8x4xbf16> to vector<1x1x8x4xbf16>
    %71 = vector.shape_cast %70 : vector<1x1x8x4xbf16> to vector<8x4xbf16>
    %cst_35 = arith.constant dense<0.000000e+00> : vector<8x896xf32>
    %72 = tpu.matmul %71, %65, %cst_35 {dimension_numbers = #tpu.dot_dimension_numbers<[1], [0], [0], [1], [0, 0, 1, 1], [], []>} : vector<8x4xbf16>, vector<4x896xbf16>, vector<8x896xf32> -> vector<8x896xf32>
    %73 = arith.addf %63, %72 : vector<8x896xf32>
    %c0_36 = arith.constant 0 : index
    %c0_37 = arith.constant 0 : index
    %c21 = arith.constant 21 : index
    %74 = vector.load %arg1[%c0_36, %c0_37, %c21] : memref<1x4x1152xbf16, #tpu.memory_space<vmem>>, vector<1x4x896xbf16>
    %75 = vector.shape_cast %74 : vector<1x4x896xbf16> to vector<4x896xbf16>
    %76 = vector.extract_strided_slice %0 {offsets = [0, 7, 0, 0], sizes = [1, 1, 8, 4], strides = [1, 1, 1, 1]} : vector<2x27x8x4xbf16> to vector<1x1x8x4xbf16>
    %77 = vector.shape_cast %76 : vector<1x1x8x4xbf16> to vector<8x4xbf16>
    %cst_38 = arith.constant dense<0.000000e+00> : vector<8x896xf32>
    %78 = tpu.matmul %77, %75, %cst_38 {dimension_numbers = #tpu.dot_dimension_numbers<[1], [0], [0], [1], [0, 0, 1, 1], [], []>} : vector<8x4xbf16>, vector<4x896xbf16>, vector<8x896xf32> -> vector<8x896xf32>
    %79 = arith.addf %69, %78 : vector<8x896xf32>
    %80 = vector.extract_strided_slice %0 {offsets = [1, 7, 0, 0], sizes = [1, 1, 8, 4], strides = [1, 1, 1, 1]} : vector<2x27x8x4xbf16> to vector<1x1x8x4xbf16>
    %81 = vector.shape_cast %80 : vector<1x1x8x4xbf16> to vector<8x4xbf16>
    %cst_39 = arith.constant dense<0.000000e+00> : vector<8x896xf32>
    %82 = tpu.matmul %81, %75, %cst_39 {dimension_numbers = #tpu.dot_dimension_numbers<[1], [0], [0], [1], [0, 0, 1, 1], [], []>} : vector<8x4xbf16>, vector<4x896xbf16>, vector<8x896xf32> -> vector<8x896xf32>
    %83 = arith.addf %73, %82 : vector<8x896xf32>
    %c0_40 = arith.constant 0 : index
    %c0_41 = arith.constant 0 : index
    %c22 = arith.constant 22 : index
    %84 = vector.load %arg1[%c0_40, %c0_41, %c22] : memref<1x4x1152xbf16, #tpu.memory_space<vmem>>, vector<1x4x896xbf16>
    %85 = vector.shape_cast %84 : vector<1x4x896xbf16> to vector<4x896xbf16>
    %86 = vector.extract_strided_slice %0 {offsets = [0, 8, 0, 0], sizes = [1, 1, 8, 4], strides = [1, 1, 1, 1]} : vector<2x27x8x4xbf16> to vector<1x1x8x4xbf16>
    %87 = vector.shape_cast %86 : vector<1x1x8x4xbf16> to vector<8x4xbf16>
    %cst_42 = arith.constant dense<0.000000e+00> : vector<8x896xf32>
    %88 = tpu.matmul %87, %85, %cst_42 {dimension_numbers = #tpu.dot_dimension_numbers<[1], [0], [0], [1], [0, 0, 1, 1], [], []>} : vector<8x4xbf16>, vector<4x896xbf16>, vector<8x896xf32> -> vector<8x896xf32>
    %89 = arith.addf %79, %88 : vector<8x896xf32>
    %90 = vector.extract_strided_slice %0 {offsets = [1, 8, 0, 0], sizes = [1, 1, 8, 4], strides = [1, 1, 1, 1]} : vector<2x27x8x4xbf16> to vector<1x1x8x4xbf16>
    %91 = vector.shape_cast %90 : vector<1x1x8x4xbf16> to vector<8x4xbf16>
    %cst_43 = arith.constant dense<0.000000e+00> : vector<8x896xf32>
    %92 = tpu.matmul %91, %85, %cst_43 {dimension_numbers = #tpu.dot_dimension_numbers<[1], [0], [0], [1], [0, 0, 1, 1], [], []>} : vector<8x4xbf16>, vector<4x896xbf16>, vector<8x896xf32> -> vector<8x896xf32>
    %93 = arith.addf %83, %92 : vector<8x896xf32>
    %c0_44 = arith.constant 0 : index
    %c0_45 = arith.constant 0 : index
    %c100 = arith.constant 100 : index
    %94 = vector.load %arg1[%c0_44, %c0_45, %c100] : memref<1x4x1152xbf16, #tpu.memory_space<vmem>>, vector<1x4x896xbf16>
    %95 = vector.shape_cast %94 : vector<1x4x896xbf16> to vector<4x896xbf16>
    %96 = vector.extract_strided_slice %0 {offsets = [0, 9, 0, 0], sizes = [1, 1, 8, 4], strides = [1, 1, 1, 1]} : vector<2x27x8x4xbf16> to vector<1x1x8x4xbf16>
    %97 = vector.shape_cast %96 : vector<1x1x8x4xbf16> to vector<8x4xbf16>
    %cst_46 = arith.constant dense<0.000000e+00> : vector<8x896xf32>
    %98 = tpu.matmul %97, %95, %cst_46 {dimension_numbers = #tpu.dot_dimension_numbers<[1], [0], [0], [1], [0, 0, 1, 1], [], []>} : vector<8x4xbf16>, vector<4x896xbf16>, vector<8x896xf32> -> vector<8x896xf32>
    %99 = arith.addf %89, %98 : vector<8x896xf32>
    %100 = vector.extract_strided_slice %0 {offsets = [1, 9, 0, 0], sizes = [1, 1, 8, 4], strides = [1, 1, 1, 1]} : vector<2x27x8x4xbf16> to vector<1x1x8x4xbf16>
    %101 = vector.shape_cast %100 : vector<1x1x8x4xbf16> to vector<8x4xbf16>
    %cst_47 = arith.constant dense<0.000000e+00> : vector<8x896xf32>
    %102 = tpu.matmul %101, %95, %cst_47 {dimension_numbers = #tpu.dot_dimension_numbers<[1], [0], [0], [1], [0, 0, 1, 1], [], []>} : vector<8x4xbf16>, vector<4x896xbf16>, vector<8x896xf32> -> vector<8x896xf32>
    %103 = arith.addf %93, %102 : vector<8x896xf32>
    %c0_48 = arith.constant 0 : index
    %c0_49 = arith.constant 0 : index
    %c101 = arith.constant 101 : index
    %104 = vector.load %arg1[%c0_48, %c0_49, %c101] : memref<1x4x1152xbf16, #tpu.memory_space<vmem>>, vector<1x4x896xbf16>
    %105 = vector.shape_cast %104 : vector<1x4x896xbf16> to vector<4x896xbf16>
    %106 = vector.extract_strided_slice %0 {offsets = [0, 10, 0, 0], sizes = [1, 1, 8, 4], strides = [1, 1, 1, 1]} : vector<2x27x8x4xbf16> to vector<1x1x8x4xbf16>
    %107 = vector.shape_cast %106 : vector<1x1x8x4xbf16> to vector<8x4xbf16>
    %cst_50 = arith.constant dense<0.000000e+00> : vector<8x896xf32>
    %108 = tpu.matmul %107, %105, %cst_50 {dimension_numbers = #tpu.dot_dimension_numbers<[1], [0], [0], [1], [0, 0, 1, 1], [], []>} : vector<8x4xbf16>, vector<4x896xbf16>, vector<8x896xf32> -> vector<8x896xf32>
    %109 = arith.addf %99, %108 : vector<8x896xf32>
    %110 = vector.extract_strided_slice %0 {offsets = [1, 10, 0, 0], sizes = [1, 1, 8, 4], strides = [1, 1, 1, 1]} : vector<2x27x8x4xbf16> to vector<1x1x8x4xbf16>
    %111 = vector.shape_cast %110 : vector<1x1x8x4xbf16> to vector<8x4xbf16>
    %cst_51 = arith.constant dense<0.000000e+00> : vector<8x896xf32>
    %112 = tpu.matmul %111, %105, %cst_51 {dimension_numbers = #tpu.dot_dimension_numbers<[1], [0], [0], [1], [0, 0, 1, 1], [], []>} : vector<8x4xbf16>, vector<4x896xbf16>, vector<8x896xf32> -> vector<8x896xf32>
    %113 = arith.addf %103, %112 : vector<8x896xf32>
    %c0_52 = arith.constant 0 : index
    %c0_53 = arith.constant 0 : index
    %c102 = arith.constant 102 : index
    %114 = vector.load %arg1[%c0_52, %c0_53, %c102] : memref<1x4x1152xbf16, #tpu.memory_space<vmem>>, vector<1x4x896xbf16>
    %115 = vector.shape_cast %114 : vector<1x4x896xbf16> to vector<4x896xbf16>
    %116 = vector.extract_strided_slice %0 {offsets = [0, 11, 0, 0], sizes = [1, 1, 8, 4], strides = [1, 1, 1, 1]} : vector<2x27x8x4xbf16> to vector<1x1x8x4xbf16>
    %117 = vector.shape_cast %116 : vector<1x1x8x4xbf16> to vector<8x4xbf16>
    %cst_54 = arith.constant dense<0.000000e+00> : vector<8x896xf32>
    %118 = tpu.matmul %117, %115, %cst_54 {dimension_numbers = #tpu.dot_dimension_numbers<[1], [0], [0], [1], [0, 0, 1, 1], [], []>} : vector<8x4xbf16>, vector<4x896xbf16>, vector<8x896xf32> -> vector<8x896xf32>
    %119 = arith.addf %109, %118 : vector<8x896xf32>
    %120 = vector.extract_strided_slice %0 {offsets = [1, 11, 0, 0], sizes = [1, 1, 8, 4], strides = [1, 1, 1, 1]} : vector<2x27x8x4xbf16> to vector<1x1x8x4xbf16>
    %121 = vector.shape_cast %120 : vector<1x1x8x4xbf16> to vector<8x4xbf16>
    %cst_55 = arith.constant dense<0.000000e+00> : vector<8x896xf32>
    %122 = tpu.matmul %121, %115, %cst_55 {dimension_numbers = #tpu.dot_dimension_numbers<[1], [0], [0], [1], [0, 0, 1, 1], [], []>} : vector<8x4xbf16>, vector<4x896xbf16>, vector<8x896xf32> -> vector<8x896xf32>
    %123 = arith.addf %113, %122 : vector<8x896xf32>
    %c0_56 = arith.constant 0 : index
    %c0_57 = arith.constant 0 : index
    %c110 = arith.constant 110 : index
    %124 = vector.load %arg1[%c0_56, %c0_57, %c110] : memref<1x4x1152xbf16, #tpu.memory_space<vmem>>, vector<1x4x896xbf16>
    %125 = vector.shape_cast %124 : vector<1x4x896xbf16> to vector<4x896xbf16>
    %126 = vector.extract_strided_slice %0 {offsets = [0, 12, 0, 0], sizes = [1, 1, 8, 4], strides = [1, 1, 1, 1]} : vector<2x27x8x4xbf16> to vector<1x1x8x4xbf16>
    %127 = vector.shape_cast %126 : vector<1x1x8x4xbf16> to vector<8x4xbf16>
    %cst_58 = arith.constant dense<0.000000e+00> : vector<8x896xf32>
    %128 = tpu.matmul %127, %125, %cst_58 {dimension_numbers = #tpu.dot_dimension_numbers<[1], [0], [0], [1], [0, 0, 1, 1], [], []>} : vector<8x4xbf16>, vector<4x896xbf16>, vector<8x896xf32> -> vector<8x896xf32>
    %129 = arith.addf %119, %128 : vector<8x896xf32>
    %130 = vector.extract_strided_slice %0 {offsets = [1, 12, 0, 0], sizes = [1, 1, 8, 4], strides = [1, 1, 1, 1]} : vector<2x27x8x4xbf16> to vector<1x1x8x4xbf16>
    %131 = vector.shape_cast %130 : vector<1x1x8x4xbf16> to vector<8x4xbf16>
    %cst_59 = arith.constant dense<0.000000e+00> : vector<8x896xf32>
    %132 = tpu.matmul %131, %125, %cst_59 {dimension_numbers = #tpu.dot_dimension_numbers<[1], [0], [0], [1], [0, 0, 1, 1], [], []>} : vector<8x4xbf16>, vector<4x896xbf16>, vector<8x896xf32> -> vector<8x896xf32>
    %133 = arith.addf %123, %132 : vector<8x896xf32>
    %c0_60 = arith.constant 0 : index
    %c0_61 = arith.constant 0 : index
    %c111 = arith.constant 111 : index
    %134 = vector.load %arg1[%c0_60, %c0_61, %c111] : memref<1x4x1152xbf16, #tpu.memory_space<vmem>>, vector<1x4x896xbf16>
    %135 = vector.shape_cast %134 : vector<1x4x896xbf16> to vector<4x896xbf16>
    %136 = vector.extract_strided_slice %0 {offsets = [0, 13, 0, 0], sizes = [1, 1, 8, 4], strides = [1, 1, 1, 1]} : vector<2x27x8x4xbf16> to vector<1x1x8x4xbf16>
    %137 = vector.shape_cast %136 : vector<1x1x8x4xbf16> to vector<8x4xbf16>
    %cst_62 = arith.constant dense<0.000000e+00> : vector<8x896xf32>
    %138 = tpu.matmul %137, %135, %cst_62 {dimension_numbers = #tpu.dot_dimension_numbers<[1], [0], [0], [1], [0, 0, 1, 1], [], []>} : vector<8x4xbf16>, vector<4x896xbf16>, vector<8x896xf32> -> vector<8x896xf32>
    %139 = arith.addf %129, %138 : vector<8x896xf32>
    %140 = vector.extract_strided_slice %0 {offsets = [1, 13, 0, 0], sizes = [1, 1, 8, 4], strides = [1, 1, 1, 1]} : vector<2x27x8x4xbf16> to vector<1x1x8x4xbf16>
    %141 = vector.shape_cast %140 : vector<1x1x8x4xbf16> to vector<8x4xbf16>
    %cst_63 = arith.constant dense<0.000000e+00> : vector<8x896xf32>
    %142 = tpu.matmul %141, %135, %cst_63 {dimension_numbers = #tpu.dot_dimension_numbers<[1], [0], [0], [1], [0, 0, 1, 1], [], []>} : vector<8x4xbf16>, vector<4x896xbf16>, vector<8x896xf32> -> vector<8x896xf32>
    %143 = arith.addf %133, %142 : vector<8x896xf32>
    %c0_64 = arith.constant 0 : index
    %c0_65 = arith.constant 0 : index
    %c112 = arith.constant 112 : index
    %144 = vector.load %arg1[%c0_64, %c0_65, %c112] : memref<1x4x1152xbf16, #tpu.memory_space<vmem>>, vector<1x4x896xbf16>
    %145 = vector.shape_cast %144 : vector<1x4x896xbf16> to vector<4x896xbf16>
    %146 = vector.extract_strided_slice %0 {offsets = [0, 14, 0, 0], sizes = [1, 1, 8, 4], strides = [1, 1, 1, 1]} : vector<2x27x8x4xbf16> to vector<1x1x8x4xbf16>
    %147 = vector.shape_cast %146 : vector<1x1x8x4xbf16> to vector<8x4xbf16>
    %cst_66 = arith.constant dense<0.000000e+00> : vector<8x896xf32>
    %148 = tpu.matmul %147, %145, %cst_66 {dimension_numbers = #tpu.dot_dimension_numbers<[1], [0], [0], [1], [0, 0, 1, 1], [], []>} : vector<8x4xbf16>, vector<4x896xbf16>, vector<8x896xf32> -> vector<8x896xf32>
    %149 = arith.addf %139, %148 : vector<8x896xf32>
    %150 = vector.extract_strided_slice %0 {offsets = [1, 14, 0, 0], sizes = [1, 1, 8, 4], strides = [1, 1, 1, 1]} : vector<2x27x8x4xbf16> to vector<1x1x8x4xbf16>
    %151 = vector.shape_cast %150 : vector<1x1x8x4xbf16> to vector<8x4xbf16>
    %cst_67 = arith.constant dense<0.000000e+00> : vector<8x896xf32>
    %152 = tpu.matmul %151, %145, %cst_67 {dimension_numbers = #tpu.dot_dimension_numbers<[1], [0], [0], [1], [0, 0, 1, 1], [], []>} : vector<8x4xbf16>, vector<4x896xbf16>, vector<8x896xf32> -> vector<8x896xf32>
    %153 = arith.addf %143, %152 : vector<8x896xf32>
    %c0_68 = arith.constant 0 : index
    %c0_69 = arith.constant 0 : index
    %c120 = arith.constant 120 : index
    %154 = vector.load %arg1[%c0_68, %c0_69, %c120] : memref<1x4x1152xbf16, #tpu.memory_space<vmem>>, vector<1x4x896xbf16>
    %155 = vector.shape_cast %154 : vector<1x4x896xbf16> to vector<4x896xbf16>
    %156 = vector.extract_strided_slice %0 {offsets = [0, 15, 0, 0], sizes = [1, 1, 8, 4], strides = [1, 1, 1, 1]} : vector<2x27x8x4xbf16> to vector<1x1x8x4xbf16>
    %157 = vector.shape_cast %156 : vector<1x1x8x4xbf16> to vector<8x4xbf16>
    %cst_70 = arith.constant dense<0.000000e+00> : vector<8x896xf32>
    %158 = tpu.matmul %157, %155, %cst_70 {dimension_numbers = #tpu.dot_dimension_numbers<[1], [0], [0], [1], [0, 0, 1, 1], [], []>} : vector<8x4xbf16>, vector<4x896xbf16>, vector<8x896xf32> -> vector<8x896xf32>
    %159 = arith.addf %149, %158 : vector<8x896xf32>
    %160 = vector.extract_strided_slice %0 {offsets = [1, 15, 0, 0], sizes = [1, 1, 8, 4], strides = [1, 1, 1, 1]} : vector<2x27x8x4xbf16> to vector<1x1x8x4xbf16>
    %161 = vector.shape_cast %160 : vector<1x1x8x4xbf16> to vector<8x4xbf16>
    %cst_71 = arith.constant dense<0.000000e+00> : vector<8x896xf32>
    %162 = tpu.matmul %161, %155, %cst_71 {dimension_numbers = #tpu.dot_dimension_numbers<[1], [0], [0], [1], [0, 0, 1, 1], [], []>} : vector<8x4xbf16>, vector<4x896xbf16>, vector<8x896xf32> -> vector<8x896xf32>
    %163 = arith.addf %153, %162 : vector<8x896xf32>
    %c0_72 = arith.constant 0 : index
    %c0_73 = arith.constant 0 : index
    %c121 = arith.constant 121 : index
    %164 = vector.load %arg1[%c0_72, %c0_73, %c121] : memref<1x4x1152xbf16, #tpu.memory_space<vmem>>, vector<1x4x896xbf16>
    %165 = vector.shape_cast %164 : vector<1x4x896xbf16> to vector<4x896xbf16>
    %166 = vector.extract_strided_slice %0 {offsets = [0, 16, 0, 0], sizes = [1, 1, 8, 4], strides = [1, 1, 1, 1]} : vector<2x27x8x4xbf16> to vector<1x1x8x4xbf16>
    %167 = vector.shape_cast %166 : vector<1x1x8x4xbf16> to vector<8x4xbf16>
    %cst_74 = arith.constant dense<0.000000e+00> : vector<8x896xf32>
    %168 = tpu.matmul %167, %165, %cst_74 {dimension_numbers = #tpu.dot_dimension_numbers<[1], [0], [0], [1], [0, 0, 1, 1], [], []>} : vector<8x4xbf16>, vector<4x896xbf16>, vector<8x896xf32> -> vector<8x896xf32>
    %169 = arith.addf %159, %168 : vector<8x896xf32>
    %170 = vector.extract_strided_slice %0 {offsets = [1, 16, 0, 0], sizes = [1, 1, 8, 4], strides = [1, 1, 1, 1]} : vector<2x27x8x4xbf16> to vector<1x1x8x4xbf16>
    %171 = vector.shape_cast %170 : vector<1x1x8x4xbf16> to vector<8x4xbf16>
    %cst_75 = arith.constant dense<0.000000e+00> : vector<8x896xf32>
    %172 = tpu.matmul %171, %165, %cst_75 {dimension_numbers = #tpu.dot_dimension_numbers<[1], [0], [0], [1], [0, 0, 1, 1], [], []>} : vector<8x4xbf16>, vector<4x896xbf16>, vector<8x896xf32> -> vector<8x896xf32>
    %173 = arith.addf %163, %172 : vector<8x896xf32>
    %c0_76 = arith.constant 0 : index
    %c0_77 = arith.constant 0 : index
    %c122 = arith.constant 122 : index
    %174 = vector.load %arg1[%c0_76, %c0_77, %c122] : memref<1x4x1152xbf16, #tpu.memory_space<vmem>>, vector<1x4x896xbf16>
    %175 = vector.shape_cast %174 : vector<1x4x896xbf16> to vector<4x896xbf16>
    %176 = vector.extract_strided_slice %0 {offsets = [0, 17, 0, 0], sizes = [1, 1, 8, 4], strides = [1, 1, 1, 1]} : vector<2x27x8x4xbf16> to vector<1x1x8x4xbf16>
    %177 = vector.shape_cast %176 : vector<1x1x8x4xbf16> to vector<8x4xbf16>
    %cst_78 = arith.constant dense<0.000000e+00> : vector<8x896xf32>
    %178 = tpu.matmul %177, %175, %cst_78 {dimension_numbers = #tpu.dot_dimension_numbers<[1], [0], [0], [1], [0, 0, 1, 1], [], []>} : vector<8x4xbf16>, vector<4x896xbf16>, vector<8x896xf32> -> vector<8x896xf32>
    %179 = arith.addf %169, %178 : vector<8x896xf32>
    %180 = vector.extract_strided_slice %0 {offsets = [1, 17, 0, 0], sizes = [1, 1, 8, 4], strides = [1, 1, 1, 1]} : vector<2x27x8x4xbf16> to vector<1x1x8x4xbf16>
    %181 = vector.shape_cast %180 : vector<1x1x8x4xbf16> to vector<8x4xbf16>
    %cst_79 = arith.constant dense<0.000000e+00> : vector<8x896xf32>
    %182 = tpu.matmul %181, %175, %cst_79 {dimension_numbers = #tpu.dot_dimension_numbers<[1], [0], [0], [1], [0, 0, 1, 1], [], []>} : vector<8x4xbf16>, vector<4x896xbf16>, vector<8x896xf32> -> vector<8x896xf32>
    %183 = arith.addf %173, %182 : vector<8x896xf32>
    %c0_80 = arith.constant 0 : index
    %c0_81 = arith.constant 0 : index
    %c200 = arith.constant 200 : index
    %184 = vector.load %arg1[%c0_80, %c0_81, %c200] : memref<1x4x1152xbf16, #tpu.memory_space<vmem>>, vector<1x4x896xbf16>
    %185 = vector.shape_cast %184 : vector<1x4x896xbf16> to vector<4x896xbf16>
    %186 = vector.extract_strided_slice %0 {offsets = [0, 18, 0, 0], sizes = [1, 1, 8, 4], strides = [1, 1, 1, 1]} : vector<2x27x8x4xbf16> to vector<1x1x8x4xbf16>
    %187 = vector.shape_cast %186 : vector<1x1x8x4xbf16> to vector<8x4xbf16>
    %cst_82 = arith.constant dense<0.000000e+00> : vector<8x896xf32>
    %188 = tpu.matmul %187, %185, %cst_82 {dimension_numbers = #tpu.dot_dimension_numbers<[1], [0], [0], [1], [0, 0, 1, 1], [], []>} : vector<8x4xbf16>, vector<4x896xbf16>, vector<8x896xf32> -> vector<8x896xf32>
    %189 = arith.addf %179, %188 : vector<8x896xf32>
    %190 = vector.extract_strided_slice %0 {offsets = [1, 18, 0, 0], sizes = [1, 1, 8, 4], strides = [1, 1, 1, 1]} : vector<2x27x8x4xbf16> to vector<1x1x8x4xbf16>
    %191 = vector.shape_cast %190 : vector<1x1x8x4xbf16> to vector<8x4xbf16>
    %cst_83 = arith.constant dense<0.000000e+00> : vector<8x896xf32>
    %192 = tpu.matmul %191, %185, %cst_83 {dimension_numbers = #tpu.dot_dimension_numbers<[1], [0], [0], [1], [0, 0, 1, 1], [], []>} : vector<8x4xbf16>, vector<4x896xbf16>, vector<8x896xf32> -> vector<8x896xf32>
    %193 = arith.addf %183, %192 : vector<8x896xf32>
    %c0_84 = arith.constant 0 : index
    %c0_85 = arith.constant 0 : index
    %c201 = arith.constant 201 : index
    %194 = vector.load %arg1[%c0_84, %c0_85, %c201] : memref<1x4x1152xbf16, #tpu.memory_space<vmem>>, vector<1x4x896xbf16>
    %195 = vector.shape_cast %194 : vector<1x4x896xbf16> to vector<4x896xbf16>
    %196 = vector.extract_strided_slice %0 {offsets = [0, 19, 0, 0], sizes = [1, 1, 8, 4], strides = [1, 1, 1, 1]} : vector<2x27x8x4xbf16> to vector<1x1x8x4xbf16>
    %197 = vector.shape_cast %196 : vector<1x1x8x4xbf16> to vector<8x4xbf16>
    %cst_86 = arith.constant dense<0.000000e+00> : vector<8x896xf32>
    %198 = tpu.matmul %197, %195, %cst_86 {dimension_numbers = #tpu.dot_dimension_numbers<[1], [0], [0], [1], [0, 0, 1, 1], [], []>} : vector<8x4xbf16>, vector<4x896xbf16>, vector<8x896xf32> -> vector<8x896xf32>
    %199 = arith.addf %189, %198 : vector<8x896xf32>
    %200 = vector.extract_strided_slice %0 {offsets = [1, 19, 0, 0], sizes = [1, 1, 8, 4], strides = [1, 1, 1, 1]} : vector<2x27x8x4xbf16> to vector<1x1x8x4xbf16>
    %201 = vector.shape_cast %200 : vector<1x1x8x4xbf16> to vector<8x4xbf16>
    %cst_87 = arith.constant dense<0.000000e+00> : vector<8x896xf32>
    %202 = tpu.matmul %201, %195, %cst_87 {dimension_numbers = #tpu.dot_dimension_numbers<[1], [0], [0], [1], [0, 0, 1, 1], [], []>} : vector<8x4xbf16>, vector<4x896xbf16>, vector<8x896xf32> -> vector<8x896xf32>
    %203 = arith.addf %193, %202 : vector<8x896xf32>
    %c0_88 = arith.constant 0 : index
    %c0_89 = arith.constant 0 : index
    %c202 = arith.constant 202 : index
    %204 = vector.load %arg1[%c0_88, %c0_89, %c202] : memref<1x4x1152xbf16, #tpu.memory_space<vmem>>, vector<1x4x896xbf16>
    %205 = vector.shape_cast %204 : vector<1x4x896xbf16> to vector<4x896xbf16>
    %206 = vector.extract_strided_slice %0 {offsets = [0, 20, 0, 0], sizes = [1, 1, 8, 4], strides = [1, 1, 1, 1]} : vector<2x27x8x4xbf16> to vector<1x1x8x4xbf16>
    %207 = vector.shape_cast %206 : vector<1x1x8x4xbf16> to vector<8x4xbf16>
    %cst_90 = arith.constant dense<0.000000e+00> : vector<8x896xf32>
    %208 = tpu.matmul %207, %205, %cst_90 {dimension_numbers = #tpu.dot_dimension_numbers<[1], [0], [0], [1], [0, 0, 1, 1], [], []>} : vector<8x4xbf16>, vector<4x896xbf16>, vector<8x896xf32> -> vector<8x896xf32>
    %209 = arith.addf %199, %208 : vector<8x896xf32>
    %210 = vector.extract_strided_slice %0 {offsets = [1, 20, 0, 0], sizes = [1, 1, 8, 4], strides = [1, 1, 1, 1]} : vector<2x27x8x4xbf16> to vector<1x1x8x4xbf16>
    %211 = vector.shape_cast %210 : vector<1x1x8x4xbf16> to vector<8x4xbf16>
    %cst_91 = arith.constant dense<0.000000e+00> : vector<8x896xf32>
    %212 = tpu.matmul %211, %205, %cst_91 {dimension_numbers = #tpu.dot_dimension_numbers<[1], [0], [0], [1], [0, 0, 1, 1], [], []>} : vector<8x4xbf16>, vector<4x896xbf16>, vector<8x896xf32> -> vector<8x896xf32>
    %213 = arith.addf %203, %212 : vector<8x896xf32>
    %c0_92 = arith.constant 0 : index
    %c0_93 = arith.constant 0 : index
    %c210 = arith.constant 210 : index
    %214 = vector.load %arg1[%c0_92, %c0_93, %c210] : memref<1x4x1152xbf16, #tpu.memory_space<vmem>>, vector<1x4x896xbf16>
    %215 = vector.shape_cast %214 : vector<1x4x896xbf16> to vector<4x896xbf16>
    %216 = vector.extract_strided_slice %0 {offsets = [0, 21, 0, 0], sizes = [1, 1, 8, 4], strides = [1, 1, 1, 1]} : vector<2x27x8x4xbf16> to vector<1x1x8x4xbf16>
    %217 = vector.shape_cast %216 : vector<1x1x8x4xbf16> to vector<8x4xbf16>
    %cst_94 = arith.constant dense<0.000000e+00> : vector<8x896xf32>
    %218 = tpu.matmul %217, %215, %cst_94 {dimension_numbers = #tpu.dot_dimension_numbers<[1], [0], [0], [1], [0, 0, 1, 1], [], []>} : vector<8x4xbf16>, vector<4x896xbf16>, vector<8x896xf32> -> vector<8x896xf32>
    %219 = arith.addf %209, %218 : vector<8x896xf32>
    %220 = vector.extract_strided_slice %0 {offsets = [1, 21, 0, 0], sizes = [1, 1, 8, 4], strides = [1, 1, 1, 1]} : vector<2x27x8x4xbf16> to vector<1x1x8x4xbf16>
    %221 = vector.shape_cast %220 : vector<1x1x8x4xbf16> to vector<8x4xbf16>
    %cst_95 = arith.constant dense<0.000000e+00> : vector<8x896xf32>
    %222 = tpu.matmul %221, %215, %cst_95 {dimension_numbers = #tpu.dot_dimension_numbers<[1], [0], [0], [1], [0, 0, 1, 1], [], []>} : vector<8x4xbf16>, vector<4x896xbf16>, vector<8x896xf32> -> vector<8x896xf32>
    %223 = arith.addf %213, %222 : vector<8x896xf32>
    %c0_96 = arith.constant 0 : index
    %c0_97 = arith.constant 0 : index
    %c211 = arith.constant 211 : index
    %224 = vector.load %arg1[%c0_96, %c0_97, %c211] : memref<1x4x1152xbf16, #tpu.memory_space<vmem>>, vector<1x4x896xbf16>
    %225 = vector.shape_cast %224 : vector<1x4x896xbf16> to vector<4x896xbf16>
    %226 = vector.extract_strided_slice %0 {offsets = [0, 22, 0, 0], sizes = [1, 1, 8, 4], strides = [1, 1, 1, 1]} : vector<2x27x8x4xbf16> to vector<1x1x8x4xbf16>
    %227 = vector.shape_cast %226 : vector<1x1x8x4xbf16> to vector<8x4xbf16>
    %cst_98 = arith.constant dense<0.000000e+00> : vector<8x896xf32>
    %228 = tpu.matmul %227, %225, %cst_98 {dimension_numbers = #tpu.dot_dimension_numbers<[1], [0], [0], [1], [0, 0, 1, 1], [], []>} : vector<8x4xbf16>, vector<4x896xbf16>, vector<8x896xf32> -> vector<8x896xf32>
    %229 = arith.addf %219, %228 : vector<8x896xf32>
    %230 = vector.extract_strided_slice %0 {offsets = [1, 22, 0, 0], sizes = [1, 1, 8, 4], strides = [1, 1, 1, 1]} : vector<2x27x8x4xbf16> to vector<1x1x8x4xbf16>
    %231 = vector.shape_cast %230 : vector<1x1x8x4xbf16> to vector<8x4xbf16>
    %cst_99 = arith.constant dense<0.000000e+00> : vector<8x896xf32>
    %232 = tpu.matmul %231, %225, %cst_99 {dimension_numbers = #tpu.dot_dimension_numbers<[1], [0], [0], [1], [0, 0, 1, 1], [], []>} : vector<8x4xbf16>, vector<4x896xbf16>, vector<8x896xf32> -> vector<8x896xf32>
    %233 = arith.addf %223, %232 : vector<8x896xf32>
    %c0_100 = arith.constant 0 : index
    %c0_101 = arith.constant 0 : index
    %c212 = arith.constant 212 : index
    %234 = vector.load %arg1[%c0_100, %c0_101, %c212] : memref<1x4x1152xbf16, #tpu.memory_space<vmem>>, vector<1x4x896xbf16>
    %235 = vector.shape_cast %234 : vector<1x4x896xbf16> to vector<4x896xbf16>
    %236 = vector.extract_strided_slice %0 {offsets = [0, 23, 0, 0], sizes = [1, 1, 8, 4], strides = [1, 1, 1, 1]} : vector<2x27x8x4xbf16> to vector<1x1x8x4xbf16>
    %237 = vector.shape_cast %236 : vector<1x1x8x4xbf16> to vector<8x4xbf16>
    %cst_102 = arith.constant dense<0.000000e+00> : vector<8x896xf32>
    %238 = tpu.matmul %237, %235, %cst_102 {dimension_numbers = #tpu.dot_dimension_numbers<[1], [0], [0], [1], [0, 0, 1, 1], [], []>} : vector<8x4xbf16>, vector<4x896xbf16>, vector<8x896xf32> -> vector<8x896xf32>
    %239 = arith.addf %229, %238 : vector<8x896xf32>
    %240 = vector.extract_strided_slice %0 {offsets = [1, 23, 0, 0], sizes = [1, 1, 8, 4], strides = [1, 1, 1, 1]} : vector<2x27x8x4xbf16> to vector<1x1x8x4xbf16>
    %241 = vector.shape_cast %240 : vector<1x1x8x4xbf16> to vector<8x4xbf16>
    %cst_103 = arith.constant dense<0.000000e+00> : vector<8x896xf32>
    %242 = tpu.matmul %241, %235, %cst_103 {dimension_numbers = #tpu.dot_dimension_numbers<[1], [0], [0], [1], [0, 0, 1, 1], [], []>} : vector<8x4xbf16>, vector<4x896xbf16>, vector<8x896xf32> -> vector<8x896xf32>
    %243 = arith.addf %233, %242 : vector<8x896xf32>
    %c0_104 = arith.constant 0 : index
    %c0_105 = arith.constant 0 : index
    %c220 = arith.constant 220 : index
    %244 = vector.load %arg1[%c0_104, %c0_105, %c220] : memref<1x4x1152xbf16, #tpu.memory_space<vmem>>, vector<1x4x896xbf16>
    %245 = vector.shape_cast %244 : vector<1x4x896xbf16> to vector<4x896xbf16>
    %246 = vector.extract_strided_slice %0 {offsets = [0, 24, 0, 0], sizes = [1, 1, 8, 4], strides = [1, 1, 1, 1]} : vector<2x27x8x4xbf16> to vector<1x1x8x4xbf16>
    %247 = vector.shape_cast %246 : vector<1x1x8x4xbf16> to vector<8x4xbf16>
    %cst_106 = arith.constant dense<0.000000e+00> : vector<8x896xf32>
    %248 = tpu.matmul %247, %245, %cst_106 {dimension_numbers = #tpu.dot_dimension_numbers<[1], [0], [0], [1], [0, 0, 1, 1], [], []>} : vector<8x4xbf16>, vector<4x896xbf16>, vector<8x896xf32> -> vector<8x896xf32>
    %249 = arith.addf %239, %248 : vector<8x896xf32>
    %250 = vector.extract_strided_slice %0 {offsets = [1, 24, 0, 0], sizes = [1, 1, 8, 4], strides = [1, 1, 1, 1]} : vector<2x27x8x4xbf16> to vector<1x1x8x4xbf16>
    %251 = vector.shape_cast %250 : vector<1x1x8x4xbf16> to vector<8x4xbf16>
    %cst_107 = arith.constant dense<0.000000e+00> : vector<8x896xf32>
    %252 = tpu.matmul %251, %245, %cst_107 {dimension_numbers = #tpu.dot_dimension_numbers<[1], [0], [0], [1], [0, 0, 1, 1], [], []>} : vector<8x4xbf16>, vector<4x896xbf16>, vector<8x896xf32> -> vector<8x896xf32>
    %253 = arith.addf %243, %252 : vector<8x896xf32>
    %c0_108 = arith.constant 0 : index
    %c0_109 = arith.constant 0 : index
    %c221 = arith.constant 221 : index
    %254 = vector.load %arg1[%c0_108, %c0_109, %c221] : memref<1x4x1152xbf16, #tpu.memory_space<vmem>>, vector<1x4x896xbf16>
    %255 = vector.shape_cast %254 : vector<1x4x896xbf16> to vector<4x896xbf16>
    %256 = vector.extract_strided_slice %0 {offsets = [0, 25, 0, 0], sizes = [1, 1, 8, 4], strides = [1, 1, 1, 1]} : vector<2x27x8x4xbf16> to vector<1x1x8x4xbf16>
    %257 = vector.shape_cast %256 : vector<1x1x8x4xbf16> to vector<8x4xbf16>
    %cst_110 = arith.constant dense<0.000000e+00> : vector<8x896xf32>
    %258 = tpu.matmul %257, %255, %cst_110 {dimension_numbers = #tpu.dot_dimension_numbers<[1], [0], [0], [1], [0, 0, 1, 1], [], []>} : vector<8x4xbf16>, vector<4x896xbf16>, vector<8x896xf32> -> vector<8x896xf32>
    %259 = arith.addf %249, %258 : vector<8x896xf32>
    %260 = vector.extract_strided_slice %0 {offsets = [1, 25, 0, 0], sizes = [1, 1, 8, 4], strides = [1, 1, 1, 1]} : vector<2x27x8x4xbf16> to vector<1x1x8x4xbf16>
    %261 = vector.shape_cast %260 : vector<1x1x8x4xbf16> to vector<8x4xbf16>
    %cst_111 = arith.constant dense<0.000000e+00> : vector<8x896xf32>
    %262 = tpu.matmul %261, %255, %cst_111 {dimension_numbers = #tpu.dot_dimension_numbers<[1], [0], [0], [1], [0, 0, 1, 1], [], []>} : vector<8x4xbf16>, vector<4x896xbf16>, vector<8x896xf32> -> vector<8x896xf32>
    %263 = arith.addf %253, %262 : vector<8x896xf32>
    %c0_112 = arith.constant 0 : index
    %c0_113 = arith.constant 0 : index
    %c222 = arith.constant 222 : index
    %264 = vector.load %arg1[%c0_112, %c0_113, %c222] : memref<1x4x1152xbf16, #tpu.memory_space<vmem>>, vector<1x4x896xbf16>
    %265 = vector.shape_cast %264 : vector<1x4x896xbf16> to vector<4x896xbf16>
    %266 = vector.extract_strided_slice %0 {offsets = [0, 26, 0, 0], sizes = [1, 1, 8, 4], strides = [1, 1, 1, 1]} : vector<2x27x8x4xbf16> to vector<1x1x8x4xbf16>
    %267 = vector.shape_cast %266 : vector<1x1x8x4xbf16> to vector<8x4xbf16>
    %cst_114 = arith.constant dense<0.000000e+00> : vector<8x896xf32>
    %268 = tpu.matmul %267, %265, %cst_114 {dimension_numbers = #tpu.dot_dimension_numbers<[1], [0], [0], [1], [0, 0, 1, 1], [], []>} : vector<8x4xbf16>, vector<4x896xbf16>, vector<8x896xf32> -> vector<8x896xf32>
    %269 = arith.addf %259, %268 : vector<8x896xf32>
    %270 = vector.extract_strided_slice %0 {offsets = [1, 26, 0, 0], sizes = [1, 1, 8, 4], strides = [1, 1, 1, 1]} : vector<2x27x8x4xbf16> to vector<1x1x8x4xbf16>
    %271 = vector.shape_cast %270 : vector<1x1x8x4xbf16> to vector<8x4xbf16>
    %cst_115 = arith.constant dense<0.000000e+00> : vector<8x896xf32>
    %272 = tpu.matmul %271, %265, %cst_115 {dimension_numbers = #tpu.dot_dimension_numbers<[1], [0], [0], [1], [0, 0, 1, 1], [], []>} : vector<8x4xbf16>, vector<4x896xbf16>, vector<8x896xf32> -> vector<8x896xf32>
    %273 = arith.addf %263, %272 : vector<8x896xf32>
    %c0_116 = arith.constant 0 : index
    %c0_117 = arith.constant 0 : index
    %274 = vector.load %arg4[%c0_116, %c0_117] : memref<1x896xf32, #tpu.memory_space<vmem>>, vector<1x896xf32>
    %275 = vector.extract_strided_slice %1 {offsets = [0, 0, 0], sizes = [1, 8, 1], strides = [1, 1, 1]} : vector<2x8x1xf32> to vector<1x8x1xf32>
    %276 = vector.shape_cast %275 : vector<1x8x1xf32> to vector<8x1xf32>
    %277 = vector.broadcast %276 : vector<8x1xf32> to vector<8x896xf32>
    %278 = arith.addf %269, %277 : vector<8x896xf32>
    %cst_118 = arith.constant 0.000000e+00 : f32
    %279 = vector.broadcast %cst_118 : f32 to vector<8x896xf32>
    %280 = arith.maximumf %278, %279 : vector<8x896xf32>
    %281 = vector.broadcast %274 : vector<1x896xf32> to vector<8x896xf32>
    %282 = arith.mulf %280, %281 : vector<8x896xf32>
    %283 = arith.truncf %282 : vector<8x896xf32> to vector<8x896xbf16>
    %c0_119 = arith.constant 0 : index
    %c0_120 = arith.constant 0 : index
    %c0_121 = arith.constant 0 : index
    %c0_122 = arith.constant 0 : index
    %284 = vector.load %arg5[%c0_119, %c0_120, %c0_121, %c0_122] : memref<1x2x8x896xbf16, #tpu.memory_space<vmem>>, vector<1x1x8x896xbf16>
    %285 = vector.shape_cast %284 : vector<1x1x8x896xbf16> to vector<8x896xbf16>
    %286 = vector.shape_cast %283 : vector<8x896xbf16> to vector<1x1x8x896xbf16>
    tpu.vector_store %arg5[%c0_119, %c0_120, %c0_121, %c0_122], %286 {strides = array<i32>} : memref<1x2x8x896xbf16, #tpu.memory_space<vmem>>, vector<1x1x8x896xbf16>,
    %287 = vector.extract_strided_slice %1 {offsets = [1, 0, 0], sizes = [1, 8, 1], strides = [1, 1, 1]} : vector<2x8x1xf32> to vector<1x8x1xf32>
    %288 = vector.shape_cast %287 : vector<1x8x1xf32> to vector<8x1xf32>
    %289 = vector.broadcast %288 : vector<8x1xf32> to vector<8x896xf32>
    %290 = arith.addf %273, %289 : vector<8x896xf32>
    %cst_123 = arith.constant 0.000000e+00 : f32
    %291 = vector.broadcast %cst_123 : f32 to vector<8x896xf32>
    %292 = arith.maximumf %290, %291 : vector<8x896xf32>
    %293 = vector.broadcast %274 : vector<1x896xf32> to vector<8x896xf32>
    %294 = arith.mulf %292, %293 : vector<8x896xf32>
    %295 = arith.truncf %294 : vector<8x896xf32> to vector<8x896xbf16>
    %c0_124 = arith.constant 0 : index
    %c1_125 = arith.constant 1 : index
    %c0_126 = arith.constant 0 : index
    %c0_127 = arith.constant 0 : index
    %296 = vector.load %arg5[%c0_124, %c1_125, %c0_126, %c0_127] : memref<1x2x8x896xbf16, #tpu.memory_space<vmem>>, vector<1x1x8x896xbf16>
    %297 = vector.shape_cast %296 : vector<1x1x8x896xbf16> to vector<8x896xbf16>
    %298 = vector.shape_cast %295 : vector<8x896xbf16> to vector<1x1x8x896xbf16>
    tpu.vector_store %arg5[%c0_124, %c1_125, %c0_126, %c0_127], %298 {strides = array<i32>} : memref<1x2x8x896xbf16, #tpu.memory_space<vmem>>, vector<1x1x8x896xbf16>,
    %299 = arith.addf %282, %294 : vector<8x896xf32>
    %cst_128 = arith.constant dense<0.000000e+00> : vector<8xf32>
    %300 = vector.multi_reduction <add>, %299, %cst_128 [1] : vector<8x896xf32> to vector<8xf32>
    %301 = vector.shape_cast %300 : vector<8xf32> to vector<8x1xf32>
    %cst_129 = arith.constant 0.001953125 : f32
    %302 = vector.broadcast %cst_129 : f32 to vector<8x1xf32>
    %303 = arith.mulf %301, %302 : vector<8x1xf32>
    %c0_130 = arith.constant 0 : index
    %c0_131 = arith.constant 0 : index
    %c0_132 = arith.constant 0 : index
    %304 = vector.load %arg6[%c0_130, %c0_131, %c0_132] : memref<1x8x1xf32, #tpu.memory_space<vmem>>, vector<1x8x1xf32>
    %305 = vector.shape_cast %304 : vector<1x8x1xf32> to vector<8x1xf32>
    %306 = vector.shape_cast %303 : vector<8x1xf32> to vector<1x8x1xf32>
    tpu.vector_store %arg6[%c0_130, %c0_131, %c0_132], %306 {strides = array<i32>} : memref<1x8x1xf32, #tpu.memory_space<vmem>>, vector<1x8x1xf32>,
    return
  }
  func.func @transform_0(%arg0: i32) -> (i32, i32, i32) {
    %c0_i32 = arith.constant 0 : i32
    %c0_i32_0 = arith.constant 0 : i32
    %c0_i32_1 = arith.constant 0 : i32
    return %arg0, %c0_i32, %c0_i32_0 : i32, i32, i32
  }
  func.func @transform_1(%arg0: i32) -> (i32, i32, i32, i32) {
    %c0_i32 = arith.constant 0 : i32
    %c0_i32_0 = arith.constant 0 : i32
    %c0_i32_1 = arith.constant 0 : i32
    %c0_i32_2 = arith.constant 0 : i32
    %c0_i32_3 = arith.constant 0 : i32
    return %c0_i32, %c0_i32_0, %c0_i32_1, %c0_i32_2 : i32, i32, i32, i32
  }
  func.func @transform_2(%arg0: i32) -> (i32, i32, i32) {
    %c0_i32 = arith.constant 0 : i32
    %c0_i32_0 = arith.constant 0 : i32
    %c0_i32_1 = arith.constant 0 : i32
    %c0_i32_2 = arith.constant 0 : i32
    return %c0_i32, %c0_i32_0, %c0_i32_1 : i32, i32, i32
  }
  func.func @transform_3(%arg0: i32) -> (i32, i32) {
    %c0_i32 = arith.constant 0 : i32
    %c0_i32_0 = arith.constant 0 : i32
    %c0_i32_1 = arith.constant 0 : i32
    return %c0_i32, %c0_i32_0 : i32, i32
  }
  func.func @transform_4(%arg0: i32) -> (i32, i32, i32, i32) {
    %c0_i32 = arith.constant 0 : i32
    %c0_i32_0 = arith.constant 0 : i32
    %c0_i32_1 = arith.constant 0 : i32
    %c0_i32_2 = arith.constant 0 : i32
    return %arg0, %c0_i32, %c0_i32_0, %c0_i32_1 : i32, i32, i32, i32
  }
  func.func @transform_5(%arg0: i32) -> (i32, i32, i32) {
    %c0_i32 = arith.constant 0 : i32
    %c0_i32_0 = arith.constant 0 : i32
    %c0_i32_1 = arith.constant 0 : i32
    return %arg0, %c0_i32, %c0_i32_0 : i32, i32, i32
  }
}

module attributes {stable_mosaic.version = 11 : i64} {
  func.func @apply_attn_kernel(%arg0: i32, %arg1: i32, %arg2: memref<1x2x8x896xbf16, #tpu.memory_space<vmem>>, %arg3: memref<1x2x8x1xf32, #tpu.memory_space<vmem>>, %arg4: memref<1x8x896xf32, #tpu.memory_space<vmem>>) attributes {dimension_semantics = [#tpu.dimension_semantics<parallel>, #tpu.dimension_semantics<parallel>], iteration_bounds = array<i64: 2, 1>, scalar_prefetch = 0 : i64, scratch_operands = 0 : i64, tpu.core_type = #tpu.core_type<tc>, window_params = [{transform_indices = @transform_0, window_bounds = array<i64: 1, 2, 8, 896>}, {transform_indices = @transform_1, window_bounds = array<i64: 1, 2, 8, 1>}, {transform_indices = @transform_2, window_bounds = array<i64: 1, 8, 896>}]} {
    %c0 = arith.constant 0 : index
    %c0_0 = arith.constant 0 : index
    %c0_1 = arith.constant 0 : index
    %c0_2 = arith.constant 0 : index
    %0 = vector.load %arg3[%c0, %c0_0, %c0_1, %c0_2] : memref<1x2x8x1xf32, #tpu.memory_space<vmem>>, vector<1x2x8x1xf32>
    %1 = vector.shape_cast %0 : vector<1x2x8x1xf32> to vector<2x8x1xf32>
    %c0_3 = arith.constant 0 : index
    %c0_4 = arith.constant 0 : index
    %c0_5 = arith.constant 0 : index
    %c0_6 = arith.constant 0 : index
    %2 = vector.load %arg2[%c0_3, %c0_4, %c0_5, %c0_6] : memref<1x2x8x896xbf16, #tpu.memory_space<vmem>>, vector<1x1x8x896xbf16>
    %3 = vector.shape_cast %2 : vector<1x1x8x896xbf16> to vector<8x896xbf16>
    %4 = arith.extf %3 : vector<8x896xbf16> to vector<8x896xf32>
    %5 = vector.extract_strided_slice %1 {offsets = [0, 0, 0], sizes = [1, 8, 1], strides = [1, 1, 1]} : vector<2x8x1xf32> to vector<1x8x1xf32>
    %6 = vector.shape_cast %5 : vector<1x8x1xf32> to vector<8x1xf32>
    %7 = vector.broadcast %6 : vector<8x1xf32> to vector<8x896xf32>
    %8 = arith.mulf %4, %7 : vector<8x896xf32>
    %c0_7 = arith.constant 0 : index
    %c1 = arith.constant 1 : index
    %c0_8 = arith.constant 0 : index
    %c0_9 = arith.constant 0 : index
    %9 = vector.load %arg2[%c0_7, %c1, %c0_8, %c0_9] : memref<1x2x8x896xbf16, #tpu.memory_space<vmem>>, vector<1x1x8x896xbf16>
    %10 = vector.shape_cast %9 : vector<1x1x8x896xbf16> to vector<8x896xbf16>
    %11 = arith.extf %10 : vector<8x896xbf16> to vector<8x896xf32>
    %12 = vector.extract_strided_slice %1 {offsets = [1, 0, 0], sizes = [1, 8, 1], strides = [1, 1, 1]} : vector<2x8x1xf32> to vector<1x8x1xf32>
    %13 = vector.shape_cast %12 : vector<1x8x1xf32> to vector<8x1xf32>
    %14 = vector.broadcast %13 : vector<8x1xf32> to vector<8x896xf32>
    %15 = arith.mulf %11, %14 : vector<8x896xf32>
    %16 = arith.addf %8, %15 : vector<8x896xf32>
    %c0_10 = arith.constant 0 : index
    %c0_11 = arith.constant 0 : index
    %c0_12 = arith.constant 0 : index
    %17 = vector.load %arg4[%c0_10, %c0_11, %c0_12] : memref<1x8x896xf32, #tpu.memory_space<vmem>>, vector<1x8x896xf32>
    %18 = vector.shape_cast %17 : vector<1x8x896xf32> to vector<8x896xf32>
    %19 = vector.shape_cast %16 : vector<8x896xf32> to vector<1x8x896xf32>
    tpu.vector_store %arg4[%c0_10, %c0_11, %c0_12], %19 {strides = array<i32>} : memref<1x8x896xf32, #tpu.memory_space<vmem>>, vector<1x8x896xf32>,
    return
  }
  func.func @transform_0(%arg0: i32, %arg1: i32) -> (i32, i32, i32, i32) {
    %c0_i32 = arith.constant 0 : i32
    %c0_i32_0 = arith.constant 0 : i32
    %c0_i32_1 = arith.constant 0 : i32
    return %arg0, %c0_i32, %c0_i32_0, %arg1 : i32, i32, i32, i32
  }
  func.func @transform_1(%arg0: i32, %arg1: i32) -> (i32, i32, i32, i32) {
    %c0_i32 = arith.constant 0 : i32
    %c0_i32_0 = arith.constant 0 : i32
    %c0_i32_1 = arith.constant 0 : i32
    %c0_i32_2 = arith.constant 0 : i32
    return %arg0, %c0_i32, %c0_i32_0, %c0_i32_1 : i32, i32, i32, i32
  }
  func.func @transform_2(%arg0: i32, %arg1: i32) -> (i32, i32, i32) {
    %c0_i32 = arith.constant 0 : i32
    %c0_i32_0 = arith.constant 0 : i32
    return %arg0, %c0_i32, %arg1 : i32, i32, i32
  }
}

</mosaic_0001>

<bundles_post_ra>
// kernel: splat_conv3d_forward.3
= control target key start
LH: loop header
LB: loop body
LE: loop exit
PB: predicated region body
PF: predicated region fallthrough
CT: control target
= control target key end

     0   :  { %s448_s9 = smov 0   ;;  %s450_s10 = smov 0   ;;  %s492_s0 = inlined_call_operand.vmem [shape: bf16[2,2,8,896], index: 0, kind: input, shape index: {}]   ;;  %s493_s1 = inlined_call_operand.vmem [shape: f32[2,2,8,1], index: 1, kind: input, shape index: {}]   ;;  %s494_s2 = inlined_call_operand.vmem [shape: f32[2,8,896], index: 2, kind: output, shape index: {}]  }
   0x1   :  { %s452_s11 = smov 0  }
   0x2 LB: > { %s24_s12 = sadd.s32 1, %s426_s10  ;;  %p369_p0 = scmp.ge.s32.totalorder %s430_s11, 1  ;;  %s430_s11 = sphi %s452_s11, %s12_s11   ;;  %s426_s10 = sphi %s450_s10, %s496_s10   ;;  %s422_s9 = sphi %s448_s9, %s495_s9  }
   0x3   : > { %p26_p1 = scmp.ge.s32.totalorder %s24_s12, 2  ;;  %p143_p2 = scmp.lt.s32.totalorder %s430_s11, 3 }
   0x5   : > { %s498_s12 = smov (%p26_p1, %s24_s12), 0  ;;  %p144_p3 = pnand %p369_p0, %p143_p2 }
   0x6   : > { %p179_p4 = scmp.lt.s32.totalorder (!%p144_p3), %s422_s9, 1 }
   0x7   : > { %147 = sbr.rel (%p144_p3) target bundleno = 150 (0x96), region = 28 }
   0xc   : > { %v432_v0 = vmov 0   ;;  %s500_s9 = smov (!%p179_p4, %s422_s9), 1 }
   0xd   : > { %407 = vset.pattern.permute.xlu0 %v432_v0  ;;  %s380_s13 = sshll.u32 %s500_s9, 4  ;;  %s381_s17 = smul.u32 56, %s500_s9 }
   0xe   : > { %s192_s16 = scalar_lea.vmem %s493_s1, %s380_s13 }
   0xf   : > { %v203_v1 = vld [vmem:[%s192_s16] sm:$0xff]  ;;  %v204_v2 = vld [vmem:[%s192_s16 + $0x8] sm:$0xff]  ;;  %s186_s20 = scalar_lea.vmem %s492_s0, %s381_s17  ;;  %s201_s23 = scalar_lea.vmem %s494_s2, %s381_s17 }
  0x10   : > { %218 = vperm.xlu0 %407, %v203_v1   ;;  %v205_v4 = vld [vmem:[%s186_s20] sm:$0xff]  ;;  %v206_v5 = vld [vmem:[%s186_s20 + $0x8] sm:$0xff]  ;;  %v207_v8 = vld [vmem:[%s186_s20 + $0x10] sm:$0xff] }
  0x11   : > { %v374_v6 = vld [vmem:[%s186_s20 + $0x1c] sm:$0xff]  ;;  %v375_v7 = vld [vmem:[%s186_s20 + $0x24] sm:$0xff]  ;;  %v376_v9 = vld [vmem:[%s186_s20 + $0x2c] sm:$0xff]  ;;  %v209_v10 = vunpack.c.l.bf16 %v205_v4  ;;  %v210_v11 = vunpack.c.h.bf16 %v205_v4  ;;  %v211_v12 = vunpack.c.l.bf16 %v206_v5  ;;  %v212_v19 = vunpack.c.h.bf16 %v206_v5 }
  0x12   : > { %v377_v13 = vld [vmem:[%s186_s20 + $0x34] sm:$0xf]  ;;  %v208_v14 = vld [vmem:[%s186_s20 + $0x18] sm:$0xf]  ;;  %v233_v15 = vunpack.c.l.bf16 %v374_v6  ;;  %v234_v16 = vunpack.c.h.bf16 %v374_v6  ;;  %v235_v17 = vunpack.c.l.bf16 %v375_v7  ;;  %v236_v18 = vunpack.c.h.bf16 %v375_v7 }
  0x13   : > { %v213_v20 = vunpack.c.l.bf16 %v207_v8  ;;  %v237_v21 = vunpack.c.l.bf16 %v376_v9  ;;  %v238_v22 = vunpack.c.h.bf16 %v376_v9  ;;  %v214_v23 = vunpack.c.h.bf16 %v207_v8 }
  0x14   : > { %v239_v24 = vunpack.c.l.bf16 %v377_v13  ;;  %v215_v25 = vunpack.c.l.bf16 %v208_v14 }
  0x18   : > { %242 = vperm.xlu0 %407, %v204_v2  }
  0x82   : > { %v219_v3 = vpop.permute.xlu0 %218 }
  0x83   : > { %v221_v26 = vmul.f32 %v219_v3, %v209_v10  ;;  %v222_v27 = vmul.f32 %v219_v3, %v210_v11  ;;  %v223_v28 = vmul.f32 %v219_v3, %v211_v12  ;;  %v224_v34 = vmul.f32 %v219_v3, %v212_v19 }
  0x84   : > { %v225_v35 = vmul.f32 %v219_v3, %v213_v20  ;;  %v226_v42 = vmul.f32 %v219_v3, %v214_v23  ;;  %v227_v44 = vmul.f32 %v219_v3, %v215_v25 }
  0x8a   : > { %v243_v29 = vpop.permute.xlu0 %242 }
  0x8b   : > { %v245_v30 = vmul.f32 %v243_v29, %v233_v15  ;;  %v246_v31 = vmul.f32 %v243_v29, %v234_v16  ;;  %v247_v32 = vmul.f32 %v243_v29, %v235_v17  ;;  %v248_v33 = vmul.f32 %v243_v29, %v236_v18 }
  0x8c   : > { %v249_v36 = vmul.f32 %v243_v29, %v237_v21  ;;  %v250_v37 = vmul.f32 %v243_v29, %v238_v22  ;;  %v251_v38 = vmul.f32 %v243_v29, %v239_v24 }
  0x8d   : > { %v252_v39 = vadd.f32 %v245_v30, %v221_v26  ;;  %v253_v40 = vadd.f32 %v246_v31, %v222_v27  ;;  %v254_v41 = vadd.f32 %v247_v32, %v223_v28  ;;  %v255_v43 = vadd.f32 %v248_v33, %v224_v34 }
  0x8e   : > { %v256_v45 = vadd.f32 %v249_v36, %v225_v35  ;;  %v257_v46 = vadd.f32 %v250_v37, %v226_v42  ;;  %v258_v47 = vadd.f32 %v251_v38, %v227_v44 }
  0x8f   : > { %259 = vst [vmem:[%s201_s23] sm:$0xff] %v252_v39 }
  0x90   : > { %260 = vst [vmem:[%s201_s23 + $0x8] sm:$0xff] %v253_v40 }
  0x91   : > { %261 = vst [vmem:[%s201_s23 + $0x10] sm:$0xff] %v254_v41 }
  0x92   : > { %262 = vst [vmem:[%s201_s23 + $0x18] sm:$0xff] %v255_v43 }
  0x93   : > { %263 = vst [vmem:[%s201_s23 + $0x20] sm:$0xff] %v256_v45 }
  0x94   : > { %264 = vst [vmem:[%s201_s23 + $0x28] sm:$0xff] %v257_v46 }
  0x95   : > { %265 = vst [vmem:[%s201_s23 + $0x30] sm:$0xff] %v258_v47 }
  0x96 PF: > { %s12_s11 = sadd.s32 1, %s430_s11   ;;  %s495_s9 = smov %s426_s10 }
  0x97   : > { %p9_p5 = scmp.ge.s32.totalorder %s12_s11, 4   ;;  %s496_s10 = smov %s498_s12 }
  0x99   :  { %11 = sbr.rel (!%p9_p5) target bundleno = 2 (0x2), region = 62 }

// kernel: splat_conv3d_forward.2
= control target key start
LH: loop header
LB: loop body
LE: loop exit
PB: predicated region body
PF: predicated region fallthrough
CT: control target
= control target key end

     0   :  { %s9862_s18 = smov 0   ;;  %s13169_s0 = inlined_call_operand.vmem [shape: bf16[2,4,1152], index: 0, kind: input, shape index: {}]   ;;  %s13170_s1 = inlined_call_operand.vmem [shape: bf16[2,27,8,4], index: 1, kind: input, shape index: {}]   ;;  %s13171_s2 = inlined_call_operand.vmem [shape: f32[2,8,1], index: 2, kind: input, shape index: {}]   ;;  %s13172_s3 = inlined_call_operand.vmem [shape: f32[1,896], index: 3, kind: input, shape index: {}]   ;;  %s13173_s4 = inlined_call_operand.vmem [shape: bf16[2,2,8,896], index: 4, kind: output, shape index: {0}]   ;;  %s13174_s5 = inlined_call_operand.vmem [shape: f32[2,8,1], index: 5, kind: output, shape index: {1}]  }
   0x1 LB: > { %s9366_s19 = sadd.s32 4294967295, %s9803_s18   ;;  %p9370_p0 = scmp.ge.s32.totalorder %s9803_s18, 1  ;;  %s9803_s18 = sphi %s9862_s18, %s16_s18  }
   0x2   : > { %p190_p1 = scmp.lt.s32.totalorder %s9803_s18, 3 }
   0x4   : > { %p191_p2 = pnand %p9370_p0, %p190_p1 }
   0x5   : > { %p222_p3 = scmp.lt.s32.totalorder (!%p191_p2), %s9366_s19, 1  ;;  %s9805_s24 = smov (!%p191_p2), 127  }
   0x6   : > { %194 = sbr.rel (%p191_p2) target bundleno = 1915 (0x77b), region = 36  ;;  %s9806_s25 = smov (!%p191_p2), 126  }
   0x7   : > { %s9807_s28 = smov (!%p191_p2), 118   ;;  %s9808_s8 = smov (!%p191_p2), 117  }
   0x8   : > { %s9809_s13 = smov (!%p191_p2), 116   ;;  %s9811_s26 = smov (!%p191_p2), 107  }
   0x9   : > { %s9812_s6 = smov (!%p191_p2), 106   ;;  %s9813_s11 = smov (!%p191_p2), 28  }
   0xa   : > { %s9814_s16 = smov (!%p191_p2), 27   ;;  %s9816_s29 = smov (!%p191_p2), 18  }
   0xb   : > { %s13176_s19 = smov (!%p222_p3, %s9366_s19), 1  ;;  %vm333_vm0 = vcmask 1039360   ;;  %vm345_vm1 = vcmask 1041408   ;;  %vm341_vm2 = vcmask 31744   ;;  %vm891_vm3 = vcmask 1031168   ;;  %s9817_s9 = smov 17  }
   0xc   : > { %s9758_s20 = smul.u32 18, %s13176_s19  ;;  %vm1224_vm4 = vcmask 965632   ;;  %vm1557_vm5 = vcmask 957440   ;;  %vm1890_vm6 = vcmask 949248   ;;  %vm2223_vm7 = vcmask 883712   ;;  %s9818_s14 = smov 16  }
   0xd   : > { %vm2556_vm8 = vcmask 875520   ;;  %vm2889_vm9 = vcmask 867328   ;;  %vm3222_vm10 = vcmask 228352   ;;  %vm3555_vm11 = vcmask 220160   ;;  %s9819_s21 = smov 8   ;;  %s9820_s27 = smov 7  }
   0xe   : > { %s9876_s23 = scalar_lea.vmem %s13169_s0, %s9758_s20  ;;  %s9810_s20 = smov 108   ;;  %vm3888_vm12 = vcmask 211968   ;;  %vm4221_vm13 = vcmask 146432   ;;  %vm4554_vm14 = vcmask 138240   ;;  %vm4887_vm15 = vcmask 130048  }
   0xf   : > { %v9879_v0 = vld [vmem:[%s9876_s23] sm:$0xff]  ;;  %v9882_v1 = vld [vmem:[%s9876_s23 + $0x8] sm:$0xff]  ;;  %s9821_s7 = smov 6   ;;  %s9822_s12 = smov 56  }
  0x10   : > { %297 = vst [vmem:[#allocation1] ss:$4 sm:$0xff] %v9879_v0  ;;  %v294_v6 = vld [vmem:[%s9876_s23 + $0x8] sm:$0x3f]  ;;  %s9823_s17 = smov 55   ;;  %s9825_s30 = smov 46  }
  0x11   : > { %300 = vst [vmem:[#allocation1 + $0x20] ss:$4 sm:$0xff] %v9882_v1  ;;  %s9826_s10 = smov 45   ;;  %s9827_s15 = smov 44  }
  0x12   : > { %s9828_s22 = smov 36  }
  0x17   : > { %v305_v2 = vld.sshfl [vmem:[#allocation1 + $0x10] sm:$0xff pattern:$0x73625140]  ;;  %v301_v3 = vld.sshfl [vmem:[#allocation1] sm:$0xff pattern:$0x73625140] }
  0x18   : > { %321 = vrot.lane.b32.xlu1 %v305_v2, %s9805_s24  ;;  %317 = vrot.lane.b32.xlu0 %v301_v3, %s9805_s24  ;;  %v307_v4 = vld.sshfl [vmem:[#allocation1 + $0x18] sm:$0xff pattern:$0x73625140]  ;;  %v303_v5 = vld.sshfl [vmem:[#allocation1 + $0x8] sm:$0xff pattern:$0x73625140] }
  0x19   : > { %458 = vst [vmem:[#allocation1] ss:$4 sm:$0xff] %v9879_v0  ;;  %v315_v7 = vld.sshfl [vmem:[#allocation1 + $0x38] sm:$0xff pattern:$0x73625140] }
  0x1a   : > { %v309_v8 = vld.sshfl [vmem:[#allocation1 + $0x20] sm:$0xff pattern:$0x73625140]  ;;  %v313_v9 = vld.sshfl [vmem:[#allocation1 + $0x30] sm:$0xff pattern:$0x73625140] }
  0x1b   : > { %325 = vrot.lane.b32.xlu2 %v309_v8, %s9805_s24  ;;  %v311_v10 = vld.sshfl [vmem:[#allocation1 + $0x28] sm:$0xff pattern:$0x73625140]  ;;  %v238_v3 = vld [vmem:[%s13170_s1 + $0x4] sm:$0xf] }
  0x1c   : > { %461 = vst [vmem:[#allocation1 + $0x20] ss:$4 sm:$0xff] %v294_v6 }
  0x20   : > { %323 = vrot.lane.b32.xlu1 %v307_v4, %s9805_s24  ;;  %319 = vrot.lane.b32.xlu0 %v303_v5, %s9805_s24  ;;  %v9893_v11 = vld.sshfl [vmem:[#allocation1] sm:$0xff pattern:$0x73625140]  ;;  %v9895_v12 = vld.sshfl [vmem:[#allocation1 + $0x8] sm:$0xff pattern:$0x73625140] }
  0x21   : > { %v9897_v13 = vld.sshfl [vmem:[#allocation1 + $0x10] sm:$0xff pattern:$0x73625140]  ;;  %v9899_v14 = vld.sshfl [vmem:[#allocation1 + $0x18] sm:$0xff pattern:$0x73625140] }
  0x22   : > { %577 = vst [vmem:[#allocation1] ss:$4 sm:$0xff] %v9879_v0  ;;  %v472_v56 = vsel %vm345_vm1, %v9893_v11, 0  ;;  %v474_v4 = vsel %vm345_vm1, %v9895_v12, 0  ;;  %v476_v12 = vsel %vm345_vm1, %v9897_v13, 0 }
  0x23   : > { %327 = vrot.lane.b32.xlu2 %v311_v10, %s9805_s24  ;;  %v9903_v15 = vld.sshfl [vmem:[#allocation1 + $0x20] sm:$0xff pattern:$0x73625140]  ;;  %v9905_v16 = vld.sshfl [vmem:[#allocation1 + $0x28] sm:$0xff pattern:$0x73625140] }
  0x24   : > { %v9907_v17 = vld.sshfl [vmem:[#allocation1 + $0x30] sm:$0xff pattern:$0x73625140]  ;;  %v480_v5 = vsel %vm345_vm1, %v9903_v15, 0  ;;  %v478_v15 = vsel %vm345_vm1, %v9899_v14, 0 }
  0x25   : > { %579 = vst [vmem:[#allocation1 + $0x20] ss:$4 sm:$0xff] %v9882_v1 }
  0x28   : > { %331 = vrot.lane.b32.xlu1 %v315_v7, %s9805_s24  ;;  %329 = vrot.lane.b32.xlu0 %v313_v9, %s9805_s24 }
  0x29   : > { %v584_v18 = vld.sshfl [vmem:[#allocation1 + $0x10] sm:$0xff pattern:$0x73625140]  ;;  %v582_v19 = vld.sshfl [vmem:[#allocation1 + $0x8] sm:$0xff pattern:$0x73625140] }
  0x2a   : > { %v580_v20 = vld.sshfl [vmem:[#allocation1] sm:$0xff pattern:$0x73625140]  ;;  %v586_v21 = vld.sshfl [vmem:[#allocation1 + $0x18] sm:$0xff pattern:$0x73625140] }
  0x2b   : > { %596 = vrot.lane.b32.xlu2 %v580_v20, %s9805_s24  ;;  %734 = vst [vmem:[#allocation1] ss:$4 sm:$0xff] %v9879_v0 }
  0x2c   : > { %v588_v22 = vld.sshfl [vmem:[#allocation1 + $0x20] sm:$0xff pattern:$0x73625140]  ;;  %v590_v23 = vld.sshfl [vmem:[#allocation1 + $0x28] sm:$0xff pattern:$0x73625140] }
  0x2d   : > { %v594_v24 = vld.sshfl [vmem:[#allocation1 + $0x38] sm:$0xff pattern:$0x73625140]  ;;  %v592_v25 = vld.sshfl [vmem:[#allocation1 + $0x30] sm:$0xff pattern:$0x73625140] }
  0x2e   : > { %736 = vst [vmem:[#allocation1 + $0x20] ss:$4 sm:$0xff] %v294_v6 }
  0x30   : > { %600 = vrot.lane.b32.xlu1 %v584_v18, %s9805_s24  ;;  %598 = vrot.lane.b32.xlu0 %v582_v19, %s9805_s24 }
  0x32   : > { %v9916_v26 = vld.sshfl [vmem:[#allocation1] sm:$0xff pattern:$0x73625140]  ;;  %v9918_v27 = vld.sshfl [vmem:[#allocation1 + $0x8] sm:$0xff pattern:$0x73625140] }
  0x33   : > { %602 = vrot.lane.b32.xlu2 %v586_v21, %s9805_s24  ;;  %v9921_v28 = vld.sshfl [vmem:[#allocation1 + $0x10] sm:$0xff pattern:$0x73625140]  ;;  %v9923_v29 = vld.sshfl [vmem:[#allocation1 + $0x18] sm:$0xff pattern:$0x73625140] }
  0x34   : > { %855 = vst [vmem:[#allocation1] ss:$4 sm:$0xff] %v9879_v0 }
  0x35   : > { %v9933_v33 = vld.sshfl [vmem:[#allocation1 + $0x20] sm:$0xff pattern:$0x73625140]  ;;  %v9935_v34 = vld.sshfl [vmem:[#allocation1 + $0x28] sm:$0xff pattern:$0x73625140] }
  0x36   : > { %v9937_v35 = vld.sshfl [vmem:[#allocation1 + $0x30] sm:$0xff pattern:$0x73625140] }
  0x37   : > { %858 = vst [vmem:[#allocation1 + $0x20] ss:$4 sm:$0xff] %v9882_v1 }
  0x38   : > { %604 = vrot.lane.b32.xlu0 %v588_v22, %s9805_s24  ;;  %606 = vrot.lane.b32.xlu1 %v590_v23, %s9805_s24 }
  0x3b   : > { %608 = vrot.lane.b32.xlu2 %v592_v25, %s9805_s24  ;;  %v859_v30 = vld.sshfl [vmem:[#allocation1] sm:$0xff pattern:$0x73625140]  ;;  %v863_v31 = vld.sshfl [vmem:[#allocation1 + $0x10] sm:$0xff pattern:$0x73625140] }
  0x3c   : > { %v865_v32 = vld.sshfl [vmem:[#allocation1 + $0x18] sm:$0xff pattern:$0x73625140]  ;;  %v861_v38 = vld.sshfl [vmem:[#allocation1 + $0x8] sm:$0xff pattern:$0x73625140] }
  0x3d   : > { %1021 = vst [vmem:[#allocation1] ss:$4 sm:$0xff] %v9879_v0  ;;  %v237_v25 = vld [vmem:[%s13170_s1] sm:$0xf] }
  0x3e   : > { %v869_v36 = vld.sshfl [vmem:[#allocation1 + $0x28] sm:$0xff pattern:$0x73625140]  ;;  %v871_v37 = vld.sshfl [vmem:[#allocation1 + $0x30] sm:$0xff pattern:$0x73625140] }
  0x3f   : > { %v873_v39 = vld.sshfl [vmem:[#allocation1 + $0x38] sm:$0xff pattern:$0x73625140]  ;;  %v867_v40 = vld.sshfl [vmem:[#allocation1 + $0x20] sm:$0xff pattern:$0x73625140] }
  0x40   : > { %610 = vrot.lane.b32.xlu0 %v594_v24, %s9805_s24  ;;  %875 = vrot.lane.b32.xlu1 %v859_v30, %s9806_s25  ;;  %1023 = vst [vmem:[#allocation1 + $0x20] ss:$4 sm:$0xff] %v9882_v1  ;;  %v482_v30 = vsel %vm345_vm1, %v9905_v16, 0  ;;  %s9815_s24 = smov 26  }
  0x43   : > { %877 = vrot.lane.b32.xlu2 %v861_v38, %s9806_s25 }
  0x44   : > { %v1026_v41 = vld.sshfl [vmem:[#allocation1 + $0x8] sm:$0xff pattern:$0x73625140]  ;;  %v1024_v42 = vld.sshfl [vmem:[#allocation1] sm:$0xff pattern:$0x73625140] }
  0x45   : > { %v1030_v44 = vld.sshfl [vmem:[#allocation1 + $0x18] sm:$0xff pattern:$0x73625140]  ;;  %v1028_v48 = vld.sshfl [vmem:[#allocation1 + $0x10] sm:$0xff pattern:$0x73625140] }
  0x46   : > { %1188 = vst [vmem:[#allocation1] ss:$4 sm:$0xff] %v9879_v0 }
  0x47   : > { %v1032_v45 = vld.sshfl [vmem:[#allocation1 + $0x20] sm:$0xff pattern:$0x73625140]  ;;  %v1036_v50 = vld.sshfl [vmem:[#allocation1 + $0x30] sm:$0xff pattern:$0x73625140] }
  0x48   : > { %879 = vrot.lane.b32.xlu0 %v863_v31, %s9806_s25  ;;  %881 = vrot.lane.b32.xlu1 %v865_v32, %s9806_s25  ;;  %v1038_v52 = vld.sshfl [vmem:[#allocation1 + $0x38] sm:$0xff pattern:$0x73625140]  ;;  %v1034_v18 = vld.sshfl [vmem:[#allocation1 + $0x28] sm:$0xff pattern:$0x73625140] }
  0x49   : > { %1191 = vst [vmem:[#allocation1 + $0x20] ss:$4 sm:$0xff] %v9882_v1  ;;  %v484_v31 = vsel %vm345_vm1, %v9907_v17, 0 }
  0x4b   : > { %883 = vrot.lane.b32.xlu2 %v867_v40, %s9806_s25 }
  0x4d   : > { %v1196_v6 = vld.sshfl [vmem:[#allocation1 + $0x10] sm:$0xff pattern:$0x73625140]  ;;  %v1194_v9 = vld.sshfl [vmem:[#allocation1 + $0x8] sm:$0xff pattern:$0x73625140] }
  0x4e   : > { %v1198_v32 = vld.sshfl [vmem:[#allocation1 + $0x18] sm:$0xff pattern:$0x73625140]  ;;  %v1192_v16 = vld.sshfl [vmem:[#allocation1] sm:$0xff pattern:$0x73625140] }
  0x4f   : > { %1354 = vst [vmem:[#allocation1] ss:$4 sm:$0xff] %v9879_v0 }
  0x50   : > { %885 = vrot.lane.b32.xlu0 %v869_v36, %s9806_s25  ;;  %887 = vrot.lane.b32.xlu1 %v871_v37, %s9806_s25  ;;  %v1200_v22 = vld.sshfl [vmem:[#allocation1 + $0x20] sm:$0xff pattern:$0x73625140]  ;;  %v1206_v40 = vld.sshfl [vmem:[#allocation1 + $0x38] sm:$0xff pattern:$0x73625140] }
  0x53   : > { %889 = vrot.lane.b32.xlu2 %v873_v39, %s9806_s25  ;;  %v1202_v39 = vld.sshfl [vmem:[#allocation1 + $0x28] sm:$0xff pattern:$0x73625140] }
  0x58   : > { %1042 = vrot.lane.b32.xlu1 %v1026_v41, %s9806_s25  ;;  %1040 = vrot.lane.b32.xlu0 %v1024_v42, %s9806_s25 }
  0x5b   : > { %1044 = vrot.lane.b32.xlu2 %v1028_v48, %s9806_s25 }
  0x60   : > { %1046 = vrot.lane.b32.xlu0 %v1030_v44, %s9806_s25  ;;  %1048 = vrot.lane.b32.xlu1 %v1032_v45, %s9806_s25 }
  0x63   : > { %1050 = vrot.lane.b32.xlu2 %v1034_v18, %s9806_s25 }
  0x68   : > { %1052 = vrot.lane.b32.xlu0 %v1036_v50, %s9806_s25  ;;  %1054 = vrot.lane.b32.xlu1 %v1038_v52, %s9806_s25  ;;  %v1361_v52 = vld.sshfl [vmem:[#allocation1 + $0x10] sm:$0xff pattern:$0x73625140]  ;;  %s9824_s25 = smov 54  }
  0x6b   : > { %1208 = vrot.lane.b32.xlu2 %v1192_v16, %s9807_s28 }
  0x70   : > { %1212 = vrot.lane.b32.xlu1 %v1196_v6, %s9807_s28  ;;  %1210 = vrot.lane.b32.xlu0 %v1194_v9, %s9807_s28  ;;  %v755_v6 = vsel %vm345_vm1, %v9933_v33, 0 }
  0x73   : > { %1214 = vrot.lane.b32.xlu2 %v1198_v32, %s9807_s28 }
  0x75   : > { %v326_v43 = vpop.permute.xlu2 %325 }
  0x78   : > { %1216 = vrot.lane.b32.xlu0 %v1200_v22, %s9807_s28  ;;  %1218 = vrot.lane.b32.xlu1 %v1202_v39, %s9807_s28 }
  0x7d   : > { %v328_v49 = vpop.permute.xlu2 %327 }
  0x7e   : > { %v338_v51 = vsel %vm333_vm0, %v326_v43, %v328_v49 }
  0x7f   : > { %v359_v55 = vsel %vm345_vm1, %v338_v51, 0 }
  0x80   : > { %1222 = vrot.lane.b32.xlu0 %v1206_v40, %s9807_s28 }
  0x85   : > { %v597_v13 = vpop.permute.xlu2 %596 }
  0x88   : > { %1377 = vrot.lane.b32.xlu0 %v1361_v52, %s9807_s28 }
  0x8a   : > { %v322_v46 = vpop.permute.xlu1 %321  ;;  %v318_v47 = vpop.permute.xlu0 %317 }
  0x8d   : > { %v603_v36 = vpop.permute.xlu2 %602 }
  0x92   : > { %v324_v53 = vpop.permute.xlu1 %323  ;;  %v320_v54 = vpop.permute.xlu0 %319 }
  0x93   : > { %v334_v57 = vsel %vm333_vm0, %v318_v47, %v320_v54  ;;  %v335_v58 = vsel %vm333_vm0, %v320_v54, %v322_v46  ;;  %v336_v59 = vsel %vm333_vm0, %v322_v46, %v324_v53  ;;  %v337_v60 = vsel %vm333_vm0, %v324_v53, %v326_v43  ;;  %v1357_v43 = vld.sshfl [vmem:[#allocation1] sm:$0xff pattern:$0x73625140]  ;;  %v1363_v53 = vld.sshfl [vmem:[#allocation1 + $0x18] sm:$0xff pattern:$0x73625140] }
  0x94   : > { %v347_v61 = vsel %vm345_vm1, %v334_v57, 0  ;;  %v350_v62 = vsel %vm345_vm1, %v335_v58, 0  ;;  %v353_v63 = vsel %vm345_vm1, %v336_v59, 0  ;;  %v356_v2 = vsel %vm345_vm1, %v337_v60, 0  ;;  %1373 = vrot.lane.b32.xlu1 %v1357_v43, %s9807_s28  ;;  %v265_v58 = vld [vmem:[%s13170_s1 + $0x70] sm:$0xf] }
  0x95   : > { %374 = vmatpush.bf16.msra.mxu0 %v347_v61  ;;  %387 = vmatpush.bf16.msra.mxu1 %v350_v62  ;;  %v609_v42 = vpop.permute.xlu2 %608  ;;  %v1204_v54 = vld.sshfl [vmem:[#allocation1 + $0x30] sm:$0xff pattern:$0x73625140]  ;;  %v747_v60 = vsel %vm345_vm1, %v9916_v26, 0  ;;  %v749_v61 = vsel %vm345_vm1, %v9918_v27, 0  ;;  %v751_v62 = vsel %vm345_vm1, %v9921_v28, 0 }
  0x96   : > { %400 = vmatpush.bf16.msra.mxu2 %v353_v63  ;;  %413 = vmatpush.bf16.msra.mxu3 %v356_v2  ;;  %1356 = vst [vmem:[#allocation1 + $0x20] ss:$4 sm:$0xff] %v9882_v1 }
  0x97   : > { %1220 = vrot.lane.b32.xlu2 %v1204_v54, %s9807_s28 }
  0x98   : > { %9374 = vmatmul.msk.bf16.vlgmr.msra.gmra.mxu0 %vm341_vm2, %v238_v3  ;;  %9375 = vmatmul.msk.bf16.vlgmr.msra.gmra.mxu1 %vm341_vm2, %v238_v3 }
  0x99   : > { %426 = vmatpush.bf16.msrb.mxu0 %v359_v55  ;;  %9376 = vmatmul.msk.bf16.vlgmr.msra.gmra.mxu2 %vm341_vm2, %v238_v3 }
  0x9a   : > { %493 = vmatpush.bf16.msrb.mxu3 %v472_v56  ;;  %v332_v7 = vpop.permute.xlu1 %331  ;;  %v330_v8 = vpop.permute.xlu0 %329 }
  0x9b   : > { %9377 = vmatmul.msk.bf16.vlgmr.msra.gmra.mxu3 %vm341_vm2, %v238_v3  ;;  %v339_v10 = vsel %vm333_vm0, %v328_v49, %v330_v8  ;;  %v340_v11 = vsel %vm333_vm0, %v330_v8, %v332_v7  ;;  %v757_v7 = vsel %vm345_vm1, %v9935_v34, 0  ;;  %v759_v8 = vsel %vm345_vm1, %v9937_v35, 0 }
  0x9c   : > { %v362_v19 = vsel %vm345_vm1, %v339_v10, 0  ;;  %v365_v20 = vsel %vm345_vm1, %v340_v11, 0  ;;  %1379 = vrot.lane.b32.xlu1 %v1363_v53, %s9807_s28 }
  0x9d   : > { %506 = vmatpush.bf16.msra.mxu0 %v474_v4  ;;  %439 = vmatpush.bf16.msrb.mxu1 %v362_v19  ;;  %v1367_v56 = vld.sshfl [vmem:[#allocation1 + $0x28] sm:$0xff pattern:$0x73625140]  ;;  %v1371_v63 = vld.sshfl [vmem:[#allocation1 + $0x38] sm:$0xff pattern:$0x73625140]  ;;  %v878_v9 = vpop.permute.xlu2 %877 }
  0x9e   : > { %545 = vmatpush.bf16.msra.mxu3 %v480_v5  ;;  %452 = vmatpush.bf16.msrb.mxu2 %v365_v20  ;;  %v1369_v2 = vld.sshfl [vmem:[#allocation1 + $0x30] sm:$0xff pattern:$0x73625140]  ;;  %v1365_v26 = vld.sshfl [vmem:[#allocation1 + $0x20] sm:$0xff pattern:$0x73625140] }
  0x9f   : > { %1383 = vrot.lane.b32.xlu0 %v1367_v56, %s9807_s28  ;;  %1524 = vst [vmem:[#allocation1 + $0x20] ss:$4 sm:$0xff] %v9882_v1  ;;  %v753_v5 = vsel %vm345_vm1, %v9923_v29, 0  ;;  %v264_v19 = vld [vmem:[%s13170_s1 + $0x6c] sm:$0xf] }
  0xa0   : > { %v239_v56 = vld [vmem:[%s13170_s1 + $0x8] sm:$0xf] }
  0xa1   : > { %519 = vmatpush.bf16.msra.mxu1 %v476_v12 }
  0xa2   : > { %532 = vmatpush.bf16.msra.mxu2 %v478_v15  ;;  %v601_v14 = vpop.permute.xlu1 %600  ;;  %v599_v21 = vpop.permute.xlu0 %598 }
  0xa3   : > { %v612_v23 = vsel %vm333_vm0, %v597_v13, %v599_v21  ;;  %v613_v24 = vsel %vm333_vm0, %v599_v21, %v601_v14  ;;  %v614_v44 = vsel %vm333_vm0, %v601_v14, %v603_v36 }
  0xa4   : > { %v623_v37 = vsel %vm345_vm1, %v612_v23, 0  ;;  %v626_v38 = vsel %vm345_vm1, %v613_v24, 0  ;;  %v629_v48 = vsel %vm345_vm1, %v614_v44, 0  ;;  %1385 = vrot.lane.b32.xlu1 %v1369_v2, %s9807_s28 }
  0xa5   : > { %v884_v12 = vpop.permute.xlu2 %883 }
  0xa6   : > { %v1533_v29 = vld.sshfl [vmem:[#allocation1 + $0x20] sm:$0xff pattern:$0x73625140]  ;;  %v1539_v35 = vld.sshfl [vmem:[#allocation1 + $0x38] sm:$0xff pattern:$0x73625140] }
  0xa7   : > { %v1537_v11 = vld.sshfl [vmem:[#allocation1 + $0x30] sm:$0xff pattern:$0x73625140] }
  0xa8   : > { %9378 = vmatmul.msk.bf16.vlgmr.msrb.gmra.mxu0 %vm341_vm2, %v238_v3  ;;  %9379 = vmatmul.msk.bf16.vlgmr.msrb.gmra.mxu1 %vm341_vm2, %v238_v3 }
  0xa9   : > { %9380 = vmatmul.msk.bf16.vlgmr.msrb.gmra.mxu2 %vm341_vm2, %v238_v3  ;;  %558 = vmatpush.bf16.msrb.mxu0 %v482_v30  ;;  %v1359_v3 = vld.sshfl [vmem:[#allocation1 + $0x8] sm:$0xff pattern:$0x73625140] }
  0xaa   : > { %571 = vmatpush.bf16.msrb.mxu1 %v484_v31  ;;  %650 = vmatpush.bf16.msrb.mxu2 %v623_v37  ;;  %v605_v17 = vpop.permute.xlu0 %604  ;;  %v607_v41 = vpop.permute.xlu1 %606  ;;  %1521 = vst [vmem:[#allocation1] ss:$4 sm:$0xff] %v9879_v0 }
  0xab   : > { %9381 = vmatmul.msk.bf16.vlgmr.msrb.gmra.mxu3 %vm341_vm2, %v237_v25  ;;  %v615_v45 = vsel %vm333_vm0, %v603_v36, %v605_v17  ;;  %v616_v46 = vsel %vm333_vm0, %v605_v17, %v607_v41  ;;  %v617_v47 = vsel %vm333_vm0, %v607_v41, %v609_v42  ;;  %1375 = vrot.lane.b32.xlu2 %v1359_v3, %s9807_s28  ;;  %v1535_v41 = vld.sshfl [vmem:[#allocation1 + $0x28] sm:$0xff pattern:$0x73625140] }
  0xac   : > { %663 = vmatpush.bf16.msrb.mxu3 %v626_v38  ;;  %v632_v49 = vsel %vm345_vm1, %v615_v45, 0  ;;  %v635_v50 = vsel %vm345_vm1, %v616_v46, 0  ;;  %v638_v51 = vsel %vm345_vm1, %v617_v47, 0  ;;  %1689 = vst [vmem:[#allocation1 + $0x20] ss:$4 sm:$0xff] %v9882_v1 }
  0xad   : > { %v890_v31 = vpop.permute.xlu2 %889 }
  0xb1   : > { %v1525_v27 = vld.sshfl [vmem:[#allocation1] sm:$0xff pattern:$0x73625140]  ;;  %v1527_v28 = vld.sshfl [vmem:[#allocation1 + $0x8] sm:$0xff pattern:$0x73625140] }
  0xb2   : > { %v611_v55 = vpop.permute.xlu0 %610  ;;  %1541 = vrot.lane.b32.xlu0 %v1525_v27, %s9808_s8  ;;  %1543 = vrot.lane.b32.xlu1 %v1527_v28, %s9808_s8  ;;  %v876_v4 = vpop.permute.xlu1 %875  ;;  %v1531_v10 = vld.sshfl [vmem:[#allocation1 + $0x18] sm:$0xff pattern:$0x73625140]  ;;  %v1529_v24 = vld.sshfl [vmem:[#allocation1 + $0x10] sm:$0xff pattern:$0x73625140] }
  0xb3   : > { %v618_v57 = vsel %vm333_vm0, %v609_v42, %v611_v55  ;;  %1381 = vrot.lane.b32.xlu2 %v1365_v26, %s9807_s28  ;;  %v892_v15 = vsel %vm891_vm3, %v876_v4, %v878_v9  ;;  %1687 = vst [vmem:[#allocation1] ss:$4 sm:$0xff] %v9879_v0  ;;  %v1698_v47 = vld.sshfl [vmem:[#allocation1 + $0x20] sm:$0xff pattern:$0x73625140]  ;;  %vm5220_vm0 = vcmask 64512  }
  0xb4   : > { %v641_v59 = vsel %vm345_vm1, %v618_v57, 0  ;;  %v903_v14 = vsel %vm345_vm1, %v892_v15, 0  ;;  %v1704_v55 = vld.sshfl [vmem:[#allocation1 + $0x38] sm:$0xff pattern:$0x73625140] }
  0xb5   : > { %v1045_v45 = vpop.permute.xlu2 %1044 }
  0xb8   : > { %9382 = vmatmul.msk.bf16.vlgmr.msra.gmra.mxu0 %vm341_vm2, %v237_v25  ;;  %9383 = vmatmul.msk.bf16.vlgmr.msra.gmra.mxu1 %vm341_vm2, %v237_v25 }
  0xb9   : > { %9384 = vmatmul.msk.bf16.vlgmr.msra.gmra.mxu2 %vm341_vm2, %v237_v25  ;;  %676 = vmatpush.bf16.msra.mxu0 %v629_v48 }
  0xba   : > { %689 = vmatpush.bf16.msra.mxu1 %v632_v49  ;;  %702 = vmatpush.bf16.msra.mxu2 %v635_v50  ;;  %v880_v33 = vpop.permute.xlu0 %879  ;;  %v882_v34 = vpop.permute.xlu1 %881  ;;  %v1694_v32 = vld.sshfl [vmem:[#allocation1 + $0x10] sm:$0xff pattern:$0x73625140]  ;;  %v1692_v36 = vld.sshfl [vmem:[#allocation1 + $0x8] sm:$0xff pattern:$0x73625140] }
  0xbb   : > { %9385 = vmatmul.msk.bf16.vlgmr.msra.gmra.mxu3 %vm341_vm2, %v237_v25  ;;  %1547 = vrot.lane.b32.xlu0 %v1531_v10, %s9808_s8  ;;  %v893_v18 = vsel %vm891_vm3, %v878_v9, %v880_v33  ;;  %v894_v20 = vsel %vm891_vm3, %v880_v33, %v882_v34  ;;  %v895_v13 = vsel %vm891_vm3, %v882_v34, %v884_v12  ;;  %v1700_v50 = vld.sshfl [vmem:[#allocation1 + $0x28] sm:$0xff pattern:$0x73625140]  ;;  %v1696_v52 = vld.sshfl [vmem:[#allocation1 + $0x18] sm:$0xff pattern:$0x73625140] }
  0xbc   : > { %715 = vmatpush.bf16.msra.mxu3 %v638_v51  ;;  %1549 = vrot.lane.b32.xlu1 %v1533_v29, %s9808_s8  ;;  %v906_v21 = vsel %vm345_vm1, %v893_v18, 0  ;;  %v909_v22 = vsel %vm345_vm1, %v894_v20, 0  ;;  %v912_v23 = vsel %vm345_vm1, %v895_v13, 0  ;;  %v10135_v34 = vld [vmem:[%s13170_s1 + $0x74] sm:$0xf] }
  0xbd   : > { %1387 = vrot.lane.b32.xlu2 %v1371_v63, %s9807_s28  ;;  %v1051_v51 = vpop.permute.xlu2 %1050  ;;  %s9829_s28 = smov 35  }
  0xc2   : > { %v888_v30 = vpop.permute.xlu1 %887 }
  0xc3   : > { %1553 = vrot.lane.b32.xlu0 %v1537_v11, %s9808_s8  ;;  %v898_v16 = vsel %vm891_vm3, %v888_v30, %v890_v31 }
  0xc4   : > { %1555 = vrot.lane.b32.xlu1 %v1539_v35, %s9808_s8  ;;  %v921_v44 = vsel %vm345_vm1, %v898_v16, 0  ;;  %v1702_v35 = vld.sshfl [vmem:[#allocation1 + $0x30] sm:$0xff pattern:$0x73625140] }
  0xc5   : > { %1545 = vrot.lane.b32.xlu2 %v1529_v24, %s9808_s8  ;;  %v1209_v28 = vpop.permute.xlu2 %1208  ;;  %1857 = vst [vmem:[#allocation1 + $0x20] ss:$4 sm:$0xff] %v9882_v1 }
  0xc8   : > { %9386 = vmatmul.msk.bf16.vlgmr.msrb.gmra.mxu0 %vm341_vm2, %v237_v25  ;;  %9387 = vmatmul.msk.bf16.vlgmr.msrb.gmra.mxu1 %vm341_vm2, %v237_v25  ;;  %v886_v25 = vpop.permute.xlu0 %885 }
  0xc9   : > { %9388 = vmatmul.msk.bf16.vlgmr.msrb.gmra.mxu2 %vm341_vm2, %v265_v58  ;;  %728 = vmatpush.bf16.msrb.mxu0 %v641_v59  ;;  %v896_v39 = vsel %vm891_vm3, %v884_v12, %v886_v25  ;;  %v897_v40 = vsel %vm891_vm3, %v886_v25, %v888_v30  ;;  %v1690_v59 = vld.sshfl [vmem:[#allocation1] sm:$0xff pattern:$0x73625140] }
  0xca   : > { %768 = vmatpush.bf16.msrb.mxu1 %v747_v60  ;;  %781 = vmatpush.bf16.msrb.mxu2 %v749_v61  ;;  %v1043_v37 = vpop.permute.xlu1 %1042  ;;  %v915_v42 = vsel %vm345_vm1, %v896_v39, 0  ;;  %v918_v43 = vsel %vm345_vm1, %v897_v40, 0  ;;  %1854 = vst [vmem:[#allocation1] ss:$4 sm:$0xff] %v9879_v0 }
  0xcb   : > { %9389 = vmatmul.msk.bf16.vlgmr.msrb.gmra.mxu3 %vm341_vm2, %v265_v58  ;;  %1708 = vrot.lane.b32.xlu0 %v1692_v36, %s9808_s8  ;;  %v1057_v53 = vsel %vm891_vm3, %v1043_v37, %v1045_v45 }
  0xcc   : > { %794 = vmatpush.bf16.msrb.mxu3 %v751_v62  ;;  %1710 = vrot.lane.b32.xlu1 %v1694_v32, %s9808_s8  ;;  %v1070_v60 = vsel %vm345_vm1, %v1057_v53, 0  ;;  %v1870_v25 = vld.sshfl [vmem:[#allocation1 + $0x30] sm:$0xff pattern:$0x73625140] }
  0xcd   : > { %1551 = vrot.lane.b32.xlu2 %v1535_v41, %s9808_s8  ;;  %v1215_v15 = vpop.permute.xlu2 %1214 }
  0xd0   : > { %v1041_v38 = vpop.permute.xlu0 %1040 }
  0xd1   : > { %v1056_v17 = vsel %vm891_vm3, %v1041_v38, %v1043_v37  ;;  %v1858_v26 = vld.sshfl [vmem:[#allocation1] sm:$0xff pattern:$0x73625140]  ;;  %v1862_v27 = vld.sshfl [vmem:[#allocation1 + $0x10] sm:$0xff pattern:$0x73625140] }
  0xd2   : > { %v1067_v46 = vsel %vm345_vm1, %v1056_v17, 0  ;;  %v1049_v49 = vpop.permute.xlu1 %1048  ;;  %v1860_v30 = vld.sshfl [vmem:[#allocation1 + $0x8] sm:$0xff pattern:$0x73625140] }
  0xd3   : > { %1714 = vrot.lane.b32.xlu0 %v1698_v47, %s9808_s8 }
  0xd4   : > { %1716 = vrot.lane.b32.xlu1 %v1700_v50, %s9808_s8 }
  0xd5   : > { %1706 = vrot.lane.b32.xlu2 %v1690_v59, %s9808_s8 }
  0xd8   : > { %9390 = vmatmul.msk.bf16.vlgmr.msra.gmra.mxu0 %vm341_vm2, %v265_v58  ;;  %9391 = vmatmul.msk.bf16.vlgmr.msra.gmra.mxu1 %vm341_vm2, %v265_v58  ;;  %v1047_v48 = vpop.permute.xlu0 %1046 }
  0xd9   : > { %9392 = vmatmul.msk.bf16.vlgmr.msra.gmra.mxu2 %vm341_vm2, %v265_v58  ;;  %807 = vmatpush.bf16.msra.mxu0 %v753_v5  ;;  %v1058_v54 = vsel %vm891_vm3, %v1045_v45, %v1047_v48  ;;  %v1059_v57 = vsel %vm891_vm3, %v1047_v48, %v1049_v49  ;;  %v1872_v48 = vld.sshfl [vmem:[#allocation1 + $0x38] sm:$0xff pattern:$0x73625140] }
  0xda   : > { %820 = vmatpush.bf16.msra.mxu1 %v755_v6  ;;  %833 = vmatpush.bf16.msra.mxu2 %v757_v7  ;;  %v1073_v61 = vsel %vm345_vm1, %v1058_v54, 0  ;;  %v1076_v62 = vsel %vm345_vm1, %v1059_v57, 0  ;;  %v1055_v3 = vpop.permute.xlu1 %1054  ;;  %v1864_v6 = vld.sshfl [vmem:[#allocation1 + $0x18] sm:$0xff pattern:$0x73625140] }
  0xdb   : > { %9393 = vmatmul.msk.bf16.vlgmr.msra.gmra.mxu3 %vm341_vm2, %v265_v58  ;;  %1720 = vrot.lane.b32.xlu0 %v1704_v55, %s9808_s8  ;;  %2020 = vst [vmem:[#allocation1] ss:$4 sm:$0xff] %v9879_v0  ;;  %v1866_v54 = vld.sshfl [vmem:[#allocation1 + $0x20] sm:$0xff pattern:$0x73625140] }
  0xdc   : > { %846 = vmatpush.bf16.msra.mxu3 %v759_v8  ;;  %1874 = vrot.lane.b32.xlu1 %v1858_v26, %s9809_s13 }
  0xdd   : > { %1712 = vrot.lane.b32.xlu2 %v1696_v52, %s9808_s8 }
  0xe0   : > { %v1053_v63 = vpop.permute.xlu0 %1052 }
  0xe1   : > { %v1061_v7 = vsel %vm891_vm3, %v1051_v51, %v1053_v63  ;;  %v1062_v8 = vsel %vm891_vm3, %v1053_v63, %v1055_v3 }
  0xe2   : > { %v1213_v4 = vpop.permute.xlu1 %1212  ;;  %v1082_v11 = vsel %vm345_vm1, %v1061_v7, 0  ;;  %v1085_v12 = vsel %vm345_vm1, %v1062_v8, 0  ;;  %v2025_v47 = vld.sshfl [vmem:[#allocation1 + $0x8] sm:$0xff pattern:$0x73625140] }
  0xe3   : > { %1878 = vrot.lane.b32.xlu0 %v1862_v27, %s9809_s13  ;;  %v1227_v37 = vsel %vm1224_vm4, %v1213_v4, %v1215_v15 }
  0xe4   : > { %1880 = vrot.lane.b32.xlu1 %v1864_v6, %s9809_s13  ;;  %v1242_v41 = vsel %vm345_vm1, %v1227_v37, 0 }
  0xe5   : > { %1718 = vrot.lane.b32.xlu2 %v1702_v35, %s9808_s8 }
  0xe8   : > { %9394 = vmatmul.msk.bf16.vlgmr.msrb.gmra.mxu0 %vm341_vm2, %v265_v58  ;;  %9395 = vmatmul.msk.bf16.vlgmr.msrb.gmra.mxu1 %vm341_vm2, %v264_v19  ;;  %v1060_v58 = vsel %vm891_vm3, %v1049_v49, %v1051_v51  ;;  %v1211_v5 = vpop.permute.xlu0 %1210  ;;  %vm5553_vm3 = vcmask 56320  }
  0xe9   : > { %9396 = vmatmul.msk.bf16.vlgmr.msrb.gmra.mxu2 %vm341_vm2, %v264_v19  ;;  %930 = vmatpush.bf16.msrb.mxu0 %v903_v14  ;;  %v1079_v2 = vsel %vm345_vm1, %v1060_v58, 0  ;;  %v1225_v29 = vsel %vm1224_vm4, %v1209_v28, %v1211_v5  ;;  %v1226_v33 = vsel %vm1224_vm4, %v1211_v5, %v1213_v4  ;;  %v10200_v4 = vld [vmem:[%s13170_s1 + $0xc] sm:$0xf] }
  0xea   : > { %943 = vmatpush.bf16.msrb.mxu1 %v906_v21  ;;  %956 = vmatpush.bf16.msrb.mxu2 %v909_v22  ;;  %v1236_v18 = vsel %vm345_vm1, %v1225_v29, 0  ;;  %v1219_v24 = vpop.permute.xlu1 %1218 }
  0xeb   : > { %9397 = vmatmul.msk.bf16.vlgmr.msrb.gmra.mxu3 %vm341_vm2, %v264_v19 }
  0xec   : > { %969 = vmatpush.bf16.msrb.mxu3 %v912_v23  ;;  %v1868_v23 = vld.sshfl [vmem:[#allocation1 + $0x28] sm:$0xff pattern:$0x73625140]  ;;  %1886 = vrot.lane.b32.xlu1 %v1870_v25, %s9809_s13 }
  0xed   : > { %1884 = vrot.lane.b32.xlu0 %v1868_v23, %s9809_s13  ;;  %1876 = vrot.lane.b32.xlu2 %v1860_v30, %s9809_s13  ;;  %2022 = vst [vmem:[#allocation1 + $0x20] ss:$4 sm:$0xff] %v9882_v1 }
  0xf0   : > { %v1217_v22 = vpop.permute.xlu0 %1216 }
  0xf1   : > { %v1221_v31 = vpop.permute.xlu2 %1220  ;;  %v1228_v38 = vsel %vm1224_vm4, %v1215_v15, %v1217_v22  ;;  %v1229_v16 = vsel %vm1224_vm4, %v1217_v22, %v1219_v24 }
  0xf2   : > { %v1230_v17 = vsel %vm1224_vm4, %v1219_v24, %v1221_v31  ;;  %v1248_v0 = vsel %vm345_vm1, %v1229_v16, 0 }
  0xf4   : > { %2041 = vrot.lane.b32.xlu1 %v2025_v47, %s9809_s13  ;;  %v2031_v27 = vld.sshfl [vmem:[#allocation1 + $0x20] sm:$0xff pattern:$0x73625140]  ;;  %v2037_v35 = vld.sshfl [vmem:[#allocation1 + $0x38] sm:$0xff pattern:$0x73625140] }
  0xf5   : > { %1882 = vrot.lane.b32.xlu2 %v1866_v54, %s9809_s13 }
  0xf8   : > { %9398 = vmatmul.msk.bf16.vlgmr.msra.gmra.mxu0 %vm341_vm2, %v264_v19  ;;  %9399 = vmatmul.msk.bf16.vlgmr.msra.gmra.mxu1 %vm341_vm2, %v264_v19 }
  0xf9   : > { %9400 = vmatmul.msk.bf16.vlgmr.msra.gmra.mxu2 %vm341_vm2, %v264_v19  ;;  %982 = vmatpush.bf16.msra.mxu0 %v915_v42  ;;  %v1245_v42 = vsel %vm345_vm1, %v1228_v38, 0 }
  0xfa   : > { %995 = vmatpush.bf16.msra.mxu1 %v918_v43  ;;  %1008 = vmatpush.bf16.msra.mxu2 %v921_v44  ;;  %v1223_v43 = vpop.permute.xlu0 %1222  ;;  %v1251_v44 = vsel %vm345_vm1, %v1230_v17, 0 }
  0xfb   : > { %9401 = vmatmul.msk.bf16.vlgmr.msra.gmra.mxu3 %vm341_vm2, %v264_v19  ;;  %v1239_v19 = vsel %vm345_vm1, %v1226_v33, 0 }
  0xfc   : > { %1094 = vmatpush.bf16.msra.mxu3 %v1067_v46  ;;  %v2023_v46 = vld.sshfl [vmem:[#allocation1] sm:$0xff pattern:$0x73625140]  ;;  %2047 = vrot.lane.b32.xlu1 %v2031_v27, %s9809_s13 }
  0xfd   : > { %2039 = vrot.lane.b32.xlu0 %v2023_v46, %s9809_s13  ;;  %1888 = vrot.lane.b32.xlu2 %v1872_v48, %s9809_s13 }
 0x102   : > { %v1378_v57 = vpop.permute.xlu0 %1377 }
 0x104   : > { %2053 = vrot.lane.b32.xlu1 %v2037_v35, %s9809_s13 }
 0x105   : > { %v1376_v55 = vpop.permute.xlu2 %1375 }
 0x106   : > { %v1374_v45 = vpop.permute.xlu1 %1373  ;;  %v1390_v3 = vsel %vm1224_vm4, %v1376_v55, %v1378_v57 }
 0x107   : > { %v1403_v7 = vsel %vm345_vm1, %v1390_v3, 0 }
 0x108   : > { %9402 = vmatmul.msk.bf16.vlgmr.msrb.gmra.mxu0 %vm341_vm2, %v239_v56  ;;  %9403 = vmatmul.msk.bf16.vlgmr.msrb.gmra.mxu1 %vm341_vm2, %v239_v56 }
 0x109   : > { %9404 = vmatmul.msk.bf16.vlgmr.msrb.gmra.mxu2 %vm341_vm2, %v239_v56  ;;  %1107 = vmatpush.bf16.msrb.mxu0 %v1070_v60 }
 0x10a   : > { %1120 = vmatpush.bf16.msrb.mxu1 %v1073_v61  ;;  %1133 = vmatpush.bf16.msrb.mxu2 %v1076_v62  ;;  %v1231_v61 = vsel %vm1224_vm4, %v1221_v31, %v1223_v43  ;;  %v1389_v62 = vsel %vm1224_vm4, %v1374_v45, %v1376_v55  ;;  %v2033_v31 = vld.sshfl [vmem:[#allocation1 + $0x28] sm:$0xff pattern:$0x73625140] }
 0x10b   : > { %9405 = vmatmul.msk.bf16.vlgmr.msrb.gmra.mxu3 %vm341_vm2, %v239_v56  ;;  %v1254_v5 = vsel %vm345_vm1, %v1231_v61, 0  ;;  %v1400_v6 = vsel %vm345_vm1, %v1389_v62, 0  ;;  %v267_v62 = vld [vmem:[%s13170_s1 + $0x78] sm:$0xf] }
 0x10c   : > { %1146 = vmatpush.bf16.msrb.mxu3 %v1079_v2 }
 0x10d   : > { %v1382_v8 = vpop.permute.xlu2 %1381 }
 0x10e   : > { %v1380_v58 = vpop.permute.xlu1 %1379 }
 0x10f   : > { %v1391_v26 = vsel %vm1224_vm4, %v1378_v57, %v1380_v58 }
 0x111   : > { %v1384_v29 = vpop.permute.xlu0 %1383 }
 0x112   : > { %v1393_v24 = vsel %vm1224_vm4, %v1382_v8, %v1384_v29 }
 0x113   : > { %v1412_v16 = vsel %vm345_vm1, %v1393_v24, 0 }
 0x115   : > { %v10126_v9 = vpop.f32.mrf.mxu0  ;;  %v10128_v10 = vpop.f32.mrf.mxu1 }
 0x118   : > { %9406 = vmatmul.msk.bf16.vlgmr.msra.gmra.mxu0 %vm341_vm2, %v239_v56  ;;  %9407 = vmatmul.msk.bf16.vlgmr.msra.gmra.mxu1 %vm341_vm2, %v239_v56 }
 0x119   : > { %9408 = vmatmul.msk.bf16.vlgmr.msra.gmra.mxu2 %vm341_vm2, %v239_v56  ;;  %1159 = vmatpush.bf16.msra.mxu0 %v1082_v11  ;;  %v2029_v56 = vld.sshfl [vmem:[#allocation1 + $0x18] sm:$0xff pattern:$0x73625140] }
 0x11a   : > { %1172 = vmatpush.bf16.msra.mxu1 %v1085_v12  ;;  %1263 = vmatpush.bf16.msra.mxu2 %v1236_v18 }
 0x11b   : > { %9409 = vmatmul.msk.bf16.vlgmr.msra.gmra.mxu3 %vm341_vm2, %v10135_v34  ;;  %2045 = vrot.lane.b32.xlu0 %v2029_v56, %s9809_s13 }
 0x11c   : > { %1276 = vmatpush.bf16.msra.mxu3 %v1239_v19  ;;  %v10149_v20 = vpop.f32.mrf.mxu2  ;;  %v2027_v19 = vld.sshfl [vmem:[#allocation1 + $0x10] sm:$0xff pattern:$0x73625140] }
 0x11d   : > { %v378_v14 = vpop.f32.mrf.mxu0  ;;  %v391_v21 = vpop.f32.mrf.mxu1  ;;  %2043 = vrot.lane.b32.xlu2 %v2027_v19, %s9809_s13 }
 0x11e   : > { %v10151_v13 = vpop.f32.mrf.mxu3  ;;  %v10226_v14 = vld [vmem:[%s9876_s23] sm:$0xff]  ;;  %v1388_v21 = vpop.permute.xlu2 %1387 }
 0x11f   : > { %2187 = vst [vmem:[#allocation1] ss:$4 sm:$0xff] %v10226_v14 }
 0x124   : > { %v404_v32 = vpop.f32.mrf.mxu2  ;;  %v1542_v17 = vpop.permute.xlu0 %1541 }
 0x125   : > { %v10159_v39 = vpop.f32.mrf.mxu0  ;;  %v10161_v40 = vpop.f32.mrf.mxu1  ;;  %2049 = vrot.lane.b32.xlu2 %v2033_v31, %s9809_s13 }
 0x126   : > { %v417_v36 = vpop.f32.mrf.mxu3  ;;  %v2195_v43 = vld.sshfl [vmem:[#allocation1 + $0x10] sm:$0xff pattern:$0x73625140]  ;;  %v2197_v3 = vld.sshfl [vmem:[#allocation1 + $0x18] sm:$0xff pattern:$0x73625140] }
 0x127   : > { %2211 = vrot.lane.b32.xlu1 %v2195_v43, %s9810_s20 }
 0x128   : > { %9410 = vmatmul.msk.bf16.vlgmr.msrb.gmra.mxu0 %vm341_vm2, %v10135_v34  ;;  %9411 = vmatmul.msk.bf16.vlgmr.msrb.gmra.mxu1 %vm341_vm2, %v10135_v34 }
 0x129   : > { %9412 = vmatmul.msk.bf16.vlgmr.msrb.gmra.mxu2 %vm341_vm2, %v10135_v34  ;;  %1289 = vmatpush.bf16.msrb.mxu0 %v1242_v41 }
 0x12a   : > { %1302 = vmatpush.bf16.msrb.mxu1 %v1245_v42  ;;  %1315 = vmatpush.bf16.msrb.mxu2 %v1248_v0  ;;  %v2193_v42 = vld.sshfl [vmem:[#allocation1 + $0x8] sm:$0xff pattern:$0x73625140] }
 0x12b   : > { %9413 = vmatmul.msk.bf16.vlgmr.msrb.gmra.mxu3 %vm341_vm2, %v10135_v34 }
 0x12c   : > { %1328 = vmatpush.bf16.msrb.mxu3 %v1251_v44  ;;  %v10177_v49 = vpop.f32.mrf.mxu2  ;;  %v10253_v44 = vld [vmem:[%s9876_s23 + $0x8] sm:$0xff] }
 0x12d   : > { %v430_v52 = vpop.f32.mrf.mxu0  ;;  %v443_v53 = vpop.f32.mrf.mxu1 }
 0x12e   : > { %v495_v50 = vpop.f32.mrf.mxu3 }
 0x12f   : > { %v10182_v51 = vadd.f32 %v495_v50, %v10126_v9  ;;  %v1406_v9 = vsel %vm345_vm1, %v1391_v26, 0  ;;  %v1548_v50 = vpop.permute.xlu0 %1547 }
 0x134   : > { %v456_v59 = vpop.f32.mrf.mxu2 }
 0x135   : > { %v508_v63 = vpop.f32.mrf.mxu0  ;;  %v521_v2 = vpop.f32.mrf.mxu1 }
 0x136   : > { %v497_v60 = vpop.f32.mrf.mxu3  ;;  %v10192_v1 = vadd.f32 %v508_v63, %v10128_v10  ;;  %v10195_v28 = vadd.f32 %v521_v2, %v10149_v20  ;;  %v2035_v10 = vld.sshfl [vmem:[#allocation1 + $0x30] sm:$0xff pattern:$0x73625140]  ;;  %v1386_v20 = vpop.permute.xlu1 %1385 }
 0x137   : > { %2051 = vrot.lane.b32.xlu0 %v2035_v10, %s9809_s13  ;;  %v1394_v32 = vsel %vm1224_vm4, %v1384_v29, %v1386_v20  ;;  %v1395_v36 = vsel %vm1224_vm4, %v1386_v20, %v1388_v21  ;;  %2190 = vst [vmem:[#allocation1 + $0x20] ss:$4 sm:$0xff] %v10253_v44  ;;  %v1554_v10 = vpop.permute.xlu0 %1553 }
 0x138   : > { %9414 = vmatmul.msk.bf16.vlgmr.msra.gmra.mxu0 %vm341_vm2, %v10135_v34  ;;  %9415 = vmatmul.msk.bf16.vlgmr.msra.gmra.mxu1 %vm341_vm2, %v10135_v34  ;;  %v1415_v41 = vsel %vm345_vm1, %v1394_v32, 0 }
 0x139   : > { %9416 = vmatmul.msk.bf16.vlgmr.msra.gmra.mxu2 %vm341_vm2, %v10200_v4  ;;  %1341 = vmatpush.bf16.msra.mxu0 %v1254_v5 }
 0x13a   : > { %1427 = vmatpush.bf16.msra.mxu1 %v1400_v6  ;;  %1440 = vmatpush.bf16.msra.mxu2 %v1403_v7 }
 0x13b   : > { %9417 = vmatmul.msk.bf16.vlgmr.msra.gmra.mxu3 %vm341_vm2, %v10200_v4 }
 0x13c   : > { %1453 = vmatpush.bf16.msra.mxu3 %v1406_v9  ;;  %v534_v33 = vpop.f32.mrf.mxu2 }
 0x13d   : > { %v10218_v11 = vadd.f32 %v534_v33, %v10151_v13  ;;  %v510_v15 = vpop.f32.mrf.mxu0  ;;  %v523_v18 = vpop.f32.mrf.mxu1  ;;  %v1392_v13 = vsel %vm1224_vm4, %v1380_v58, %v1382_v8  ;;  %v2191_v8 = vld.sshfl [vmem:[#allocation1] sm:$0xff pattern:$0x73625140]  ;;  %vm5886_vm4 = vcmask 48128  }
 0x13e   : > { %v547_v34 = vpop.f32.mrf.mxu3  ;;  %v1544_v0 = vpop.permute.xlu1 %1543  ;;  %v2199_v52 = vld.sshfl [vmem:[#allocation1 + $0x20] sm:$0xff pattern:$0x73625140]  ;;  %v2201_v54 = vld.sshfl [vmem:[#allocation1 + $0x28] sm:$0xff pattern:$0x73625140]  ;;  %2207 = vrot.lane.b32.xlu2 %v2191_v8, %s9810_s20 }
 0x13f   : > { %v10221_v12 = vadd.f32 %v547_v34, %v10159_v39  ;;  %v1409_v39 = vsel %vm345_vm1, %v1392_v13, 0  ;;  %2209 = vrot.lane.b32.xlu0 %v2193_v42, %s9810_s20  ;;  %v1558_v57 = vsel %vm1557_vm5, %v1542_v17, %v1544_v0  ;;  %v10264_v59 = vld.sshfl [vmem:[#allocation1 + $0x30] sm:$0xff pattern:$0x73625140]  ;;  %2217 = vrot.lane.b32.xlu1 %v2201_v54, %s9810_s20  ;;  %2353 = vst [vmem:[#allocation1] ss:$4 sm:$0xff] %v10226_v14  ;;  %v1709_v31 = vpop.permute.xlu0 %1708 }
 0x140   : > { %v2205_v26 = vld.sshfl [vmem:[#allocation1 + $0x38] sm:$0xff pattern:$0x73625140]  ;;  %v1569_v27 = vsel %vm345_vm1, %v1558_v57, 0 }
 0x141   : > { %2355 = vst [vmem:[#allocation1 + $0x20] ss:$4 sm:$0xff] %v10253_v44 }
 0x144   : > { %v536_v22 = vpop.f32.mrf.mxu2 }
 0x145   : > { %v560_v25 = vpop.f32.mrf.mxu0  ;;  %v573_v30 = vpop.f32.mrf.mxu1 }
 0x146   : > { %v549_v23 = vpop.f32.mrf.mxu3  ;;  %v10234_v37 = vadd.f32 %v560_v25, %v10161_v40  ;;  %v10237_v38 = vadd.f32 %v573_v30, %v10177_v49  ;;  %v1418_v40 = vsel %vm345_vm1, %v1395_v36, 0  ;;  %v1546_v49 = vpop.permute.xlu2 %1545  ;;  %v2356_v15 = vld.sshfl [vmem:[#allocation1] sm:$0xff pattern:$0x73625140]  ;;  %2213 = vrot.lane.b32.xlu2 %v2197_v3, %s9810_s20 }
 0x147   : > { %v1550_v53 = vpop.permute.xlu1 %1549  ;;  %v1559_v58 = vsel %vm1557_vm5, %v1544_v0, %v1546_v49  ;;  %2215 = vrot.lane.b32.xlu0 %v2199_v52, %s9810_s20  ;;  %v1560_v63 = vsel %vm1557_vm5, %v1546_v49, %v1548_v50  ;;  %v2360_v18 = vld.sshfl [vmem:[#allocation1 + $0x10] sm:$0xff pattern:$0x73625140]  ;;  %2372 = vrot.lane.b32.xlu1 %v2356_v15, %s9810_s20  ;;  %v1715_v52 = vpop.permute.xlu0 %1714 }
 0x148   : > { %9418 = vmatmul.msk.bf16.vlgmr.msrb.gmra.mxu0 %vm341_vm2, %v10200_v4  ;;  %9419 = vmatmul.msk.bf16.vlgmr.msrb.gmra.mxu1 %vm341_vm2, %v10200_v4  ;;  %v1561_v2 = vsel %vm1557_vm5, %v1548_v50, %v1550_v53  ;;  %v1572_v5 = vsel %vm345_vm1, %v1559_v58, 0  ;;  %v1575_v6 = vsel %vm345_vm1, %v1560_v63, 0  ;;  %v2366_v49 = vld.sshfl [vmem:[#allocation1 + $0x28] sm:$0xff pattern:$0x73625140] }
 0x149   : > { %9420 = vmatmul.msk.bf16.vlgmr.msrb.gmra.mxu2 %vm341_vm2, %v10200_v4  ;;  %1466 = vmatpush.bf16.msrb.mxu0 %v1409_v39  ;;  %v1578_v7 = vsel %vm345_vm1, %v1561_v2, 0 }
 0x14a   : > { %1479 = vmatpush.bf16.msrb.mxu1 %v1412_v16  ;;  %1492 = vmatpush.bf16.msrb.mxu2 %v1415_v41 }
 0x14b   : > { %9421 = vmatmul.msk.bf16.vlgmr.msrb.gmra.mxu3 %vm341_vm2, %v10200_v4 }
 0x14c   : > { %1505 = vmatpush.bf16.msrb.mxu3 %v1418_v40  ;;  %v10256_v45 = vpop.f32.mrf.mxu2  ;;  %v2362_v40 = vld.sshfl [vmem:[#allocation1 + $0x18] sm:$0xff pattern:$0x73625140] }
 0x14d   : > { %v562_v47 = vpop.f32.mrf.mxu0  ;;  %v575_v48 = vpop.f32.mrf.mxu1 }
 0x14e   : > { %v10258_v46 = vpop.f32.mrf.mxu3  ;;  %v1552_v9 = vpop.permute.xlu2 %1551  ;;  %2219 = vrot.lane.b32.xlu2 %v10264_v59, %s9810_s20 }
 0x14f   : > { %2221 = vrot.lane.b32.xlu0 %v2205_v26, %s9810_s20  ;;  %v1556_v35 = vpop.permute.xlu1 %1555  ;;  %v1562_v22 = vsel %vm1557_vm5, %v1550_v53, %v1552_v9  ;;  %v1563_v23 = vsel %vm1557_vm5, %v1552_v9, %v1554_v10  ;;  %2378 = vrot.lane.b32.xlu1 %v2362_v40, %s9810_s20  ;;  %v2368_v53 = vld.sshfl [vmem:[#allocation1 + $0x30] sm:$0xff pattern:$0x73625140]  ;;  %v2358_v26 = vld.sshfl [vmem:[#allocation1 + $0x8] sm:$0xff pattern:$0x73625140]  ;;  %v1721_v8 = vpop.permute.xlu0 %1720 }
 0x150   : > { %v1564_v25 = vsel %vm1557_vm5, %v1554_v10, %v1556_v35  ;;  %v1581_v32 = vsel %vm345_vm1, %v1562_v22, 0  ;;  %v1584_v36 = vsel %vm345_vm1, %v1563_v23, 0  ;;  %2520 = vst [vmem:[#allocation1] ss:$4 sm:$0xff] %v10226_v14  ;;  %v10374_v40 = vld [vmem:[%s13170_s1 + $0x7c] sm:$0xf] }
 0x151   : > { %v1587_v16 = vsel %vm345_vm1, %v1564_v25, 0 }
 0x154   : > { %v654_v55 = vpop.f32.mrf.mxu2 }
 0x155   : > { %v10268_v60 = vpop.f32.mrf.mxu0  ;;  %v10270_v61 = vpop.f32.mrf.mxu1 }
 0x156   : > { %v667_v56 = vpop.f32.mrf.mxu3  ;;  %v1707_v19 = vpop.permute.xlu2 %1706  ;;  %2374 = vrot.lane.b32.xlu2 %v2358_v26, %s9810_s20 }
 0x157   : > { %2376 = vrot.lane.b32.xlu0 %v2360_v18, %s9810_s20  ;;  %v1722_v39 = vsel %vm1557_vm5, %v1707_v19, %v1709_v31  ;;  %v1711_v17 = vpop.permute.xlu1 %1710  ;;  %2384 = vrot.lane.b32.xlu1 %v2368_v53, %s9810_s20  ;;  %v2364_v18 = vld.sshfl [vmem:[#allocation1 + $0x20] sm:$0xff pattern:$0x73625140]  ;;  %v2528_v26 = vld.sshfl [vmem:[#allocation1 + $0x10] sm:$0xff pattern:$0x73625140] }
 0x158   : > { %9422 = vmatmul.msk.bf16.vlgmr.msra.gmra.mxu0 %vm341_vm2, %v10200_v4  ;;  %9423 = vmatmul.msk.bf16.vlgmr.msra.gmra.mxu1 %vm341_vm2, %v267_v62  ;;  %v1733_v41 = vsel %vm345_vm1, %v1722_v39, 0  ;;  %v1723_v57 = vsel %vm1557_vm5, %v1709_v31, %v1711_v17  ;;  %v2524_v19 = vld.sshfl [vmem:[#allocation1] sm:$0xff pattern:$0x73625140] }
 0x159   : > { %9424 = vmatmul.msk.bf16.vlgmr.msra.gmra.mxu2 %vm341_vm2, %v267_v62  ;;  %1596 = vmatpush.bf16.msra.mxu0 %v1569_v27  ;;  %v1736_v27 = vsel %vm345_vm1, %v1723_v57, 0  ;;  %v2530_v31 = vld.sshfl [vmem:[#allocation1 + $0x18] sm:$0xff pattern:$0x73625140] }
 0x15a   : > { %1609 = vmatpush.bf16.msra.mxu1 %v1572_v5  ;;  %1622 = vmatpush.bf16.msra.mxu2 %v1575_v6 }
 0x15b   : > { %9425 = vmatmul.msk.bf16.vlgmr.msra.gmra.mxu3 %vm341_vm2, %v267_v62 }
 0x15c   : > { %1635 = vmatpush.bf16.msra.mxu3 %v1578_v7  ;;  %v704_v4 = vpop.f32.mrf.mxu2 }
 0x15d   : > { %v680_v33 = vpop.f32.mrf.mxu0  ;;  %v693_v34 = vpop.f32.mrf.mxu1 }
 0x15e   : > { %v10288_v29 = vpop.f32.mrf.mxu3  ;;  %v1713_v50 = vpop.permute.xlu2 %1712  ;;  %2380 = vrot.lane.b32.xlu2 %v2364_v18, %s9810_s20 }
 0x15f   : > { %2382 = vrot.lane.b32.xlu0 %v2366_v49, %s9810_s20  ;;  %v1717_v54 = vpop.permute.xlu1 %1716  ;;  %v1724_v58 = vsel %vm1557_vm5, %v1711_v17, %v1713_v50 }
 0x160   : > { %v1726_v63 = vsel %vm1557_vm5, %v1715_v52, %v1717_v54  ;;  %v1739_v5 = vsel %vm345_vm1, %v1724_v58, 0 }
 0x161   : > { %v1745_v7 = vsel %vm345_vm1, %v1726_v63, 0 }
 0x164   : > { %v706_v20 = vpop.f32.mrf.mxu2 }
 0x165   : > { %v10297_v13 = vpop.f32.mrf.mxu0  ;;  %v770_v24 = vpop.f32.mrf.mxu1  ;;  %v2526_v20 = vld.sshfl [vmem:[#allocation1 + $0x8] sm:$0xff pattern:$0x73625140] }
 0x166   : > { %v719_v21 = vpop.f32.mrf.mxu3  ;;  %v10301_v30 = vadd.f32 %v770_v24, %v10256_v45  ;;  %v1719_v6 = vpop.permute.xlu2 %1718  ;;  %2542 = vrot.lane.b32.xlu1 %v2526_v20, %s9811_s26  ;;  %2686 = vst [vmem:[#allocation1] ss:$4 sm:$0xff] %v10226_v14 }
 0x167   : > { %2540 = vrot.lane.b32.xlu0 %v2524_v19, %s9811_s26  ;;  %v1875_v21 = vpop.permute.xlu1 %1874  ;;  %v1727_v24 = vsel %vm1557_vm5, %v1717_v54, %v1719_v6  ;;  %v1728_v25 = vsel %vm1557_vm5, %v1719_v6, %v1721_v8 }
 0x168   : > { %9426 = vmatmul.msk.bf16.vlgmr.msrb.gmra.mxu0 %vm341_vm2, %v267_v62  ;;  %9427 = vmatmul.msk.bf16.vlgmr.msrb.gmra.mxu1 %vm341_vm2, %v267_v62 }
 0x169   : > { %9428 = vmatmul.msk.bf16.vlgmr.msrb.gmra.mxu2 %vm341_vm2, %v267_v62  ;;  %1648 = vmatpush.bf16.msrb.mxu0 %v1581_v32 }
 0x16a   : > { %1661 = vmatpush.bf16.msrb.mxu1 %v1584_v36  ;;  %1674 = vmatpush.bf16.msrb.mxu2 %v1587_v16 }
 0x16b   : > { %9429 = vmatmul.msk.bf16.vlgmr.msrb.gmra.mxu3 %vm341_vm2, %v267_v62  ;;  %v1725_v62 = vsel %vm1557_vm5, %v1713_v50, %v1715_v52  ;;  %vm6219_vm5 = vcmask 457728  }
 0x16c   : > { %1760 = vmatpush.bf16.msrb.mxu3 %v1733_v41  ;;  %v783_v42 = vpop.f32.mrf.mxu2 }
 0x16d   : > { %v10316_v43 = vadd.f32 %v783_v42, %v10258_v46  ;;  %v732_v47 = vpop.f32.mrf.mxu0  ;;  %v772_v48 = vpop.f32.mrf.mxu1  ;;  %v2691_v18 = vld.sshfl [vmem:[#allocation1 + $0x8] sm:$0xff pattern:$0x73625140] }
 0x16e   : > { %v796_v0 = vpop.f32.mrf.mxu3  ;;  %v1877_v22 = vpop.permute.xlu2 %1876  ;;  %v1751_v47 = vsel %vm345_vm1, %v1728_v25, 0 }
 0x16f   : > { %v10319_v45 = vadd.f32 %v796_v0, %v10268_v60  ;;  %v10328_v60 = vld [vmem:[%s13170_s1 + $0x10] sm:$0xf]  ;;  %v1891_v39 = vsel %vm1890_vm6, %v1875_v21, %v1877_v22  ;;  %v1748_v0 = vsel %vm345_vm1, %v1727_v24, 0  ;;  %2546 = vrot.lane.b32.xlu0 %v2530_v31, %s9811_s26 }
 0x174   : > { %v785_v55 = vpop.f32.mrf.mxu2 }
 0x175   : > { %v809_v46 = vpop.f32.mrf.mxu0  ;;  %v822_v59 = vpop.f32.mrf.mxu1 }
 0x176   : > { %v798_v56 = vpop.f32.mrf.mxu3  ;;  %v10333_v2 = vadd.f32 %v809_v46, %v10270_v61  ;;  %v10335_v3 = vadd.f32 %v822_v59, %v704_v4  ;;  %v1742_v61 = vsel %vm345_vm1, %v1725_v62, 0  ;;  %v2370_v4 = vld.sshfl [vmem:[#allocation1 + $0x38] sm:$0xff pattern:$0x73625140]  ;;  %v1883_v58 = vpop.permute.xlu2 %1882 }
 0x177   : > { %2523 = vst [vmem:[#allocation1 + $0x20] ss:$4 sm:$0xff] %v10253_v44  ;;  %2386 = vrot.lane.b32.xlu2 %v2370_v4, %s9810_s20 }
 0x178   : > { %9430 = vmatmul.msk.bf16.vlgmr.msra.gmra.mxu0 %vm341_vm2, %v10328_v60  ;;  %9431 = vmatmul.msk.bf16.vlgmr.msra.gmra.mxu1 %vm341_vm2, %v10328_v60 }
 0x179   : > { %9432 = vmatmul.msk.bf16.vlgmr.msra.gmra.mxu2 %vm341_vm2, %v10328_v60  ;;  %1773 = vmatpush.bf16.msra.mxu0 %v1736_v27 }
 0x17a   : > { %1786 = vmatpush.bf16.msra.mxu1 %v1739_v5  ;;  %1799 = vmatpush.bf16.msra.mxu2 %v1742_v61 }
 0x17b   : > { %9433 = vmatmul.msk.bf16.vlgmr.msra.gmra.mxu3 %vm341_vm2, %v10328_v60 }
 0x17c   : > { %1812 = vmatpush.bf16.msra.mxu3 %v1745_v7  ;;  %v835_v9 = vpop.f32.mrf.mxu2 }
 0x17d   : > { %v10352_v33 = vadd.f32 %v835_v9, %v10288_v29  ;;  %v811_v35 = vpop.f32.mrf.mxu0  ;;  %v824_v15 = vpop.f32.mrf.mxu1 }
 0x17e   : > { %v848_v10 = vpop.f32.mrf.mxu3  ;;  %v1879_v29 = vpop.permute.xlu0 %1878  ;;  %v2532_v42 = vld.sshfl [vmem:[#allocation1 + $0x20] sm:$0xff pattern:$0x73625140]  ;;  %v2534_v52 = vld.sshfl [vmem:[#allocation1 + $0x28] sm:$0xff pattern:$0x73625140] }
 0x17f   : > { %v10355_v34 = vadd.f32 %v848_v10, %v10297_v13  ;;  %v1892_v16 = vsel %vm1890_vm6, %v1877_v22, %v1879_v29  ;;  %2548 = vrot.lane.b32.xlu1 %v2532_v42, %s9811_s26  ;;  %v2536_v57 = vld.sshfl [vmem:[#allocation1 + $0x30] sm:$0xff pattern:$0x73625140]  ;;  %v2538_v46 = vld.sshfl [vmem:[#allocation1 + $0x38] sm:$0xff pattern:$0x73625140]  ;;  %2544 = vrot.lane.b32.xlu2 %v2528_v26, %s9811_s26  ;;  %v1889_v35 = vpop.permute.xlu2 %1888 }
 0x180   : > { %v1905_v48 = vsel %vm345_vm1, %v1892_v16, 0  ;;  %2552 = vrot.lane.b32.xlu0 %v2536_v57, %s9811_s26  ;;  %2688 = vst [vmem:[#allocation1 + $0x20] ss:$4 sm:$0xff] %v10253_v44  ;;  %v2693_v22 = vld.sshfl [vmem:[#allocation1 + $0x10] sm:$0xff pattern:$0x73625140] }
 0x184   : > { %v837_v23 = vpop.f32.mrf.mxu2 }
 0x185   : > { %v932_v32 = vpop.f32.mrf.mxu0  ;;  %v945_v36 = vpop.f32.mrf.mxu1 }
 0x186   : > { %v850_v13 = vpop.f32.mrf.mxu3  ;;  %v10366_v17 = vadd.f32 %v932_v32, %v10182_v51  ;;  %v10369_v41 = vadd.f32 %v945_v36, %v10192_v1  ;;  %v1881_v51 = vpop.permute.xlu1 %1880  ;;  %v1902_v1 = vsel %vm345_vm1, %v1891_v39, 0 }
 0x187   : > { %2554 = vrot.lane.b32.xlu1 %v2538_v46, %s9811_s26  ;;  %v1885_v59 = vpop.permute.xlu0 %1884  ;;  %2550 = vrot.lane.b32.xlu2 %v2534_v52, %s9811_s26  ;;  %v2044_v24 = vpop.permute.xlu2 %2043  ;;  %v2697_v25 = vld.sshfl [vmem:[#allocation1 + $0x20] sm:$0xff pattern:$0x73625140] }
 0x188   : > { %9434 = vmatmul.msk.bf16.vlgmr.msrb.gmra.mxu0 %vm341_vm2, %v10328_v60  ;;  %9435 = vmatmul.msk.bf16.vlgmr.msrb.gmra.mxu1 %vm341_vm2, %v10328_v60  ;;  %v1895_v61 = vsel %vm1890_vm6, %v1883_v58, %v1885_v59 }
 0x189   : > { %9436 = vmatmul.msk.bf16.vlgmr.msrb.gmra.mxu2 %vm341_vm2, %v10328_v60  ;;  %1825 = vmatpush.bf16.msrb.mxu0 %v1748_v0  ;;  %v1914_v4 = vsel %vm345_vm1, %v1895_v61, 0 }
 0x18a   : > { %1838 = vmatpush.bf16.msrb.mxu1 %v1751_v47  ;;  %1929 = vmatpush.bf16.msrb.mxu2 %v1902_v1  ;;  %v10446_v47 = vld [vmem:[%s13170_s1 + $0x14] sm:$0xf]  ;;  %v2699_v1 = vld.sshfl [vmem:[#allocation1 + $0x28] sm:$0xff pattern:$0x73625140] }
 0x18b   : > { %9437 = vmatmul.msk.bf16.vlgmr.msrb.gmra.mxu3 %vm341_vm2, %v10374_v40  ;;  %2707 = vrot.lane.b32.xlu0 %v2691_v18, %s9811_s26 }
 0x18c   : > { %1942 = vmatpush.bf16.msrb.mxu3 %v1905_v48  ;;  %v958_v49 = vpop.f32.mrf.mxu2 }
 0x18d   : > { %v10392_v53 = vadd.f32 %v958_v49, %v10195_v28  ;;  %v934_v55 = vpop.f32.mrf.mxu0  ;;  %v947_v56 = vpop.f32.mrf.mxu1  ;;  %v1893_v28 = vsel %vm1890_vm6, %v1879_v29, %v1881_v51 }
 0x18e   : > { %v971_v50 = vpop.f32.mrf.mxu3  ;;  %v1887_v60 = vpop.permute.xlu1 %1886  ;;  %v1908_v9 = vsel %vm345_vm1, %v1893_v28, 0  ;;  %v2701_v55 = vld.sshfl [vmem:[#allocation1 + $0x30] sm:$0xff pattern:$0x73625140] }
 0x18f   : > { %v10395_v54 = vadd.f32 %v971_v50, %v10218_v11  ;;  %v1894_v11 = vsel %vm1890_vm6, %v1881_v51, %v1883_v58  ;;  %v1896_v6 = vsel %vm1890_vm6, %v1885_v59, %v1887_v60  ;;  %v2040_v23 = vpop.permute.xlu0 %2039  ;;  %2709 = vrot.lane.b32.xlu1 %v2693_v22, %s9811_s26  ;;  %v2050_v56 = vpop.permute.xlu2 %2049  ;;  %v2689_v28 = vld.sshfl [vmem:[#allocation1] sm:$0xff pattern:$0x73625140] }
 0x190   : > { %v1911_v10 = vsel %vm345_vm1, %v1894_v11, 0  ;;  %v1917_v15 = vsel %vm345_vm1, %v1896_v6, 0  ;;  %2705 = vrot.lane.b32.xlu2 %v2689_v28, %s9811_s26 }
 0x193   : > { %2713 = vrot.lane.b32.xlu0 %v2697_v25, %s9811_s26 }
 0x194   : > { %v960_v62 = vpop.f32.mrf.mxu2 }
 0x195   : > { %v984_v27 = vpop.f32.mrf.mxu0  ;;  %v997_v5 = vpop.f32.mrf.mxu1 }
 0x196   : > { %v973_v63 = vpop.f32.mrf.mxu3  ;;  %v10407_v7 = vadd.f32 %v984_v27, %v10221_v12  ;;  %v10410_v8 = vadd.f32 %v997_v5, %v10234_v37  ;;  %v2042_v13 = vpop.permute.xlu1 %2041 }
 0x197   : > { %v2056_v16 = vsel %vm1890_vm6, %v2042_v13, %v2044_v24  ;;  %v2046_v51 = vpop.permute.xlu0 %2045  ;;  %2715 = vrot.lane.b32.xlu1 %v2699_v1, %s9811_s26  ;;  %v2703_v63 = vld.sshfl [vmem:[#allocation1 + $0x38] sm:$0xff pattern:$0x73625140] }
 0x198   : > { %9438 = vmatmul.msk.bf16.vlgmr.msra.gmra.mxu0 %vm341_vm2, %v10374_v40  ;;  %9439 = vmatmul.msk.bf16.vlgmr.msra.gmra.mxu1 %vm341_vm2, %v10374_v40  ;;  %v2057_v50 = vsel %vm1890_vm6, %v2044_v24, %v2046_v51  ;;  %2856 = vst [vmem:[#allocation1 + $0x20] ss:$4 sm:$0xff] %v10253_v44 }
 0x199   : > { %9440 = vmatmul.msk.bf16.vlgmr.msra.gmra.mxu2 %vm341_vm2, %v10374_v40  ;;  %1955 = vmatpush.bf16.msra.mxu0 %v1908_v9  ;;  %v2072_v52 = vsel %vm345_vm1, %v2057_v50, 0 }
 0x19a   : > { %1968 = vmatpush.bf16.msra.mxu1 %v1911_v10  ;;  %1981 = vmatpush.bf16.msra.mxu2 %v1914_v4 }
 0x19b   : > { %9441 = vmatmul.msk.bf16.vlgmr.msra.gmra.mxu3 %vm341_vm2, %v10374_v40  ;;  %2719 = vrot.lane.b32.xlu0 %v2703_v63, %s9811_s26 }
 0x19c   : > { %1994 = vmatpush.bf16.msra.mxu3 %v1917_v15  ;;  %v1010_v12 = vpop.f32.mrf.mxu2 }
 0x19d   : > { %v10425_v19 = vadd.f32 %v1010_v12, %v10237_v38  ;;  %v986_v21 = vpop.f32.mrf.mxu0  ;;  %v999_v29 = vpop.f32.mrf.mxu1  ;;  %v1897_v38 = vsel %vm1890_vm6, %v1887_v60, %v1889_v35 }
 0x19e   : > { %v1096_v37 = vpop.f32.mrf.mxu3  ;;  %v1920_v48 = vsel %vm345_vm1, %v1897_v38, 0  ;;  %v2208_v12 = vpop.permute.xlu2 %2207 }
 0x19f   : > { %v10428_v20 = vadd.f32 %v1096_v37, %v10301_v30  ;;  %v2055_v30 = vsel %vm1890_vm6, %v2040_v23, %v2042_v13 }
 0x1a0   : > { %v2066_v49 = vsel %vm345_vm1, %v2055_v30, 0 }
 0x1a4   : > { %v1012_v31 = vpop.f32.mrf.mxu2 }
 0x1a5   : > { %v1109_v36 = vpop.f32.mrf.mxu0  ;;  %v1122_v39 = vpop.f32.mrf.mxu1 }
 0x1a6   : > { %v1098_v32 = vpop.f32.mrf.mxu3  ;;  %v10438_v42 = vadd.f32 %v1109_v36, %v10316_v43  ;;  %v10441_v0 = vadd.f32 %v1122_v39, %v10319_v45  ;;  %v2069_v43 = vsel %vm345_vm1, %v2056_v16, 0  ;;  %v2048_v45 = vpop.permute.xlu1 %2047  ;;  %v2867_v36 = vld.sshfl [vmem:[#allocation1 + $0x28] sm:$0xff pattern:$0x73625140] }
 0x1a7   : > { %v2058_v5 = vsel %vm1890_vm6, %v2046_v51, %v2048_v45  ;;  %v2214_v30 = vpop.permute.xlu2 %2213 }
 0x1a8   : > { %9442 = vmatmul.msk.bf16.vlgmr.msrb.gmra.mxu0 %vm341_vm2, %v10374_v40  ;;  %9443 = vmatmul.msk.bf16.vlgmr.msrb.gmra.mxu1 %vm341_vm2, %v10374_v40  ;;  %v2695_v40 = vld.sshfl [vmem:[#allocation1 + $0x18] sm:$0xff pattern:$0x73625140]  ;;  %v2075_v37 = vsel %vm345_vm1, %v2058_v5, 0 }
 0x1a9   : > { %9444 = vmatmul.msk.bf16.vlgmr.msrb.gmra.mxu2 %vm341_vm2, %v10446_v47  ;;  %2007 = vmatpush.bf16.msrb.mxu0 %v1920_v48  ;;  %2853 = vst [vmem:[#allocation1] ss:$4 sm:$0xff] %v10226_v14  ;;  %v2052_v11 = vpop.permute.xlu0 %2051  ;;  %v269_v48 = vld [vmem:[%s13170_s1 + $0x80] sm:$0xf] }
 0x1aa   : > { %2093 = vmatpush.bf16.msrb.mxu1 %v2066_v49  ;;  %2106 = vmatpush.bf16.msrb.mxu2 %v2069_v43  ;;  %v2060_v9 = vsel %vm1890_vm6, %v2050_v56, %v2052_v11 }
 0x1ab   : > { %9445 = vmatmul.msk.bf16.vlgmr.msrb.gmra.mxu3 %vm341_vm2, %v10446_v47  ;;  %2711 = vrot.lane.b32.xlu2 %v2695_v40, %s9811_s26 }
 0x1ac   : > { %2119 = vmatpush.bf16.msrb.mxu3 %v2072_v52  ;;  %v1135_v57 = vpop.f32.mrf.mxu2  ;;  %v2869_v52 = vld.sshfl [vmem:[#allocation1 + $0x30] sm:$0xff pattern:$0x73625140] }
 0x1ad   : > { %v10463_v46 = vadd.f32 %v1135_v57, %v10333_v2  ;;  %v1111_v60 = vpop.f32.mrf.mxu0  ;;  %v1124_v62 = vpop.f32.mrf.mxu1 }
 0x1ae   : > { %v1148_v58 = vpop.f32.mrf.mxu3  ;;  %v2054_v26 = vpop.permute.xlu1 %2053 }
 0x1af   : > { %v10466_v59 = vadd.f32 %v1148_v58, %v10335_v3  ;;  %v2059_v3 = vsel %vm1890_vm6, %v2048_v45, %v2050_v56  ;;  %v2061_v10 = vsel %vm1890_vm6, %v2052_v11, %v2054_v26  ;;  %v2220_v60 = vpop.permute.xlu2 %2219  ;;  %vm6552_vm6 = vcmask 449536  }
 0x1b0   : > { %v2857_v15 = vld.sshfl [vmem:[#allocation1] sm:$0xff pattern:$0x73625140]  ;;  %v2078_v18 = vsel %vm345_vm1, %v2059_v3, 0 }
 0x1b1   : > { %2873 = vrot.lane.b32.xlu1 %v2857_v15, %s9812_s6  ;;  %v2861_v21 = vld.sshfl [vmem:[#allocation1 + $0x10] sm:$0xff pattern:$0x73625140]  ;;  %v2863_v23 = vld.sshfl [vmem:[#allocation1 + $0x18] sm:$0xff pattern:$0x73625140]  ;;  %v2210_v32 = vpop.permute.xlu0 %2209 }
 0x1b2   : > { %2877 = vrot.lane.b32.xlu0 %v2861_v21, %s9812_s6  ;;  %v2224_v51 = vsel %vm2223_vm7, %v2208_v12, %v2210_v32  ;;  %v2859_v58 = vld.sshfl [vmem:[#allocation1 + $0x8] sm:$0xff pattern:$0x73625140]  ;;  %v2871_v3 = vld.sshfl [vmem:[#allocation1 + $0x38] sm:$0xff pattern:$0x73625140] }
 0x1b3   : > { %2717 = vrot.lane.b32.xlu2 %v2701_v55, %s9811_s26  ;;  %v2235_v55 = vsel %vm345_vm1, %v2224_v51, 0  ;;  %3019 = vst [vmem:[#allocation1] ss:$4 sm:$0xff] %v10226_v14 }
 0x1b4   : > { %v1137_v27 = vpop.f32.mrf.mxu2 }
 0x1b5   : > { %v1161_v61 = vpop.f32.mrf.mxu0  ;;  %v1174_v6 = vpop.f32.mrf.mxu1 }
 0x1b6   : > { %v1150_v2 = vpop.f32.mrf.mxu3  ;;  %v10477_v4 = vadd.f32 %v1161_v61, %v10352_v33  ;;  %v10480_v35 = vadd.f32 %v1174_v6, %v10355_v34  ;;  %v2081_v33 = vsel %vm345_vm1, %v2060_v9, 0  ;;  %v2084_v34 = vsel %vm345_vm1, %v2061_v10, 0  ;;  %v2212_v38 = vpop.permute.xlu1 %2211 }
 0x1b7   : > { %v2226_v49 = vsel %vm2223_vm7, %v2212_v38, %v2214_v30  ;;  %v2375_v61 = vpop.permute.xlu2 %2374 }
 0x1b8   : > { %9446 = vmatmul.msk.bf16.vlgmr.msra.gmra.mxu0 %vm341_vm2, %v10446_v47  ;;  %9447 = vmatmul.msk.bf16.vlgmr.msra.gmra.mxu1 %vm341_vm2, %v10446_v47 }
 0x1b9   : > { %9448 = vmatmul.msk.bf16.vlgmr.msra.gmra.mxu2 %vm341_vm2, %v10446_v47  ;;  %2132 = vmatpush.bf16.msra.mxu0 %v2075_v37  ;;  %v2216_v45 = vpop.permute.xlu0 %2215 }
 0x1ba   : > { %2145 = vmatpush.bf16.msra.mxu1 %v2078_v18  ;;  %2158 = vmatpush.bf16.msra.mxu2 %v2081_v33  ;;  %v2227_v57 = vsel %vm2223_vm7, %v2214_v30, %v2216_v45  ;;  %v3024_v2 = vld.sshfl [vmem:[#allocation1 + $0x8] sm:$0xff pattern:$0x73625140]  ;;  %v3022_v5 = vld.sshfl [vmem:[#allocation1] sm:$0xff pattern:$0x73625140] }
 0x1bb   : > { %9449 = vmatmul.msk.bf16.vlgmr.msra.gmra.mxu3 %vm341_vm2, %v10446_v47  ;;  %2879 = vrot.lane.b32.xlu1 %v2863_v23, %s9812_s6 }
 0x1bc   : > { %2171 = vmatpush.bf16.msra.mxu3 %v2084_v34  ;;  %v1265_v29 = vpop.f32.mrf.mxu2  ;;  %2883 = vrot.lane.b32.xlu0 %v2867_v36, %s9812_s6 }
 0x1bd   : > { %v10498_v13 = vadd.f32 %v1265_v29, %v10366_v17  ;;  %v1163_v25 = vpop.f32.mrf.mxu0  ;;  %v1176_v31 = vpop.f32.mrf.mxu1  ;;  %v2225_v17 = vsel %vm2223_vm7, %v2210_v32, %v2212_v38  ;;  %2875 = vrot.lane.b32.xlu2 %v2859_v58, %s9812_s6 }
 0x1be   : > { %v1278_v22 = vpop.f32.mrf.mxu3  ;;  %v2238_v56 = vsel %vm345_vm1, %v2225_v17, 0  ;;  %v2218_v40 = vpop.permute.xlu1 %2217 }
 0x1bf   : > { %v10501_v24 = vadd.f32 %v1278_v22, %v10369_v41  ;;  %v2229_v15 = vsel %vm2223_vm7, %v2218_v40, %v2220_v60  ;;  %v2381_v17 = vpop.permute.xlu2 %2380 }
 0x1c0   : > { %v2250_v22 = vsel %vm345_vm1, %v2229_v15, 0 }
 0x1c1   : > { %v2222_v27 = vpop.permute.xlu0 %2221 }
 0x1c2   : > { %v2230_v18 = vsel %vm2223_vm7, %v2220_v60, %v2222_v27 }
 0x1c3   : > { %2885 = vrot.lane.b32.xlu1 %v2869_v52, %s9812_s6  ;;  %v2253_v23 = vsel %vm345_vm1, %v2230_v18, 0 }
 0x1c4   : > { %v1267_v39 = vpop.f32.mrf.mxu2  ;;  %3038 = vrot.lane.b32.xlu0 %v3022_v5, %s9812_s6 }
 0x1c5   : > { %v1291_v41 = vpop.f32.mrf.mxu0  ;;  %v1304_v1 = vpop.f32.mrf.mxu1 }
 0x1c6   : > { %v1280_v16 = vpop.f32.mrf.mxu3  ;;  %v10513_v50 = vadd.f32 %v1291_v41, %v10392_v53  ;;  %v10516_v43 = vadd.f32 %v1304_v1, %v10395_v54  ;;  %v2241_v53 = vsel %vm345_vm1, %v2226_v49, 0  ;;  %v2244_v54 = vsel %vm345_vm1, %v2227_v57, 0  ;;  %v2373_v6 = vpop.permute.xlu1 %2372 }
 0x1c7   : > { %v2388_v33 = vsel %vm2223_vm7, %v2373_v6, %v2375_v61 }
 0x1c8   : > { %9450 = vmatmul.msk.bf16.vlgmr.msrb.gmra.mxu0 %vm341_vm2, %v10446_v47  ;;  %9451 = vmatmul.msk.bf16.vlgmr.msrb.gmra.mxu1 %vm341_vm2, %v269_v48  ;;  %v2399_v31 = vsel %vm345_vm1, %v2388_v33, 0 }
 0x1c9   : > { %9452 = vmatmul.msk.bf16.vlgmr.msrb.gmra.mxu2 %vm341_vm2, %v269_v48  ;;  %2262 = vmatpush.bf16.msrb.mxu0 %v2235_v55  ;;  %v2377_v25 = vpop.permute.xlu0 %2376 }
 0x1ca   : > { %2275 = vmatpush.bf16.msrb.mxu1 %v2238_v56  ;;  %2288 = vmatpush.bf16.msrb.mxu2 %v2241_v53  ;;  %v243_v56 = vld [vmem:[%s13170_s1 + $0x18] sm:$0xf] }
 0x1cb   : > { %9453 = vmatmul.msk.bf16.vlgmr.msrb.gmra.mxu3 %vm341_vm2, %v269_v48  ;;  %3040 = vrot.lane.b32.xlu1 %v3024_v2, %s9812_s6 }
 0x1cc   : > { %2301 = vmatpush.bf16.msrb.mxu3 %v2244_v54  ;;  %v1317_v47 = vpop.f32.mrf.mxu2 }
 0x1cd   : > { %v10532_v63 = vadd.f32 %v1317_v47, %v10407_v7  ;;  %v1293_v11 = vpop.f32.mrf.mxu0  ;;  %v1306_v26 = vpop.f32.mrf.mxu1  ;;  %v2228_v7 = vsel %vm2223_vm7, %v2216_v45, %v2218_v40  ;;  %v2389_v45 = vsel %vm2223_vm7, %v2375_v61, %v2377_v25  ;;  %v3026_v40 = vld.sshfl [vmem:[#allocation1 + $0x10] sm:$0xff pattern:$0x73625140] }
 0x1ce   : > { %v1330_v62 = vpop.f32.mrf.mxu3  ;;  %v2247_v29 = vsel %vm345_vm1, %v2228_v7, 0  ;;  %v2379_v51 = vpop.permute.xlu1 %2378  ;;  %v2402_v60 = vsel %vm345_vm1, %v2389_v45, 0 }
 0x1cf   : > { %v10535_v28 = vadd.f32 %v1330_v62, %v10410_v8  ;;  %v2865_v8 = vld.sshfl [vmem:[#allocation1 + $0x20] sm:$0xff pattern:$0x73625140]  ;;  %v2391_v57 = vsel %vm2223_vm7, %v2379_v51, %v2381_v17 }
 0x1d0   : > { %2881 = vrot.lane.b32.xlu2 %v2865_v8, %s9812_s6  ;;  %3021 = vst [vmem:[#allocation1 + $0x20] ss:$4 sm:$0xff] %v10253_v44  ;;  %v2408_v62 = vsel %vm345_vm1, %v2391_v57, 0 }
 0x1d1   : > { %v2383_v1 = vpop.permute.xlu0 %2382 }
 0x1d2   : > { %v2392_v53 = vsel %vm2223_vm7, %v2381_v17, %v2383_v1 }
 0x1d3   : > { %v2411_v11 = vsel %vm345_vm1, %v2392_v53, 0 }
 0x1d4   : > { %v1319_v9 = vpop.f32.mrf.mxu2 }
 0x1d5   : > { %v1343_v12 = vpop.f32.mrf.mxu0  ;;  %v1429_v37 = vpop.f32.mrf.mxu1 }
 0x1d6   : > { %v1332_v10 = vpop.f32.mrf.mxu3  ;;  %v10546_v34 = vadd.f32 %v1343_v12, %v10425_v19  ;;  %v10549_v21 = vadd.f32 %v1429_v37, %v10428_v20  ;;  %v3028_v19 = vld.sshfl [vmem:[#allocation1 + $0x18] sm:$0xff pattern:$0x73625140] }
 0x1d7   : > { %3044 = vrot.lane.b32.xlu0 %v3028_v19, %s9812_s6  ;;  %v3030_v38 = vld.sshfl [vmem:[#allocation1 + $0x20] sm:$0xff pattern:$0x73625140]  ;;  %v3034_v41 = vld.sshfl [vmem:[#allocation1 + $0x30] sm:$0xff pattern:$0x73625140] }
 0x1d8   : > { %9454 = vmatmul.msk.bf16.vlgmr.msra.gmra.mxu0 %vm341_vm2, %v269_v48  ;;  %9455 = vmatmul.msk.bf16.vlgmr.msra.gmra.mxu1 %vm341_vm2, %v269_v48  ;;  %3186 = vst [vmem:[#allocation1] ss:$4 sm:$0xff] %v10226_v14  ;;  %v3032_v37 = vld.sshfl [vmem:[#allocation1 + $0x28] sm:$0xff pattern:$0x73625140] }
 0x1d9   : > { %9456 = vmatmul.msk.bf16.vlgmr.msra.gmra.mxu2 %vm341_vm2, %v269_v48  ;;  %2314 = vmatpush.bf16.msra.mxu0 %v2247_v29  ;;  %v2541_v10 = vpop.permute.xlu0 %2540 }
 0x1da   : > { %2327 = vmatpush.bf16.msra.mxu1 %v2250_v22  ;;  %2340 = vmatpush.bf16.msra.mxu2 %v2253_v23 }
 0x1db   : > { %9457 = vmatmul.msk.bf16.vlgmr.msra.gmra.mxu3 %vm341_vm2, %v269_v48  ;;  %3046 = vrot.lane.b32.xlu1 %v3030_v38, %s9812_s6 }
 0x1dc   : > { %2426 = vmatpush.bf16.msra.mxu3 %v2399_v31  ;;  %v1442_v20 = vpop.f32.mrf.mxu2  ;;  %2887 = vrot.lane.b32.xlu2 %v2871_v3, %s9812_s6  ;;  %v10616_v31 = vld [vmem:[%s13170_s1 + $0x84] sm:$0xf] }
 0x1dd   : > { %v10561_v30 = vadd.f32 %v1442_v20, %v10438_v42  ;;  %v1345_v39 = vpop.f32.mrf.mxu0  ;;  %v1431_v16 = vpop.f32.mrf.mxu1  ;;  %v2390_v42 = vsel %vm2223_vm7, %v2377_v25, %v2379_v51 }
 0x1de   : > { %v1455_v32 = vpop.f32.mrf.mxu3  ;;  %v2405_v47 = vsel %vm345_vm1, %v2390_v42, 0 }
 0x1df   : > { %v10564_v36 = vadd.f32 %v1455_v32, %v10441_v0  ;;  %3050 = vrot.lane.b32.xlu0 %v3034_v41, %s9812_s6  ;;  %v3036_v0 = vld.sshfl [vmem:[#allocation1 + $0x38] sm:$0xff pattern:$0x73625140]  ;;  %v3194_v6 = vld.sshfl [vmem:[#allocation1 + $0x10] sm:$0xff pattern:$0x73625140] }
 0x1e0   : > { %v3192_v9 = vld.sshfl [vmem:[#allocation1 + $0x8] sm:$0xff pattern:$0x73625140]  ;;  %3189 = vst [vmem:[#allocation1 + $0x20] ss:$4 sm:$0xff] %v10253_v44 }
 0x1e1   : > { %v3196_v38 = vld.sshfl [vmem:[#allocation1 + $0x18] sm:$0xff pattern:$0x73625140]  ;;  %v3190_v42 = vld.sshfl [vmem:[#allocation1] sm:$0xff pattern:$0x73625140] }
 0x1e2   : > { %3352 = vst [vmem:[#allocation1] ss:$4 sm:$0xff] %v10226_v14 }
 0x1e3   : > { %3052 = vrot.lane.b32.xlu1 %v3036_v0, %s9812_s6 }
 0x1e4   : > { %v1444_v48 = vpop.f32.mrf.mxu2  ;;  %3042 = vrot.lane.b32.xlu2 %v3026_v40, %s9812_s6 }
 0x1e5   : > { %v1468_v52 = vpop.f32.mrf.mxu0  ;;  %v1481_v55 = vpop.f32.mrf.mxu1 }
 0x1e6   : > { %v1457_v49 = vpop.f32.mrf.mxu3  ;;  %v10578_v54 = vadd.f32 %v1468_v52, %v10463_v46  ;;  %v10581_v58 = vadd.f32 %v1481_v55, %v10466_v59  ;;  %v2385_v46 = vpop.permute.xlu1 %2384 }
 0x1e7   : > { %v2387_v59 = vpop.permute.xlu2 %2386  ;;  %3208 = vrot.lane.b32.xlu0 %v3192_v9, %s9813_s11  ;;  %v3198_v51 = vld.sshfl [vmem:[#allocation1 + $0x20] sm:$0xff pattern:$0x73625140]  ;;  %v3200_v17 = vld.sshfl [vmem:[#allocation1 + $0x28] sm:$0xff pattern:$0x73625140] }
 0x1e8   : > { %9458 = vmatmul.msk.bf16.vlgmr.msrb.gmra.mxu0 %vm341_vm2, %v243_v56  ;;  %9459 = vmatmul.msk.bf16.vlgmr.msrb.gmra.mxu1 %vm341_vm2, %v243_v56  ;;  %v3204_v55 = vld.sshfl [vmem:[#allocation1 + $0x38] sm:$0xff pattern:$0x73625140] }
 0x1e9   : > { %9460 = vmatmul.msk.bf16.vlgmr.msrb.gmra.mxu2 %vm341_vm2, %v243_v56  ;;  %2439 = vmatpush.bf16.msrb.mxu0 %v2402_v60 }
 0x1ea   : > { %2452 = vmatpush.bf16.msrb.mxu1 %v2405_v47  ;;  %2465 = vmatpush.bf16.msrb.mxu2 %v2408_v62 }
 0x1eb   : > { %9461 = vmatmul.msk.bf16.vlgmr.msrb.gmra.mxu3 %vm341_vm2, %v243_v56  ;;  %3210 = vrot.lane.b32.xlu1 %v3194_v6, %s9813_s11 }
 0x1ec   : > { %2478 = vmatpush.bf16.msrb.mxu3 %v2411_v11  ;;  %v1494_v26 = vpop.f32.mrf.mxu2  ;;  %3048 = vrot.lane.b32.xlu2 %v3032_v37, %s9812_s6  ;;  %s9759_s6 = smul.u32 56, %s13176_s19 }
 0x1ed   : > { %v10594_v2 = vadd.f32 %v1494_v26, %v10477_v4  ;;  %v1470_v3 = vpop.f32.mrf.mxu0  ;;  %v1483_v61 = vpop.f32.mrf.mxu1  ;;  %v2393_v4 = vsel %vm2223_vm7, %v2383_v1, %v2385_v46 }
 0x1ee   : > { %v1507_v27 = vpop.f32.mrf.mxu3  ;;  %v2543_v15 = vpop.permute.xlu1 %2542  ;;  %v2414_v19 = vsel %vm345_vm1, %v2393_v4, 0  ;;  %v3359_v3 = vld.sshfl [vmem:[#allocation1 + $0x10] sm:$0xff pattern:$0x73625140]  ;;  %s13082_s8 = scalar_lea.vmem %s13173_s4, %s9759_s6 }
 0x1ef   : > { %v10597_v5 = vadd.f32 %v1507_v27, %v10480_v35  ;;  %v2545_v7 = vpop.permute.xlu2 %2544  ;;  %v2394_v35 = vsel %vm2223_vm7, %v2385_v46, %v2387_v59  ;;  %v2557_v29 = vsel %vm2556_vm8, %v2541_v10, %v2543_v15  ;;  %3214 = vrot.lane.b32.xlu0 %v3198_v51, %s9813_s11  ;;  %v3355_v46 = vld.sshfl [vmem:[#allocation1] sm:$0xff pattern:$0x73625140]  ;;  %vm6885_vm7 = vcmask 441344  }
 0x1f0   : > { %v2558_v22 = vsel %vm2556_vm8, %v2543_v15, %v2545_v7  ;;  %v2417_v20 = vsel %vm345_vm1, %v2394_v35, 0  ;;  %v2568_v32 = vsel %vm345_vm1, %v2557_v29, 0  ;;  %v3202_v29 = vld.sshfl [vmem:[#allocation1 + $0x30] sm:$0xff pattern:$0x73625140] }
 0x1f1   : > { %3354 = vst [vmem:[#allocation1 + $0x20] ss:$4 sm:$0xff] %v10253_v44 }
 0x1f3   : > { %3216 = vrot.lane.b32.xlu1 %v3200_v17, %s9813_s11 }
 0x1f4   : > { %v1496_v8 = vpop.f32.mrf.mxu2  ;;  %3206 = vrot.lane.b32.xlu2 %v3190_v42, %s9813_s11 }
 0x1f5   : > { %v1598_v18 = vpop.f32.mrf.mxu0  ;;  %v1611_v33 = vpop.f32.mrf.mxu1  ;;  %v3361_v8 = vld.sshfl [vmem:[#allocation1 + $0x18] sm:$0xff pattern:$0x73625140] }
 0x1f6   : > { %v1509_v12 = vpop.f32.mrf.mxu3  ;;  %v10608_v23 = vadd.f32 %v1598_v18, %v10498_v13  ;;  %v10611_v25 = vadd.f32 %v1611_v33, %v10501_v24  ;;  %v2571_v13 = vsel %vm345_vm1, %v2558_v22, 0  ;;  %v2547_v24 = vpop.permute.xlu0 %2546 }
 0x1f7   : > { %v2549_v45 = vpop.permute.xlu1 %2548  ;;  %v2551_v0 = vpop.permute.xlu2 %2550  ;;  %3220 = vrot.lane.b32.xlu0 %v3204_v55, %s9813_s11  ;;  %v3357_v55 = vld.sshfl [vmem:[#allocation1 + $0x8] sm:$0xff pattern:$0x73625140] }
 0x1f8   : > { %9462 = vmatmul.msk.bf16.vlgmr.msra.gmra.mxu0 %vm341_vm2, %v243_v56  ;;  %9463 = vmatmul.msk.bf16.vlgmr.msra.gmra.mxu1 %vm341_vm2, %v243_v56  ;;  %v2560_v57 = vsel %vm2556_vm8, %v2547_v24, %v2549_v45  ;;  %v2561_v60 = vsel %vm2556_vm8, %v2549_v45, %v2551_v0  ;;  %v3365_v17 = vld.sshfl [vmem:[#allocation1 + $0x28] sm:$0xff pattern:$0x73625140]  ;;  %v3367_v42 = vld.sshfl [vmem:[#allocation1 + $0x30] sm:$0xff pattern:$0x73625140] }
 0x1f9   : > { %9464 = vmatmul.msk.bf16.vlgmr.msra.gmra.mxu2 %vm341_vm2, %v243_v56  ;;  %2491 = vmatpush.bf16.msra.mxu0 %v2414_v19  ;;  %v2577_v59 = vsel %vm345_vm1, %v2560_v57, 0 }
 0x1fa   : > { %2504 = vmatpush.bf16.msra.mxu1 %v2417_v20  ;;  %2595 = vmatpush.bf16.msra.mxu2 %v2568_v32 }
 0x1fb   : > { %9465 = vmatmul.msk.bf16.vlgmr.msra.gmra.mxu3 %vm341_vm2, %v10616_v31  ;;  %3371 = vrot.lane.b32.xlu1 %v3355_v46, %s9813_s11 }
 0x1fc   : > { %2608 = vmatpush.bf16.msra.mxu3 %v2571_v13  ;;  %v1624_v39 = vpop.f32.mrf.mxu2  ;;  %3212 = vrot.lane.b32.xlu2 %v3196_v38, %s9813_s11 }
 0x1fd   : > { %v10628_v41 = vadd.f32 %v1624_v39, %v10513_v50  ;;  %v1600_v48 = vpop.f32.mrf.mxu0  ;;  %v1613_v49 = vpop.f32.mrf.mxu1 }
 0x1fe   : > { %v1637_v16 = vpop.f32.mrf.mxu3  ;;  %v2553_v52 = vpop.permute.xlu0 %2552 }
 0x1ff   : > { %v10631_v1 = vadd.f32 %v1637_v16, %v10516_v43  ;;  %v2559_v43 = vsel %vm2556_vm8, %v2545_v7, %v2547_v24  ;;  %v2562_v47 = vsel %vm2556_vm8, %v2551_v0, %v2553_v52  ;;  %v2555_v26 = vpop.permute.xlu1 %2554  ;;  %v2706_v27 = vpop.permute.xlu2 %2705  ;;  %3375 = vrot.lane.b32.xlu0 %v3359_v3, %s9813_s11  ;;  %v10685_v24 = vld [vmem:[%s13170_s1 + $0x1c] sm:$0xf]  ;;  %v10707_v0 = vld [vmem:[%s9876_s23] sm:$0xff] }
 0x200   : > { %v2574_v11 = vsel %vm345_vm1, %v2559_v43, 0  ;;  %v2563_v33 = vsel %vm2556_vm8, %v2553_v52, %v2555_v26  ;;  %3519 = vst [vmem:[#allocation1] ss:$4 sm:$0xff] %v10707_v0  ;;  %v3363_v3 = vld.sshfl [vmem:[#allocation1 + $0x20] sm:$0xff pattern:$0x73625140] }
 0x201   : > { %v2586_v38 = vsel %vm345_vm1, %v2563_v33, 0 }
 0x203   : > { %3377 = vrot.lane.b32.xlu1 %v3361_v8, %s9813_s11 }
 0x204   : > { %v1626_v50 = vpop.f32.mrf.mxu2  ;;  %3218 = vrot.lane.b32.xlu2 %v3202_v29, %s9813_s11 }
 0x205   : > { %v1650_v53 = vpop.f32.mrf.mxu0  ;;  %v1663_v40 = vpop.f32.mrf.mxu1 }
 0x206   : > { %v1639_v56 = vpop.f32.mrf.mxu3  ;;  %v10643_v62 = vadd.f32 %v1650_v53, %v10532_v63  ;;  %v10646_v14 = vadd.f32 %v1663_v40, %v10535_v28  ;;  %v2580_v63 = vsel %vm345_vm1, %v2561_v60, 0  ;;  %v2583_v28 = vsel %vm345_vm1, %v2562_v47, 0  ;;  %v2708_v12 = vpop.permute.xlu0 %2707  ;;  %v3369_v60 = vld.sshfl [vmem:[#allocation1 + $0x38] sm:$0xff pattern:$0x73625140] }
 0x207   : > { %v2710_v4 = vpop.permute.xlu1 %2709  ;;  %v2712_v35 = vpop.permute.xlu2 %2711  ;;  %3381 = vrot.lane.b32.xlu0 %v3365_v17, %s9813_s11  ;;  %v3525_v26 = vld.sshfl [vmem:[#allocation1 + $0x8] sm:$0xff pattern:$0x73625140] }
 0x208   : > { %9466 = vmatmul.msk.bf16.vlgmr.msrb.gmra.mxu0 %vm341_vm2, %v10616_v31  ;;  %9467 = vmatmul.msk.bf16.vlgmr.msrb.gmra.mxu1 %vm341_vm2, %v10616_v31  ;;  %v2722_v19 = vsel %vm2556_vm8, %v2708_v12, %v2710_v4  ;;  %v2723_v20 = vsel %vm2556_vm8, %v2710_v4, %v2712_v35 }
 0x209   : > { %9468 = vmatmul.msk.bf16.vlgmr.msrb.gmra.mxu2 %vm341_vm2, %v10616_v31  ;;  %2621 = vmatpush.bf16.msrb.mxu0 %v2574_v11  ;;  %v2735_v44 = vsel %vm345_vm1, %v2722_v19, 0 }
 0x20a   : > { %2634 = vmatpush.bf16.msrb.mxu1 %v2577_v59  ;;  %2647 = vmatpush.bf16.msrb.mxu2 %v2580_v63  ;;  %v3523_v63 = vld.sshfl [vmem:[#allocation1] sm:$0xff pattern:$0x73625140] }
 0x20b   : > { %9469 = vmatmul.msk.bf16.vlgmr.msrb.gmra.mxu3 %vm341_vm2, %v10616_v31  ;;  %3383 = vrot.lane.b32.xlu1 %v3367_v42, %s9813_s11  ;;  %v3527_v42 = vld.sshfl [vmem:[#allocation1 + $0x10] sm:$0xff pattern:$0x73625140] }
 0x20c   : > { %2660 = vmatpush.bf16.msrb.mxu3 %v2583_v28  ;;  %v1676_v61 = vpop.f32.mrf.mxu2  ;;  %3373 = vrot.lane.b32.xlu2 %v3357_v55, %s9813_s11 }
 0x20d   : > { %v10663_v9 = vadd.f32 %v1676_v61, %v10546_v34  ;;  %v1652_v7 = vpop.f32.mrf.mxu0  ;;  %v1665_v15 = vpop.f32.mrf.mxu1  ;;  %v2721_v34 = vsel %vm2556_vm8, %v2706_v27, %v2708_v12  ;;  %v3529_v12 = vld.sshfl [vmem:[#allocation1 + $0x18] sm:$0xff pattern:$0x73625140] }
 0x20e   : > { %v1762_v6 = vpop.f32.mrf.mxu3  ;;  %v2732_v39 = vsel %vm345_vm1, %v2721_v34, 0  ;;  %3685 = vst [vmem:[#allocation1] ss:$4 sm:$0xff] %v10707_v0 }
 0x20f   : > { %v10666_v10 = vadd.f32 %v1762_v6, %v10549_v21  ;;  %v2718_v52 = vpop.permute.xlu2 %2717  ;;  %v2716_v50 = vpop.permute.xlu1 %2715  ;;  %3539 = vrot.lane.b32.xlu0 %v3523_v63, %s9814_s16  ;;  %v10733_v6 = vld [vmem:[%s9876_s23 + $0x8] sm:$0xff] }
 0x210   : > { %v2726_v47 = vsel %vm2556_vm8, %v2716_v50, %v2718_v52  ;;  %3522 = vst [vmem:[#allocation1 + $0x20] ss:$4 sm:$0xff] %v10733_v6 }
 0x213   : > { %3541 = vrot.lane.b32.xlu1 %v3525_v26, %s9814_s16 }
 0x214   : > { %v1678_v37 = vpop.f32.mrf.mxu2  ;;  %3379 = vrot.lane.b32.xlu2 %v3363_v3, %s9813_s11 }
 0x215   : > { %v1775_v22 = vpop.f32.mrf.mxu0  ;;  %v1788_v21 = vpop.f32.mrf.mxu1 }
 0x216   : > { %v1764_v18 = vpop.f32.mrf.mxu3  ;;  %v10677_v32 = vadd.f32 %v1775_v22, %v10561_v30  ;;  %v10680_v13 = vadd.f32 %v1788_v21, %v10564_v36  ;;  %v2714_v30 = vpop.permute.xlu0 %2713  ;;  %v2738_v36 = vsel %vm345_vm1, %v2723_v20, 0 }
 0x217   : > { %v2724_v43 = vsel %vm2556_vm8, %v2712_v35, %v2714_v30  ;;  %v2725_v57 = vsel %vm2556_vm8, %v2714_v30, %v2716_v50  ;;  %v2876_v61 = vpop.permute.xlu2 %2875  ;;  %3545 = vrot.lane.b32.xlu0 %v3529_v12, %s9814_s16  ;;  %v3531_v33 = vld.sshfl [vmem:[#allocation1 + $0x20] sm:$0xff pattern:$0x73625140] }
 0x218   : > { %9470 = vmatmul.msk.bf16.vlgmr.msra.gmra.mxu0 %vm341_vm2, %v10616_v31  ;;  %9471 = vmatmul.msk.bf16.vlgmr.msra.gmra.mxu1 %vm341_vm2, %v10616_v31  ;;  %v2741_v28 = vsel %vm345_vm1, %v2724_v43, 0  ;;  %v2744_v27 = vsel %vm345_vm1, %v2725_v57, 0 }
 0x219   : > { %9472 = vmatmul.msk.bf16.vlgmr.msra.gmra.mxu2 %vm341_vm2, %v10685_v24  ;;  %2673 = vmatpush.bf16.msra.mxu0 %v2586_v38 }
 0x21a   : > { %2759 = vmatpush.bf16.msra.mxu1 %v2732_v39  ;;  %2772 = vmatpush.bf16.msra.mxu2 %v2735_v44  ;;  %v271_v39 = vld [vmem:[%s13170_s1 + $0x88] sm:$0xf] }
 0x21b   : > { %9473 = vmatmul.msk.bf16.vlgmr.msra.gmra.mxu3 %vm341_vm2, %v10685_v24  ;;  %3547 = vrot.lane.b32.xlu1 %v3531_v33, %s9814_s16 }
 0x21c   : > { %2785 = vmatpush.bf16.msra.mxu3 %v2738_v36  ;;  %v1801_v16 = vpop.f32.mrf.mxu2  ;;  %3385 = vrot.lane.b32.xlu2 %v3369_v60, %s9813_s11 }
 0x21d   : > { %v10700_v31 = vadd.f32 %v1801_v16, %v10578_v54  ;;  %v1777_v49 = vpop.f32.mrf.mxu0  ;;  %v1790_v45 = vpop.f32.mrf.mxu1 }
 0x21e   : > { %v1814_v51 = vpop.f32.mrf.mxu3  ;;  %v2720_v54 = vpop.permute.xlu0 %2719 }
 0x21f   : > { %v10703_v48 = vadd.f32 %v1814_v51, %v10581_v58  ;;  %v2727_v46 = vsel %vm2556_vm8, %v2718_v52, %v2720_v54  ;;  %v3535_v51 = vld.sshfl [vmem:[#allocation1 + $0x30] sm:$0xff pattern:$0x73625140]  ;;  %vm7218_vm8 = vcmask 375808  }
 0x220   : > { %3551 = vrot.lane.b32.xlu0 %v3535_v51, %s9814_s16 }
 0x223   : > { %v2874_v7 = vpop.permute.xlu1 %2873 }
 0x224   : > { %v1803_v56 = vpop.f32.mrf.mxu2  ;;  %v2890_v20 = vsel %vm2889_vm9, %v2874_v7, %v2876_v61  ;;  %3543 = vrot.lane.b32.xlu2 %v3527_v42, %s9814_s16 }
 0x225   : > { %v1827_v53 = vpop.f32.mrf.mxu0  ;;  %v1840_v40 = vpop.f32.mrf.mxu1  ;;  %v2901_v17 = vsel %vm345_vm1, %v2890_v20, 0 }
 0x226   : > { %v1816_v58 = vpop.f32.mrf.mxu3  ;;  %v10717_v11 = vadd.f32 %v1827_v53, %v10594_v2  ;;  %v10720_v59 = vadd.f32 %v1840_v40, %v10597_v5  ;;  %v2747_v2 = vsel %vm345_vm1, %v2726_v47, 0  ;;  %v2750_v5 = vsel %vm345_vm1, %v2727_v46, 0  ;;  %v2878_v34 = vpop.permute.xlu0 %2877  ;;  %v3692_v53 = vld.sshfl [vmem:[#allocation1 + $0x10] sm:$0xff pattern:$0x73625140] }
 0x227   : > { %v3690_v40 = vld.sshfl [vmem:[#allocation1 + $0x8] sm:$0xff pattern:$0x73625140] }
 0x228   : > { %9474 = vmatmul.msk.bf16.vlgmr.msrb.gmra.mxu0 %vm341_vm2, %v10685_v24  ;;  %9475 = vmatmul.msk.bf16.vlgmr.msrb.gmra.mxu1 %vm341_vm2, %v10685_v24 }
 0x229   : > { %9476 = vmatmul.msk.bf16.vlgmr.msrb.gmra.mxu2 %vm341_vm2, %v10685_v24  ;;  %2798 = vmatpush.bf16.msrb.mxu0 %v2741_v28 }
 0x22a   : > { %2811 = vmatpush.bf16.msrb.mxu1 %v2744_v27  ;;  %2824 = vmatpush.bf16.msrb.mxu2 %v2747_v2  ;;  %v2882_v22 = vpop.permute.xlu2 %2881 }
 0x22b   : > { %9477 = vmatmul.msk.bf16.vlgmr.msrb.gmra.mxu3 %vm341_vm2, %v10685_v24  ;;  %3706 = vrot.lane.b32.xlu0 %v3690_v40, %s9814_s16 }
 0x22c   : > { %2837 = vmatpush.bf16.msrb.mxu3 %v2750_v5  ;;  %v1931_v15 = vpop.f32.mrf.mxu2  ;;  %v3533_v5 = vld.sshfl [vmem:[#allocation1 + $0x28] sm:$0xff pattern:$0x73625140] }
 0x22d   : > { %v10742_v4 = vadd.f32 %v1931_v15, %v10608_v23  ;;  %v1829_v37 = vpop.f32.mrf.mxu0  ;;  %v1842_v18 = vpop.f32.mrf.mxu1  ;;  %v2891_v23 = vsel %vm2889_vm9, %v2876_v61, %v2878_v34  ;;  %3549 = vrot.lane.b32.xlu2 %v3533_v5, %s9814_s16 }
 0x22e   : > { %v1944_v8 = vpop.f32.mrf.mxu3  ;;  %v2880_v29 = vpop.permute.xlu1 %2879  ;;  %v2904_v49 = vsel %vm345_vm1, %v2891_v23, 0 }
 0x22f   : > { %v10745_v35 = vadd.f32 %v1944_v8, %v10611_v25  ;;  %v2892_v44 = vsel %vm2889_vm9, %v2878_v34, %v2880_v29  ;;  %v2893_v30 = vsel %vm2889_vm9, %v2880_v29, %v2882_v22  ;;  %v2884_v55 = vpop.permute.xlu0 %2883 }
 0x230   : > { %v2907_v45 = vsel %vm345_vm1, %v2892_v44, 0  ;;  %v2894_v63 = vsel %vm2889_vm9, %v2882_v22, %v2884_v55 }
 0x231   : > { %v2913_v61 = vsel %vm345_vm1, %v2894_v63, 0 }
 0x234   : > { %v1933_v21 = vpop.f32.mrf.mxu2 }
 0x235   : > { %v1957_v25 = vpop.f32.mrf.mxu0  ;;  %v1970_v38 = vpop.f32.mrf.mxu1 }
 0x236   : > { %v1946_v19 = vpop.f32.mrf.mxu3  ;;  %v10758_v36 = vadd.f32 %v1957_v25, %v10628_v41  ;;  %v10761_v16 = vadd.f32 %v1970_v38, %v10631_v1  ;;  %v2910_v41 = vsel %vm345_vm1, %v2893_v30, 0  ;;  %v3537_v1 = vld.sshfl [vmem:[#allocation1 + $0x38] sm:$0xff pattern:$0x73625140]  ;;  %v2886_v52 = vpop.permute.xlu1 %2885 }
 0x237   : > { %3553 = vrot.lane.b32.xlu1 %v3537_v1, %s9814_s16  ;;  %v2888_v57 = vpop.permute.xlu2 %2887  ;;  %v2895_v26 = vsel %vm2889_vm9, %v2884_v55, %v2886_v52  ;;  %v3039_v2 = vpop.permute.xlu0 %3038  ;;  %3687 = vst [vmem:[#allocation1 + $0x20] ss:$4 sm:$0xff] %v10733_v6  ;;  %v3688_v1 = vld.sshfl [vmem:[#allocation1] sm:$0xff pattern:$0x73625140] }
 0x238   : > { %9478 = vmatmul.msk.bf16.vlgmr.msra.gmra.mxu0 %vm341_vm2, %v10685_v24  ;;  %9479 = vmatmul.msk.bf16.vlgmr.msra.gmra.mxu1 %vm341_vm2, %v271_v39  ;;  %v2916_v7 = vsel %vm345_vm1, %v2895_v26, 0 }
 0x239   : > { %9480 = vmatmul.msk.bf16.vlgmr.msra.gmra.mxu2 %vm341_vm2, %v271_v39  ;;  %2928 = vmatpush.bf16.msra.mxu0 %v2901_v17  ;;  %v245_v17 = vld [vmem:[%s13170_s1 + $0x20] sm:$0xf] }
 0x23a   : > { %2941 = vmatpush.bf16.msra.mxu1 %v2904_v49  ;;  %2954 = vmatpush.bf16.msra.mxu2 %v2907_v45 }
 0x23b   : > { %9481 = vmatmul.msk.bf16.vlgmr.msra.gmra.mxu3 %vm341_vm2, %v271_v39  ;;  %3704 = vrot.lane.b32.xlu2 %v3688_v1, %s9814_s16 }
 0x23c   : > { %2967 = vmatpush.bf16.msra.mxu3 %v2910_v41  ;;  %v1983_v24 = vpop.f32.mrf.mxu2 }
 0x23d   : > { %v10777_v54 = vadd.f32 %v1983_v24, %v10643_v62  ;;  %v1959_v58 = vpop.f32.mrf.mxu0  ;;  %v1972_v43 = vpop.f32.mrf.mxu1 }
 0x23e   : > { %v1996_v50 = vpop.f32.mrf.mxu3  ;;  %v3041_v60 = vpop.permute.xlu1 %3040  ;;  %v3696_v21 = vld.sshfl [vmem:[#allocation1 + $0x20] sm:$0xff pattern:$0x73625140]  ;;  %v3698_v19 = vld.sshfl [vmem:[#allocation1 + $0x28] sm:$0xff pattern:$0x73625140] }
 0x23f   : > { %v10780_v56 = vadd.f32 %v1996_v50, %v10646_v14  ;;  %3708 = vrot.lane.b32.xlu1 %v3692_v53, %s9814_s16  ;;  %v2896_v14 = vsel %vm2889_vm9, %v2886_v52, %v2888_v57  ;;  %v3054_v15 = vsel %vm2889_vm9, %v3039_v2, %v3041_v60  ;;  %3712 = vrot.lane.b32.xlu0 %v3696_v21, %s9814_s16 }
 0x240   : > { %v3065_v8 = vsel %vm345_vm1, %v3054_v15, 0 }
 0x244   : > { %v1985_v47 = vpop.f32.mrf.mxu2 }
 0x245   : > { %v2009_v62 = vpop.f32.mrf.mxu0  ;;  %v2095_v28 = vpop.f32.mrf.mxu1 }
 0x246   : > { %v1998_v46 = vpop.f32.mrf.mxu3  ;;  %v10788_v27 = vadd.f32 %v2009_v62, %v10663_v9  ;;  %v10791_v3 = vadd.f32 %v2095_v28, %v10666_v10  ;;  %v2919_v9 = vsel %vm345_vm1, %v2896_v14, 0  ;;  %v3043_v10 = vpop.permute.xlu2 %3042 }
 0x247   : > { %3714 = vrot.lane.b32.xlu1 %v3698_v19, %s9814_s16 }
 0x248   : > { %9482 = vmatmul.msk.bf16.vlgmr.msrb.gmra.mxu0 %vm341_vm2, %v271_v39  ;;  %9483 = vmatmul.msk.bf16.vlgmr.msrb.gmra.mxu1 %vm341_vm2, %v271_v39 }
 0x249   : > { %9484 = vmatmul.msk.bf16.vlgmr.msrb.gmra.mxu2 %vm341_vm2, %v271_v39  ;;  %2980 = vmatpush.bf16.msrb.mxu0 %v2913_v61  ;;  %v3045_v22 = vpop.permute.xlu0 %3044 }
 0x24a   : > { %2993 = vmatpush.bf16.msrb.mxu1 %v2916_v7  ;;  %3006 = vmatpush.bf16.msrb.mxu2 %v2919_v9  ;;  %v3056_v44 = vsel %vm2889_vm9, %v3043_v10, %v3045_v22 }
 0x24b   : > { %9485 = vmatmul.msk.bf16.vlgmr.msrb.gmra.mxu3 %vm341_vm2, %v271_v39  ;;  %v3694_v39 = vld.sshfl [vmem:[#allocation1 + $0x18] sm:$0xff pattern:$0x73625140]  ;;  %v3071_v55 = vsel %vm345_vm1, %v3056_v44, 0 }
 0x24c   : > { %3092 = vmatpush.bf16.msrb.mxu3 %v3065_v8  ;;  %v2108_v12 = vpop.f32.mrf.mxu2  ;;  %3852 = vst [vmem:[#allocation1] ss:$4 sm:$0xff] %v10707_v0  ;;  %3710 = vrot.lane.b32.xlu2 %v3694_v39, %s9814_s16  ;;  %v10858_v8 = vld [vmem:[%s13170_s1 + $0x8c] sm:$0xf] }
 0x24d   : > { %v10805_v18 = vadd.f32 %v2108_v12, %v10677_v32  ;;  %v2011_v34 = vpop.f32.mrf.mxu0  ;;  %v2097_v29 = vpop.f32.mrf.mxu1  ;;  %v3055_v32 = vsel %vm2889_vm9, %v3041_v60, %v3043_v10  ;;  %v3700_v12 = vld.sshfl [vmem:[#allocation1 + $0x30] sm:$0xff pattern:$0x73625140] }
 0x24e   : > { %v2121_v37 = vpop.f32.mrf.mxu3  ;;  %v3047_v20 = vpop.permute.xlu1 %3046  ;;  %v3068_v52 = vsel %vm345_vm1, %v3055_v32, 0 }
 0x24f   : > { %v10808_v33 = vadd.f32 %v2121_v37, %v10680_v13  ;;  %v3049_v23 = vpop.permute.xlu2 %3048  ;;  %v3702_v13 = vld.sshfl [vmem:[#allocation1 + $0x38] sm:$0xff pattern:$0x73625140]  ;;  %v3057_v49 = vsel %vm2889_vm9, %v3045_v22, %v3047_v20 }
 0x250   : > { %v3058_v45 = vsel %vm2889_vm9, %v3047_v20, %v3049_v23  ;;  %3718 = vrot.lane.b32.xlu0 %v3702_v13, %s9814_s16  ;;  %3855 = vst [vmem:[#allocation1 + $0x20] ss:$4 sm:$0xff] %v10733_v6 }
 0x251   : > { %v3051_v24 = vpop.permute.xlu0 %3050 }
 0x253   : > { %v3856_v47 = vld.sshfl [vmem:[#allocation1] sm:$0xff pattern:$0x73625140]  ;;  %v3860_v63 = vld.sshfl [vmem:[#allocation1 + $0x10] sm:$0xff pattern:$0x73625140] }
 0x254   : > { %v2110_v25 = vpop.f32.mrf.mxu2  ;;  %3872 = vrot.lane.b32.xlu1 %v3856_v47, %s9815_s24  ;;  %v3862_v2 = vld.sshfl [vmem:[#allocation1 + $0x18] sm:$0xff pattern:$0x73625140]  ;;  %3716 = vrot.lane.b32.xlu2 %v3700_v12, %s9814_s16  ;;  %v3858_v13 = vld.sshfl [vmem:[#allocation1 + $0x8] sm:$0xff pattern:$0x73625140] }
 0x255   : > { %v2134_v30 = vpop.f32.mrf.mxu0  ;;  %v2147_v51 = vpop.f32.mrf.mxu1  ;;  %4018 = vst [vmem:[#allocation1] ss:$4 sm:$0xff] %v10707_v0 }
 0x256   : > { %v2123_v38 = vpop.f32.mrf.mxu3  ;;  %v10820_v41 = vadd.f32 %v2134_v30, %v10700_v31  ;;  %v10823_v42 = vadd.f32 %v2147_v51, %v10703_v48  ;;  %v3074_v31 = vsel %vm345_vm1, %v3057_v49, 0  ;;  %v3077_v48 = vsel %vm345_vm1, %v3058_v45, 0  ;;  %v3053_v50 = vpop.permute.xlu1 %3052 }
 0x257   : > { %v3207_v46 = vpop.permute.xlu2 %3206  ;;  %v3060_v14 = vsel %vm2889_vm9, %v3051_v24, %v3053_v50  ;;  %v3866_v38 = vld.sshfl [vmem:[#allocation1 + $0x28] sm:$0xff pattern:$0x73625140]  ;;  %v3868_v44 = vld.sshfl [vmem:[#allocation1 + $0x30] sm:$0xff pattern:$0x73625140] }
 0x258   : > { %9486 = vmatmul.msk.bf16.vlgmr.msra.gmra.mxu0 %vm341_vm2, %v245_v17  ;;  %9487 = vmatmul.msk.bf16.vlgmr.msra.gmra.mxu1 %vm341_vm2, %v245_v17  ;;  %v3083_v34 = vsel %vm345_vm1, %v3060_v14, 0 }
 0x259   : > { %9488 = vmatmul.msk.bf16.vlgmr.msra.gmra.mxu2 %vm341_vm2, %v245_v17  ;;  %3105 = vmatpush.bf16.msra.mxu0 %v3068_v52  ;;  %v3209_v62 = vpop.permute.xlu0 %3208 }
 0x25a   : > { %3118 = vmatpush.bf16.msra.mxu1 %v3071_v55  ;;  %3131 = vmatpush.bf16.msra.mxu2 %v3074_v31  ;;  %v3223_v7 = vsel %vm3222_vm10, %v3207_v46, %v3209_v62  ;;  %v3870_v46 = vld.sshfl [vmem:[#allocation1 + $0x38] sm:$0xff pattern:$0x73625140] }
 0x25b   : > { %9489 = vmatmul.msk.bf16.vlgmr.msra.gmra.mxu3 %vm341_vm2, %v245_v17  ;;  %3876 = vrot.lane.b32.xlu0 %v3860_v63, %s9815_s24 }
 0x25c   : > { %3144 = vmatpush.bf16.msra.mxu3 %v3077_v48  ;;  %v2160_v58 = vpop.f32.mrf.mxu2  ;;  %3878 = vrot.lane.b32.xlu1 %v3862_v2, %s9815_s24  ;;  %v4027_v14 = vld.sshfl [vmem:[#allocation1 + $0x18] sm:$0xff pattern:$0x73625140] }
 0x25d   : > { %v10837_v57 = vadd.f32 %v2160_v58, %v10717_v11  ;;  %v2136_v40 = vpop.f32.mrf.mxu0  ;;  %v2149_v60 = vpop.f32.mrf.mxu1  ;;  %3874 = vrot.lane.b32.xlu2 %v3858_v13, %s9815_s24 }
 0x25e   : > { %v2173_v43 = vpop.f32.mrf.mxu3  ;;  %v3211_v26 = vpop.permute.xlu1 %3210  ;;  %v4023_v40 = vld.sshfl [vmem:[#allocation1 + $0x8] sm:$0xff pattern:$0x73625140] }
 0x25f   : > { %v10840_v53 = vadd.f32 %v2173_v43, %v10720_v59  ;;  %v3059_v59 = vsel %vm2889_vm9, %v3049_v23, %v3051_v24  ;;  %v3224_v15 = vsel %vm3222_vm10, %v3209_v62, %v3211_v26  ;;  %vm7551_vm9 = vcmask 367616  }
 0x260   : > { %v3080_v37 = vsel %vm345_vm1, %v3059_v59, 0  ;;  %v3237_v29 = vsel %vm345_vm1, %v3224_v15, 0  ;;  %v3864_v59 = vld.sshfl [vmem:[#allocation1 + $0x20] sm:$0xff pattern:$0x73625140] }
 0x261   : > { %v3215_v39 = vpop.permute.xlu0 %3214  ;;  %4020 = vst [vmem:[#allocation1 + $0x20] ss:$4 sm:$0xff] %v10733_v6 }
 0x263   : > { %3882 = vrot.lane.b32.xlu0 %v3866_v38, %s9815_s24 }
 0x264   : > { %v2162_v11 = vpop.f32.mrf.mxu2  ;;  %3884 = vrot.lane.b32.xlu1 %v3868_v44, %s9815_s24 }
 0x265   : > { %v2264_v5 = vpop.f32.mrf.mxu0  ;;  %v2277_v61 = vpop.f32.mrf.mxu1  ;;  %3880 = vrot.lane.b32.xlu2 %v3864_v59, %s9815_s24 }
 0x266   : > { %v2175_v28 = vpop.f32.mrf.mxu3  ;;  %v10850_v9 = vadd.f32 %v2264_v5, %v10742_v4  ;;  %v10853_v10 = vadd.f32 %v2277_v61, %v10745_v35  ;;  %v3213_v4 = vpop.permute.xlu2 %3212  ;;  %v3234_v35 = vsel %vm345_vm1, %v3223_v7, 0 }
 0x267   : > { %v3217_v32 = vpop.permute.xlu1 %3216 }
 0x268   : > { %9490 = vmatmul.msk.bf16.vlgmr.msrb.gmra.mxu0 %vm341_vm2, %v245_v17  ;;  %9491 = vmatmul.msk.bf16.vlgmr.msrb.gmra.mxu1 %vm341_vm2, %v245_v17  ;;  %v3227_v1 = vsel %vm3222_vm10, %v3215_v39, %v3217_v32  ;;  %v4033_v38 = vld.sshfl [vmem:[#allocation1 + $0x30] sm:$0xff pattern:$0x73625140]  ;;  %v4031_v44 = vld.sshfl [vmem:[#allocation1 + $0x28] sm:$0xff pattern:$0x73625140] }
 0x269   : > { %9492 = vmatmul.msk.bf16.vlgmr.msrb.gmra.mxu2 %vm341_vm2, %v245_v17  ;;  %3157 = vmatpush.bf16.msrb.mxu0 %v3080_v37  ;;  %v3225_v17 = vsel %vm3222_vm10, %v3211_v26, %v3213_v4  ;;  %v3246_v50 = vsel %vm345_vm1, %v3227_v1, 0  ;;  %v3221_v58 = vpop.permute.xlu0 %3220 }
 0x26a   : > { %3170 = vmatpush.bf16.msrb.mxu1 %v3083_v34  ;;  %3261 = vmatpush.bf16.msrb.mxu2 %v3234_v35  ;;  %v3240_v24 = vsel %vm345_vm1, %v3225_v17, 0  ;;  %v4025_v17 = vld.sshfl [vmem:[#allocation1 + $0x10] sm:$0xff pattern:$0x73625140] }
 0x26b   : > { %9493 = vmatmul.msk.bf16.vlgmr.msrb.gmra.mxu3 %vm341_vm2, %v10858_v8 }
 0x26c   : > { %3274 = vmatpush.bf16.msrb.mxu3 %v3237_v29  ;;  %v2290_v22 = vpop.f32.mrf.mxu2  ;;  %4039 = vrot.lane.b32.xlu1 %v4023_v40, %s9815_s24  ;;  %v10928_v29 = vld [vmem:[%s13170_s1 + $0x24] sm:$0xf] }
 0x26d   : > { %v10873_v19 = vadd.f32 %v2290_v22, %v10758_v36  ;;  %v2266_v23 = vpop.f32.mrf.mxu0  ;;  %v2279_v25 = vpop.f32.mrf.mxu1  ;;  %v4029_v22 = vld.sshfl [vmem:[#allocation1 + $0x20] sm:$0xff pattern:$0x73625140]  ;;  %3886 = vrot.lane.b32.xlu2 %v3870_v46, %s9815_s24 }
 0x26e   : > { %v2303_v21 = vpop.f32.mrf.mxu3  ;;  %v3219_v30 = vpop.permute.xlu2 %3218 }
 0x26f   : > { %v10876_v20 = vadd.f32 %v2303_v21, %v10761_v16  ;;  %v3226_v16 = vsel %vm3222_vm10, %v3213_v4, %v3215_v39  ;;  %v3228_v52 = vsel %vm3222_vm10, %v3217_v32, %v3219_v30  ;;  %v3229_v15 = vsel %vm3222_vm10, %v3219_v30, %v3221_v58 }
 0x270   : > { %v3243_v48 = vsel %vm345_vm1, %v3226_v16, 0  ;;  %v3249_v43 = vsel %vm345_vm1, %v3228_v52, 0  ;;  %v3252_v21 = vsel %vm345_vm1, %v3229_v15, 0 }
 0x271   : > { %v3376_v2 = vpop.permute.xlu0 %3375 }
 0x274   : > { %v2292_v51 = vpop.f32.mrf.mxu2  ;;  %4045 = vrot.lane.b32.xlu1 %v4029_v22, %s9815_s24 }
 0x275   : > { %v2316_v49 = vpop.f32.mrf.mxu0  ;;  %v2329_v45 = vpop.f32.mrf.mxu1  ;;  %4041 = vrot.lane.b32.xlu2 %v4025_v17, %s9815_s24 }
 0x276   : > { %v2305_v36 = vpop.f32.mrf.mxu3  ;;  %v10887_v55 = vadd.f32 %v2316_v49, %v10777_v54  ;;  %v10890_v31 = vadd.f32 %v2329_v45, %v10780_v56  ;;  %v4021_v54 = vld.sshfl [vmem:[#allocation1] sm:$0xff pattern:$0x73625140]  ;;  %v3372_v56 = vpop.permute.xlu1 %3371 }
 0x277   : > { %4037 = vrot.lane.b32.xlu0 %v4021_v54, %s9815_s24  ;;  %v3374_v28 = vpop.permute.xlu2 %3373  ;;  %v4035_v36 = vld.sshfl [vmem:[#allocation1 + $0x38] sm:$0xff pattern:$0x73625140]  ;;  %4185 = vst [vmem:[#allocation1] ss:$4 sm:$0xff] %v10707_v0 }
 0x278   : > { %9494 = vmatmul.msk.bf16.vlgmr.msra.gmra.mxu0 %vm341_vm2, %v10858_v8  ;;  %9495 = vmatmul.msk.bf16.vlgmr.msra.gmra.mxu1 %vm341_vm2, %v10858_v8  ;;  %v3388_v37 = vsel %vm3222_vm10, %v3374_v28, %v3376_v2  ;;  %4188 = vst [vmem:[#allocation1 + $0x20] ss:$4 sm:$0xff] %v10733_v6 }
 0x279   : > { %9496 = vmatmul.msk.bf16.vlgmr.msra.gmra.mxu2 %vm341_vm2, %v10858_v8  ;;  %3287 = vmatpush.bf16.msra.mxu0 %v3240_v24  ;;  %v3382_v16 = vpop.permute.xlu0 %3381 }
 0x27a   : > { %3300 = vmatpush.bf16.msra.mxu1 %v3243_v48  ;;  %3313 = vmatpush.bf16.msra.mxu2 %v3246_v50 }
 0x27b   : > { %9497 = vmatmul.msk.bf16.vlgmr.msra.gmra.mxu3 %vm341_vm2, %v10858_v8 }
 0x27c   : > { %3326 = vmatpush.bf16.msra.mxu3 %v3249_v43  ;;  %v2342_v60 = vpop.f32.mrf.mxu2  ;;  %4051 = vrot.lane.b32.xlu1 %v4035_v36, %s9815_s24 }
 0x27d   : > { %v10907_v63 = vadd.f32 %v2342_v60, %v10788_v27  ;;  %v2318_v62 = vpop.f32.mrf.mxu0  ;;  %v2331_v11 = vpop.f32.mrf.mxu1  ;;  %v3387_v27 = vsel %vm3222_vm10, %v3372_v56, %v3374_v28  ;;  %4047 = vrot.lane.b32.xlu2 %v4031_v44, %s9815_s24 }
 0x27e   : > { %v2428_v47 = vpop.f32.mrf.mxu3  ;;  %v3378_v5 = vpop.permute.xlu1 %3377  ;;  %v3398_v23 = vsel %vm345_vm1, %v3387_v27, 0  ;;  %v4191_v43 = vld.sshfl [vmem:[#allocation1 + $0x8] sm:$0xff pattern:$0x73625140] }
 0x27f   : > { %v10910_v26 = vadd.f32 %v2428_v47, %v10791_v3  ;;  %4043 = vrot.lane.b32.xlu0 %v4027_v14, %s9815_s24  ;;  %v3389_v34 = vsel %vm3222_vm10, %v3376_v2, %v3378_v5  ;;  %v4193_v40 = vld.sshfl [vmem:[#allocation1 + $0x10] sm:$0xff pattern:$0x73625140] }
 0x280   : > { %v3404_v25 = vsel %vm345_vm1, %v3389_v34, 0 }
 0x281   : > { %v3540_v46 = vpop.permute.xlu0 %3539 }
 0x284   : > { %v2344_v61 = vpop.f32.mrf.mxu2  ;;  %4209 = vrot.lane.b32.xlu1 %v4193_v40, %s9816_s29 }
 0x285   : > { %v2441_v3 = vpop.f32.mrf.mxu0  ;;  %v2454_v12 = vpop.f32.mrf.mxu1  ;;  %v4197_v61 = vld.sshfl [vmem:[#allocation1 + $0x20] sm:$0xff pattern:$0x73625140] }
 0x286   : > { %v2430_v7 = vpop.f32.mrf.mxu3  ;;  %v10920_v4 = vadd.f32 %v2441_v3, %v10805_v18  ;;  %v10923_v35 = vadd.f32 %v2454_v12, %v10808_v33  ;;  %v3401_v18 = vsel %vm345_vm1, %v3388_v37, 0  ;;  %v3380_v33 = vpop.permute.xlu2 %3379 }
 0x287   : > { %4049 = vrot.lane.b32.xlu0 %v4033_v38, %s9815_s24  ;;  %v3384_v49 = vpop.permute.xlu1 %3383  ;;  %v3391_v52 = vsel %vm3222_vm10, %v3380_v33, %v3382_v16  ;;  %v4199_v7 = vld.sshfl [vmem:[#allocation1 + $0x28] sm:$0xff pattern:$0x73625140] }
 0x288   : > { %9498 = vmatmul.msk.bf16.vlgmr.msrb.gmra.mxu0 %vm341_vm2, %v10858_v8  ;;  %9499 = vmatmul.msk.bf16.vlgmr.msrb.gmra.mxu1 %vm341_vm2, %v10858_v8  ;;  %v3392_v50 = vsel %vm3222_vm10, %v3382_v16, %v3384_v49  ;;  %v3410_v47 = vsel %vm345_vm1, %v3391_v52, 0 }
 0x289   : > { %9500 = vmatmul.msk.bf16.vlgmr.msrb.gmra.mxu2 %vm341_vm2, %v10928_v29  ;;  %3339 = vmatpush.bf16.msrb.mxu0 %v3252_v21  ;;  %v3546_v27 = vpop.permute.xlu0 %3545 }
 0x28a   : > { %3425 = vmatpush.bf16.msrb.mxu1 %v3398_v23  ;;  %3438 = vmatpush.bf16.msrb.mxu2 %v3401_v18  ;;  %v273_v23 = vld [vmem:[%s13170_s1 + $0x90] sm:$0xf] }
 0x28b   : > { %9501 = vmatmul.msk.bf16.vlgmr.msrb.gmra.mxu3 %vm341_vm2, %v10928_v29 }
 0x28c   : > { %3451 = vmatpush.bf16.msrb.mxu3 %v3404_v25  ;;  %v2467_v39 = vpop.f32.mrf.mxu2  ;;  %4215 = vrot.lane.b32.xlu1 %v4199_v7, %s9816_s29 }
 0x28d   : > { %v10946_v8 = vadd.f32 %v2467_v39, %v10820_v41  ;;  %v2443_v30 = vpop.f32.mrf.mxu0  ;;  %v2456_v51 = vpop.f32.mrf.mxu1  ;;  %v4195_v39 = vld.sshfl [vmem:[#allocation1 + $0x18] sm:$0xff pattern:$0x73625140] }
 0x28e   : > { %v2480_v32 = vpop.f32.mrf.mxu3  ;;  %v3386_v45 = vpop.permute.xlu2 %3385  ;;  %v4189_v51 = vld.sshfl [vmem:[#allocation1] sm:$0xff pattern:$0x73625140] }
 0x28f   : > { %v10949_v13 = vadd.f32 %v2480_v32, %v10823_v42  ;;  %v3390_v42 = vsel %vm3222_vm10, %v3378_v5, %v3380_v33  ;;  %v3393_v58 = vsel %vm3222_vm10, %v3384_v49, %v3386_v45  ;;  %4207 = vrot.lane.b32.xlu0 %v4191_v43, %s9816_s29  ;;  %v3542_v62 = vpop.permute.xlu1 %3541  ;;  %v4203_v32 = vld.sshfl [vmem:[#allocation1 + $0x38] sm:$0xff pattern:$0x73625140]  ;;  %4351 = vst [vmem:[#allocation1] ss:$4 sm:$0xff] %v10707_v0  ;;  %vm7884_vm10 = vcmask 359424  }
 0x290   : > { %v3407_v60 = vsel %vm345_vm1, %v3390_v42, 0  ;;  %4205 = vrot.lane.b32.xlu2 %v4189_v51, %s9816_s29 }
 0x292   : > { %v3552_v17 = vpop.permute.xlu0 %3551 }
 0x294   : > { %v2469_v41 = vpop.f32.mrf.mxu2 }
 0x295   : > { %v2493_v24 = vpop.f32.mrf.mxu0  ;;  %v2506_v48 = vpop.f32.mrf.mxu1 }
 0x296   : > { %v2482_v1 = vpop.f32.mrf.mxu3  ;;  %v10960_v54 = vadd.f32 %v2493_v24, %v10837_v57  ;;  %v10963_v56 = vadd.f32 %v2506_v48, %v10840_v53  ;;  %v3413_v57 = vsel %vm345_vm1, %v3392_v50, 0  ;;  %v3416_v53 = vsel %vm345_vm1, %v3393_v58, 0  ;;  %v3544_v15 = vpop.permute.xlu2 %3543  ;;  %v4358_v52 = vld.sshfl [vmem:[#allocation1 + $0x10] sm:$0xff pattern:$0x73625140] }
 0x297   : > { %4213 = vrot.lane.b32.xlu0 %v4197_v61, %s9816_s29  ;;  %v3548_v3 = vpop.permute.xlu1 %3547  ;;  %v3557_v34 = vsel %vm3555_vm11, %v3542_v62, %v3544_v15  ;;  %v3558_v18 = vsel %vm3555_vm11, %v3544_v15, %v3546_v27  ;;  %v4354_v24 = vld.sshfl [vmem:[#allocation1] sm:$0xff pattern:$0x73625140] }
 0x298   : > { %9502 = vmatmul.msk.bf16.vlgmr.msra.gmra.mxu0 %vm341_vm2, %v10928_v29  ;;  %9503 = vmatmul.msk.bf16.vlgmr.msra.gmra.mxu1 %vm341_vm2, %v10928_v29  ;;  %v3559_v33 = vsel %vm3555_vm11, %v3546_v27, %v3548_v3  ;;  %v3570_v30 = vsel %vm345_vm1, %v3557_v34, 0 }
 0x299   : > { %9504 = vmatmul.msk.bf16.vlgmr.msra.gmra.mxu2 %vm341_vm2, %v10928_v29  ;;  %3464 = vmatpush.bf16.msra.mxu0 %v3407_v60 }
 0x29a   : > { %3477 = vmatpush.bf16.msra.mxu1 %v3410_v47  ;;  %3490 = vmatpush.bf16.msra.mxu2 %v3413_v57 }
 0x29b   : > { %9505 = vmatmul.msk.bf16.vlgmr.msra.gmra.mxu3 %vm341_vm2, %v10928_v29  ;;  %4370 = vrot.lane.b32.xlu1 %v4354_v24, %s9816_s29 }
 0x29c   : > { %3503 = vmatpush.bf16.msra.mxu3 %v3416_v53  ;;  %v2597_v11 = vpop.f32.mrf.mxu2  ;;  %4211 = vrot.lane.b32.xlu2 %v4195_v39, %s9816_s29 }
 0x29d   : > { %v10981_v59 = vadd.f32 %v2597_v11, %v10850_v9  ;;  %v2495_v2 = vpop.f32.mrf.mxu0  ;;  %v2508_v5 = vpop.f32.mrf.mxu1  ;;  %v3556_v9 = vsel %vm3555_vm11, %v3540_v46, %v3542_v62 }
 0x29e   : > { %v2610_v28 = vpop.f32.mrf.mxu3  ;;  %v3567_v44 = vsel %vm345_vm1, %v3556_v9, 0  ;;  %v3550_v36 = vpop.permute.xlu2 %3549 }
 0x29f   : > { %v10984_v14 = vadd.f32 %v2610_v28, %v10853_v10  ;;  %v10990_v10 = vld.sshfl [vmem:[#allocation1 + $0x30] sm:$0xff pattern:$0x73625140]  ;;  %4219 = vrot.lane.b32.xlu0 %v4203_v32, %s9816_s29  ;;  %v3560_v43 = vsel %vm3555_vm11, %v3548_v3, %v3550_v36  ;;  %v3707_v53 = vpop.permute.xlu0 %3706 }
 0x2a0   : > { %4353 = vst [vmem:[#allocation1 + $0x20] ss:$4 sm:$0xff] %v10733_v6  ;;  %v3579_v46 = vsel %vm345_vm1, %v3560_v43, 0 }
 0x2a4   : > { %v2599_v12 = vpop.f32.mrf.mxu2  ;;  %4217 = vrot.lane.b32.xlu2 %v10990_v10, %s9816_s29 }
 0x2a5   : > { %v2623_v22 = vpop.f32.mrf.mxu0  ;;  %v2636_v21 = vpop.f32.mrf.mxu1 }
 0x2a6   : > { %v2612_v37 = vpop.f32.mrf.mxu3  ;;  %v10998_v25 = vadd.f32 %v2623_v22, %v10873_v19  ;;  %v11001_v38 = vadd.f32 %v2636_v21, %v10876_v20  ;;  %v3573_v19 = vsel %vm345_vm1, %v3558_v18, 0  ;;  %v3576_v20 = vsel %vm345_vm1, %v3559_v33, 0  ;;  %v3705_v48 = vpop.permute.xlu2 %3704  ;;  %v247_v33 = vld [vmem:[%s13170_s1 + $0x28] sm:$0xf] }
 0x2a7   : > { %4374 = vrot.lane.b32.xlu0 %v4358_v52, %s9816_s29  ;;  %v3720_v11 = vsel %vm3555_vm11, %v3705_v48, %v3707_v53  ;;  %v4364_v12 = vld.sshfl [vmem:[#allocation1 + $0x28] sm:$0xff pattern:$0x73625140]  ;;  %v4366_v34 = vld.sshfl [vmem:[#allocation1 + $0x30] sm:$0xff pattern:$0x73625140] }
 0x2a8   : > { %9506 = vmatmul.msk.bf16.vlgmr.msrb.gmra.mxu0 %vm341_vm2, %v10928_v29  ;;  %9507 = vmatmul.msk.bf16.vlgmr.msrb.gmra.mxu1 %vm341_vm2, %v273_v23  ;;  %v4362_v48 = vld.sshfl [vmem:[#allocation1 + $0x20] sm:$0xff pattern:$0x73625140] }
 0x2a9   : > { %9508 = vmatmul.msk.bf16.vlgmr.msrb.gmra.mxu2 %vm341_vm2, %v273_v23  ;;  %3594 = vmatpush.bf16.msrb.mxu0 %v3567_v44  ;;  %v3554_v42 = vpop.permute.xlu1 %3553 }
 0x2aa   : > { %3607 = vmatpush.bf16.msrb.mxu1 %v3570_v30  ;;  %3620 = vmatpush.bf16.msrb.mxu2 %v3573_v19  ;;  %v3562_v60 = vsel %vm3555_vm11, %v3552_v17, %v3554_v42  ;;  %v4356_v19 = vld.sshfl [vmem:[#allocation1 + $0x8] sm:$0xff pattern:$0x73625140] }
 0x2ab   : > { %9509 = vmatmul.msk.bf16.vlgmr.msrb.gmra.mxu3 %vm341_vm2, %v273_v23  ;;  %v3585_v28 = vsel %vm345_vm1, %v3562_v60, 0 }
 0x2ac   : > { %3633 = vmatpush.bf16.msrb.mxu3 %v3576_v20  ;;  %v2649_v29 = vpop.f32.mrf.mxu2  ;;  %4372 = vrot.lane.b32.xlu2 %v4356_v19, %s9816_s29 }
 0x2ad   : > { %v11017_v49 = vadd.f32 %v2649_v29, %v10887_v55  ;;  %v2625_v41 = vpop.f32.mrf.mxu0  ;;  %v2638_v1 = vpop.f32.mrf.mxu1  ;;  %v3561_v55 = vsel %vm3555_vm11, %v3550_v36, %v3552_v17 }
 0x2ae   : > { %v2662_v16 = vpop.f32.mrf.mxu3  ;;  %v3582_v62 = vsel %vm345_vm1, %v3561_v55, 0  ;;  %v3711_v37 = vpop.permute.xlu2 %3710  ;;  %v4368_v41 = vld.sshfl [vmem:[#allocation1 + $0x38] sm:$0xff pattern:$0x73625140] }
 0x2af   : > { %v11020_v45 = vadd.f32 %v2662_v16, %v10890_v31  ;;  %4380 = vrot.lane.b32.xlu0 %v4364_v12, %s9816_s29  ;;  %4521 = vst [vmem:[#allocation1 + $0x20] ss:$4 sm:$0xff] %v10733_v6 }
 0x2b1   : > { %v3709_v2 = vpop.permute.xlu1 %3708  ;;  %v3713_v9 = vpop.permute.xlu0 %3712 }
 0x2b2   : > { %v3721_v18 = vsel %vm3555_vm11, %v3707_v53, %v3709_v2  ;;  %v3722_v10 = vsel %vm3555_vm11, %v3709_v2, %v3711_v37  ;;  %v3723_v39 = vsel %vm3555_vm11, %v3711_v37, %v3713_v9 }
 0x2b3   : > { %v3734_v20 = vsel %vm345_vm1, %v3721_v18, 0  ;;  %v3737_v51 = vsel %vm345_vm1, %v3722_v10, 0  ;;  %v3740_v36 = vsel %vm345_vm1, %v3723_v39, 0 }
 0x2b4   : > { %v2651_v50 = vpop.f32.mrf.mxu2  ;;  %4378 = vrot.lane.b32.xlu2 %v4362_v48, %s9816_s29 }
 0x2b5   : > { %v2675_v31 = vpop.f32.mrf.mxu0  ;;  %v2761_v40 = vpop.f32.mrf.mxu1 }
 0x2b6   : > { %v2664_v58 = vpop.f32.mrf.mxu3  ;;  %v11029_v47 = vadd.f32 %v2675_v31, %v10907_v63  ;;  %v11032_v57 = vadd.f32 %v2761_v40, %v10910_v26  ;;  %v3731_v63 = vsel %vm345_vm1, %v3720_v11, 0  ;;  %v4360_v26 = vld.sshfl [vmem:[#allocation1 + $0x18] sm:$0xff pattern:$0x73625140] }
 0x2b7   : > { %4376 = vrot.lane.b32.xlu1 %v4360_v26, %s9816_s29  ;;  %4518 = vst [vmem:[#allocation1] ss:$4 sm:$0xff] %v10707_v0  ;;  %v11100_v26 = vld [vmem:[%s13170_s1 + $0x94] sm:$0xf] }
 0x2b8   : > { %9510 = vmatmul.msk.bf16.vlgmr.msra.gmra.mxu0 %vm341_vm2, %v273_v23  ;;  %9511 = vmatmul.msk.bf16.vlgmr.msra.gmra.mxu1 %vm341_vm2, %v273_v23  ;;  %v4534_v18 = vld.sshfl [vmem:[#allocation1 + $0x30] sm:$0xff pattern:$0x73625140] }
 0x2b9   : > { %9512 = vmatmul.msk.bf16.vlgmr.msra.gmra.mxu2 %vm341_vm2, %v273_v23  ;;  %3646 = vmatpush.bf16.msra.mxu0 %v3579_v46  ;;  %v3715_v22 = vpop.permute.xlu1 %3714 }
 0x2ba   : > { %3659 = vmatpush.bf16.msra.mxu1 %v3582_v62  ;;  %3672 = vmatpush.bf16.msra.mxu2 %v3585_v28  ;;  %v3724_v32 = vsel %vm3555_vm11, %v3713_v9, %v3715_v22  ;;  %v4532_v9 = vld.sshfl [vmem:[#allocation1 + $0x28] sm:$0xff pattern:$0x73625140] }
 0x2bb   : > { %9513 = vmatmul.msk.bf16.vlgmr.msra.gmra.mxu3 %vm341_vm2, %v273_v23  ;;  %v3743_v17 = vsel %vm345_vm1, %v3724_v32, 0 }
 0x2bc   : > { %3758 = vmatpush.bf16.msra.mxu3 %v3731_v63  ;;  %v2774_v5 = vpop.f32.mrf.mxu2  ;;  %4384 = vrot.lane.b32.xlu2 %v4368_v41, %s9816_s29 }
 0x2bd   : > { %v11047_v7 = vadd.f32 %v2774_v5, %v10920_v4  ;;  %v2677_v27 = vpop.f32.mrf.mxu0  ;;  %v2763_v3 = vpop.f32.mrf.mxu1  ;;  %v4530_v5 = vld.sshfl [vmem:[#allocation1 + $0x20] sm:$0xff pattern:$0x73625140] }
 0x2be   : > { %v2787_v61 = vpop.f32.mrf.mxu3  ;;  %v4522_v50 = vld.sshfl [vmem:[#allocation1] sm:$0xff pattern:$0x73625140]  ;;  %v4524_v58 = vld.sshfl [vmem:[#allocation1 + $0x8] sm:$0xff pattern:$0x73625140] }
 0x2bf   : > { %v11050_v15 = vadd.f32 %v2787_v61, %v10923_v35  ;;  %4382 = vrot.lane.b32.xlu1 %v4366_v34, %s9816_s29  ;;  %4538 = vrot.lane.b32.xlu0 %v4522_v50, %s9817_s9  ;;  %v4528_v53 = vld.sshfl [vmem:[#allocation1 + $0x18] sm:$0xff pattern:$0x73625140]  ;;  %v4526_v19 = vld.sshfl [vmem:[#allocation1 + $0x10] sm:$0xff pattern:$0x73625140] }
 0x2c0   : > { %4684 = vst [vmem:[#allocation1] ss:$4 sm:$0xff] %v10707_v0 }
 0x2c4   : > { %v2776_v21 = vpop.f32.mrf.mxu2  ;;  %4542 = vrot.lane.b32.xlu2 %v4526_v19, %s9817_s9 }
 0x2c5   : > { %v2800_v4 = vpop.f32.mrf.mxu0  ;;  %v2813_v35 = vpop.f32.mrf.mxu1 }
 0x2c6   : > { %v2789_v23 = vpop.f32.mrf.mxu3  ;;  %v11062_v44 = vadd.f32 %v2800_v4, %v10946_v8  ;;  %v11065_v30 = vadd.f32 %v2813_v35, %v10949_v13  ;;  %v3717_v8 = vpop.permute.xlu2 %3716  ;;  %v4536_v4 = vld.sshfl [vmem:[#allocation1 + $0x38] sm:$0xff pattern:$0x73625140] }
 0x2c7   : > { %v3719_v13 = vpop.permute.xlu0 %3718  ;;  %4540 = vrot.lane.b32.xlu1 %v4524_v58, %s9817_s9  ;;  %v3873_v43 = vpop.permute.xlu1 %3872  ;;  %v3725_v40 = vsel %vm3555_vm11, %v3715_v22, %v3717_v8  ;;  %4544 = vrot.lane.b32.xlu0 %v4528_v53, %s9817_s9  ;;  %4686 = vst [vmem:[#allocation1 + $0x20] ss:$4 sm:$0xff] %v10733_v6 }
 0x2c8   : > { %9514 = vmatmul.msk.bf16.vlgmr.msrb.gmra.mxu0 %vm341_vm2, %v247_v33  ;;  %9515 = vmatmul.msk.bf16.vlgmr.msrb.gmra.mxu1 %vm341_vm2, %v247_v33  ;;  %v3726_v60 = vsel %vm3555_vm11, %v3717_v8, %v3719_v13  ;;  %v3746_v61 = vsel %vm345_vm1, %v3725_v40, 0  ;;  %vm8217_vm11 = vcmask 293888  }
 0x2c9   : > { %9516 = vmatmul.msk.bf16.vlgmr.msrb.gmra.mxu2 %vm341_vm2, %v247_v33  ;;  %3771 = vmatpush.bf16.msrb.mxu0 %v3734_v20  ;;  %v3749_v27 = vsel %vm345_vm1, %v3726_v60, 0 }
 0x2ca   : > { %3784 = vmatpush.bf16.msrb.mxu1 %v3737_v51  ;;  %3797 = vmatpush.bf16.msrb.mxu2 %v3740_v36 }
 0x2cb   : > { %9517 = vmatmul.msk.bf16.vlgmr.msrb.gmra.mxu3 %vm341_vm2, %v247_v33 }
 0x2cc   : > { %3810 = vmatpush.bf16.msrb.mxu3 %v3743_v17  ;;  %v2826_v29 = vpop.f32.mrf.mxu2  ;;  %4548 = vrot.lane.b32.xlu2 %v4532_v9, %s9817_s9 }
 0x2cd   : > { %v11078_v1 = vadd.f32 %v2826_v29, %v10960_v54  ;;  %v2802_v52 = vpop.f32.mrf.mxu0  ;;  %v2815_v24 = vpop.f32.mrf.mxu1 }
 0x2ce   : > { %v2839_v16 = vpop.f32.mrf.mxu3  ;;  %v3875_v55 = vpop.permute.xlu2 %3874  ;;  %v4689_v52 = vld.sshfl [vmem:[#allocation1 + $0x8] sm:$0xff pattern:$0x73625140] }
 0x2cf   : > { %v11081_v42 = vadd.f32 %v2839_v16, %v10963_v56  ;;  %v3877_v54 = vpop.permute.xlu0 %3876  ;;  %v3889_v11 = vsel %vm3888_vm12, %v3873_v43, %v3875_v55  ;;  %4546 = vrot.lane.b32.xlu1 %v4530_v5, %s9817_s9  ;;  %v3879_v3 = vpop.permute.xlu1 %3878  ;;  %4550 = vrot.lane.b32.xlu0 %v4534_v18, %s9817_s9  ;;  %v4691_v43 = vld.sshfl [vmem:[#allocation1 + $0x10] sm:$0xff pattern:$0x73625140]  ;;  %v11169_v5 = vld [vmem:[%s13170_s1 + $0x2c] sm:$0xf] }
 0x2d0   : > { %v3890_v28 = vsel %vm3888_vm12, %v3875_v55, %v3877_v54 }
 0x2d4   : > { %v2828_v56 = vpop.f32.mrf.mxu2 }
 0x2d5   : > { %v2930_v46 = vpop.f32.mrf.mxu0  ;;  %v2943_v62 = vpop.f32.mrf.mxu1 }
 0x2d6   : > { %v2841_v31 = vpop.f32.mrf.mxu3  ;;  %v11092_v2 = vadd.f32 %v2930_v46, %v10981_v59  ;;  %v11095_v63 = vadd.f32 %v2943_v62, %v10984_v14  ;;  %v3900_v59 = vsel %vm345_vm1, %v3889_v11, 0  ;;  %v3903_v14 = vsel %vm345_vm1, %v3890_v28, 0  ;;  %v3881_v10 = vpop.permute.xlu2 %3880 }
 0x2d7   : > { %4552 = vrot.lane.b32.xlu1 %v4536_v4, %s9817_s9  ;;  %v3883_v35 = vpop.permute.xlu0 %3882  ;;  %4705 = vrot.lane.b32.xlu0 %v4689_v52, %s9817_s9  ;;  %v4695_v31 = vld.sshfl [vmem:[#allocation1 + $0x20] sm:$0xff pattern:$0x73625140] }
 0x2d8   : > { %9518 = vmatmul.msk.bf16.vlgmr.msra.gmra.mxu0 %vm341_vm2, %v247_v33  ;;  %9519 = vmatmul.msk.bf16.vlgmr.msra.gmra.mxu1 %vm341_vm2, %v247_v33  ;;  %v3893_v36 = vsel %vm3888_vm12, %v3881_v10, %v3883_v35 }
 0x2d9   : > { %9520 = vmatmul.msk.bf16.vlgmr.msra.gmra.mxu2 %vm341_vm2, %v247_v33  ;;  %3823 = vmatpush.bf16.msra.mxu0 %v3746_v61  ;;  %v3885_v33 = vpop.permute.xlu1 %3884  ;;  %v3912_v16 = vsel %vm345_vm1, %v3893_v36, 0 }
 0x2da   : > { %3836 = vmatpush.bf16.msra.mxu1 %v3749_v27  ;;  %3927 = vmatpush.bf16.msra.mxu2 %v3900_v59  ;;  %v3894_v8 = vsel %vm3888_vm12, %v3883_v35, %v3885_v33  ;;  %v4697_v27 = vld.sshfl [vmem:[#allocation1 + $0x28] sm:$0xff pattern:$0x73625140]  ;;  %v4701_v35 = vld.sshfl [vmem:[#allocation1 + $0x38] sm:$0xff pattern:$0x73625140] }
 0x2db   : > { %9521 = vmatmul.msk.bf16.vlgmr.msra.gmra.mxu3 %vm341_vm2, %v11100_v26  ;;  %v3915_v0 = vsel %vm345_vm1, %v3894_v8, 0 }
 0x2dc   : > { %3940 = vmatpush.bf16.msra.mxu3 %v3903_v14  ;;  %v2956_v12 = vpop.f32.mrf.mxu2 }
 0x2dd   : > { %v11115_v34 = vadd.f32 %v2956_v12, %v10998_v25  ;;  %v2932_v21 = vpop.f32.mrf.mxu0  ;;  %v2945_v23 = vpop.f32.mrf.mxu1  ;;  %v3891_v25 = vsel %vm3888_vm12, %v3877_v54, %v3879_v3 }
 0x2de   : > { %v2969_v37 = vpop.f32.mrf.mxu3  ;;  %v3906_v13 = vsel %vm345_vm1, %v3891_v25, 0  ;;  %v3887_v41 = vpop.permute.xlu2 %3886 }
 0x2df   : > { %v11118_v22 = vadd.f32 %v2969_v37, %v11001_v38  ;;  %v3892_v38 = vsel %vm3888_vm12, %v3879_v3, %v3881_v10  ;;  %4707 = vrot.lane.b32.xlu1 %v4691_v43, %s9817_s9  ;;  %4711 = vrot.lane.b32.xlu0 %v4695_v31, %s9817_s9 }
 0x2e0   : > { %v3909_v29 = vsel %vm345_vm1, %v3892_v38, 0 }
 0x2e1   : > { %v4040_v55 = vpop.permute.xlu1 %4039 }
 0x2e4   : > { %v2958_v39 = vpop.f32.mrf.mxu2 }
 0x2e5   : > { %v2982_v20 = vpop.f32.mrf.mxu0  ;;  %v2995_v51 = vpop.f32.mrf.mxu1 }
 0x2e6   : > { %v2971_v32 = vpop.f32.mrf.mxu3  ;;  %v11130_v6 = vadd.f32 %v2982_v20, %v11017_v49  ;;  %v11133_v17 = vadd.f32 %v2995_v51, %v11020_v45  ;;  %v4042_v56 = vpop.permute.xlu2 %4041 }
 0x2e7   : > { %v4054_v62 = vsel %vm3888_vm12, %v4040_v55, %v4042_v56  ;;  %4713 = vrot.lane.b32.xlu1 %v4697_v27, %s9817_s9  ;;  %4717 = vrot.lane.b32.xlu0 %v4701_v35, %s9817_s9  ;;  %v4687_v32 = vld.sshfl [vmem:[#allocation1] sm:$0xff pattern:$0x73625140] }
 0x2e8   : > { %9522 = vmatmul.msk.bf16.vlgmr.msrb.gmra.mxu0 %vm341_vm2, %v11100_v26  ;;  %9523 = vmatmul.msk.bf16.vlgmr.msrb.gmra.mxu1 %vm341_vm2, %v11100_v26 }
 0x2e9   : > { %9524 = vmatmul.msk.bf16.vlgmr.msrb.gmra.mxu2 %vm341_vm2, %v11100_v26  ;;  %3953 = vmatpush.bf16.msrb.mxu0 %v3906_v13  ;;  %v4038_v54 = vpop.permute.xlu0 %4037  ;;  %v4046_v12 = vpop.permute.xlu1 %4045 }
 0x2ea   : > { %3966 = vmatpush.bf16.msrb.mxu1 %v3909_v29  ;;  %3979 = vmatpush.bf16.msrb.mxu2 %v3912_v16 }
 0x2eb   : > { %9525 = vmatmul.msk.bf16.vlgmr.msrb.gmra.mxu3 %vm341_vm2, %v11100_v26  ;;  %4703 = vrot.lane.b32.xlu2 %v4687_v32, %s9817_s9 }
 0x2ec   : > { %3992 = vmatpush.bf16.msrb.mxu3 %v3915_v0  ;;  %v3008_v49 = vpop.f32.mrf.mxu2 }
 0x2ed   : > { %v11148_v24 = vadd.f32 %v3008_v49, %v11029_v47  ;;  %v2984_v50 = vpop.f32.mrf.mxu0  ;;  %v2997_v58 = vpop.f32.mrf.mxu1  ;;  %v3895_v47 = vsel %vm3888_vm12, %v3885_v33, %v3887_v41  ;;  %v11192_v33 = vld [vmem:[%s9876_s23] sm:$0xff] }
 0x2ee   : > { %v3094_v45 = vpop.f32.mrf.mxu3  ;;  %v3918_v59 = vsel %vm345_vm1, %v3895_v47, 0  ;;  %v4048_v37 = vpop.permute.xlu2 %4047  ;;  %v4699_v50 = vld.sshfl [vmem:[#allocation1 + $0x30] sm:$0xff pattern:$0x73625140] }
 0x2ef   : > { %v11151_v48 = vadd.f32 %v3094_v45, %v11032_v57  ;;  %v4053_v57 = vsel %vm3888_vm12, %v4038_v54, %v4040_v55 }
 0x2f0   : > { %v4064_v14 = vsel %vm345_vm1, %v4053_v57, 0 }
 0x2f1   : > { %v4044_v61 = vpop.permute.xlu0 %4043  ;;  %v4052_v25 = vpop.permute.xlu1 %4051 }
 0x2f2   : > { %v4055_v3 = vsel %vm3888_vm12, %v4042_v56, %v4044_v61  ;;  %v4056_v19 = vsel %vm3888_vm12, %v4044_v61, %v4046_v12 }
 0x2f3   : > { %v4073_v0 = vsel %vm345_vm1, %v4056_v19, 0 }
 0x2f4   : > { %v3010_v40 = vpop.f32.mrf.mxu2 }
 0x2f5   : > { %v3107_v53 = vpop.f32.mrf.mxu0  ;;  %v3120_v46 = vpop.f32.mrf.mxu1 }
 0x2f6   : > { %v3096_v60 = vpop.f32.mrf.mxu3  ;;  %v11161_v11 = vadd.f32 %v3107_v53, %v11047_v7  ;;  %v11164_v28 = vadd.f32 %v3120_v46, %v11050_v15  ;;  %v4067_v7 = vsel %vm345_vm1, %v4054_v62, 0  ;;  %v4070_v15 = vsel %vm345_vm1, %v4055_v3, 0  ;;  %v4206_v41 = vpop.permute.xlu2 %4205 }
 0x2f7   : > { %v11229_v60 = vld [vmem:[%s9876_s23 + $0x8] sm:$0xff] }
 0x2f8   : > { %9526 = vmatmul.msk.bf16.vlgmr.msra.gmra.mxu0 %vm341_vm2, %v11100_v26  ;;  %9527 = vmatmul.msk.bf16.vlgmr.msra.gmra.mxu1 %vm341_vm2, %v11100_v26  ;;  %v4693_v26 = vld.sshfl [vmem:[#allocation1 + $0x18] sm:$0xff pattern:$0x73625140]  ;;  %4854 = vst [vmem:[#allocation1 + $0x20] ss:$4 sm:$0xff] %v11229_v60 }
 0x2f9   : > { %9528 = vmatmul.msk.bf16.vlgmr.msra.gmra.mxu2 %vm341_vm2, %v11169_v5  ;;  %4005 = vmatpush.bf16.msra.mxu0 %v3918_v59  ;;  %v4050_v39 = vpop.permute.xlu0 %4049  ;;  %4851 = vst [vmem:[#allocation1] ss:$4 sm:$0xff] %v11192_v33  ;;  %v4210_v57 = vpop.permute.xlu1 %4209  ;;  %v275_v59 = vld [vmem:[%s13170_s1 + $0x98] sm:$0xf] }
 0x2fa   : > { %4091 = vmatpush.bf16.msra.mxu1 %v4064_v14  ;;  %4104 = vmatpush.bf16.msra.mxu2 %v4067_v7  ;;  %v4058_v36 = vsel %vm3888_vm12, %v4048_v37, %v4050_v39  ;;  %v4059_v8 = vsel %vm3888_vm12, %v4050_v39, %v4052_v25 }
 0x2fb   : > { %9529 = vmatmul.msk.bf16.vlgmr.msra.gmra.mxu3 %vm341_vm2, %v11169_v5  ;;  %4709 = vrot.lane.b32.xlu2 %v4693_v26, %s9817_s9 }
 0x2fc   : > { %4117 = vmatpush.bf16.msra.mxu3 %v4070_v15  ;;  %v3133_v9 = vpop.f32.mrf.mxu2 }
 0x2fd   : > { %v11186_v23 = vadd.f32 %v3133_v9, %v11062_v44  ;;  %v3109_v10 = vpop.f32.mrf.mxu0  ;;  %v3122_v4 = vpop.f32.mrf.mxu1 }
 0x2fe   : > { %v3146_v21 = vpop.f32.mrf.mxu3  ;;  %v4212_v47 = vpop.permute.xlu2 %4211 }
 0x2ff   : > { %v11189_v18 = vadd.f32 %v3146_v21, %v11065_v30  ;;  %v4057_v30 = vsel %vm3888_vm12, %v4046_v12, %v4048_v37  ;;  %v4224_v14 = vsel %vm4221_vm13, %v4210_v57, %v4212_v47  ;;  %v4865_v7 = vld.sshfl [vmem:[#allocation1 + $0x28] sm:$0xff pattern:$0x73625140]  ;;  %v4867_v37 = vld.sshfl [vmem:[#allocation1 + $0x30] sm:$0xff pattern:$0x73625140] }
 0x300   : > { %v4855_v16 = vld.sshfl [vmem:[#allocation1] sm:$0xff pattern:$0x73625140]  ;;  %v4076_v49 = vsel %vm345_vm1, %v4057_v30, 0  ;;  %vm8550_vm12 = vcmask 285696  }
 0x301   : > { %4871 = vrot.lane.b32.xlu1 %v4855_v16, %s9818_s14  ;;  %v4208_v45 = vpop.permute.xlu0 %4207  ;;  %v4859_v52 = vld.sshfl [vmem:[#allocation1 + $0x10] sm:$0xff pattern:$0x73625140]  ;;  %v4861_v54 = vld.sshfl [vmem:[#allocation1 + $0x18] sm:$0xff pattern:$0x73625140]  ;;  %v4216_v4 = vpop.permute.xlu1 %4215 }
 0x302   : > { %4875 = vrot.lane.b32.xlu0 %v4859_v52, %s9818_s14  ;;  %v4222_v62 = vsel %vm4221_vm13, %v4206_v41, %v4208_v45  ;;  %v4863_v41 = vld.sshfl [vmem:[#allocation1 + $0x20] sm:$0xff pattern:$0x73625140] }
 0x303   : > { %4715 = vrot.lane.b32.xlu2 %v4699_v50, %s9817_s9  ;;  %v4233_v9 = vsel %vm345_vm1, %v4222_v62, 0  ;;  %s9373_s9 = sshll.u32 %s13176_s19, 3 }
 0x304   : > { %v3135_v38 = vpop.f32.mrf.mxu2 }
 0x305   : > { %v3159_v20 = vpop.f32.mrf.mxu0  ;;  %v3172_v51 = vpop.f32.mrf.mxu1 }
 0x306   : > { %v3148_v44 = vpop.f32.mrf.mxu3  ;;  %v11202_v13 = vadd.f32 %v3159_v20, %v11078_v1  ;;  %v11205_v29 = vadd.f32 %v3172_v51, %v11081_v42  ;;  %v4079_v1 = vsel %vm345_vm1, %v4058_v36, 0  ;;  %v4082_v42 = vsel %vm345_vm1, %v4059_v8, 0  ;;  %v4218_v10 = vpop.permute.xlu2 %4217  ;;  %v4869_v20 = vld.sshfl [vmem:[#allocation1 + $0x38] sm:$0xff pattern:$0x73625140] }
 0x307   : > { %5019 = vst [vmem:[#allocation1 + $0x20] ss:$4 sm:$0xff] %v11229_v60 }
 0x308   : > { %9530 = vmatmul.msk.bf16.vlgmr.msrb.gmra.mxu0 %vm341_vm2, %v11169_v5  ;;  %9531 = vmatmul.msk.bf16.vlgmr.msrb.gmra.mxu1 %vm341_vm2, %v11169_v5 }
 0x309   : > { %9532 = vmatmul.msk.bf16.vlgmr.msrb.gmra.mxu2 %vm341_vm2, %v11169_v5  ;;  %4130 = vmatpush.bf16.msrb.mxu0 %v4073_v0  ;;  %v4214_v53 = vpop.permute.xlu0 %4213 }
 0x30a   : > { %4143 = vmatpush.bf16.msrb.mxu1 %v4076_v49  ;;  %4156 = vmatpush.bf16.msrb.mxu2 %v4079_v1  ;;  %v4225_v3 = vsel %vm4221_vm13, %v4212_v47, %v4214_v53  ;;  %v4226_v16 = vsel %vm4221_vm13, %v4214_v53, %v4216_v4 }
 0x30b   : > { %9533 = vmatmul.msk.bf16.vlgmr.msrb.gmra.mxu3 %vm341_vm2, %v11169_v5  ;;  %4877 = vrot.lane.b32.xlu1 %v4861_v54, %s9818_s14  ;;  %v4242_v26 = vsel %vm345_vm1, %v4225_v3, 0  ;;  %v4245_v52 = vsel %vm345_vm1, %v4226_v16, 0 }
 0x30c   : > { %4169 = vmatpush.bf16.msrb.mxu3 %v4082_v42  ;;  %v3263_v58 = vpop.f32.mrf.mxu2  ;;  %4881 = vrot.lane.b32.xlu0 %v4865_v7, %s9818_s14 }
 0x30d   : > { %v11223_v55 = vadd.f32 %v3263_v58, %v11092_v2  ;;  %v3161_v31 = vpop.f32.mrf.mxu0  ;;  %v3174_v40 = vpop.f32.mrf.mxu1 }
 0x30e   : > { %v3276_v43 = vpop.f32.mrf.mxu3  ;;  %v4373_v51 = vpop.permute.xlu2 %4372  ;;  %v5028_v47 = vld.sshfl [vmem:[#allocation1 + $0x20] sm:$0xff pattern:$0x73625140] }
 0x30f   : > { %v11226_v56 = vadd.f32 %v3276_v43, %v11095_v63  ;;  %v4223_v63 = vsel %vm4221_vm13, %v4208_v45, %v4210_v57  ;;  %v4371_v45 = vpop.permute.xlu1 %4370 }
 0x310   : > { %v4236_v21 = vsel %vm345_vm1, %v4223_v63, 0  ;;  %v4386_v58 = vsel %vm4221_vm13, %v4371_v45, %v4373_v51 }
 0x311   : > { %v4220_v44 = vpop.permute.xlu0 %4219 }
 0x312   : > { %v4228_v49 = vsel %vm4221_vm13, %v4218_v10, %v4220_v44 }
 0x313   : > { %4883 = vrot.lane.b32.xlu1 %v4867_v37, %s9818_s14  ;;  %v4251_v43 = vsel %vm345_vm1, %v4228_v49, 0  ;;  %v5030_v49 = vld.sshfl [vmem:[#allocation1 + $0x28] sm:$0xff pattern:$0x73625140] }
 0x314   : > { %v3265_v46 = vpop.f32.mrf.mxu2 }
 0x315   : > { %v3289_v61 = vpop.f32.mrf.mxu0  ;;  %v3302_v27 = vpop.f32.mrf.mxu1 }
 0x316   : > { %v3278_v2 = vpop.f32.mrf.mxu3  ;;  %v11242_v15 = vadd.f32 %v3289_v61, %v11115_v34  ;;  %v11245_v12 = vadd.f32 %v3302_v27, %v11118_v22  ;;  %v4239_v34 = vsel %vm345_vm1, %v4224_v14, 0  ;;  %v4857_v22 = vld.sshfl [vmem:[#allocation1 + $0x8] sm:$0xff pattern:$0x73625140]  ;;  %v4379_v63 = vpop.permute.xlu2 %4378 }
 0x317   : > { %5017 = vst [vmem:[#allocation1] ss:$4 sm:$0xff] %v11192_v33  ;;  %4873 = vrot.lane.b32.xlu2 %v4857_v22, %s9818_s14  ;;  %v5032_v61 = vld.sshfl [vmem:[#allocation1 + $0x30] sm:$0xff pattern:$0x73625140] }
 0x318   : > { %9534 = vmatmul.msk.bf16.vlgmr.msra.gmra.mxu0 %vm341_vm2, %v11169_v5  ;;  %9535 = vmatmul.msk.bf16.vlgmr.msra.gmra.mxu1 %vm341_vm2, %v275_v59 }
 0x319   : > { %9536 = vmatmul.msk.bf16.vlgmr.msra.gmra.mxu2 %vm341_vm2, %v275_v59  ;;  %4260 = vmatpush.bf16.msra.mxu0 %v4233_v9  ;;  %v4375_v54 = vpop.permute.xlu0 %4374  ;;  %v249_v9 = vld [vmem:[%s13170_s1 + $0x30] sm:$0xf] }
 0x31a   : > { %4273 = vmatpush.bf16.msra.mxu1 %v4236_v21  ;;  %4286 = vmatpush.bf16.msra.mxu2 %v4239_v34  ;;  %v4387_v3 = vsel %vm4221_vm13, %v4373_v51, %v4375_v54 }
 0x31b   : > { %9537 = vmatmul.msk.bf16.vlgmr.msra.gmra.mxu3 %vm341_vm2, %v275_v59 }
 0x31c   : > { %4299 = vmatpush.bf16.msra.mxu3 %v4242_v26  ;;  %v3315_v5 = vpop.f32.mrf.mxu2 }
 0x31d   : > { %v11261_v39 = vadd.f32 %v3315_v5, %v11130_v6  ;;  %v3291_v25 = vpop.f32.mrf.mxu0  ;;  %v3304_v38 = vpop.f32.mrf.mxu1  ;;  %v4227_v6 = vsel %vm4221_vm13, %v4216_v4, %v4218_v10  ;;  %v4400_v4 = vsel %vm345_vm1, %v4387_v3, 0 }
 0x31e   : > { %v3328_v35 = vpop.f32.mrf.mxu3  ;;  %v5022_v19 = vld.sshfl [vmem:[#allocation1 + $0x8] sm:$0xff pattern:$0x73625140]  ;;  %v5020_v30 = vld.sshfl [vmem:[#allocation1] sm:$0xff pattern:$0x73625140] }
 0x31f   : > { %v11264_v32 = vadd.f32 %v3328_v35, %v11133_v17  ;;  %5038 = vrot.lane.b32.xlu1 %v5022_v19, %s9818_s14  ;;  %5036 = vrot.lane.b32.xlu0 %v5020_v30, %s9818_s14  ;;  %v4248_v50 = vsel %vm345_vm1, %v4227_v6, 0  ;;  %v5024_v10 = vld.sshfl [vmem:[#allocation1 + $0x10] sm:$0xff pattern:$0x73625140] }
 0x320   : > { %4879 = vrot.lane.b32.xlu2 %v4863_v41, %s9818_s14 }
 0x321   : > { %v4381_v27 = vpop.permute.xlu0 %4380 }
 0x322   : > { %v4390_v34 = vsel %vm4221_vm13, %v4379_v63, %v4381_v27 }
 0x323   : > { %v4409_v25 = vsel %vm345_vm1, %v4390_v34, 0 }
 0x324   : > { %v3317_v36 = vpop.f32.mrf.mxu2 }
 0x325   : > { %v3341_v17 = vpop.f32.mrf.mxu0  ;;  %v3427_v0 = vpop.f32.mrf.mxu1 }
 0x326   : > { %v3330_v8 = vpop.f32.mrf.mxu3  ;;  %v11274_v1 = vadd.f32 %v3341_v17, %v11148_v24  ;;  %v11277_v42 = vadd.f32 %v3427_v0, %v11151_v48  ;;  %v4397_v24 = vsel %vm345_vm1, %v4386_v58, 0  ;;  %v5026_v48 = vld.sshfl [vmem:[#allocation1 + $0x18] sm:$0xff pattern:$0x73625140] }
 0x327   : > { %5042 = vrot.lane.b32.xlu0 %v5026_v48, %s9818_s14  ;;  %5044 = vrot.lane.b32.xlu1 %v5028_v47, %s9818_s14  ;;  %5184 = vst [vmem:[#allocation1] ss:$4 sm:$0xff] %v11192_v33 }
 0x328   : > { %9538 = vmatmul.msk.bf16.vlgmr.msrb.gmra.mxu0 %vm341_vm2, %v275_v59  ;;  %9539 = vmatmul.msk.bf16.vlgmr.msrb.gmra.mxu1 %vm341_vm2, %v275_v59 }
 0x329   : > { %9540 = vmatmul.msk.bf16.vlgmr.msrb.gmra.mxu2 %vm341_vm2, %v275_v59  ;;  %4312 = vmatpush.bf16.msrb.mxu0 %v4245_v52  ;;  %v4377_v62 = vpop.permute.xlu1 %4376 }
 0x32a   : > { %4325 = vmatpush.bf16.msrb.mxu1 %v4248_v50  ;;  %4338 = vmatpush.bf16.msrb.mxu2 %v4251_v43  ;;  %v4389_v21 = vsel %vm4221_vm13, %v4377_v62, %v4379_v63 }
 0x32b   : > { %9541 = vmatmul.msk.bf16.vlgmr.msrb.gmra.mxu3 %vm341_vm2, %v275_v59  ;;  %4885 = vrot.lane.b32.xlu2 %v4869_v20, %s9818_s14  ;;  %v4406_v35 = vsel %vm345_vm1, %v4389_v21, 0 }
 0x32c   : > { %4424 = vmatpush.bf16.msrb.mxu3 %v4397_v24  ;;  %v3440_v31 = vpop.f32.mrf.mxu2  ;;  %v11345_v24 = vld [vmem:[%s13170_s1 + $0x9c] sm:$0xf] }
 0x32d   : > { %v11290_v57 = vadd.f32 %v3440_v31, %v11161_v11  ;;  %v3343_v46 = vpop.f32.mrf.mxu0  ;;  %v3429_v2 = vpop.f32.mrf.mxu1  ;;  %v4388_v11 = vsel %vm4221_vm13, %v4375_v54, %v4377_v62 }
 0x32e   : > { %v3453_v40 = vpop.f32.mrf.mxu3  ;;  %v4403_v5 = vsel %vm345_vm1, %v4388_v11, 0  ;;  %v5192_v36 = vld.sshfl [vmem:[#allocation1 + $0x10] sm:$0xff pattern:$0x73625140] }
 0x32f   : > { %v11293_v53 = vadd.f32 %v3453_v40, %v11164_v28  ;;  %5048 = vrot.lane.b32.xlu0 %v5032_v61, %s9818_s14  ;;  %v5034_v28 = vld.sshfl [vmem:[#allocation1 + $0x38] sm:$0xff pattern:$0x73625140]  ;;  %v5190_v8 = vld.sshfl [vmem:[#allocation1 + $0x8] sm:$0xff pattern:$0x73625140] }
 0x330   : > { %5050 = vrot.lane.b32.xlu1 %v5034_v28, %s9818_s14  ;;  %5187 = vst [vmem:[#allocation1 + $0x20] ss:$4 sm:$0xff] %v11229_v60  ;;  %v5194_v47 = vld.sshfl [vmem:[#allocation1 + $0x18] sm:$0xff pattern:$0x73625140] }
 0x331   : > { %v4539_v16 = vpop.permute.xlu0 %4538  ;;  %v5188_v11 = vld.sshfl [vmem:[#allocation1] sm:$0xff pattern:$0x73625140] }
 0x332   : > { %5350 = vst [vmem:[#allocation1] ss:$4 sm:$0xff] %v11192_v33 }
 0x333   : > { %5040 = vrot.lane.b32.xlu2 %v5024_v10, %s9818_s14 }
 0x334   : > { %v3442_v59 = vpop.f32.mrf.mxu2 }
 0x335   : > { %v3466_v7 = vpop.f32.mrf.mxu0  ;;  %v3479_v37 = vpop.f32.mrf.mxu1 }
 0x336   : > { %v3455_v14 = vpop.f32.mrf.mxu3  ;;  %v11307_v26 = vadd.f32 %v3466_v7, %v11186_v23  ;;  %v11310_v22 = vadd.f32 %v3479_v37, %v11189_v18  ;;  %v4383_v23 = vpop.permute.xlu1 %4382 }
 0x337   : > { %v4385_v18 = vpop.permute.xlu2 %4384  ;;  %5206 = vrot.lane.b32.xlu0 %v5190_v8, %s9819_s21  ;;  %v5196_v62 = vld.sshfl [vmem:[#allocation1 + $0x20] sm:$0xff pattern:$0x73625140]  ;;  %v5198_v63 = vld.sshfl [vmem:[#allocation1 + $0x28] sm:$0xff pattern:$0x73625140] }
 0x338   : > { %9542 = vmatmul.msk.bf16.vlgmr.msra.gmra.mxu0 %vm341_vm2, %v249_v9  ;;  %9543 = vmatmul.msk.bf16.vlgmr.msra.gmra.mxu1 %vm341_vm2, %v249_v9  ;;  %v5202_v37 = vld.sshfl [vmem:[#allocation1 + $0x38] sm:$0xff pattern:$0x73625140] }
 0x339   : > { %9544 = vmatmul.msk.bf16.vlgmr.msra.gmra.mxu2 %vm341_vm2, %v249_v9  ;;  %4437 = vmatpush.bf16.msra.mxu0 %v4400_v4 }
 0x33a   : > { %4450 = vmatpush.bf16.msra.mxu1 %v4403_v5  ;;  %4463 = vmatpush.bf16.msra.mxu2 %v4406_v35 }
 0x33b   : > { %9545 = vmatmul.msk.bf16.vlgmr.msra.gmra.mxu3 %vm341_vm2, %v249_v9  ;;  %5208 = vrot.lane.b32.xlu1 %v5192_v36, %s9819_s21 }
 0x33c   : > { %4476 = vmatpush.bf16.msra.mxu3 %v4409_v25  ;;  %v3492_v38 = vpop.f32.mrf.mxu2  ;;  %5046 = vrot.lane.b32.xlu2 %v5030_v49, %s9818_s14  ;;  %v5353_v25 = vld.sshfl [vmem:[#allocation1] sm:$0xff pattern:$0x73625140] }
 0x33d   : > { %v11323_v19 = vadd.f32 %v3492_v38, %v11202_v13  ;;  %v3468_v20 = vpop.f32.mrf.mxu0  ;;  %v3481_v51 = vpop.f32.mrf.mxu1  ;;  %v4391_v13 = vsel %vm4221_vm13, %v4381_v27, %v4383_v23 }
 0x33e   : > { %v3505_v44 = vpop.f32.mrf.mxu3  ;;  %v4541_v41 = vpop.permute.xlu1 %4540  ;;  %v4412_v48 = vsel %vm345_vm1, %v4391_v13, 0  ;;  %v5357_v51 = vld.sshfl [vmem:[#allocation1 + $0x10] sm:$0xff pattern:$0x73625140] }
 0x33f   : > { %v11326_v30 = vadd.f32 %v3505_v44, %v11205_v29  ;;  %v4543_v6 = vpop.permute.xlu2 %4542  ;;  %v4392_v29 = vsel %vm4221_vm13, %v4383_v23, %v4385_v18  ;;  %v4555_v50 = vsel %vm4554_vm14, %v4539_v16, %v4541_v41  ;;  %5212 = vrot.lane.b32.xlu0 %v5196_v62, %s9819_s21  ;;  %vm8883_vm13 = vcmask 277504  }
 0x340   : > { %v4556_v58 = vsel %vm4554_vm14, %v4541_v41, %v4543_v6  ;;  %v4415_v31 = vsel %vm345_vm1, %v4392_v29, 0  ;;  %v4566_v40 = vsel %vm345_vm1, %v4555_v50, 0 }
 0x343   : > { %5214 = vrot.lane.b32.xlu1 %v5198_v63, %s9819_s21 }
 0x344   : > { %v3494_v17 = vpop.f32.mrf.mxu2  ;;  %5204 = vrot.lane.b32.xlu2 %v5188_v11, %s9819_s21 }
 0x345   : > { %v3596_v45 = vpop.f32.mrf.mxu0  ;;  %v3609_v52 = vpop.f32.mrf.mxu1 }
 0x346   : > { %v3507_v0 = vpop.f32.mrf.mxu3  ;;  %v11337_v43 = vadd.f32 %v3596_v45, %v11223_v55  ;;  %v11340_v54 = vadd.f32 %v3609_v52, %v11226_v56  ;;  %v4569_v55 = vsel %vm345_vm1, %v4556_v58, 0  ;;  %v4545_v56 = vpop.permute.xlu0 %4544  ;;  %v5200_v58 = vld.sshfl [vmem:[#allocation1 + $0x30] sm:$0xff pattern:$0x73625140] }
 0x347   : > { %v4547_v3 = vpop.permute.xlu1 %4546  ;;  %v4549_v28 = vpop.permute.xlu2 %4548  ;;  %5218 = vrot.lane.b32.xlu0 %v5202_v37, %s9819_s21  ;;  %v5359_v0 = vld.sshfl [vmem:[#allocation1 + $0x18] sm:$0xff pattern:$0x73625140]  ;;  %5352 = vst [vmem:[#allocation1 + $0x20] ss:$4 sm:$0xff] %v11229_v60 }
 0x348   : > { %9546 = vmatmul.msk.bf16.vlgmr.msrb.gmra.mxu0 %vm341_vm2, %v249_v9  ;;  %9547 = vmatmul.msk.bf16.vlgmr.msrb.gmra.mxu1 %vm341_vm2, %v249_v9  ;;  %v4558_v21 = vsel %vm4554_vm14, %v4545_v56, %v4547_v3  ;;  %v4559_v4 = vsel %vm4554_vm14, %v4547_v3, %v4549_v28 }
 0x349   : > { %9548 = vmatmul.msk.bf16.vlgmr.msrb.gmra.mxu2 %vm341_vm2, %v249_v9  ;;  %4489 = vmatpush.bf16.msrb.mxu0 %v4412_v48  ;;  %v4575_v38 = vsel %vm345_vm1, %v4558_v21, 0 }
 0x34a   : > { %4502 = vmatpush.bf16.msrb.mxu1 %v4415_v31  ;;  %4593 = vmatpush.bf16.msrb.mxu2 %v4566_v40 }
 0x34b   : > { %9549 = vmatmul.msk.bf16.vlgmr.msrb.gmra.mxu3 %vm341_vm2, %v11345_v24  ;;  %5369 = vrot.lane.b32.xlu1 %v5353_v25, %s9819_s21 }
 0x34c   : > { %4606 = vmatpush.bf16.msrb.mxu3 %v4569_v55  ;;  %v3622_v46 = vpop.f32.mrf.mxu2  ;;  %5210 = vrot.lane.b32.xlu2 %v5194_v47, %s9819_s21  ;;  %v11414_v47 = vld [vmem:[%s13170_s1 + $0x34] sm:$0xf] }
 0x34d   : > { %v11357_v61 = vadd.f32 %v3622_v46, %v11242_v15  ;;  %v3598_v59 = vpop.f32.mrf.mxu0  ;;  %v3611_v14 = vpop.f32.mrf.mxu1 }
 0x34e   : > { %v3635_v2 = vpop.f32.mrf.mxu3  ;;  %v4551_v7 = vpop.permute.xlu0 %4550  ;;  %v5363_v14 = vld.sshfl [vmem:[#allocation1 + $0x28] sm:$0xff pattern:$0x73625140] }
 0x34f   : > { %v11360_v27 = vadd.f32 %v3635_v2, %v11245_v12  ;;  %v4557_v12 = vsel %vm4554_vm14, %v4543_v6, %v4545_v56  ;;  %v4560_v5 = vsel %vm4554_vm14, %v4549_v28, %v4551_v7  ;;  %v4553_v44 = vpop.permute.xlu1 %4552  ;;  %v4704_v20 = vpop.permute.xlu2 %4703  ;;  %5373 = vrot.lane.b32.xlu0 %v5357_v51, %s9819_s21 }
 0x350   : > { %v4572_v18 = vsel %vm345_vm1, %v4557_v12, 0  ;;  %v4561_v50 = vsel %vm4554_vm14, %v4551_v7, %v4553_v44  ;;  %v5365_v7 = vld.sshfl [vmem:[#allocation1 + $0x30] sm:$0xff pattern:$0x73625140] }
 0x351   : > { %v4584_v46 = vsel %vm345_vm1, %v4561_v50, 0 }
 0x353   : > { %5375 = vrot.lane.b32.xlu1 %v5359_v0, %s9819_s21 }
 0x354   : > { %v3624_v15 = vpop.f32.mrf.mxu2  ;;  %5216 = vrot.lane.b32.xlu2 %v5200_v58, %s9819_s21 }
 0x355   : > { %v3648_v34 = vpop.f32.mrf.mxu0  ;;  %v3661_v10 = vpop.f32.mrf.mxu1  ;;  %v5355_v15 = vld.sshfl [vmem:[#allocation1 + $0x8] sm:$0xff pattern:$0x73625140] }
 0x356   : > { %v3637_v9 = vpop.f32.mrf.mxu3  ;;  %v11372_v35 = vadd.f32 %v3648_v34, %v11261_v39  ;;  %v11375_v23 = vadd.f32 %v3661_v10, %v11264_v32  ;;  %v4578_v39 = vsel %vm345_vm1, %v4559_v4, 0  ;;  %v4581_v32 = vsel %vm345_vm1, %v4560_v5, 0  ;;  %v4706_v13 = vpop.permute.xlu0 %4705  ;;  %5517 = vst [vmem:[#allocation1] ss:$4 sm:$0xff] %v11192_v33 }
 0x357   : > { %v4708_v29 = vpop.permute.xlu1 %4707  ;;  %v4710_v49 = vpop.permute.xlu2 %4709  ;;  %5379 = vrot.lane.b32.xlu0 %v5363_v14, %s9819_s21  ;;  %v5367_v5 = vld.sshfl [vmem:[#allocation1 + $0x38] sm:$0xff pattern:$0x73625140] }
 0x358   : > { %9550 = vmatmul.msk.bf16.vlgmr.msra.gmra.mxu0 %vm341_vm2, %v11345_v24  ;;  %9551 = vmatmul.msk.bf16.vlgmr.msra.gmra.mxu1 %vm341_vm2, %v11345_v24  ;;  %v4720_v31 = vsel %vm4554_vm14, %v4706_v13, %v4708_v29  ;;  %v4721_v40 = vsel %vm4554_vm14, %v4708_v29, %v4710_v49 }
 0x359   : > { %9552 = vmatmul.msk.bf16.vlgmr.msra.gmra.mxu2 %vm341_vm2, %v11345_v24  ;;  %4619 = vmatpush.bf16.msra.mxu0 %v4572_v18 }
 0x35a   : > { %4632 = vmatpush.bf16.msra.mxu1 %v4575_v38  ;;  %4645 = vmatpush.bf16.msra.mxu2 %v4578_v39 }
 0x35b   : > { %9553 = vmatmul.msk.bf16.vlgmr.msra.gmra.mxu3 %vm341_vm2, %v11345_v24  ;;  %5381 = vrot.lane.b32.xlu1 %v5365_v7, %s9819_s21 }
 0x35c   : > { %4658 = vmatpush.bf16.msra.mxu3 %v4581_v32  ;;  %v3674_v36 = vpop.f32.mrf.mxu2  ;;  %5371 = vrot.lane.b32.xlu2 %v5355_v15, %s9819_s21 }
 0x35d   : > { %v11392_v16 = vadd.f32 %v3674_v36, %v11274_v1  ;;  %v3650_v41 = vpop.f32.mrf.mxu0  ;;  %v3663_v17 = vpop.f32.mrf.mxu1  ;;  %v4719_v1 = vsel %vm4554_vm14, %v4704_v20, %v4706_v13  ;;  %v5521_v44 = vld.sshfl [vmem:[#allocation1] sm:$0xff pattern:$0x73625140]  ;;  %v5523_v32 = vld.sshfl [vmem:[#allocation1 + $0x8] sm:$0xff pattern:$0x73625140] }
 0x35e   : > { %v3760_v8 = vpop.f32.mrf.mxu3  ;;  %v4730_v2 = vsel %vm345_vm1, %v4719_v1, 0  ;;  %v4712_v62 = vpop.permute.xlu0 %4711  ;;  %v5361_v36 = vld.sshfl [vmem:[#allocation1 + $0x20] sm:$0xff pattern:$0x73625140] }
 0x35f   : > { %v11395_v6 = vadd.f32 %v3760_v8, %v11277_v42  ;;  %v4716_v37 = vpop.permute.xlu2 %4715  ;;  %v4714_v9 = vpop.permute.xlu1 %4713  ;;  %5537 = vrot.lane.b32.xlu0 %v5521_v44, %s9820_s27  ;;  %5520 = vst [vmem:[#allocation1 + $0x20] ss:$4 sm:$0xff] %v11229_v60  ;;  %v5527_v13 = vld.sshfl [vmem:[#allocation1 + $0x18] sm:$0xff pattern:$0x73625140] }
 0x360   : > { %v4723_v34 = vsel %vm4554_vm14, %v4712_v62, %v4714_v9  ;;  %v4724_v25 = vsel %vm4554_vm14, %v4714_v9, %v4716_v37  ;;  %v5525_v7 = vld.sshfl [vmem:[#allocation1 + $0x10] sm:$0xff pattern:$0x73625140] }
 0x361   : > { %v4742_v51 = vsel %vm345_vm1, %v4723_v34, 0  ;;  %5683 = vst [vmem:[#allocation1] ss:$4 sm:$0xff] %v11192_v33 }
 0x363   : > { %5539 = vrot.lane.b32.xlu1 %v5523_v32, %s9820_s27 }
 0x364   : > { %v3676_v45 = vpop.f32.mrf.mxu2  ;;  %5377 = vrot.lane.b32.xlu2 %v5361_v36, %s9819_s21 }
 0x365   : > { %v3773_v48 = vpop.f32.mrf.mxu0  ;;  %v3786_v42 = vpop.f32.mrf.mxu1 }
 0x366   : > { %v3762_v52 = vpop.f32.mrf.mxu3  ;;  %v11406_v55 = vadd.f32 %v3773_v48, %v11290_v57  ;;  %v11409_v56 = vadd.f32 %v3786_v42, %v11293_v53  ;;  %v4733_v57 = vsel %vm345_vm1, %v4720_v31, 0  ;;  %v4736_v53 = vsel %vm345_vm1, %v4721_v40, 0  ;;  %v4718_v12 = vpop.permute.xlu0 %4717  ;;  %v5529_v1 = vld.sshfl [vmem:[#allocation1 + $0x20] sm:$0xff pattern:$0x73625140] }
 0x367   : > { %v4725_v18 = vsel %vm4554_vm14, %v4716_v37, %v4718_v12  ;;  %5543 = vrot.lane.b32.xlu0 %v5527_v13, %s9820_s27  ;;  %v5535_v37 = vld.sshfl [vmem:[#allocation1 + $0x38] sm:$0xff pattern:$0x73625140] }
 0x368   : > { %9554 = vmatmul.msk.bf16.vlgmr.msrb.gmra.mxu0 %vm341_vm2, %v11345_v24  ;;  %9555 = vmatmul.msk.bf16.vlgmr.msrb.gmra.mxu1 %vm341_vm2, %v11345_v24 }
 0x369   : > { %9556 = vmatmul.msk.bf16.vlgmr.msrb.gmra.mxu2 %vm341_vm2, %v11414_v47  ;;  %4671 = vmatpush.bf16.msrb.mxu0 %v4584_v46 }
 0x36a   : > { %4757 = vmatpush.bf16.msrb.mxu1 %v4730_v2  ;;  %4770 = vmatpush.bf16.msrb.mxu2 %v4733_v57  ;;  %v277_v2 = vld [vmem:[%s13170_s1 + $0xa0] sm:$0xf] }
 0x36b   : > { %9557 = vmatmul.msk.bf16.vlgmr.msrb.gmra.mxu3 %vm341_vm2, %v11414_v47  ;;  %5545 = vrot.lane.b32.xlu1 %v5529_v1, %s9820_s27 }
 0x36c   : > { %4783 = vmatpush.bf16.msrb.mxu3 %v4736_v53  ;;  %v3799_v63 = vpop.f32.mrf.mxu2  ;;  %5383 = vrot.lane.b32.xlu2 %v5367_v5, %s9819_s21 }
 0x36d   : > { %v11429_v24 = vadd.f32 %v3799_v63, %v11307_v26  ;;  %v3775_v11 = vpop.f32.mrf.mxu0  ;;  %v3788_v28 = vpop.f32.mrf.mxu1 }
 0x36e   : > { %v3812_v59 = vpop.f32.mrf.mxu3 }
 0x36f   : > { %v11432_v3 = vadd.f32 %v3812_v59, %v11310_v22  ;;  %v4722_v22 = vsel %vm4554_vm14, %v4710_v49, %v4712_v62  ;;  %v5533_v59 = vld.sshfl [vmem:[#allocation1 + $0x30] sm:$0xff pattern:$0x73625140] }
 0x370   : > { %v4739_v20 = vsel %vm345_vm1, %v4722_v22, 0  ;;  %5549 = vrot.lane.b32.xlu0 %v5533_v59, %s9820_s27 }
 0x371   : > { %v4874_v8 = vpop.permute.xlu2 %4873 }
 0x373   : > { %v4872_v41 = vpop.permute.xlu1 %4871  ;;  %5551 = vrot.lane.b32.xlu1 %v5535_v37, %s9820_s27 }
 0x374   : > { %v3801_v26 = vpop.f32.mrf.mxu2  ;;  %v4876_v50 = vpop.permute.xlu0 %4875  ;;  %v4888_v40 = vsel %vm4887_vm15, %v4872_v41, %v4874_v8  ;;  %5541 = vrot.lane.b32.xlu2 %v5525_v7, %s9820_s27 }
 0x375   : > { %v3825_v10 = vpop.f32.mrf.mxu0  ;;  %v3838_v4 = vpop.f32.mrf.mxu1  ;;  %v4899_v14 = vsel %vm345_vm1, %v4888_v40, 0 }
 0x376   : > { %v3814_v21 = vpop.f32.mrf.mxu3  ;;  %v11443_v38 = vadd.f32 %v3825_v10, %v11323_v19  ;;  %v11446_v39 = vadd.f32 %v3838_v4, %v11326_v30  ;;  %v4745_v19 = vsel %vm345_vm1, %v4724_v25, 0  ;;  %v4748_v30 = vsel %vm345_vm1, %v4725_v18, 0  ;;  %v5690_v10 = vld.sshfl [vmem:[#allocation1 + $0x10] sm:$0xff pattern:$0x73625140] }
 0x377   : > { %v5688_v4 = vld.sshfl [vmem:[#allocation1 + $0x8] sm:$0xff pattern:$0x73625140] }
 0x378   : > { %9558 = vmatmul.msk.bf16.vlgmr.msra.gmra.mxu0 %vm341_vm2, %v11414_v47  ;;  %9559 = vmatmul.msk.bf16.vlgmr.msra.gmra.mxu1 %vm341_vm2, %v11414_v47 }
 0x379   : > { %9560 = vmatmul.msk.bf16.vlgmr.msra.gmra.mxu2 %vm341_vm2, %v11414_v47  ;;  %4796 = vmatpush.bf16.msra.mxu0 %v4739_v20 }
 0x37a   : > { %4809 = vmatpush.bf16.msra.mxu1 %v4742_v51  ;;  %4822 = vmatpush.bf16.msra.mxu2 %v4745_v19  ;;  %v4880_v48 = vpop.permute.xlu2 %4879 }
 0x37b   : > { %9561 = vmatmul.msk.bf16.vlgmr.msra.gmra.mxu3 %vm341_vm2, %v11414_v47  ;;  %5704 = vrot.lane.b32.xlu0 %v5688_v4, %s9820_s27 }
 0x37c   : > { %4835 = vmatpush.bf16.msra.mxu3 %v4748_v30  ;;  %v3929_v17 = vpop.f32.mrf.mxu2  ;;  %5706 = vrot.lane.b32.xlu1 %v5690_v10, %s9820_s27 }
 0x37d   : > { %v11465_v29 = vadd.f32 %v3929_v17, %v11337_v43  ;;  %v3827_v45 = vpop.f32.mrf.mxu0  ;;  %v3840_v52 = vpop.f32.mrf.mxu1  ;;  %v4889_v43 = vsel %vm4887_vm15, %v4874_v8, %v4876_v50  ;;  %v5531_v8 = vld.sshfl [vmem:[#allocation1 + $0x28] sm:$0xff pattern:$0x73625140] }
 0x37e   : > { %v3942_v0 = vpop.f32.mrf.mxu3  ;;  %v4878_v58 = vpop.permute.xlu1 %4877  ;;  %v4902_v11 = vsel %vm345_vm1, %v4889_v43, 0  ;;  %5547 = vrot.lane.b32.xlu2 %v5531_v8, %s9820_s27  ;;  %5685 = vst [vmem:[#allocation1 + $0x20] ss:$4 sm:$0xff] %v11229_v60 }
 0x37f   : > { %v11468_v49 = vadd.f32 %v3942_v0, %v11340_v54  ;;  %v4890_v57 = vsel %vm4887_vm15, %v4876_v50, %v4878_v58  ;;  %v4891_v62 = vsel %vm4887_vm15, %v4878_v58, %v4880_v48 }
 0x380   : > { %v4905_v28 = vsel %vm345_vm1, %v4890_v57, 0 }
 0x384   : > { %v3931_v42 = vpop.f32.mrf.mxu2 }
 0x385   : > { %v3955_v54 = vpop.f32.mrf.mxu0  ;;  %v3968_v46 = vpop.f32.mrf.mxu1  ;;  %v5694_v42 = vld.sshfl [vmem:[#allocation1 + $0x20] sm:$0xff pattern:$0x73625140] }
 0x386   : > { %v3944_v31 = vpop.f32.mrf.mxu3  ;;  %v11481_v53 = vadd.f32 %v3955_v54, %v11357_v61  ;;  %v11484_v63 = vadd.f32 %v3968_v46, %v11360_v27  ;;  %v4908_v61 = vsel %vm345_vm1, %v4891_v62, 0  ;;  %v4882_v27 = vpop.permute.xlu0 %4881  ;;  %5710 = vrot.lane.b32.xlu0 %v5694_v42, %s9820_s27 }
 0x387   : > { %v4884_v15 = vpop.permute.xlu1 %4883  ;;  %v4886_v34 = vpop.permute.xlu2 %4885  ;;  %v4892_v32 = vsel %vm4887_vm15, %v4880_v48, %v4882_v27  ;;  %v5696_v31 = vld.sshfl [vmem:[#allocation1 + $0x28] sm:$0xff pattern:$0x73625140] }
 0x388   : > { %9562 = vmatmul.msk.bf16.vlgmr.msrb.gmra.mxu0 %vm341_vm2, %v11414_v47  ;;  %9563 = vmatmul.msk.bf16.vlgmr.msrb.gmra.mxu1 %vm341_vm2, %v277_v2  ;;  %v4893_v20 = vsel %vm4887_vm15, %v4882_v27, %v4884_v15  ;;  %v4894_v51 = vsel %vm4887_vm15, %v4884_v15, %v4886_v34  ;;  %v4911_v41 = vsel %vm345_vm1, %v4892_v32, 0  ;;  %v5686_v27 = vld.sshfl [vmem:[#allocation1] sm:$0xff pattern:$0x73625140] }
 0x389   : > { %9564 = vmatmul.msk.bf16.vlgmr.msrb.gmra.mxu2 %vm341_vm2, %v277_v2  ;;  %4926 = vmatpush.bf16.msrb.mxu0 %v4899_v14  ;;  %v4914_v17 = vsel %vm345_vm1, %v4893_v20, 0  ;;  %v4917_v0 = vsel %vm345_vm1, %v4894_v51, 0  ;;  %v251_v14 = vld [vmem:[%s13170_s1 + $0x38] sm:$0xf] }
 0x38a   : > { %4939 = vmatpush.bf16.msrb.mxu1 %v4902_v11  ;;  %4952 = vmatpush.bf16.msrb.mxu2 %v4905_v28 }
 0x38b   : > { %9565 = vmatmul.msk.bf16.vlgmr.msrb.gmra.mxu3 %vm341_vm2, %v277_v2  ;;  %5712 = vrot.lane.b32.xlu1 %v5696_v31, %s9820_s27 }
 0x38c   : > { %4965 = vmatpush.bf16.msrb.mxu3 %v4908_v61  ;;  %v3981_v47 = vpop.f32.mrf.mxu2  ;;  %5702 = vrot.lane.b32.xlu2 %v5686_v27, %s9820_s27 }
 0x38d   : > { %v11500_v12 = vadd.f32 %v3981_v47, %v11372_v35  ;;  %v3957_v21 = vpop.f32.mrf.mxu0  ;;  %v3970_v22 = vpop.f32.mrf.mxu1 }
 0x38e   : > { %v3994_v9 = vpop.f32.mrf.mxu3 }
 0x38f   : > { %v11503_v26 = vadd.f32 %v3994_v9, %v11375_v23 }
 0x391   : > { %v5039_v5 = vpop.permute.xlu1 %5038  ;;  %v5037_v25 = vpop.permute.xlu0 %5036 }
 0x392   : > { %v5052_v36 = vsel %vm4887_vm15, %v5037_v25, %v5039_v5 }
 0x393   : > { %v5063_v13 = vsel %vm345_vm1, %v5052_v36, 0 }
 0x394   : > { %v3983_v18 = vpop.f32.mrf.mxu2 }
 0x395   : > { %v4007_v35 = vpop.f32.mrf.mxu0  ;;  %v4093_v23 = vpop.f32.mrf.mxu1 }
 0x396   : > { %v3996_v44 = vpop.f32.mrf.mxu3  ;;  %v11512_v19 = vadd.f32 %v4007_v35, %v11392_v16  ;;  %v11515_v30 = vadd.f32 %v4093_v23, %v11395_v6  ;;  %v5041_v16 = vpop.permute.xlu2 %5040 }
 0x398   : > { %9566 = vmatmul.msk.bf16.vlgmr.msra.gmra.mxu0 %vm341_vm2, %v277_v2  ;;  %9567 = vmatmul.msk.bf16.vlgmr.msra.gmra.mxu1 %vm341_vm2, %v277_v2 }
 0x399   : > { %9568 = vmatmul.msk.bf16.vlgmr.msra.gmra.mxu2 %vm341_vm2, %v277_v2  ;;  %4978 = vmatpush.bf16.msra.mxu0 %v4911_v41  ;;  %v5043_v48 = vpop.permute.xlu0 %5042  ;;  %v5045_v40 = vpop.permute.xlu1 %5044 }
 0x39a   : > { %4991 = vmatpush.bf16.msra.mxu1 %v4914_v17  ;;  %5004 = vmatpush.bf16.msra.mxu2 %v4917_v0  ;;  %v5054_v57 = vsel %vm4887_vm15, %v5041_v16, %v5043_v48  ;;  %v5055_v11 = vsel %vm4887_vm15, %v5043_v48, %v5045_v40 }
 0x39b   : > { %9569 = vmatmul.msk.bf16.vlgmr.msra.gmra.mxu3 %vm341_vm2, %v277_v2  ;;  %v5692_v2 = vld.sshfl [vmem:[#allocation1 + $0x18] sm:$0xff pattern:$0x73625140]  ;;  %v5069_v15 = vsel %vm345_vm1, %v5054_v57, 0 }
 0x39c   : > { %5090 = vmatpush.bf16.msra.mxu3 %v5063_v13  ;;  %v4106_v6 = vpop.f32.mrf.mxu2  ;;  %5850 = vst [vmem:[#allocation1] ss:$4 sm:$0xff] %v11192_v33  ;;  %5708 = vrot.lane.b32.xlu2 %v5692_v2, %s9820_s27  ;;  %v11581_v13 = vld [vmem:[%s13170_s1 + $0xa4] sm:$0xf] }
 0x39d   : > { %v11528_v52 = vadd.f32 %v4106_v6, %v11406_v55  ;;  %v4009_v1 = vpop.f32.mrf.mxu0  ;;  %v4095_v58 = vpop.f32.mrf.mxu1  ;;  %v5053_v55 = vsel %vm4887_vm15, %v5039_v5, %v5041_v16  ;;  %v5698_v6 = vld.sshfl [vmem:[#allocation1 + $0x30] sm:$0xff pattern:$0x73625140] }
 0x39e   : > { %v4119_v45 = vpop.f32.mrf.mxu3  ;;  %v5047_v43 = vpop.permute.xlu2 %5046  ;;  %v5066_v37 = vsel %vm345_vm1, %v5053_v55, 0 }
 0x39f   : > { %v11531_v50 = vadd.f32 %v4119_v45, %v11409_v56  ;;  %v5700_v56 = vld.sshfl [vmem:[#allocation1 + $0x38] sm:$0xff pattern:$0x73625140]  ;;  %v5056_v28 = vsel %vm4887_vm15, %v5045_v40, %v5047_v43 }
 0x3a0   : > { %5716 = vrot.lane.b32.xlu0 %v5700_v56, %s9820_s27  ;;  %5853 = vst [vmem:[#allocation1 + $0x20] ss:$4 sm:$0xff] %v11229_v60 }
 0x3a1   : > { %v5049_v47 = vpop.permute.xlu0 %5048 }
 0x3a2   : > { %v5051_v9 = vpop.permute.xlu1 %5050 }
 0x3a3   : > { %v5854_v25 = vld.sshfl [vmem:[#allocation1] sm:$0xff pattern:$0x73625140]  ;;  %v5858_v44 = vld.sshfl [vmem:[#allocation1 + $0x10] sm:$0xff pattern:$0x73625140]  ;;  %v5058_v23 = vsel %vm4887_vm15, %v5049_v47, %v5051_v9 }
 0x3a4   : > { %v4108_v54 = vpop.f32.mrf.mxu2  ;;  %5870 = vrot.lane.b32.xlu1 %v5854_v25, %s9821_s7  ;;  %v5860_v51 = vld.sshfl [vmem:[#allocation1 + $0x18] sm:$0xff pattern:$0x73625140]  ;;  %v5081_v1 = vsel %vm345_vm1, %v5058_v23, 0  ;;  %5714 = vrot.lane.b32.xlu2 %v5698_v6, %s9820_s27 }
 0x3a5   : > { %v4132_v62 = vpop.f32.mrf.mxu0  ;;  %v4145_v59 = vpop.f32.mrf.mxu1  ;;  %v5856_v56 = vld.sshfl [vmem:[#allocation1 + $0x8] sm:$0xff pattern:$0x73625140] }
 0x3a6   : > { %v4121_v46 = vpop.f32.mrf.mxu3  ;;  %v11543_v61 = vadd.f32 %v4132_v62, %v11429_v24  ;;  %v11546_v7 = vadd.f32 %v4145_v59, %v11432_v3  ;;  %v5072_v24 = vsel %vm345_vm1, %v5055_v11, 0  ;;  %v5075_v3 = vsel %vm345_vm1, %v5056_v28, 0  ;;  %v5205_v18 = vpop.permute.xlu2 %5204  ;;  %6016 = vst [vmem:[#allocation1] ss:$4 sm:$0xff] %v11192_v33 }
 0x3a7   : > { %v5864_v46 = vld.sshfl [vmem:[#allocation1 + $0x28] sm:$0xff pattern:$0x73625140]  ;;  %v5866_v57 = vld.sshfl [vmem:[#allocation1 + $0x30] sm:$0xff pattern:$0x73625140] }
 0x3a8   : > { %9570 = vmatmul.msk.bf16.vlgmr.msrb.gmra.mxu0 %vm341_vm2, %v251_v14  ;;  %9571 = vmatmul.msk.bf16.vlgmr.msrb.gmra.mxu1 %vm341_vm2, %v251_v14  ;;  %v5868_v25 = vld.sshfl [vmem:[#allocation1 + $0x38] sm:$0xff pattern:$0x73625140] }
 0x3a9   : > { %9572 = vmatmul.msk.bf16.vlgmr.msrb.gmra.mxu2 %vm341_vm2, %v251_v14  ;;  %5103 = vmatpush.bf16.msrb.mxu0 %v5066_v37  ;;  %v5207_v20 = vpop.permute.xlu0 %5206 }
 0x3aa   : > { %5116 = vmatpush.bf16.msrb.mxu1 %v5069_v15  ;;  %5129 = vmatpush.bf16.msrb.mxu2 %v5072_v24  ;;  %v5221_v41 = vsel %vm5220_vm0, %v5205_v18, %v5207_v20 }
 0x3ab   : > { %9573 = vmatmul.msk.bf16.vlgmr.msrb.gmra.mxu3 %vm341_vm2, %v251_v14  ;;  %5874 = vrot.lane.b32.xlu0 %v5858_v44, %s9821_s7 }
 0x3ac   : > { %5142 = vmatpush.bf16.msrb.mxu3 %v5075_v3  ;;  %v4158_v21 = vpop.f32.mrf.mxu2  ;;  %5876 = vrot.lane.b32.xlu1 %v5860_v51, %s9821_s7 }
 0x3ad   : > { %v11560_v34 = vadd.f32 %v4158_v21, %v11443_v38  ;;  %v4134_v4 = vpop.f32.mrf.mxu0  ;;  %v4147_v5 = vpop.f32.mrf.mxu1  ;;  %5872 = vrot.lane.b32.xlu2 %v5856_v56, %s9821_s7 }
 0x3ae   : > { %v4171_v22 = vpop.f32.mrf.mxu3  ;;  %v5209_v32 = vpop.permute.xlu1 %5208 }
 0x3af   : > { %v11563_v10 = vadd.f32 %v4171_v22, %v11446_v39  ;;  %v5057_v39 = vsel %vm4887_vm15, %v5047_v43, %v5049_v47  ;;  %v5222_v17 = vsel %vm5220_vm0, %v5207_v20, %v5209_v32  ;;  %v6021_v22 = vld.sshfl [vmem:[#allocation1 + $0x8] sm:$0xff pattern:$0x73625140] }
 0x3b0   : > { %v5078_v45 = vsel %vm345_vm1, %v5057_v39, 0  ;;  %v5235_v58 = vsel %vm345_vm1, %v5222_v17, 0  ;;  %v6025_v39 = vld.sshfl [vmem:[#allocation1 + $0x18] sm:$0xff pattern:$0x73625140] }
 0x3b1   : > { %v5213_v2 = vpop.permute.xlu0 %5212 }
 0x3b3   : > { %5880 = vrot.lane.b32.xlu0 %v5864_v46, %s9821_s7 }
 0x3b4   : > { %v4160_v38 = vpop.f32.mrf.mxu2  ;;  %5882 = vrot.lane.b32.xlu1 %v5866_v57, %s9821_s7 }
 0x3b5   : > { %v4262_v36 = vpop.f32.mrf.mxu0  ;;  %v4275_v8 = vpop.f32.mrf.mxu1 }
 0x3b6   : > { %v4173_v35 = vpop.f32.mrf.mxu3  ;;  %v11573_v0 = vadd.f32 %v4262_v36, %v11465_v29  ;;  %v11576_v16 = vadd.f32 %v4275_v8, %v11468_v49  ;;  %v5211_v29 = vpop.permute.xlu2 %5210  ;;  %v5232_v49 = vsel %vm345_vm1, %v5221_v41, 0 }
 0x3b7   : > { %v5215_v55 = vpop.permute.xlu1 %5214  ;;  %v5862_v35 = vld.sshfl [vmem:[#allocation1 + $0x20] sm:$0xff pattern:$0x73625140] }
 0x3b8   : > { %9574 = vmatmul.msk.bf16.vlgmr.msra.gmra.mxu0 %vm341_vm2, %v251_v14  ;;  %9575 = vmatmul.msk.bf16.vlgmr.msra.gmra.mxu1 %vm341_vm2, %v251_v14  ;;  %v5225_v27 = vsel %vm5220_vm0, %v5213_v2, %v5215_v55  ;;  %6018 = vst [vmem:[#allocation1 + $0x20] ss:$4 sm:$0xff] %v11229_v60 }
 0x3b9   : > { %9576 = vmatmul.msk.bf16.vlgmr.msra.gmra.mxu2 %vm341_vm2, %v251_v14  ;;  %5155 = vmatpush.bf16.msra.mxu0 %v5078_v45  ;;  %v5223_v14 = vsel %vm5220_vm0, %v5209_v32, %v5211_v29  ;;  %v5244_v3 = vsel %vm345_vm1, %v5225_v27, 0  ;;  %v5219_v9 = vpop.permute.xlu0 %5218 }
 0x3ba   : > { %5168 = vmatpush.bf16.msra.mxu1 %v5081_v1  ;;  %5259 = vmatpush.bf16.msra.mxu2 %v5232_v49  ;;  %v5238_v24 = vsel %vm345_vm1, %v5223_v14, 0  ;;  %v11677_v14 = vld [vmem:[%s9876_s23 + $0x2] sm:$0xff] }
 0x3bb   : > { %9577 = vmatmul.msk.bf16.vlgmr.msra.gmra.mxu3 %vm341_vm2, %v11581_v13  ;;  %5878 = vrot.lane.b32.xlu2 %v5862_v35, %s9821_s7 }
 0x3bc   : > { %5272 = vmatpush.bf16.msra.mxu3 %v5235_v58  ;;  %v4288_v48 = vpop.f32.mrf.mxu2  ;;  %6037 = vrot.lane.b32.xlu1 %v6021_v22, %s9821_s7 }
 0x3bd   : > { %v11596_v31 = vadd.f32 %v4288_v48, %v11481_v53  ;;  %v4264_v43 = vpop.f32.mrf.mxu0  ;;  %v4277_v54 = vpop.f32.mrf.mxu1 }
 0x3be   : > { %v4301_v42 = vpop.f32.mrf.mxu3  ;;  %v5217_v62 = vpop.permute.xlu2 %5216 }
 0x3bf   : > { %v11599_v40 = vadd.f32 %v4301_v42, %v11484_v63  ;;  %v5224_v63 = vsel %vm5220_vm0, %v5211_v29, %v5213_v2  ;;  %v5226_v37 = vsel %vm5220_vm0, %v5215_v55, %v5217_v62  ;;  %v5227_v41 = vsel %vm5220_vm0, %v5217_v62, %v5219_v9  ;;  %v11651_v29 = vld [vmem:[%s13170_s1 + $0x3c] sm:$0xf]  ;;  %v6027_v49 = vld.sshfl [vmem:[#allocation1 + $0x20] sm:$0xff pattern:$0x73625140] }
 0x3c0   : > { %v5241_v47 = vsel %vm345_vm1, %v5224_v63, 0  ;;  %v5247_v21 = vsel %vm345_vm1, %v5226_v37, 0  ;;  %v5250_v58 = vsel %vm345_vm1, %v5227_v41, 0  ;;  %v6031_v43 = vld.sshfl [vmem:[#allocation1 + $0x30] sm:$0xff pattern:$0x73625140] }
 0x3c1   : > { %v5374_v23 = vpop.permute.xlu0 %5373  ;;  %v6033_v56 = vld.sshfl [vmem:[#allocation1 + $0x38] sm:$0xff pattern:$0x73625140]  ;;  %v6023_v62 = vld.sshfl [vmem:[#allocation1 + $0x10] sm:$0xff pattern:$0x73625140] }
 0x3c3   : > { %5884 = vrot.lane.b32.xlu2 %v5868_v25, %s9821_s7 }
 0x3c4   : > { %v4290_v59 = vpop.f32.mrf.mxu2  ;;  %6043 = vrot.lane.b32.xlu1 %v6027_v49, %s9821_s7 }
 0x3c5   : > { %v4314_v11 = vpop.f32.mrf.mxu0  ;;  %v4327_v28 = vpop.f32.mrf.mxu1 }
 0x3c6   : > { %v4303_v53 = vpop.f32.mrf.mxu3  ;;  %v11610_v15 = vadd.f32 %v4314_v11, %v11500_v12  ;;  %v11613_v33 = vadd.f32 %v4327_v28, %v11503_v26  ;;  %v6019_v12 = vld.sshfl [vmem:[#allocation1] sm:$0xff pattern:$0x73625140]  ;;  %v5370_v26 = vpop.permute.xlu1 %5369 }
 0x3c7   : > { %6035 = vrot.lane.b32.xlu0 %v6019_v12, %s9821_s7  ;;  %v5372_v38 = vpop.permute.xlu2 %5371  ;;  %6183 = vst [vmem:[#allocation1] ss:$4 sm:$0xff] %v11677_v14 }
 0x3c8   : > { %9578 = vmatmul.msk.bf16.vlgmr.msrb.gmra.mxu0 %vm341_vm2, %v11581_v13  ;;  %9579 = vmatmul.msk.bf16.vlgmr.msrb.gmra.mxu1 %vm341_vm2, %v11581_v13  ;;  %v5386_v6 = vsel %vm5220_vm0, %v5372_v38, %v5374_v23 }
 0x3c9   : > { %9580 = vmatmul.msk.bf16.vlgmr.msrb.gmra.mxu2 %vm341_vm2, %v11581_v13  ;;  %5285 = vmatpush.bf16.msrb.mxu0 %v5238_v24  ;;  %v5380_v59 = vpop.permute.xlu0 %5379 }
 0x3ca   : > { %5298 = vmatpush.bf16.msrb.mxu1 %v5241_v47  ;;  %5311 = vmatpush.bf16.msrb.mxu2 %v5244_v3 }
 0x3cb   : > { %9581 = vmatmul.msk.bf16.vlgmr.msrb.gmra.mxu3 %vm341_vm2, %v11581_v13  ;;  %6039 = vrot.lane.b32.xlu2 %v6023_v62, %s9821_s7 }
 0x3cc   : > { %5324 = vmatpush.bf16.msrb.mxu3 %v5247_v21  ;;  %v4340_v4 = vpop.f32.mrf.mxu2  ;;  %6049 = vrot.lane.b32.xlu1 %v6033_v56, %s9821_s7  ;;  %v6029_v21 = vld.sshfl [vmem:[#allocation1 + $0x28] sm:$0xff pattern:$0x73625140] }
 0x3cd   : > { %v11630_v18 = vadd.f32 %v4340_v4, %v11512_v19  ;;  %v4316_v32 = vpop.f32.mrf.mxu0  ;;  %v4329_v20 = vpop.f32.mrf.mxu1  ;;  %v5385_v19 = vsel %vm5220_vm0, %v5370_v26, %v5372_v38 }
 0x3ce   : > { %v4426_v5 = vpop.f32.mrf.mxu3  ;;  %v5376_v51 = vpop.permute.xlu1 %5375  ;;  %v5396_v48 = vsel %vm345_vm1, %v5385_v19, 0  ;;  %v6189_v4 = vld.sshfl [vmem:[#allocation1 + $0x8] sm:$0xff pattern:$0x73625140] }
 0x3cf   : > { %v11633_v44 = vadd.f32 %v4426_v5, %v11515_v30  ;;  %6041 = vrot.lane.b32.xlu0 %v6025_v39, %s9821_s7  ;;  %v5387_v45 = vsel %vm5220_vm0, %v5374_v23, %v5376_v51  ;;  %v6191_v25 = vld.sshfl [vmem:[#allocation1 + $0x10] sm:$0xff pattern:$0x73625140]  ;;  %v6187_v62 = vld.sshfl [vmem:[#allocation1] sm:$0xff pattern:$0x73625140] }
 0x3d0   : > { %v5402_v42 = vsel %vm345_vm1, %v5387_v45, 0  ;;  %v11704_v32 = vld [vmem:[%s9876_s23 + $0xa] sm:$0xff] }
 0x3d1   : > { %6186 = vst [vmem:[#allocation1 + $0x20] ss:$4 sm:$0xff] %v11704_v32 }
 0x3d3   : > { %6045 = vrot.lane.b32.xlu2 %v6029_v21, %s9821_s7 }
 0x3d4   : > { %v4342_v36 = vpop.f32.mrf.mxu2  ;;  %6207 = vrot.lane.b32.xlu1 %v6191_v25, %s9822_s12 }
 0x3d5   : > { %v4439_v30 = vpop.f32.mrf.mxu0  ;;  %v4452_v17 = vpop.f32.mrf.mxu1 }
 0x3d6   : > { %v4428_v8 = vpop.f32.mrf.mxu3  ;;  %v11643_v1 = vadd.f32 %v4439_v30, %v11528_v52  ;;  %v11646_v60 = vadd.f32 %v4452_v17, %v11531_v50  ;;  %v5399_v52 = vsel %vm345_vm1, %v5386_v6, 0  ;;  %v5378_v50 = vpop.permute.xlu2 %5377 }
 0x3d7   : > { %6047 = vrot.lane.b32.xlu0 %v6031_v43, %s9821_s7  ;;  %v5382_v53 = vpop.permute.xlu1 %5381  ;;  %v5389_v28 = vsel %vm5220_vm0, %v5378_v50, %v5380_v59 }
 0x3d8   : > { %9582 = vmatmul.msk.bf16.vlgmr.msra.gmra.mxu0 %vm341_vm2, %v11581_v13  ;;  %9583 = vmatmul.msk.bf16.vlgmr.msra.gmra.mxu1 %vm341_vm2, %v11581_v13  ;;  %v5390_v24 = vsel %vm5220_vm0, %v5380_v59, %v5382_v53  ;;  %v5408_v26 = vsel %vm345_vm1, %v5389_v28, 0  ;;  %v6195_v41 = vld.sshfl [vmem:[#allocation1 + $0x20] sm:$0xff pattern:$0x73625140] }
 0x3d9   : > { %9584 = vmatmul.msk.bf16.vlgmr.msra.gmra.mxu2 %vm341_vm2, %v11651_v29  ;;  %5337 = vmatpush.bf16.msra.mxu0 %v5250_v58  ;;  %v6197_v30 = vld.sshfl [vmem:[#allocation1 + $0x28] sm:$0xff pattern:$0x73625140]  ;;  %v11717_v58 = vld.sshfl [vmem:[#allocation1 + $0x30] sm:$0xff pattern:$0x73625140] }
 0x3da   : > { %5423 = vmatpush.bf16.msra.mxu1 %v5396_v48  ;;  %5436 = vmatpush.bf16.msra.mxu2 %v5399_v52  ;;  %v279_v48 = vld [vmem:[%s13170_s1 + $0xa8] sm:$0xf] }
 0x3db   : > { %9585 = vmatmul.msk.bf16.vlgmr.msra.gmra.mxu3 %vm341_vm2, %v11651_v29  ;;  %6203 = vrot.lane.b32.xlu2 %v6187_v62, %s9822_s12 }
 0x3dc   : > { %5449 = vmatpush.bf16.msra.mxu3 %v5402_v42  ;;  %v4465_v54 = vpop.f32.mrf.mxu2  ;;  %6213 = vrot.lane.b32.xlu1 %v6197_v30, %s9822_s12 }
 0x3dd   : > { %v11669_v13 = vadd.f32 %v4465_v54, %v11543_v61  ;;  %v4441_v55 = vpop.f32.mrf.mxu0  ;;  %v4454_v57 = vpop.f32.mrf.mxu1  ;;  %v6193_v54 = vld.sshfl [vmem:[#allocation1 + $0x18] sm:$0xff pattern:$0x73625140] }
 0x3de   : > { %v4478_v46 = vpop.f32.mrf.mxu3  ;;  %v5384_v63 = vpop.permute.xlu2 %5383  ;;  %6349 = vst [vmem:[#allocation1] ss:$4 sm:$0xff] %v11677_v14 }
 0x3df   : > { %v11672_v2 = vadd.f32 %v4478_v46, %v11546_v7  ;;  %v5388_v7 = vsel %vm5220_vm0, %v5376_v51, %v5378_v50  ;;  %v5391_v47 = vsel %vm5220_vm0, %v5382_v53, %v5384_v63  ;;  %v5540_v5 = vpop.permute.xlu1 %5539  ;;  %6205 = vrot.lane.b32.xlu0 %v6189_v4, %s9822_s12  ;;  %v6201_v46 = vld.sshfl [vmem:[#allocation1 + $0x38] sm:$0xff pattern:$0x73625140] }
 0x3e0   : > { %v5405_v12 = vsel %vm345_vm1, %v5388_v7, 0  ;;  %v5414_v22 = vsel %vm345_vm1, %v5391_v47, 0  ;;  %6351 = vst [vmem:[#allocation1 + $0x20] ss:$4 sm:$0xff] %v11704_v32 }
 0x3e3   : > { %6209 = vrot.lane.b32.xlu2 %v6193_v54, %s9822_s12 }
 0x3e4   : > { %v4467_v61 = vpop.f32.mrf.mxu2 }
 0x3e5   : > { %v4491_v27 = vpop.f32.mrf.mxu0  ;;  %v4504_v37 = vpop.f32.mrf.mxu1 }
 0x3e6   : > { %v4480_v11 = vpop.f32.mrf.mxu3  ;;  %v11685_v3 = vadd.f32 %v4491_v27, %v11560_v34  ;;  %v11688_v9 = vadd.f32 %v4504_v37, %v11563_v10  ;;  %v5411_v34 = vsel %vm345_vm1, %v5390_v24, 0  ;;  %v5538_v10 = vpop.permute.xlu0 %5537  ;;  %v6356_v27 = vld.sshfl [vmem:[#allocation1 + $0x10] sm:$0xff pattern:$0x73625140] }
 0x3e7   : > { %v5542_v36 = vpop.permute.xlu2 %5541  ;;  %v5546_v19 = vpop.permute.xlu1 %5545  ;;  %v5554_v45 = vsel %vm5553_vm3, %v5538_v10, %v5540_v5  ;;  %6211 = vrot.lane.b32.xlu0 %v6195_v41, %s9822_s12  ;;  %v6352_v37 = vld.sshfl [vmem:[#allocation1] sm:$0xff pattern:$0x73625140] }
 0x3e8   : > { %9586 = vmatmul.msk.bf16.vlgmr.msrb.gmra.mxu0 %vm341_vm2, %v11651_v29  ;;  %9587 = vmatmul.msk.bf16.vlgmr.msrb.gmra.mxu1 %vm341_vm2, %v11651_v29  ;;  %v5555_v49 = vsel %vm5553_vm3, %v5540_v5, %v5542_v36  ;;  %v5565_v55 = vsel %vm345_vm1, %v5554_v45, 0 }
 0x3e9   : > { %9588 = vmatmul.msk.bf16.vlgmr.msrb.gmra.mxu2 %vm341_vm2, %v11651_v29  ;;  %5462 = vmatpush.bf16.msrb.mxu0 %v5405_v12  ;;  %v5568_v57 = vsel %vm345_vm1, %v5555_v49, 0  ;;  %v6364_v49 = vld.sshfl [vmem:[#allocation1 + $0x30] sm:$0xff pattern:$0x73625140] }
 0x3ea   : > { %5475 = vmatpush.bf16.msrb.mxu1 %v5408_v26  ;;  %5488 = vmatpush.bf16.msrb.mxu2 %v5411_v34 }
 0x3eb   : > { %9589 = vmatmul.msk.bf16.vlgmr.msrb.gmra.mxu3 %vm341_vm2, %v11651_v29  ;;  %6368 = vrot.lane.b32.xlu1 %v6352_v37, %s9822_s12 }
 0x3ec   : > { %5501 = vmatpush.bf16.msrb.mxu3 %v5414_v22  ;;  %v4595_v20 = vpop.f32.mrf.mxu2  ;;  %6215 = vrot.lane.b32.xlu2 %v11717_v58, %s9822_s12 }
 0x3ed   : > { %v11710_v35 = vadd.f32 %v4595_v20, %v11573_v0  ;;  %v4493_v23 = vpop.f32.mrf.mxu0  ;;  %v4506_v51 = vpop.f32.mrf.mxu1 }
 0x3ee   : > { %v4608_v38 = vpop.f32.mrf.mxu3  ;;  %v5544_v8 = vpop.permute.xlu0 %5543 }
 0x3ef   : > { %v11713_v39 = vadd.f32 %v4608_v38, %v11576_v16  ;;  %v5556_v52 = vsel %vm5553_vm3, %v5542_v36, %v5544_v8  ;;  %v5557_v50 = vsel %vm5553_vm3, %v5544_v8, %v5546_v19  ;;  %6217 = vrot.lane.b32.xlu0 %v6201_v46, %s9822_s12  ;;  %v5552_v28 = vpop.permute.xlu1 %5551 }
 0x3f0   : > { %v5571_v56 = vsel %vm345_vm1, %v5556_v52, 0 }
 0x3f4   : > { %v4597_v17 = vpop.f32.mrf.mxu2 }
 0x3f5   : > { %v4621_v0 = vpop.f32.mrf.mxu0  ;;  %v4634_v16 = vpop.f32.mrf.mxu1  ;;  %v6362_v17 = vld.sshfl [vmem:[#allocation1 + $0x28] sm:$0xff pattern:$0x73625140] }
 0x3f6   : > { %v4610_v6 = vpop.f32.mrf.mxu3  ;;  %v11727_v42 = vadd.f32 %v4621_v0, %v11596_v31  ;;  %v11730_v43 = vadd.f32 %v4634_v16, %v11599_v40  ;;  %v5574_v31 = vsel %vm345_vm1, %v5557_v50, 0  ;;  %v5548_v40 = vpop.permute.xlu2 %5547  ;;  %v253_v50 = vld [vmem:[%s13170_s1 + $0x40] sm:$0xf] }
 0x3f7   : > { %v5550_v59 = vpop.permute.xlu0 %5549  ;;  %v5558_v12 = vsel %vm5553_vm3, %v5546_v19, %v5548_v40  ;;  %6372 = vrot.lane.b32.xlu0 %v6356_v27, %s9822_s12  ;;  %v5707_v23 = vpop.permute.xlu1 %5706 }
 0x3f8   : > { %9590 = vmatmul.msk.bf16.vlgmr.msra.gmra.mxu0 %vm341_vm2, %v11651_v29  ;;  %9591 = vmatmul.msk.bf16.vlgmr.msra.gmra.mxu1 %vm341_vm2, %v279_v48  ;;  %v5559_v26 = vsel %vm5553_vm3, %v5548_v40, %v5550_v59  ;;  %v5560_v34 = vsel %vm5553_vm3, %v5550_v59, %v5552_v28  ;;  %v5577_v5 = vsel %vm345_vm1, %v5558_v12, 0 }
 0x3f9   : > { %9592 = vmatmul.msk.bf16.vlgmr.msra.gmra.mxu2 %vm341_vm2, %v279_v48  ;;  %5592 = vmatpush.bf16.msra.mxu0 %v5565_v55  ;;  %v5580_v25 = vsel %vm345_vm1, %v5559_v26, 0  ;;  %v5583_v38 = vsel %vm345_vm1, %v5560_v34, 0 }
 0x3fa   : > { %5605 = vmatpush.bf16.msra.mxu1 %v5568_v57  ;;  %5618 = vmatpush.bf16.msra.mxu2 %v5571_v56  ;;  %v6354_v56 = vld.sshfl [vmem:[#allocation1 + $0x8] sm:$0xff pattern:$0x73625140] }
 0x3fb   : > { %9593 = vmatmul.msk.bf16.vlgmr.msra.gmra.mxu3 %vm341_vm2, %v279_v48  ;;  %6370 = vrot.lane.b32.xlu2 %v6354_v56, %s9822_s12 }
 0x3fc   : > { %5631 = vmatpush.bf16.msra.mxu3 %v5574_v31  ;;  %v4647_v29 = vpop.f32.mrf.mxu2 }
 0x3fd   : > { %v11746_v63 = vadd.f32 %v4647_v29, %v11610_v15  ;;  %v4623_v11 = vpop.f32.mrf.mxu0  ;;  %v4636_v7 = vpop.f32.mrf.mxu1 }
 0x3fe   : > { %v4660_v53 = vpop.f32.mrf.mxu3  ;;  %v5703_v24 = vpop.permute.xlu2 %5702  ;;  %v6366_v11 = vld.sshfl [vmem:[#allocation1 + $0x38] sm:$0xff pattern:$0x73625140] }
 0x3ff   : > { %v11749_v61 = vadd.f32 %v4660_v53, %v11613_v33  ;;  %v5705_v10 = vpop.permute.xlu0 %5704  ;;  %6378 = vrot.lane.b32.xlu0 %v6362_v17, %s9822_s12  ;;  %v5713_v0 = vpop.permute.xlu1 %5712 }
 0x400   : > { %v5718_v20 = vsel %vm5553_vm3, %v5703_v24, %v5705_v10  ;;  %v5719_v52 = vsel %vm5553_vm3, %v5705_v10, %v5707_v23  ;;  %v6360_v24 = vld.sshfl [vmem:[#allocation1 + $0x20] sm:$0xff pattern:$0x73625140] }
 0x401   : > { %v5732_v31 = vsel %vm345_vm1, %v5719_v52, 0  ;;  %6519 = vst [vmem:[#allocation1 + $0x20] ss:$4 sm:$0xff] %v11704_v32 }
 0x403   : > { %6376 = vrot.lane.b32.xlu2 %v6360_v24, %s9822_s12 }
 0x404   : > { %v4649_v47 = vpop.f32.mrf.mxu2 }
 0x405   : > { %v4673_v15 = vpop.f32.mrf.mxu0  ;;  %v4759_v33 = vpop.f32.mrf.mxu1 }
 0x406   : > { %v4662_v21 = vpop.f32.mrf.mxu3  ;;  %v11758_v22 = vadd.f32 %v4673_v15, %v11630_v18  ;;  %v11761_v4 = vadd.f32 %v4759_v33, %v11633_v44  ;;  %v5729_v18 = vsel %vm345_vm1, %v5718_v20, 0  ;;  %v6358_v44 = vld.sshfl [vmem:[#allocation1 + $0x18] sm:$0xff pattern:$0x73625140]  ;;  %v5709_v6 = vpop.permute.xlu2 %5708 }
 0x407   : > { %6374 = vrot.lane.b32.xlu1 %v6358_v44, %s9822_s12  ;;  %v5711_v45 = vpop.permute.xlu0 %5710  ;;  %v5720_v58 = vsel %vm5553_vm3, %v5707_v23, %v5709_v6  ;;  %6516 = vst [vmem:[#allocation1] ss:$4 sm:$0xff] %v11677_v14  ;;  %v11829_v44 = vld [vmem:[%s13170_s1 + $0xac] sm:$0xf] }
 0x408   : > { %9594 = vmatmul.msk.bf16.vlgmr.msrb.gmra.mxu0 %vm341_vm2, %v279_v48  ;;  %9595 = vmatmul.msk.bf16.vlgmr.msrb.gmra.mxu1 %vm341_vm2, %v279_v48  ;;  %v5721_v54 = vsel %vm5553_vm3, %v5709_v6, %v5711_v45  ;;  %v5722_v46 = vsel %vm5553_vm3, %v5711_v45, %v5713_v0  ;;  %v5735_v62 = vsel %vm345_vm1, %v5720_v58, 0  ;;  %v6530_v45 = vld.sshfl [vmem:[#allocation1 + $0x28] sm:$0xff pattern:$0x73625140] }
 0x409   : > { %9596 = vmatmul.msk.bf16.vlgmr.msrb.gmra.mxu2 %vm341_vm2, %v279_v48  ;;  %5644 = vmatpush.bf16.msrb.mxu0 %v5577_v5  ;;  %v5738_v40 = vsel %vm345_vm1, %v5721_v54, 0  ;;  %v5741_v59 = vsel %vm345_vm1, %v5722_v46, 0  ;;  %v6532_v52 = vld.sshfl [vmem:[#allocation1 + $0x30] sm:$0xff pattern:$0x73625140] }
 0x40a   : > { %5657 = vmatpush.bf16.msrb.mxu1 %v5580_v25  ;;  %5670 = vmatpush.bf16.msrb.mxu2 %v5583_v38 }
 0x40b   : > { %9597 = vmatmul.msk.bf16.vlgmr.msrb.gmra.mxu3 %vm341_vm2, %v279_v48  ;;  %6382 = vrot.lane.b32.xlu2 %v6366_v11, %s9822_s12 }
 0x40c   : > { %5756 = vmatpush.bf16.msrb.mxu3 %v5729_v18  ;;  %v4772_v51 = vpop.f32.mrf.mxu2 }
 0x40d   : > { %v11776_v8 = vadd.f32 %v4772_v51, %v11643_v1  ;;  %v4675_v19 = vpop.f32.mrf.mxu0  ;;  %v4761_v30 = vpop.f32.mrf.mxu1  ;;  %v6528_v51 = vld.sshfl [vmem:[#allocation1 + $0x20] sm:$0xff pattern:$0x73625140] }
 0x40e   : > { %v4785_v36 = vpop.f32.mrf.mxu3  ;;  %v6520_v47 = vld.sshfl [vmem:[#allocation1] sm:$0xff pattern:$0x73625140]  ;;  %v6522_v21 = vld.sshfl [vmem:[#allocation1 + $0x8] sm:$0xff pattern:$0x73625140] }
 0x40f   : > { %v11779_v41 = vadd.f32 %v4785_v36, %v11646_v60  ;;  %6380 = vrot.lane.b32.xlu1 %v6364_v49, %s9822_s12  ;;  %6536 = vrot.lane.b32.xlu0 %v6520_v47, %s9823_s17  ;;  %v6526_v10 = vld.sshfl [vmem:[#allocation1 + $0x18] sm:$0xff pattern:$0x73625140]  ;;  %v6524_v56 = vld.sshfl [vmem:[#allocation1 + $0x10] sm:$0xff pattern:$0x73625140]  ;;  %s235_s12 = scalar_lea.vmem %s13174_s5, %s9373_s9 }
 0x410   : > { %6682 = vst [vmem:[#allocation1] ss:$4 sm:$0xff] %v11677_v14 }
 0x413   : > { %6540 = vrot.lane.b32.xlu2 %v6524_v56, %s9823_s17 }
 0x414   : > { %v4774_v16 = vpop.f32.mrf.mxu2 }
 0x415   : > { %v4798_v1 = vpop.f32.mrf.mxu0  ;;  %v4811_v60 = vpop.f32.mrf.mxu1 }
 0x416   : > { %v4787_v48 = vpop.f32.mrf.mxu3  ;;  %v11791_v55 = vadd.f32 %v4798_v1, %v11669_v13  ;;  %v11794_v57 = vadd.f32 %v4811_v60, %v11672_v2  ;;  %v5715_v13 = vpop.permute.xlu2 %5714  ;;  %v6534_v1 = vld.sshfl [vmem:[#allocation1 + $0x38] sm:$0xff pattern:$0x73625140] }
 0x417   : > { %v5717_v2 = vpop.permute.xlu0 %5716  ;;  %6538 = vrot.lane.b32.xlu1 %v6522_v21, %s9823_s17  ;;  %v5871_v12 = vpop.permute.xlu1 %5870  ;;  %v5723_v33 = vsel %vm5553_vm3, %v5713_v0, %v5715_v13  ;;  %6542 = vrot.lane.b32.xlu0 %v6526_v10, %s9823_s17  ;;  %6684 = vst [vmem:[#allocation1 + $0x20] ss:$4 sm:$0xff] %v11704_v32  ;;  %v6687_v24 = vld.sshfl [vmem:[#allocation1 + $0x8] sm:$0xff pattern:$0x73625140] }
 0x418   : > { %9598 = vmatmul.msk.bf16.vlgmr.msra.gmra.mxu0 %vm341_vm2, %v253_v50  ;;  %9599 = vmatmul.msk.bf16.vlgmr.msra.gmra.mxu1 %vm341_vm2, %v253_v50  ;;  %v5724_v34 = vsel %vm5553_vm3, %v5715_v13, %v5717_v2  ;;  %v5744_v36 = vsel %vm345_vm1, %v5723_v33, 0 }
 0x419   : > { %9600 = vmatmul.msk.bf16.vlgmr.msra.gmra.mxu2 %vm341_vm2, %v253_v50  ;;  %5769 = vmatpush.bf16.msra.mxu0 %v5732_v31  ;;  %v5747_v19 = vsel %vm345_vm1, %v5724_v34, 0 }
 0x41a   : > { %5782 = vmatpush.bf16.msra.mxu1 %v5735_v62  ;;  %5795 = vmatpush.bf16.msra.mxu2 %v5738_v40 }
 0x41b   : > { %9601 = vmatmul.msk.bf16.vlgmr.msra.gmra.mxu3 %vm341_vm2, %v253_v50  ;;  %6546 = vrot.lane.b32.xlu2 %v6530_v45, %s9823_s17 }
 0x41c   : > { %5808 = vmatpush.bf16.msra.mxu3 %v5741_v59  ;;  %v4824_v29 = vpop.f32.mrf.mxu2 }
 0x41d   : > { %v11807_v7 = vadd.f32 %v4824_v29, %v11685_v3  ;;  %v4800_v27 = vpop.f32.mrf.mxu0  ;;  %v4813_v37 = vpop.f32.mrf.mxu1 }
 0x41e   : > { %v4837_v53 = vpop.f32.mrf.mxu3  ;;  %v5873_v26 = vpop.permute.xlu2 %5872  ;;  %v6693_v34 = vld.sshfl [vmem:[#allocation1 + $0x20] sm:$0xff pattern:$0x73625140] }
 0x41f   : > { %v11810_v28 = vadd.f32 %v4837_v53, %v11688_v9  ;;  %v5875_v3 = vpop.permute.xlu0 %5874  ;;  %v5887_v20 = vsel %vm5886_vm4, %v5871_v12, %v5873_v26  ;;  %6544 = vrot.lane.b32.xlu1 %v6528_v51, %s9823_s17  ;;  %v5877_v30 = vpop.permute.xlu1 %5876  ;;  %6548 = vrot.lane.b32.xlu0 %v6532_v52, %s9823_s17 }
 0x420   : > { %v5888_v38 = vsel %vm5886_vm4, %v5873_v26, %v5875_v3  ;;  %v6689_v26 = vld.sshfl [vmem:[#allocation1 + $0x10] sm:$0xff pattern:$0x73625140] }
 0x424   : > { %v4826_v9 = vpop.f32.mrf.mxu2 }
 0x425   : > { %v4928_v5 = vpop.f32.mrf.mxu0  ;;  %v4941_v25 = vpop.f32.mrf.mxu1 }
 0x426   : > { %v4839_v15 = vpop.f32.mrf.mxu3  ;;  %v11821_v23 = vadd.f32 %v4928_v5, %v11710_v35  ;;  %v11824_v18 = vadd.f32 %v4941_v25, %v11713_v39  ;;  %v5898_v35 = vsel %vm345_vm1, %v5887_v20, 0  ;;  %v5901_v39 = vsel %vm345_vm1, %v5888_v38, 0  ;;  %v5879_v58 = vpop.permute.xlu2 %5878 }
 0x427   : > { %6550 = vrot.lane.b32.xlu1 %v6534_v1, %s9823_s17  ;;  %v5881_v60 = vpop.permute.xlu0 %5880  ;;  %6703 = vrot.lane.b32.xlu0 %v6687_v24, %s9823_s17 }
 0x428   : > { %9602 = vmatmul.msk.bf16.vlgmr.msrb.gmra.mxu0 %vm341_vm2, %v253_v50  ;;  %9603 = vmatmul.msk.bf16.vlgmr.msrb.gmra.mxu1 %vm341_vm2, %v253_v50  ;;  %v5891_v40 = vsel %vm5886_vm4, %v5879_v58, %v5881_v60 }
 0x429   : > { %9604 = vmatmul.msk.bf16.vlgmr.msrb.gmra.mxu2 %vm341_vm2, %v253_v50  ;;  %5821 = vmatpush.bf16.msrb.mxu0 %v5744_v36  ;;  %v5883_v50 = vpop.permute.xlu1 %5882  ;;  %v5910_v11 = vsel %vm345_vm1, %v5891_v40, 0 }
 0x42a   : > { %5834 = vmatpush.bf16.msrb.mxu1 %v5747_v19  ;;  %5925 = vmatpush.bf16.msrb.mxu2 %v5898_v35  ;;  %v5892_v13 = vsel %vm5886_vm4, %v5881_v60, %v5883_v50  ;;  %v11898_v19 = vld [vmem:[%s13170_s1 + $0x44] sm:$0xf] }
 0x42b   : > { %9605 = vmatmul.msk.bf16.vlgmr.msrb.gmra.mxu3 %vm341_vm2, %v11829_v44  ;;  %v5913_v37 = vsel %vm345_vm1, %v5892_v13, 0 }
 0x42c   : > { %5938 = vmatpush.bf16.msrb.mxu3 %v5901_v39  ;;  %v4954_v17 = vpop.f32.mrf.mxu2  ;;  %v6695_v39 = vld.sshfl [vmem:[#allocation1 + $0x28] sm:$0xff pattern:$0x73625140] }
 0x42d   : > { %v11844_v49 = vadd.f32 %v4954_v17, %v11727_v42  ;;  %v4930_v16 = vpop.f32.mrf.mxu0  ;;  %v4943_v48 = vpop.f32.mrf.mxu1  ;;  %v5889_v42 = vsel %vm5886_vm4, %v5875_v3, %v5877_v30 }
 0x42e   : > { %v4967_v6 = vpop.f32.mrf.mxu3  ;;  %v5904_v29 = vsel %vm345_vm1, %v5889_v42, 0  ;;  %v5885_v27 = vpop.permute.xlu2 %5884  ;;  %v6697_v16 = vld.sshfl [vmem:[#allocation1 + $0x30] sm:$0xff pattern:$0x73625140] }
 0x42f   : > { %v11847_v0 = vadd.f32 %v4967_v6, %v11730_v43  ;;  %v5890_v43 = vsel %vm5886_vm4, %v5877_v30, %v5879_v58  ;;  %6705 = vrot.lane.b32.xlu1 %v6689_v26, %s9823_s17  ;;  %6709 = vrot.lane.b32.xlu0 %v6693_v34, %s9823_s17  ;;  %v6685_v42 = vld.sshfl [vmem:[#allocation1] sm:$0xff pattern:$0x73625140] }
 0x430   : > { %v5907_v53 = vsel %vm345_vm1, %v5890_v43, 0  ;;  %6701 = vrot.lane.b32.xlu2 %v6685_v42, %s9823_s17 }
 0x431   : > { %v6038_v15 = vpop.permute.xlu1 %6037 }
 0x434   : > { %v4956_v54 = vpop.f32.mrf.mxu2 }
 0x435   : > { %v4980_v31 = vpop.f32.mrf.mxu0  ;;  %v4993_v62 = vpop.f32.mrf.mxu1 }
 0x436   : > { %v4969_v46 = vpop.f32.mrf.mxu3  ;;  %v11859_v59 = vadd.f32 %v4980_v31, %v11746_v63  ;;  %v11862_v2 = vadd.f32 %v4993_v62, %v11749_v61  ;;  %v6040_v33 = vpop.permute.xlu2 %6039 }
 0x437   : > { %v6052_v38 = vsel %vm5886_vm4, %v6038_v15, %v6040_v33  ;;  %6711 = vrot.lane.b32.xlu1 %v6695_v39, %s9823_s17  ;;  %v6699_v46 = vld.sshfl [vmem:[#allocation1 + $0x38] sm:$0xff pattern:$0x73625140] }
 0x438   : > { %9606 = vmatmul.msk.bf16.vlgmr.msra.gmra.mxu0 %vm341_vm2, %v11829_v44  ;;  %9607 = vmatmul.msk.bf16.vlgmr.msra.gmra.mxu1 %vm341_vm2, %v11829_v44  ;;  %6852 = vst [vmem:[#allocation1 + $0x20] ss:$4 sm:$0xff] %v11704_v32 }
 0x439   : > { %9608 = vmatmul.msk.bf16.vlgmr.msra.gmra.mxu2 %vm341_vm2, %v11829_v44  ;;  %5951 = vmatpush.bf16.msra.mxu0 %v5904_v29  ;;  %v6036_v9 = vpop.permute.xlu0 %6035  ;;  %v6044_v45 = vpop.permute.xlu1 %6043 }
 0x43a   : > { %5964 = vmatpush.bf16.msra.mxu1 %v5907_v53  ;;  %5977 = vmatpush.bf16.msra.mxu2 %v5910_v11 }
 0x43b   : > { %9609 = vmatmul.msk.bf16.vlgmr.msra.gmra.mxu3 %vm341_vm2, %v11829_v44  ;;  %6715 = vrot.lane.b32.xlu0 %v6699_v46, %s9823_s17 }
 0x43c   : > { %5990 = vmatpush.bf16.msra.mxu3 %v5913_v37  ;;  %v5006_v63 = vpop.f32.mrf.mxu2 }
 0x43d   : > { %v11877_v47 = vadd.f32 %v5006_v63, %v11758_v22  ;;  %v4982_v12 = vpop.f32.mrf.mxu0  ;;  %v4995_v3 = vpop.f32.mrf.mxu1  ;;  %v5893_v22 = vsel %vm5886_vm4, %v5883_v50, %v5885_v27 }
 0x43e   : > { %v5092_v61 = vpop.f32.mrf.mxu3  ;;  %v5916_v30 = vsel %vm345_vm1, %v5893_v22, 0  ;;  %v6046_v48 = vpop.permute.xlu2 %6045 }
 0x43f   : > { %v11880_v21 = vadd.f32 %v5092_v61, %v11761_v4  ;;  %v6051_v4 = vsel %vm5886_vm4, %v6036_v9, %v6038_v15 }
 0x440   : > { %v6062_v17 = vsel %vm345_vm1, %v6051_v4, 0 }
 0x441   : > { %v6042_v35 = vpop.permute.xlu0 %6041  ;;  %v6050_v56 = vpop.permute.xlu1 %6049 }
 0x442   : > { %v6053_v6 = vsel %vm5886_vm4, %v6040_v33, %v6042_v35  ;;  %v6054_v62 = vsel %vm5886_vm4, %v6042_v35, %v6044_v45 }
 0x443   : > { %v6071_v61 = vsel %vm345_vm1, %v6054_v62, 0 }
 0x444   : > { %v5008_v10 = vpop.f32.mrf.mxu2 }
 0x445   : > { %v5105_v25 = vpop.f32.mrf.mxu0  ;;  %v5118_v20 = vpop.f32.mrf.mxu1 }
 0x446   : > { %v5094_v5 = vpop.f32.mrf.mxu3  ;;  %v11890_v51 = vadd.f32 %v5105_v25, %v11776_v8  ;;  %v11893_v36 = vadd.f32 %v5118_v20, %v11779_v41  ;;  %v6065_v8 = vsel %vm345_vm1, %v6052_v38, 0  ;;  %v6068_v41 = vsel %vm345_vm1, %v6053_v6, 0  ;;  %v6204_v63 = vpop.permute.xlu2 %6203  ;;  %v6863_v25 = vld.sshfl [vmem:[#allocation1 + $0x28] sm:$0xff pattern:$0x73625140] }
 0x448   : > { %9610 = vmatmul.msk.bf16.vlgmr.msrb.gmra.mxu0 %vm341_vm2, %v11829_v44  ;;  %9611 = vmatmul.msk.bf16.vlgmr.msrb.gmra.mxu1 %vm341_vm2, %v11829_v44  ;;  %v6691_v44 = vld.sshfl [vmem:[#allocation1 + $0x18] sm:$0xff pattern:$0x73625140] }
 0x449   : > { %9612 = vmatmul.msk.bf16.vlgmr.msrb.gmra.mxu2 %vm341_vm2, %v11898_v19  ;;  %6003 = vmatpush.bf16.msrb.mxu0 %v5916_v30  ;;  %6849 = vst [vmem:[#allocation1] ss:$4 sm:$0xff] %v11677_v14  ;;  %v6048_v43 = vpop.permute.xlu0 %6047  ;;  %v6208_v4 = vpop.permute.xlu1 %6207  ;;  %v281_v30 = vld [vmem:[%s13170_s1 + $0xb0] sm:$0xf] }
 0x44a   : > { %6089 = vmatpush.bf16.msrb.mxu1 %v6062_v17  ;;  %6102 = vmatpush.bf16.msrb.mxu2 %v6065_v8  ;;  %v6056_v29 = vsel %vm5886_vm4, %v6046_v48, %v6048_v43  ;;  %v6057_v53 = vsel %vm5886_vm4, %v6048_v43, %v6050_v56 }
 0x44b   : > { %9613 = vmatmul.msk.bf16.vlgmr.msrb.gmra.mxu3 %vm341_vm2, %v11898_v19  ;;  %6707 = vrot.lane.b32.xlu2 %v6691_v44, %s9823_s17 }
 0x44c   : > { %6115 = vmatpush.bf16.msrb.mxu3 %v6068_v41  ;;  %v5131_v52 = vpop.f32.mrf.mxu2 }
 0x44d   : > { %v11915_v1 = vadd.f32 %v5131_v52, %v11791_v55  ;;  %v5107_v50 = vpop.f32.mrf.mxu0  ;;  %v5120_v54 = vpop.f32.mrf.mxu1 }
 0x44e   : > { %v5144_v58 = vpop.f32.mrf.mxu3  ;;  %v6210_v22 = vpop.permute.xlu2 %6209 }
 0x44f   : > { %v11918_v60 = vadd.f32 %v5144_v58, %v11794_v57  ;;  %v6055_v57 = vsel %vm5886_vm4, %v6044_v45, %v6046_v48  ;;  %v6222_v17 = vsel %vm6219_vm5, %v6208_v4, %v6210_v22  ;;  %v6865_v45 = vld.sshfl [vmem:[#allocation1 + $0x30] sm:$0xff pattern:$0x73625140] }
 0x450   : > { %v6853_v37 = vld.sshfl [vmem:[#allocation1] sm:$0xff pattern:$0x73625140]  ;;  %v6074_v24 = vsel %vm345_vm1, %v6055_v57, 0 }
 0x451   : > { %6869 = vrot.lane.b32.xlu1 %v6853_v37, %s9824_s25  ;;  %v6857_v12 = vld.sshfl [vmem:[#allocation1 + $0x10] sm:$0xff pattern:$0x73625140]  ;;  %v6859_v9 = vld.sshfl [vmem:[#allocation1 + $0x18] sm:$0xff pattern:$0x73625140]  ;;  %v6206_v5 = vpop.permute.xlu0 %6205  ;;  %v6214_v50 = vpop.permute.xlu1 %6213 }
 0x452   : > { %6873 = vrot.lane.b32.xlu0 %v6857_v12, %s9824_s25  ;;  %v6220_v35 = vsel %vm6219_vm5, %v6204_v63, %v6206_v5  ;;  %v6855_v58 = vld.sshfl [vmem:[#allocation1 + $0x8] sm:$0xff pattern:$0x73625140]  ;;  %v6867_v57 = vld.sshfl [vmem:[#allocation1 + $0x38] sm:$0xff pattern:$0x73625140] }
 0x453   : > { %6713 = vrot.lane.b32.xlu2 %v6697_v16, %s9823_s17  ;;  %v6231_v16 = vsel %vm345_vm1, %v6220_v35, 0  ;;  %7015 = vst [vmem:[#allocation1] ss:$4 sm:$0xff] %v11677_v14  ;;  %v6861_v37 = vld.sshfl [vmem:[#allocation1 + $0x20] sm:$0xff pattern:$0x73625140] }
 0x454   : > { %v5133_v31 = vpop.f32.mrf.mxu2  ;;  %7017 = vst [vmem:[#allocation1 + $0x20] ss:$4 sm:$0xff] %v11704_v32 }
 0x455   : > { %v5157_v40 = vpop.f32.mrf.mxu0  ;;  %v5170_v13 = vpop.f32.mrf.mxu1 }
 0x456   : > { %v5146_v55 = vpop.f32.mrf.mxu3  ;;  %v11929_v11 = vadd.f32 %v5157_v40, %v11807_v7  ;;  %v11932_v27 = vadd.f32 %v5170_v13, %v11810_v28  ;;  %v6077_v7 = vsel %vm345_vm1, %v6056_v29, 0  ;;  %v6080_v28 = vsel %vm345_vm1, %v6057_v53, 0  ;;  %v6216_v44 = vpop.permute.xlu2 %6215 }
 0x458   : > { %9614 = vmatmul.msk.bf16.vlgmr.msra.gmra.mxu0 %vm341_vm2, %v11898_v19  ;;  %9615 = vmatmul.msk.bf16.vlgmr.msra.gmra.mxu1 %vm341_vm2, %v11898_v19 }
 0x459   : > { %9616 = vmatmul.msk.bf16.vlgmr.msra.gmra.mxu2 %vm341_vm2, %v11898_v19  ;;  %6128 = vmatpush.bf16.msra.mxu0 %v6071_v61  ;;  %v6212_v41 = vpop.permute.xlu0 %6211 }
 0x45a   : > { %6141 = vmatpush.bf16.msra.mxu1 %v6074_v24  ;;  %6154 = vmatpush.bf16.msra.mxu2 %v6077_v7  ;;  %v6223_v52 = vsel %vm6219_vm5, %v6210_v22, %v6212_v41  ;;  %v7020_v55 = vld.sshfl [vmem:[#allocation1 + $0x8] sm:$0xff pattern:$0x73625140]  ;;  %v7018_v62 = vld.sshfl [vmem:[#allocation1] sm:$0xff pattern:$0x73625140]  ;;  %v6224_v53 = vsel %vm6219_vm5, %v6212_v41, %v6214_v50 }
 0x45b   : > { %9617 = vmatmul.msk.bf16.vlgmr.msra.gmra.mxu3 %vm341_vm2, %v11898_v19  ;;  %6875 = vrot.lane.b32.xlu1 %v6859_v9, %s9824_s25  ;;  %v6243_v12 = vsel %vm345_vm1, %v6224_v53, 0  ;;  %v7026_v22 = vld.sshfl [vmem:[#allocation1 + $0x20] sm:$0xff pattern:$0x73625140] }
 0x45c   : > { %6167 = vmatpush.bf16.msra.mxu3 %v6080_v28  ;;  %v5261_v3 = vpop.f32.mrf.mxu2  ;;  %6879 = vrot.lane.b32.xlu0 %v6863_v25, %s9824_s25 }
 0x45d   : > { %v11950_v15 = vadd.f32 %v5261_v3, %v11821_v23  ;;  %v5159_v34 = vpop.f32.mrf.mxu0  ;;  %v5172_v10 = vpop.f32.mrf.mxu1  ;;  %v6221_v23 = vsel %vm6219_vm5, %v6206_v5, %v6208_v4  ;;  %6871 = vrot.lane.b32.xlu2 %v6855_v58, %s9824_s25 }
 0x45e   : > { %v5274_v26 = vpop.f32.mrf.mxu3  ;;  %v6234_v48 = vsel %vm345_vm1, %v6221_v23, 0  ;;  %v6371_v40 = vpop.permute.xlu2 %6370 }
 0x45f   : > { %v11953_v33 = vadd.f32 %v5274_v26, %v11824_v18  ;;  %v6369_v28 = vpop.permute.xlu1 %6368 }
 0x460   : > { %v6384_v26 = vsel %vm6219_vm5, %v6369_v28, %v6371_v40 }
 0x461   : > { %v6218_v31 = vpop.permute.xlu0 %6217 }
 0x462   : > { %v6226_v61 = vsel %vm6219_vm5, %v6216_v44, %v6218_v31 }
 0x463   : > { %6881 = vrot.lane.b32.xlu1 %v6865_v45, %s9824_s25  ;;  %v6249_v9 = vsel %vm345_vm1, %v6226_v61, 0  ;;  %v7028_v61 = vld.sshfl [vmem:[#allocation1 + $0x28] sm:$0xff pattern:$0x73625140] }
 0x464   : > { %v5263_v20 = vpop.f32.mrf.mxu2  ;;  %7034 = vrot.lane.b32.xlu0 %v7018_v62, %s9824_s25 }
 0x465   : > { %v5287_v18 = vpop.f32.mrf.mxu0  ;;  %v5300_v39 = vpop.f32.mrf.mxu1  ;;  %6877 = vrot.lane.b32.xlu2 %v6861_v37, %s9824_s25 }
 0x466   : > { %v5276_v38 = vpop.f32.mrf.mxu3  ;;  %v11965_v6 = vadd.f32 %v5287_v18, %v11844_v49  ;;  %v11968_v8 = vadd.f32 %v5300_v39, %v11847_v0  ;;  %v6237_v49 = vsel %vm345_vm1, %v6222_v17, 0  ;;  %v6240_v0 = vsel %vm345_vm1, %v6223_v52, 0  ;;  %v6377_v23 = vpop.permute.xlu2 %6376  ;;  %v7030_v18 = vld.sshfl [vmem:[#allocation1 + $0x30] sm:$0xff pattern:$0x73625140] }
 0x468   : > { %9618 = vmatmul.msk.bf16.vlgmr.msrb.gmra.mxu0 %vm341_vm2, %v11898_v19  ;;  %9619 = vmatmul.msk.bf16.vlgmr.msrb.gmra.mxu1 %vm341_vm2, %v281_v30 }
 0x469   : > { %9620 = vmatmul.msk.bf16.vlgmr.msrb.gmra.mxu2 %vm341_vm2, %v281_v30  ;;  %6258 = vmatpush.bf16.msrb.mxu0 %v6231_v16  ;;  %v6373_v34 = vpop.permute.xlu0 %6372 }
 0x46a   : > { %6271 = vmatpush.bf16.msrb.mxu1 %v6234_v48  ;;  %6284 = vmatpush.bf16.msrb.mxu2 %v6237_v49  ;;  %v6385_v41 = vsel %vm6219_vm5, %v6371_v40, %v6373_v34  ;;  %v255_v48 = vld [vmem:[%s13170_s1 + $0x48] sm:$0xf] }
 0x46b   : > { %9621 = vmatmul.msk.bf16.vlgmr.msrb.gmra.mxu3 %vm341_vm2, %v281_v30  ;;  %7036 = vrot.lane.b32.xlu1 %v7020_v55, %s9824_s25 }
 0x46c   : > { %6297 = vmatpush.bf16.msrb.mxu3 %v6240_v0  ;;  %v5313_v19 = vpop.f32.mrf.mxu2 }
 0x46d   : > { %v11984_v46 = vadd.f32 %v5313_v19, %v11859_v59  ;;  %v5289_v43 = vpop.f32.mrf.mxu0  ;;  %v5302_v56 = vpop.f32.mrf.mxu1  ;;  %v6225_v59 = vsel %vm6219_vm5, %v6214_v50, %v6216_v44  ;;  %6883 = vrot.lane.b32.xlu2 %v6867_v57, %s9824_s25  ;;  %v7022_v44 = vld.sshfl [vmem:[#allocation1 + $0x10] sm:$0xff pattern:$0x73625140]  ;;  %v6398_v50 = vsel %vm345_vm1, %v6385_v41, 0 }
 0x46e   : > { %v5326_v54 = vpop.f32.mrf.mxu3  ;;  %v6246_v3 = vsel %vm345_vm1, %v6225_v59, 0 }
 0x46f   : > { %v11987_v42 = vadd.f32 %v5326_v54, %v11862_v2 }
 0x471   : > { %v6379_v39 = vpop.permute.xlu0 %6378 }
 0x472   : > { %v6388_v49 = vsel %vm6219_vm5, %v6377_v23, %v6379_v39 }
 0x473   : > { %7042 = vrot.lane.b32.xlu1 %v7026_v22, %s9824_s25 }
 0x474   : > { %v5315_v13 = vpop.f32.mrf.mxu2 }
 0x475   : > { %v5339_v2 = vpop.f32.mrf.mxu0  ;;  %v5425_v63 = vpop.f32.mrf.mxu1  ;;  %7038 = vrot.lane.b32.xlu2 %v7022_v44, %s9824_s25 }
 0x476   : > { %v5328_v29 = vpop.f32.mrf.mxu3  ;;  %v11997_v24 = vadd.f32 %v5339_v2, %v11877_v47  ;;  %v12000_v7 = vadd.f32 %v5425_v63, %v11880_v21  ;;  %v6395_v47 = vsel %vm345_vm1, %v6384_v26, 0  ;;  %v7024_v21 = vld.sshfl [vmem:[#allocation1 + $0x18] sm:$0xff pattern:$0x73625140] }
 0x477   : > { %7040 = vrot.lane.b32.xlu0 %v7024_v21, %s9824_s25  ;;  %7182 = vst [vmem:[#allocation1] ss:$4 sm:$0xff] %v11677_v14 }
 0x478   : > { %9622 = vmatmul.msk.bf16.vlgmr.msra.gmra.mxu0 %vm341_vm2, %v281_v30  ;;  %9623 = vmatmul.msk.bf16.vlgmr.msra.gmra.mxu1 %vm341_vm2, %v281_v30 }
 0x479   : > { %9624 = vmatmul.msk.bf16.vlgmr.msra.gmra.mxu2 %vm341_vm2, %v281_v30  ;;  %6310 = vmatpush.bf16.msra.mxu0 %v6243_v12  ;;  %v6375_v35 = vpop.permute.xlu1 %6374 }
 0x47a   : > { %6323 = vmatpush.bf16.msra.mxu1 %v6246_v3  ;;  %6336 = vmatpush.bf16.msra.mxu2 %v6249_v9  ;;  %v6387_v52 = vsel %vm6219_vm5, %v6375_v35, %v6377_v23 }
 0x47b   : > { %9625 = vmatmul.msk.bf16.vlgmr.msra.gmra.mxu3 %vm341_vm2, %v281_v30  ;;  %v6404_v54 = vsel %vm345_vm1, %v6387_v52, 0 }
 0x47c   : > { %6422 = vmatpush.bf16.msra.mxu3 %v6395_v47  ;;  %v5438_v10 = vpop.f32.mrf.mxu2  ;;  %v12068_v47 = vld [vmem:[%s13170_s1 + $0xb4] sm:$0xf] }
 0x47d   : > { %v12013_v4 = vadd.f32 %v5438_v10, %v11890_v51  ;;  %v5341_v20 = vpop.f32.mrf.mxu0  ;;  %v5427_v38 = vpop.f32.mrf.mxu1  ;;  %v6386_v51 = vsel %vm6219_vm5, %v6373_v34, %v6375_v35  ;;  %7044 = vrot.lane.b32.xlu2 %v7028_v61, %s9824_s25 }
 0x47e   : > { %v5451_v5 = vpop.f32.mrf.mxu3  ;;  %v6401_v19 = vsel %vm345_vm1, %v6386_v51, 0  ;;  %v7190_v13 = vld.sshfl [vmem:[#allocation1 + $0x10] sm:$0xff pattern:$0x73625140] }
 0x47f   : > { %v12016_v25 = vadd.f32 %v5451_v5, %v11893_v36  ;;  %7046 = vrot.lane.b32.xlu0 %v7030_v18, %s9824_s25  ;;  %v7032_v36 = vld.sshfl [vmem:[#allocation1 + $0x38] sm:$0xff pattern:$0x73625140]  ;;  %v7188_v29 = vld.sshfl [vmem:[#allocation1 + $0x8] sm:$0xff pattern:$0x73625140] }
 0x480   : > { %7048 = vrot.lane.b32.xlu1 %v7032_v36, %s9824_s25  ;;  %7185 = vst [vmem:[#allocation1 + $0x20] ss:$4 sm:$0xff] %v11704_v32  ;;  %v7192_v22 = vld.sshfl [vmem:[#allocation1 + $0x18] sm:$0xff pattern:$0x73625140] }
 0x481   : > { %v6381_v43 = vpop.permute.xlu1 %6380  ;;  %v6537_v53 = vpop.permute.xlu0 %6536  ;;  %v7186_v51 = vld.sshfl [vmem:[#allocation1] sm:$0xff pattern:$0x73625140] }
 0x482   : > { %7348 = vst [vmem:[#allocation1] ss:$4 sm:$0xff] %v11677_v14 }
 0x484   : > { %v5440_v30 = vpop.f32.mrf.mxu2 }
 0x485   : > { %v5464_v45 = vpop.f32.mrf.mxu0  ;;  %v5477_v16 = vpop.f32.mrf.mxu1  ;;  %7202 = vrot.lane.b32.xlu2 %v7186_v51, %s9825_s30 }
 0x486   : > { %v5453_v17 = vpop.f32.mrf.mxu3  ;;  %v12030_v0 = vadd.f32 %v5464_v45, %v11915_v1  ;;  %v12033_v58 = vadd.f32 %v5477_v16, %v11918_v60  ;;  %v6407_v1 = vsel %vm345_vm1, %v6388_v49, 0  ;;  %v6383_v60 = vpop.permute.xlu2 %6382 }
 0x487   : > { %7204 = vrot.lane.b32.xlu0 %v7188_v29, %s9825_s30  ;;  %v7194_v35 = vld.sshfl [vmem:[#allocation1 + $0x20] sm:$0xff pattern:$0x73625140]  ;;  %v7196_v23 = vld.sshfl [vmem:[#allocation1 + $0x28] sm:$0xff pattern:$0x73625140] }
 0x488   : > { %9626 = vmatmul.msk.bf16.vlgmr.msrb.gmra.mxu0 %vm341_vm2, %v255_v48  ;;  %9627 = vmatmul.msk.bf16.vlgmr.msrb.gmra.mxu1 %vm341_vm2, %v255_v48  ;;  %v7200_v16 = vld.sshfl [vmem:[#allocation1 + $0x38] sm:$0xff pattern:$0x73625140] }
 0x489   : > { %9628 = vmatmul.msk.bf16.vlgmr.msrb.gmra.mxu2 %vm341_vm2, %v255_v48  ;;  %6435 = vmatpush.bf16.msrb.mxu0 %v6398_v50  ;;  %v6539_v37 = vpop.permute.xlu1 %6538 }
 0x48a   : > { %6448 = vmatpush.bf16.msrb.mxu1 %v6401_v19  ;;  %6461 = vmatpush.bf16.msrb.mxu2 %v6404_v54  ;;  %v6553_v3 = vsel %vm6552_vm6, %v6537_v53, %v6539_v37 }
 0x48b   : > { %9629 = vmatmul.msk.bf16.vlgmr.msrb.gmra.mxu3 %vm341_vm2, %v255_v48  ;;  %7206 = vrot.lane.b32.xlu1 %v7190_v13, %s9825_s30  ;;  %v6564_v5 = vsel %vm345_vm1, %v6553_v3, 0  ;;  %v7198_v3 = vld.sshfl [vmem:[#allocation1 + $0x30] sm:$0xff pattern:$0x73625140] }
 0x48c   : > { %6474 = vmatpush.bf16.msrb.mxu3 %v6407_v1  ;;  %v5490_v56 = vpop.f32.mrf.mxu2  ;;  %v7351_v1 = vld.sshfl [vmem:[#allocation1] sm:$0xff pattern:$0x73625140]  ;;  %7350 = vst [vmem:[#allocation1 + $0x20] ss:$4 sm:$0xff] %v11704_v32 }
 0x48d   : > { %v12046_v55 = vadd.f32 %v5490_v56, %v11929_v11  ;;  %v5466_v57 = vpop.f32.mrf.mxu0  ;;  %v5479_v40 = vpop.f32.mrf.mxu1  ;;  %v6389_v11 = vsel %vm6219_vm5, %v6379_v39, %v6381_v43  ;;  %7208 = vrot.lane.b32.xlu2 %v7192_v22, %s9825_s30 }
 0x48e   : > { %v5503_v31 = vpop.f32.mrf.mxu3  ;;  %v6541_v59 = vpop.permute.xlu2 %6540  ;;  %v6410_v21 = vsel %vm345_vm1, %v6389_v11, 0  ;;  %v7355_v57 = vld.sshfl [vmem:[#allocation1 + $0x10] sm:$0xff pattern:$0x73625140] }
 0x48f   : > { %v12049_v62 = vadd.f32 %v5503_v31, %v11932_v27  ;;  %v6390_v27 = vsel %vm6219_vm5, %v6381_v43, %v6383_v60  ;;  %v6554_v26 = vsel %vm6552_vm6, %v6539_v37, %v6541_v59  ;;  %7210 = vrot.lane.b32.xlu0 %v7194_v35, %s9825_s30 }
 0x490   : > { %v6413_v10 = vsel %vm345_vm1, %v6390_v27, 0 }
 0x491   : > { %v6545_v41 = vpop.permute.xlu1 %6544 }
 0x493   : > { %7212 = vrot.lane.b32.xlu1 %v7196_v23, %s9825_s30  ;;  %v7361_v23 = vld.sshfl [vmem:[#allocation1 + $0x28] sm:$0xff pattern:$0x73625140]  ;;  %v7363_v51 = vld.sshfl [vmem:[#allocation1 + $0x30] sm:$0xff pattern:$0x73625140] }
 0x494   : > { %v5492_v2 = vpop.f32.mrf.mxu2 }
 0x495   : > { %v5594_v28 = vpop.f32.mrf.mxu0  ;;  %v5607_v12 = vpop.f32.mrf.mxu1  ;;  %v7357_v2 = vld.sshfl [vmem:[#allocation1 + $0x18] sm:$0xff pattern:$0x73625140]  ;;  %7214 = vrot.lane.b32.xlu2 %v7198_v3, %s9825_s30 }
 0x496   : > { %v5505_v63 = vpop.f32.mrf.mxu3  ;;  %v12060_v9 = vadd.f32 %v5594_v28, %v11950_v15  ;;  %v12063_v34 = vadd.f32 %v5607_v12, %v11953_v33  ;;  %v6567_v15 = vsel %vm345_vm1, %v6554_v26, 0  ;;  %v6543_v33 = vpop.permute.xlu0 %6542 }
 0x497   : > { %v6547_v36 = vpop.permute.xlu2 %6546  ;;  %v6556_v52 = vsel %vm6552_vm6, %v6543_v33, %v6545_v41  ;;  %7216 = vrot.lane.b32.xlu0 %v7200_v16, %s9825_s30  ;;  %v12161_v16 = vld [vmem:[%s9876_s23 + $0x2] sm:$0xff] }
 0x498   : > { %9630 = vmatmul.msk.bf16.vlgmr.msra.gmra.mxu0 %vm341_vm2, %v255_v48  ;;  %9631 = vmatmul.msk.bf16.vlgmr.msra.gmra.mxu1 %vm341_vm2, %v255_v48  ;;  %v6557_v50 = vsel %vm6552_vm6, %v6545_v41, %v6547_v36  ;;  %v6573_v60 = vsel %vm345_vm1, %v6556_v52, 0 }
 0x499   : > { %9632 = vmatmul.msk.bf16.vlgmr.msra.gmra.mxu2 %vm341_vm2, %v255_v48  ;;  %6487 = vmatpush.bf16.msra.mxu0 %v6410_v21  ;;  %v6551_v56 = vpop.permute.xlu1 %6550 }
 0x49a   : > { %6500 = vmatpush.bf16.msra.mxu1 %v6413_v10  ;;  %6591 = vmatpush.bf16.msra.mxu2 %v6564_v5 }
 0x49b   : > { %9633 = vmatmul.msk.bf16.vlgmr.msra.gmra.mxu3 %vm341_vm2, %v12068_v47  ;;  %7367 = vrot.lane.b32.xlu1 %v7351_v1, %s9825_s30 }
 0x49c   : > { %6604 = vmatpush.bf16.msra.mxu3 %v6567_v15  ;;  %v5620_v20 = vpop.f32.mrf.mxu2 }
 0x49d   : > { %v12080_v18 = vadd.f32 %v5620_v20, %v11965_v6  ;;  %v5596_v30 = vpop.f32.mrf.mxu0  ;;  %v5609_v17 = vpop.f32.mrf.mxu1 }
 0x49e   : > { %v5633_v38 = vpop.f32.mrf.mxu3  ;;  %v6549_v45 = vpop.permute.xlu0 %6548 }
 0x49f   : > { %v12083_v39 = vadd.f32 %v5633_v38, %v11968_v8  ;;  %v6555_v8 = vsel %vm6552_vm6, %v6541_v59, %v6543_v33  ;;  %v6558_v19 = vsel %vm6552_vm6, %v6547_v36, %v6549_v45  ;;  %v6702_v31 = vpop.permute.xlu2 %6701  ;;  %7371 = vrot.lane.b32.xlu0 %v7355_v57, %s9825_s30  ;;  %v6559_v12 = vsel %vm6552_vm6, %v6549_v45, %v6551_v56  ;;  %v12137_v33 = vld [vmem:[%s13170_s1 + $0x4c] sm:$0xf]  ;;  %v7359_v57 = vld.sshfl [vmem:[#allocation1 + $0x20] sm:$0xff pattern:$0x73625140] }
 0x4a0   : > { %v6570_v43 = vsel %vm345_vm1, %v6555_v8, 0  ;;  %v6582_v22 = vsel %vm345_vm1, %v6559_v12, 0  ;;  %v7353_v36 = vld.sshfl [vmem:[#allocation1 + $0x8] sm:$0xff pattern:$0x73625140] }
 0x4a1   : > { %v6706_v11 = vpop.permute.xlu1 %6705  ;;  %7369 = vrot.lane.b32.xlu2 %v7353_v36, %s9825_s30  ;;  %7515 = vst [vmem:[#allocation1] ss:$4 sm:$0xff] %v12161_v16 }
 0x4a3   : > { %7373 = vrot.lane.b32.xlu1 %v7357_v2, %s9825_s30 }
 0x4a4   : > { %v5622_v6 = vpop.f32.mrf.mxu2 }
 0x4a5   : > { %v5646_v49 = vpop.f32.mrf.mxu0  ;;  %v5659_v44 = vpop.f32.mrf.mxu1 }
 0x4a6   : > { %v5635_v48 = vpop.f32.mrf.mxu3  ;;  %v12095_v54 = vadd.f32 %v5646_v49, %v11984_v46  ;;  %v12098_v14 = vadd.f32 %v5659_v44, %v11987_v42  ;;  %v6576_v46 = vsel %vm345_vm1, %v6557_v50, 0  ;;  %v6579_v42 = vsel %vm345_vm1, %v6558_v19, 0  ;;  %v6704_v63 = vpop.permute.xlu0 %6703  ;;  %v7365_v50 = vld.sshfl [vmem:[#allocation1 + $0x38] sm:$0xff pattern:$0x73625140] }
 0x4a7   : > { %v6708_v27 = vpop.permute.xlu2 %6707  ;;  %v6718_v21 = vsel %vm6552_vm6, %v6704_v63, %v6706_v11  ;;  %7377 = vrot.lane.b32.xlu0 %v7361_v23, %s9825_s30 }
 0x4a8   : > { %9634 = vmatmul.msk.bf16.vlgmr.msrb.gmra.mxu0 %vm341_vm2, %v12068_v47  ;;  %9635 = vmatmul.msk.bf16.vlgmr.msrb.gmra.mxu1 %vm341_vm2, %v12068_v47  ;;  %v6719_v10 = vsel %vm6552_vm6, %v6706_v11, %v6708_v27  ;;  %v6731_v32 = vsel %vm345_vm1, %v6718_v21, 0 }
 0x4a9   : > { %9636 = vmatmul.msk.bf16.vlgmr.msrb.gmra.mxu2 %vm341_vm2, %v12068_v47  ;;  %6617 = vmatpush.bf16.msrb.mxu0 %v6570_v43  ;;  %v6712_v6 = vpop.permute.xlu1 %6711 }
 0x4aa   : > { %6630 = vmatpush.bf16.msrb.mxu1 %v6573_v60  ;;  %6643 = vmatpush.bf16.msrb.mxu2 %v6576_v46  ;;  %v7519_v46 = vld.sshfl [vmem:[#allocation1] sm:$0xff pattern:$0x73625140] }
 0x4ab   : > { %9637 = vmatmul.msk.bf16.vlgmr.msrb.gmra.mxu3 %vm341_vm2, %v12068_v47  ;;  %7379 = vrot.lane.b32.xlu1 %v7363_v51, %s9825_s30  ;;  %v7523_v51 = vld.sshfl [vmem:[#allocation1 + $0x10] sm:$0xff pattern:$0x73625140] }
 0x4ac   : > { %6656 = vmatpush.bf16.msrb.mxu3 %v6579_v42  ;;  %v5672_v40 = vpop.f32.mrf.mxu2  ;;  %v7521_v42 = vld.sshfl [vmem:[#allocation1 + $0x8] sm:$0xff pattern:$0x73625140]  ;;  %7375 = vrot.lane.b32.xlu2 %v7359_v57, %s9825_s30 }
 0x4ad   : > { %v12115_v29 = vadd.f32 %v5672_v40, %v11997_v24  ;;  %v5648_v59 = vpop.f32.mrf.mxu0  ;;  %v5661_v37 = vpop.f32.mrf.mxu1  ;;  %v6717_v24 = vsel %vm6552_vm6, %v6702_v31, %v6704_v63  ;;  %v7525_v63 = vld.sshfl [vmem:[#allocation1 + $0x18] sm:$0xff pattern:$0x73625140] }
 0x4ae   : > { %v5758_v13 = vpop.f32.mrf.mxu3  ;;  %v6728_v20 = vsel %vm345_vm1, %v6717_v24, 0  ;;  %7681 = vst [vmem:[#allocation1] ss:$4 sm:$0xff] %v12161_v16 }
 0x4af   : > { %v12118_v53 = vadd.f32 %v5758_v13, %v12000_v7  ;;  %v6714_v45 = vpop.permute.xlu2 %6713  ;;  %7535 = vrot.lane.b32.xlu0 %v7519_v46, %s9826_s10  ;;  %v12185_v13 = vld [vmem:[%s9876_s23 + $0xa] sm:$0xff] }
 0x4b0   : > { %v6722_v19 = vsel %vm6552_vm6, %v6712_v6, %v6714_v45  ;;  %7518 = vst [vmem:[#allocation1 + $0x20] ss:$4 sm:$0xff] %v12185_v13 }
 0x4b3   : > { %7537 = vrot.lane.b32.xlu1 %v7521_v42, %s9826_s10 }
 0x4b4   : > { %v5674_v61 = vpop.f32.mrf.mxu2  ;;  %7381 = vrot.lane.b32.xlu2 %v7365_v50, %s9825_s30 }
 0x4b5   : > { %v5771_v26 = vpop.f32.mrf.mxu0  ;;  %v5784_v7 = vpop.f32.mrf.mxu1 }
 0x4b6   : > { %v5760_v28 = vpop.f32.mrf.mxu3  ;;  %v12129_v5 = vadd.f32 %v5771_v26, %v12013_v4  ;;  %v12132_v15 = vadd.f32 %v5784_v7, %v12016_v25  ;;  %v6734_v4 = vsel %vm345_vm1, %v6719_v10, 0  ;;  %v6710_v25 = vpop.permute.xlu0 %6709 }
 0x4b7   : > { %v6720_v8 = vsel %vm6552_vm6, %v6708_v27, %v6710_v25  ;;  %v6721_v52 = vsel %vm6552_vm6, %v6710_v25, %v6712_v6  ;;  %v6872_v40 = vpop.permute.xlu2 %6871  ;;  %7541 = vrot.lane.b32.xlu0 %v7525_v63, %s9826_s10  ;;  %v7527_v12 = vld.sshfl [vmem:[#allocation1 + $0x20] sm:$0xff pattern:$0x73625140] }
 0x4b8   : > { %9638 = vmatmul.msk.bf16.vlgmr.msra.gmra.mxu0 %vm341_vm2, %v12068_v47  ;;  %9639 = vmatmul.msk.bf16.vlgmr.msra.gmra.mxu1 %vm341_vm2, %v12068_v47  ;;  %v6737_v56 = vsel %vm345_vm1, %v6720_v8, 0  ;;  %v6740_v31 = vsel %vm345_vm1, %v6721_v52, 0 }
 0x4b9   : > { %9640 = vmatmul.msk.bf16.vlgmr.msra.gmra.mxu2 %vm341_vm2, %v12137_v33  ;;  %6669 = vmatpush.bf16.msra.mxu0 %v6582_v22 }
 0x4ba   : > { %6755 = vmatpush.bf16.msra.mxu1 %v6728_v20  ;;  %6768 = vmatpush.bf16.msra.mxu2 %v6731_v32  ;;  %v283_v20 = vld [vmem:[%s13170_s1 + $0xb8] sm:$0xf] }
 0x4bb   : > { %9641 = vmatmul.msk.bf16.vlgmr.msra.gmra.mxu3 %vm341_vm2, %v12137_v33  ;;  %7543 = vrot.lane.b32.xlu1 %v7527_v12, %s9826_s10 }
 0x4bc   : > { %6781 = vmatpush.bf16.msra.mxu3 %v6734_v4  ;;  %v5797_v38 = vpop.f32.mrf.mxu2  ;;  %7539 = vrot.lane.b32.xlu2 %v7523_v51, %s9826_s10 }
 0x4bd   : > { %v12152_v47 = vadd.f32 %v5797_v38, %v12030_v0  ;;  %v5773_v17 = vpop.f32.mrf.mxu0  ;;  %v5786_v41 = vpop.f32.mrf.mxu1 }
 0x4be   : > { %v5810_v35 = vpop.f32.mrf.mxu3  ;;  %v6716_v0 = vpop.permute.xlu0 %6715 }
 0x4bf   : > { %v12155_v30 = vadd.f32 %v5810_v35, %v12033_v58  ;;  %v6723_v1 = vsel %vm6552_vm6, %v6714_v45, %v6716_v0  ;;  %v6878_v26 = vpop.permute.xlu2 %6877  ;;  %v7531_v35 = vld.sshfl [vmem:[#allocation1 + $0x30] sm:$0xff pattern:$0x73625140] }
 0x4c0   : > { %7547 = vrot.lane.b32.xlu0 %v7531_v35, %s9826_s10 }
 0x4c3   : > { %v6870_v59 = vpop.permute.xlu1 %6869 }
 0x4c4   : > { %v5799_v48 = vpop.f32.mrf.mxu2  ;;  %v6886_v10 = vsel %vm6885_vm7, %v6870_v59, %v6872_v40 }
 0x4c5   : > { %v5823_v49 = vpop.f32.mrf.mxu0  ;;  %v5836_v44 = vpop.f32.mrf.mxu1  ;;  %v6897_v23 = vsel %vm345_vm1, %v6886_v10, 0 }
 0x4c6   : > { %v5812_v58 = vpop.f32.mrf.mxu3  ;;  %v12169_v43 = vadd.f32 %v5823_v49, %v12046_v55  ;;  %v12172_v60 = vadd.f32 %v5836_v44, %v12049_v62  ;;  %v6743_v55 = vsel %vm345_vm1, %v6722_v19, 0  ;;  %v6746_v62 = vsel %vm345_vm1, %v6723_v1, 0  ;;  %v6874_v24 = vpop.permute.xlu0 %6873  ;;  %v7688_v49 = vld.sshfl [vmem:[#allocation1 + $0x10] sm:$0xff pattern:$0x73625140] }
 0x4c7   : > { %v6884_v52 = vpop.permute.xlu2 %6883  ;;  %v7686_v44 = vld.sshfl [vmem:[#allocation1 + $0x8] sm:$0xff pattern:$0x73625140] }
 0x4c8   : > { %9642 = vmatmul.msk.bf16.vlgmr.msrb.gmra.mxu0 %vm341_vm2, %v12137_v33  ;;  %9643 = vmatmul.msk.bf16.vlgmr.msrb.gmra.mxu1 %vm341_vm2, %v12137_v33 }
 0x4c9   : > { %9644 = vmatmul.msk.bf16.vlgmr.msrb.gmra.mxu2 %vm341_vm2, %v12137_v33  ;;  %6794 = vmatpush.bf16.msrb.mxu0 %v6737_v56 }
 0x4ca   : > { %6807 = vmatpush.bf16.msrb.mxu1 %v6740_v31  ;;  %6820 = vmatpush.bf16.msrb.mxu2 %v6743_v55 }
 0x4cb   : > { %9645 = vmatmul.msk.bf16.vlgmr.msrb.gmra.mxu3 %vm341_vm2, %v12137_v33  ;;  %7702 = vrot.lane.b32.xlu0 %v7686_v44, %s9826_s10 }
 0x4cc   : > { %6833 = vmatpush.bf16.msrb.mxu3 %v6746_v62  ;;  %v5927_v37 = vpop.f32.mrf.mxu2  ;;  %v7529_v62 = vld.sshfl [vmem:[#allocation1 + $0x28] sm:$0xff pattern:$0x73625140] }
 0x4cd   : > { %v12194_v11 = vadd.f32 %v5927_v37, %v12060_v9  ;;  %v5825_v61 = vpop.f32.mrf.mxu0  ;;  %v5838_v28 = vpop.f32.mrf.mxu1  ;;  %v6887_v9 = vsel %vm6885_vm7, %v6872_v40, %v6874_v24  ;;  %7545 = vrot.lane.b32.xlu2 %v7529_v62, %s9826_s10 }
 0x4ce   : > { %v5940_v2 = vpop.f32.mrf.mxu3  ;;  %v6876_v3 = vpop.permute.xlu1 %6875  ;;  %v6900_v17 = vsel %vm345_vm1, %v6887_v9, 0 }
 0x4cf   : > { %v12197_v27 = vadd.f32 %v5940_v2, %v12063_v34  ;;  %v6888_v32 = vsel %vm6885_vm7, %v6874_v24, %v6876_v3  ;;  %v6889_v4 = vsel %vm6885_vm7, %v6876_v3, %v6878_v26  ;;  %v6880_v45 = vpop.permute.xlu0 %6879 }
 0x4d0   : > { %v6903_v41 = vsel %vm345_vm1, %v6888_v32, 0  ;;  %v6890_v46 = vsel %vm6885_vm7, %v6878_v26, %v6880_v45 }
 0x4d1   : > { %v6909_v40 = vsel %vm345_vm1, %v6890_v46, 0 }
 0x4d4   : > { %v5929_v7 = vpop.f32.mrf.mxu2 }
 0x4d5   : > { %v5953_v34 = vpop.f32.mrf.mxu0  ;;  %v5966_v22 = vpop.f32.mrf.mxu1 }
 0x4d6   : > { %v5942_v21 = vpop.f32.mrf.mxu3  ;;  %v12210_v25 = vadd.f32 %v5953_v34, %v12080_v18  ;;  %v12213_v38 = vadd.f32 %v5966_v22, %v12083_v39  ;;  %v6906_v18 = vsel %vm345_vm1, %v6889_v4, 0  ;;  %v7533_v39 = vld.sshfl [vmem:[#allocation1 + $0x38] sm:$0xff pattern:$0x73625140]  ;;  %v6882_v36 = vpop.permute.xlu1 %6881 }
 0x4d7   : > { %7549 = vrot.lane.b32.xlu1 %v7533_v39, %s9826_s10  ;;  %v6891_v42 = vsel %vm6885_vm7, %v6880_v45, %v6882_v36  ;;  %v7035_v55 = vpop.permute.xlu0 %7034  ;;  %7683 = vst [vmem:[#allocation1 + $0x20] ss:$4 sm:$0xff] %v12185_v13  ;;  %v7684_v39 = vld.sshfl [vmem:[#allocation1] sm:$0xff pattern:$0x73625140] }
 0x4d8   : > { %9646 = vmatmul.msk.bf16.vlgmr.msra.gmra.mxu0 %vm341_vm2, %v12137_v33  ;;  %9647 = vmatmul.msk.bf16.vlgmr.msra.gmra.mxu1 %vm341_vm2, %v283_v20  ;;  %v6912_v59 = vsel %vm345_vm1, %v6891_v42, 0 }
 0x4d9   : > { %9648 = vmatmul.msk.bf16.vlgmr.msra.gmra.mxu2 %vm341_vm2, %v283_v20  ;;  %6924 = vmatpush.bf16.msra.mxu0 %v6897_v23  ;;  %v257_v23 = vld [vmem:[%s13170_s1 + $0x50] sm:$0xf] }
 0x4da   : > { %6937 = vmatpush.bf16.msra.mxu1 %v6900_v17  ;;  %6950 = vmatpush.bf16.msra.mxu2 %v6903_v41 }
 0x4db   : > { %9649 = vmatmul.msk.bf16.vlgmr.msra.gmra.mxu3 %vm341_vm2, %v283_v20  ;;  %7700 = vrot.lane.b32.xlu2 %v7684_v39, %s9826_s10 }
 0x4dc   : > { %6963 = vmatpush.bf16.msra.mxu3 %v6906_v18  ;;  %v5979_v33 = vpop.f32.mrf.mxu2 }
 0x4dd   : > { %v12229_v0 = vadd.f32 %v5979_v33, %v12095_v54  ;;  %v5955_v58 = vpop.f32.mrf.mxu0  ;;  %v5968_v8 = vpop.f32.mrf.mxu1 }
 0x4de   : > { %v5992_v6 = vpop.f32.mrf.mxu3  ;;  %v7037_v50 = vpop.permute.xlu1 %7036  ;;  %v7692_v7 = vld.sshfl [vmem:[#allocation1 + $0x20] sm:$0xff pattern:$0x73625140]  ;;  %v7694_v21 = vld.sshfl [vmem:[#allocation1 + $0x28] sm:$0xff pattern:$0x73625140] }
 0x4df   : > { %v12232_v48 = vadd.f32 %v5992_v6, %v12098_v14  ;;  %7704 = vrot.lane.b32.xlu1 %v7688_v49, %s9826_s10  ;;  %v6892_v14 = vsel %vm6885_vm7, %v6882_v36, %v6884_v52  ;;  %v7050_v37 = vsel %vm6885_vm7, %v7035_v55, %v7037_v50  ;;  %7708 = vrot.lane.b32.xlu0 %v7692_v7, %s9826_s10 }
 0x4e0   : > { %v7061_v2 = vsel %vm345_vm1, %v7050_v37, 0 }
 0x4e4   : > { %v5981_v19 = vpop.f32.mrf.mxu2 }
 0x4e5   : > { %v6005_v54 = vpop.f32.mrf.mxu0  ;;  %v6091_v56 = vpop.f32.mrf.mxu1 }
 0x4e6   : > { %v5994_v1 = vpop.f32.mrf.mxu3  ;;  %v12240_v31 = vadd.f32 %v6005_v54, %v12115_v29  ;;  %v12243_v57 = vadd.f32 %v6091_v56, %v12118_v53  ;;  %v6915_v29 = vsel %vm345_vm1, %v6892_v14, 0  ;;  %v7039_v53 = vpop.permute.xlu2 %7038 }
 0x4e7   : > { %v7043_v10 = vpop.permute.xlu1 %7042  ;;  %7710 = vrot.lane.b32.xlu1 %v7694_v21, %s9826_s10 }
 0x4e8   : > { %9650 = vmatmul.msk.bf16.vlgmr.msrb.gmra.mxu0 %vm341_vm2, %v283_v20  ;;  %9651 = vmatmul.msk.bf16.vlgmr.msrb.gmra.mxu1 %vm341_vm2, %v283_v20 }
 0x4e9   : > { %9652 = vmatmul.msk.bf16.vlgmr.msrb.gmra.mxu2 %vm341_vm2, %v283_v20  ;;  %6976 = vmatpush.bf16.msrb.mxu0 %v6909_v40  ;;  %v7041_v26 = vpop.permute.xlu0 %7040 }
 0x4ea   : > { %6989 = vmatpush.bf16.msrb.mxu1 %v6912_v59  ;;  %7002 = vmatpush.bf16.msrb.mxu2 %v6915_v29  ;;  %v7052_v32 = vsel %vm6885_vm7, %v7039_v53, %v7041_v26  ;;  %v7053_v17 = vsel %vm6885_vm7, %v7041_v26, %v7043_v10 }
 0x4eb   : > { %9653 = vmatmul.msk.bf16.vlgmr.msrb.gmra.mxu3 %vm341_vm2, %v283_v20  ;;  %v7690_v20 = vld.sshfl [vmem:[#allocation1 + $0x18] sm:$0xff pattern:$0x73625140]  ;;  %v7067_v45 = vsel %vm345_vm1, %v7052_v32, 0 }
 0x4ec   : > { %7088 = vmatpush.bf16.msrb.mxu3 %v7061_v2  ;;  %v6104_v63 = vpop.f32.mrf.mxu2  ;;  %7848 = vst [vmem:[#allocation1] ss:$4 sm:$0xff] %v12161_v16  ;;  %7706 = vrot.lane.b32.xlu2 %v7690_v20, %s9826_s10  ;;  %v12310_v2 = vld [vmem:[%s13170_s1 + $0xbc] sm:$0xf] }
 0x4ed   : > { %v12257_v28 = vadd.f32 %v6104_v63, %v12129_v5  ;;  %v6007_v24 = vpop.f32.mrf.mxu0  ;;  %v6093_v3 = vpop.f32.mrf.mxu1  ;;  %v7051_v5 = vsel %vm6885_vm7, %v7037_v50, %v7039_v53  ;;  %v7696_v63 = vld.sshfl [vmem:[#allocation1 + $0x30] sm:$0xff pattern:$0x73625140] }
 0x4ee   : > { %v6117_v61 = vpop.f32.mrf.mxu3  ;;  %v7045_v9 = vpop.permute.xlu2 %7044  ;;  %v7064_v36 = vsel %vm345_vm1, %v7051_v5, 0 }
 0x4ef   : > { %v12260_v12 = vadd.f32 %v6117_v61, %v12132_v15  ;;  %v7698_v15 = vld.sshfl [vmem:[#allocation1 + $0x38] sm:$0xff pattern:$0x73625140]  ;;  %v7054_v41 = vsel %vm6885_vm7, %v7043_v10, %v7045_v9 }
 0x4f0   : > { %7714 = vrot.lane.b32.xlu0 %v7698_v15, %s9826_s10  ;;  %7851 = vst [vmem:[#allocation1 + $0x20] ss:$4 sm:$0xff] %v12185_v13 }
 0x4f1   : > { %v7047_v33 = vpop.permute.xlu0 %7046 }
 0x4f2   : > { %v7049_v6 = vpop.permute.xlu1 %7048 }
 0x4f3   : > { %v7852_v19 = vld.sshfl [vmem:[#allocation1] sm:$0xff pattern:$0x73625140]  ;;  %v7856_v46 = vld.sshfl [vmem:[#allocation1 + $0x10] sm:$0xff pattern:$0x73625140]  ;;  %v7056_v14 = vsel %vm6885_vm7, %v7047_v33, %v7049_v6 }
 0x4f4   : > { %v6106_v34 = vpop.f32.mrf.mxu2  ;;  %7868 = vrot.lane.b32.xlu1 %v7852_v19, %s9827_s15  ;;  %v7858_v55 = vld.sshfl [vmem:[#allocation1 + $0x18] sm:$0xff pattern:$0x73625140]  ;;  %v7079_v24 = vsel %vm345_vm1, %v7056_v14, 0  ;;  %7712 = vrot.lane.b32.xlu2 %v7696_v63, %s9826_s10 }
 0x4f5   : > { %v6130_v4 = vpop.f32.mrf.mxu0  ;;  %v6143_v35 = vpop.f32.mrf.mxu1  ;;  %v7854_v15 = vld.sshfl [vmem:[#allocation1 + $0x8] sm:$0xff pattern:$0x73625140] }
 0x4f6   : > { %v6119_v22 = vpop.f32.mrf.mxu3  ;;  %v12272_v18 = vadd.f32 %v6130_v4, %v12152_v47  ;;  %v12275_v51 = vadd.f32 %v6143_v35, %v12155_v30  ;;  %v7070_v47 = vsel %vm345_vm1, %v7053_v17, 0  ;;  %v7073_v30 = vsel %vm345_vm1, %v7054_v41, 0  ;;  %v7203_v1 = vpop.permute.xlu2 %7202  ;;  %8014 = vst [vmem:[#allocation1] ss:$4 sm:$0xff] %v12161_v16 }
 0x4f7   : > { %v7862_v22 = vld.sshfl [vmem:[#allocation1 + $0x28] sm:$0xff pattern:$0x73625140]  ;;  %v7864_v32 = vld.sshfl [vmem:[#allocation1 + $0x30] sm:$0xff pattern:$0x73625140] }
 0x4f8   : > { %9654 = vmatmul.msk.bf16.vlgmr.msra.gmra.mxu0 %vm341_vm2, %v257_v23  ;;  %9655 = vmatmul.msk.bf16.vlgmr.msra.gmra.mxu1 %vm341_vm2, %v257_v23 }
 0x4f9   : > { %9656 = vmatmul.msk.bf16.vlgmr.msra.gmra.mxu2 %vm341_vm2, %v257_v23  ;;  %7101 = vmatpush.bf16.msra.mxu0 %v7064_v36  ;;  %v7205_v54 = vpop.permute.xlu0 %7204 }
 0x4fa   : > { %7114 = vmatpush.bf16.msra.mxu1 %v7067_v45  ;;  %7127 = vmatpush.bf16.msra.mxu2 %v7070_v47  ;;  %v7219_v59 = vsel %vm7218_vm8, %v7203_v1, %v7205_v54 }
 0x4fb   : > { %9657 = vmatmul.msk.bf16.vlgmr.msra.gmra.mxu3 %vm341_vm2, %v257_v23  ;;  %7872 = vrot.lane.b32.xlu0 %v7856_v46, %s9827_s15 }
 0x4fc   : > { %7140 = vmatpush.bf16.msra.mxu3 %v7073_v30  ;;  %v6156_v58 = vpop.f32.mrf.mxu2  ;;  %7874 = vrot.lane.b32.xlu1 %v7858_v55, %s9827_s15 }
 0x4fd   : > { %v12289_v52 = vadd.f32 %v6156_v58, %v12169_v43  ;;  %v6132_v44 = vpop.f32.mrf.mxu0  ;;  %v6145_v50 = vpop.f32.mrf.mxu1  ;;  %7870 = vrot.lane.b32.xlu2 %v7854_v15, %s9827_s15  ;;  %v8023_v14 = vld.sshfl [vmem:[#allocation1 + $0x18] sm:$0xff pattern:$0x73625140] }
 0x4fe   : > { %v6169_v8 = vpop.f32.mrf.mxu3  ;;  %v7207_v42 = vpop.permute.xlu1 %7206  ;;  %v8019_v44 = vld.sshfl [vmem:[#allocation1 + $0x8] sm:$0xff pattern:$0x73625140]  ;;  %v7866_v50 = vld.sshfl [vmem:[#allocation1 + $0x38] sm:$0xff pattern:$0x73625140] }
 0x4ff   : > { %v12292_v49 = vadd.f32 %v6169_v8, %v12172_v60  ;;  %v7055_v60 = vsel %vm6885_vm7, %v7045_v9, %v7047_v33  ;;  %v7220_v37 = vsel %vm7218_vm8, %v7205_v54, %v7207_v42  ;;  %v7209_v3 = vpop.permute.xlu2 %7208 }
 0x500   : > { %v7076_v61 = vsel %vm345_vm1, %v7055_v60, 0 }
 0x501   : > { %v7211_v20 = vpop.permute.xlu0 %7210 }
 0x503   : > { %7878 = vrot.lane.b32.xlu0 %v7862_v22, %s9827_s15 }
 0x504   : > { %v6158_v43 = vpop.f32.mrf.mxu2  ;;  %7880 = vrot.lane.b32.xlu1 %v7864_v32, %s9827_s15 }
 0x505   : > { %v6260_v62 = vpop.f32.mrf.mxu0  ;;  %v6273_v40 = vpop.f32.mrf.mxu1 }
 0x506   : > { %v6171_v56 = vpop.f32.mrf.mxu3  ;;  %v12302_v29 = vadd.f32 %v6260_v62, %v12194_v11  ;;  %v12305_v53 = vadd.f32 %v6273_v40, %v12197_v27  ;;  %v7230_v11 = vsel %vm345_vm1, %v7219_v59, 0  ;;  %v7233_v27 = vsel %vm345_vm1, %v7220_v37, 0  ;;  %v7213_v5 = vpop.permute.xlu1 %7212 }
 0x507   : > { %v7215_v4 = vpop.permute.xlu2 %7214  ;;  %v7223_v39 = vsel %vm7218_vm8, %v7211_v20, %v7213_v5  ;;  %v7860_v56 = vld.sshfl [vmem:[#allocation1 + $0x20] sm:$0xff pattern:$0x73625140] }
 0x508   : > { %9658 = vmatmul.msk.bf16.vlgmr.msrb.gmra.mxu0 %vm341_vm2, %v257_v23  ;;  %9659 = vmatmul.msk.bf16.vlgmr.msrb.gmra.mxu1 %vm341_vm2, %v257_v23  ;;  %v7224_v36 = vsel %vm7218_vm8, %v7213_v5, %v7215_v4  ;;  %v7242_v6 = vsel %vm345_vm1, %v7223_v39, 0  ;;  %8016 = vst [vmem:[#allocation1 + $0x20] ss:$4 sm:$0xff] %v12185_v13 }
 0x509   : > { %9660 = vmatmul.msk.bf16.vlgmr.msrb.gmra.mxu2 %vm341_vm2, %v257_v23  ;;  %7153 = vmatpush.bf16.msrb.mxu0 %v7076_v61  ;;  %v7221_v23 = vsel %vm7218_vm8, %v7207_v42, %v7209_v3  ;;  %v7245_v58 = vsel %vm345_vm1, %v7224_v36, 0  ;;  %v7217_v8 = vpop.permute.xlu0 %7216 }
 0x50a   : > { %7166 = vmatpush.bf16.msrb.mxu1 %v7079_v24  ;;  %7257 = vmatpush.bf16.msrb.mxu2 %v7230_v11  ;;  %v7236_v30 = vsel %vm345_vm1, %v7221_v23, 0  ;;  %v7225_v37 = vsel %vm7218_vm8, %v7215_v4, %v7217_v8  ;;  %v8021_v23 = vld.sshfl [vmem:[#allocation1 + $0x10] sm:$0xff pattern:$0x73625140] }
 0x50b   : > { %9661 = vmatmul.msk.bf16.vlgmr.msrb.gmra.mxu3 %vm341_vm2, %v12310_v2  ;;  %7876 = vrot.lane.b32.xlu2 %v7860_v56, %s9827_s15 }
 0x50c   : > { %7270 = vmatpush.bf16.msrb.mxu3 %v7233_v27  ;;  %v6286_v26 = vpop.f32.mrf.mxu2  ;;  %8035 = vrot.lane.b32.xlu1 %v8019_v44, %s9827_s15 }
 0x50d   : > { %v12325_v21 = vadd.f32 %v6286_v26, %v12210_v25  ;;  %v6262_v9 = vpop.f32.mrf.mxu0  ;;  %v6275_v34 = vpop.f32.mrf.mxu1  ;;  %v12380_v26 = vld [vmem:[%s13170_s1 + $0x54] sm:$0xf] }
 0x50e   : > { %v6299_v7 = vpop.f32.mrf.mxu3 }
 0x50f   : > { %v12328_v10 = vadd.f32 %v6299_v7, %v12213_v38  ;;  %v7222_v38 = vsel %vm7218_vm8, %v7209_v3, %v7211_v20  ;;  %v7370_v60 = vpop.permute.xlu2 %7369  ;;  %v8025_v11 = vld.sshfl [vmem:[#allocation1 + $0x20] sm:$0xff pattern:$0x73625140]  ;;  %v7248_v7 = vsel %vm345_vm1, %v7225_v37, 0 }
 0x510   : > { %v7239_v33 = vsel %vm345_vm1, %v7222_v38, 0  ;;  %v8029_v22 = vld.sshfl [vmem:[#allocation1 + $0x30] sm:$0xff pattern:$0x73625140] }
 0x511   : > { %v7372_v55 = vpop.permute.xlu0 %7371  ;;  %v8027_v20 = vld.sshfl [vmem:[#allocation1 + $0x28] sm:$0xff pattern:$0x73625140] }
 0x512   : > { %v7384_v61 = vsel %vm7218_vm8, %v7370_v60, %v7372_v55 }
 0x513   : > { %7882 = vrot.lane.b32.xlu2 %v7866_v50, %s9827_s15 }
 0x514   : > { %v6288_v35 = vpop.f32.mrf.mxu2  ;;  %8041 = vrot.lane.b32.xlu1 %v8025_v11, %s9827_s15 }
 0x515   : > { %v6312_v17 = vpop.f32.mrf.mxu0  ;;  %v6325_v41 = vpop.f32.mrf.mxu1 }
 0x516   : > { %v6301_v25 = vpop.f32.mrf.mxu3  ;;  %v12339_v45 = vadd.f32 %v6312_v17, %v12229_v0  ;;  %v12342_v47 = vadd.f32 %v6325_v41, %v12232_v48  ;;  %v8017_v0 = vld.sshfl [vmem:[#allocation1] sm:$0xff pattern:$0x73625140]  ;;  %v7368_v48 = vpop.permute.xlu1 %7367 }
 0x517   : > { %8033 = vrot.lane.b32.xlu0 %v8017_v0, %s9827_s15  ;;  %v7376_v34 = vpop.permute.xlu2 %7375  ;;  %v8031_v25 = vld.sshfl [vmem:[#allocation1 + $0x38] sm:$0xff pattern:$0x73625140]  ;;  %8181 = vst [vmem:[#allocation1] ss:$4 sm:$0xff] %v12161_v16 }
 0x518   : > { %9662 = vmatmul.msk.bf16.vlgmr.msra.gmra.mxu0 %vm341_vm2, %v12310_v2  ;;  %9663 = vmatmul.msk.bf16.vlgmr.msra.gmra.mxu1 %vm341_vm2, %v12310_v2  ;;  %8184 = vst [vmem:[#allocation1 + $0x20] ss:$4 sm:$0xff] %v12185_v13 }
 0x519   : > { %9664 = vmatmul.msk.bf16.vlgmr.msra.gmra.mxu2 %vm341_vm2, %v12310_v2  ;;  %7283 = vmatpush.bf16.msra.mxu0 %v7236_v30  ;;  %v7378_v38 = vpop.permute.xlu0 %7377 }
 0x51a   : > { %7296 = vmatpush.bf16.msra.mxu1 %v7239_v33  ;;  %7309 = vmatpush.bf16.msra.mxu2 %v7242_v6  ;;  %v7387_v36 = vsel %vm7218_vm8, %v7376_v34, %v7378_v38 }
 0x51b   : > { %9665 = vmatmul.msk.bf16.vlgmr.msra.gmra.mxu3 %vm341_vm2, %v12310_v2  ;;  %8037 = vrot.lane.b32.xlu2 %v8021_v23, %s9827_s15  ;;  %v7406_v50 = vsel %vm345_vm1, %v7387_v36, 0 }
 0x51c   : > { %7322 = vmatpush.bf16.msra.mxu3 %v7245_v58  ;;  %v6338_v19 = vpop.f32.mrf.mxu2  ;;  %8047 = vrot.lane.b32.xlu1 %v8031_v25, %s9827_s15 }
 0x51d   : > { %v12359_v46 = vadd.f32 %v6338_v19, %v12240_v31  ;;  %v6314_v54 = vpop.f32.mrf.mxu0  ;;  %v6327_v43 = vpop.f32.mrf.mxu1  ;;  %v7383_v31 = vsel %vm7218_vm8, %v7368_v48, %v7370_v60 }
 0x51e   : > { %v6424_v1 = vpop.f32.mrf.mxu3  ;;  %v7374_v62 = vpop.permute.xlu1 %7373  ;;  %v7394_v9 = vsel %vm345_vm1, %v7383_v31, 0  ;;  %v8187_v48 = vld.sshfl [vmem:[#allocation1 + $0x8] sm:$0xff pattern:$0x73625140] }
 0x51f   : > { %v12362_v42 = vadd.f32 %v6424_v1, %v12243_v57  ;;  %8039 = vrot.lane.b32.xlu0 %v8023_v14, %s9827_s15  ;;  %v7385_v24 = vsel %vm7218_vm8, %v7372_v55, %v7374_v62  ;;  %v7382_v41 = vpop.permute.xlu2 %7381  ;;  %v8189_v54 = vld.sshfl [vmem:[#allocation1 + $0x10] sm:$0xff pattern:$0x73625140]  ;;  %v8195_v31 = vld.sshfl [vmem:[#allocation1 + $0x28] sm:$0xff pattern:$0x73625140] }
 0x521   : > { %v7536_v19 = vpop.permute.xlu0 %7535 }
 0x523   : > { %8043 = vrot.lane.b32.xlu2 %v8027_v20, %s9827_s15  ;;  %v8191_v20 = vld.sshfl [vmem:[#allocation1 + $0x18] sm:$0xff pattern:$0x73625140] }
 0x524   : > { %v6340_v40 = vpop.f32.mrf.mxu2  ;;  %8205 = vrot.lane.b32.xlu1 %v8189_v54, %s9828_s22 }
 0x525   : > { %v6437_v57 = vpop.f32.mrf.mxu0  ;;  %v6450_v63 = vpop.f32.mrf.mxu1  ;;  %v8193_v40 = vld.sshfl [vmem:[#allocation1 + $0x20] sm:$0xff pattern:$0x73625140] }
 0x526   : > { %v6426_v59 = vpop.f32.mrf.mxu3  ;;  %v12372_v27 = vadd.f32 %v6437_v57, %v12257_v28  ;;  %v12375_v3 = vadd.f32 %v6450_v63, %v12260_v12  ;;  %v7397_v28 = vsel %vm345_vm1, %v7384_v61, 0  ;;  %v7400_v12 = vsel %vm345_vm1, %v7385_v24, 0  ;;  %v7380_v17 = vpop.permute.xlu1 %7379  ;;  %v12439_v24 = vld.sshfl [vmem:[#allocation1 + $0x30] sm:$0xff pattern:$0x73625140] }
 0x527   : > { %8045 = vrot.lane.b32.xlu0 %v8029_v22, %s9827_s15  ;;  %v7388_v6 = vsel %vm7218_vm8, %v7378_v38, %v7380_v17  ;;  %v7389_v58 = vsel %vm7218_vm8, %v7380_v17, %v7382_v41  ;;  %v7540_v59 = vpop.permute.xlu2 %7539 }
 0x528   : > { %9666 = vmatmul.msk.bf16.vlgmr.msrb.gmra.mxu0 %vm341_vm2, %v12310_v2  ;;  %9667 = vmatmul.msk.bf16.vlgmr.msrb.gmra.mxu1 %vm341_vm2, %v12310_v2 }
 0x529   : > { %9668 = vmatmul.msk.bf16.vlgmr.msrb.gmra.mxu2 %vm341_vm2, %v12380_v26  ;;  %7335 = vmatpush.bf16.msrb.mxu0 %v7248_v7  ;;  %v7542_v37 = vpop.permute.xlu0 %7541 }
 0x52a   : > { %7421 = vmatpush.bf16.msrb.mxu1 %v7394_v9  ;;  %7434 = vmatpush.bf16.msrb.mxu2 %v7397_v28  ;;  %v285_v9 = vld [vmem:[%s13170_s1 + $0xc0] sm:$0xf]  ;;  %v7554_v28 = vsel %vm7551_vm9, %v7540_v59, %v7542_v37 }
 0x52b   : > { %9669 = vmatmul.msk.bf16.vlgmr.msrb.gmra.mxu3 %vm341_vm2, %v12380_v26 }
 0x52c   : > { %7447 = vmatpush.bf16.msrb.mxu3 %v7400_v12  ;;  %v6463_v5 = vpop.f32.mrf.mxu2  ;;  %8211 = vrot.lane.b32.xlu1 %v8195_v31, %s9828_s22 }
 0x52d   : > { %v12398_v2 = vadd.f32 %v6463_v5, %v12272_v18  ;;  %v6439_v4 = vpop.f32.mrf.mxu0  ;;  %v6452_v35 = vpop.f32.mrf.mxu1  ;;  %v8199_v5 = vld.sshfl [vmem:[#allocation1 + $0x38] sm:$0xff pattern:$0x73625140] }
 0x52e   : > { %v6476_v32 = vpop.f32.mrf.mxu3  ;;  %v7538_v1 = vpop.permute.xlu1 %7537  ;;  %8349 = vst [vmem:[#allocation1 + $0x20] ss:$4 sm:$0xff] %v12185_v13  ;;  %v8185_v35 = vld.sshfl [vmem:[#allocation1] sm:$0xff pattern:$0x73625140] }
 0x52f   : > { %v12401_v15 = vadd.f32 %v6476_v32, %v12275_v51  ;;  %v7386_v51 = vsel %vm7218_vm8, %v7374_v62, %v7376_v34  ;;  %8203 = vrot.lane.b32.xlu0 %v8187_v48, %s9828_s22  ;;  %v7553_v11 = vsel %vm7551_vm9, %v7538_v1, %v7540_v59  ;;  %v7546_v25 = vpop.permute.xlu2 %7545  ;;  %8347 = vst [vmem:[#allocation1] ss:$4 sm:$0xff] %v12161_v16 }
 0x530   : > { %v7403_v44 = vsel %vm345_vm1, %v7386_v51, 0  ;;  %v7566_v4 = vsel %vm345_vm1, %v7553_v11, 0  ;;  %8201 = vrot.lane.b32.xlu2 %v8185_v35, %s9828_s22 }
 0x532   : > { %v7548_v23 = vpop.permute.xlu0 %7547 }
 0x534   : > { %v6465_v18 = vpop.f32.mrf.mxu2 }
 0x535   : > { %v6489_v30 = vpop.f32.mrf.mxu0  ;;  %v6502_v33 = vpop.f32.mrf.mxu1  ;;  %v8362_v11 = vld.sshfl [vmem:[#allocation1 + $0x30] sm:$0xff pattern:$0x73625140] }
 0x536   : > { %v6478_v39 = vpop.f32.mrf.mxu3  ;;  %v12412_v8 = vadd.f32 %v6489_v30, %v12289_v52  ;;  %v12415_v0 = vadd.f32 %v6502_v33, %v12292_v49  ;;  %v7409_v52 = vsel %vm345_vm1, %v7388_v6, 0  ;;  %v7412_v49 = vsel %vm345_vm1, %v7389_v58, 0  ;;  %v7544_v57 = vpop.permute.xlu1 %7543  ;;  %v8354_v36 = vld.sshfl [vmem:[#allocation1 + $0x10] sm:$0xff pattern:$0x73625140] }
 0x537   : > { %8209 = vrot.lane.b32.xlu0 %v8193_v40, %s9828_s22  ;;  %v7555_v12 = vsel %vm7551_vm9, %v7542_v37, %v7544_v57  ;;  %v8350_v30 = vld.sshfl [vmem:[#allocation1] sm:$0xff pattern:$0x73625140]  ;;  %v7701_v33 = vpop.permute.xlu2 %7700  ;;  %v7556_v48 = vsel %vm7551_vm9, %v7544_v57, %v7546_v25 }
 0x538   : > { %9670 = vmatmul.msk.bf16.vlgmr.msra.gmra.mxu0 %vm341_vm2, %v12380_v26  ;;  %9671 = vmatmul.msk.bf16.vlgmr.msra.gmra.mxu1 %vm341_vm2, %v12380_v26 }
 0x539   : > { %9672 = vmatmul.msk.bf16.vlgmr.msra.gmra.mxu2 %vm341_vm2, %v12380_v26  ;;  %7460 = vmatpush.bf16.msra.mxu0 %v7403_v44 }
 0x53a   : > { %7473 = vmatpush.bf16.msra.mxu1 %v7406_v50  ;;  %7486 = vmatpush.bf16.msra.mxu2 %v7409_v52 }
 0x53b   : > { %9673 = vmatmul.msk.bf16.vlgmr.msra.gmra.mxu3 %vm341_vm2, %v12380_v26  ;;  %8366 = vrot.lane.b32.xlu1 %v8350_v30, %s9828_s22 }
 0x53c   : > { %7499 = vmatpush.bf16.msra.mxu3 %v7412_v49  ;;  %v6593_v43 = vpop.f32.mrf.mxu2  ;;  %8207 = vrot.lane.b32.xlu2 %v8191_v20, %s9828_s22 }
 0x53d   : > { %v12433_v60 = vadd.f32 %v6593_v43, %v12302_v29  ;;  %v6491_v55 = vpop.f32.mrf.mxu0  ;;  %v6504_v62 = vpop.f32.mrf.mxu1  ;;  %v7552_v29 = vsel %vm7551_vm9, %v7536_v19, %v7538_v1  ;;  %v7575_v1 = vsel %vm345_vm1, %v7556_v48, 0 }
 0x53e   : > { %v6606_v56 = vpop.f32.mrf.mxu3  ;;  %v7563_v32 = vsel %vm345_vm1, %v7552_v29, 0  ;;  %v7703_v19 = vpop.permute.xlu0 %7702 }
 0x53f   : > { %v12436_v14 = vadd.f32 %v6606_v56, %v12305_v53  ;;  %8215 = vrot.lane.b32.xlu0 %v8199_v5, %s9828_s22  ;;  %v7716_v43 = vsel %vm7551_vm9, %v7701_v33, %v7703_v19  ;;  %v8358_v33 = vld.sshfl [vmem:[#allocation1 + $0x20] sm:$0xff pattern:$0x73625140] }
 0x544   : > { %v6595_v63 = vpop.f32.mrf.mxu2  ;;  %8213 = vrot.lane.b32.xlu2 %v12439_v24, %s9828_s22 }
 0x545   : > { %v6619_v53 = vpop.f32.mrf.mxu0  ;;  %v6632_v7 = vpop.f32.mrf.mxu1  ;;  %v8360_v63 = vld.sshfl [vmem:[#allocation1 + $0x28] sm:$0xff pattern:$0x73625140] }
 0x546   : > { %v6608_v61 = vpop.f32.mrf.mxu3  ;;  %v12450_v34 = vadd.f32 %v6619_v53, %v12325_v21  ;;  %v12453_v22 = vadd.f32 %v6632_v7, %v12328_v10  ;;  %v7569_v21 = vsel %vm345_vm1, %v7554_v28, 0  ;;  %v7572_v10 = vsel %vm345_vm1, %v7555_v12, 0  ;;  %v259_v12 = vld [vmem:[%s13170_s1 + $0x58] sm:$0xf] }
 0x547   : > { %8370 = vrot.lane.b32.xlu0 %v8354_v36, %s9828_s22  ;;  %v7707_v61 = vpop.permute.xlu2 %7706 }
 0x548   : > { %9674 = vmatmul.msk.bf16.vlgmr.msrb.gmra.mxu0 %vm341_vm2, %v12380_v26  ;;  %9675 = vmatmul.msk.bf16.vlgmr.msrb.gmra.mxu1 %vm341_vm2, %v285_v9 }
 0x549   : > { %9676 = vmatmul.msk.bf16.vlgmr.msrb.gmra.mxu2 %vm341_vm2, %v285_v9  ;;  %7590 = vmatpush.bf16.msrb.mxu0 %v7563_v32  ;;  %v7550_v51 = vpop.permute.xlu1 %7549 }
 0x54a   : > { %7603 = vmatpush.bf16.msrb.mxu1 %v7566_v4  ;;  %7616 = vmatpush.bf16.msrb.mxu2 %v7569_v21  ;;  %v7558_v50 = vsel %vm7551_vm9, %v7548_v23, %v7550_v51  ;;  %v8352_v21 = vld.sshfl [vmem:[#allocation1 + $0x8] sm:$0xff pattern:$0x73625140] }
 0x54b   : > { %9677 = vmatmul.msk.bf16.vlgmr.msrb.gmra.mxu3 %vm341_vm2, %v285_v9  ;;  %v7581_v56 = vsel %vm345_vm1, %v7558_v50, 0 }
 0x54c   : > { %7629 = vmatpush.bf16.msrb.mxu3 %v7572_v10  ;;  %v6645_v26 = vpop.f32.mrf.mxu2  ;;  %8368 = vrot.lane.b32.xlu2 %v8352_v21, %s9828_s22 }
 0x54d   : > { %v12469_v17 = vadd.f32 %v6645_v26, %v12339_v45  ;;  %v6621_v18 = vpop.f32.mrf.mxu0  ;;  %v6634_v39 = vpop.f32.mrf.mxu1  ;;  %v7557_v45 = vsel %vm7551_vm9, %v7546_v25, %v7548_v23  ;;  %v8364_v26 = vld.sshfl [vmem:[#allocation1 + $0x38] sm:$0xff pattern:$0x73625140] }
 0x54e   : > { %v6658_v38 = vpop.f32.mrf.mxu3  ;;  %v7578_v54 = vsel %vm345_vm1, %v7557_v45, 0  ;;  %8517 = vst [vmem:[#allocation1 + $0x20] ss:$4 sm:$0xff] %v12185_v13 }
 0x54f   : > { %v12472_v41 = vadd.f32 %v6658_v38, %v12342_v47  ;;  %8376 = vrot.lane.b32.xlu0 %v8360_v63, %s9828_s22  ;;  %v7713_v23 = vpop.permute.xlu2 %7712 }
 0x551   : > { %v7705_v55 = vpop.permute.xlu1 %7704  ;;  %v7709_v29 = vpop.permute.xlu0 %7708 }
 0x552   : > { %v7717_v28 = vsel %vm7551_vm9, %v7703_v19, %v7705_v55  ;;  %v7718_v24 = vsel %vm7551_vm9, %v7705_v55, %v7707_v61  ;;  %v7719_v20 = vsel %vm7551_vm9, %v7707_v61, %v7709_v29 }
 0x553   : > { %v7730_v10 = vsel %vm345_vm1, %v7717_v28, 0  ;;  %v7733_v35 = vsel %vm345_vm1, %v7718_v24, 0  ;;  %v7736_v25 = vsel %vm345_vm1, %v7719_v20, 0 }
 0x554   : > { %v6647_v6 = vpop.f32.mrf.mxu2  ;;  %8374 = vrot.lane.b32.xlu2 %v8358_v33, %s9828_s22 }
 0x555   : > { %v6671_v47 = vpop.f32.mrf.mxu0  ;;  %v6757_v44 = vpop.f32.mrf.mxu1  ;;  %v8528_v63 = vld.sshfl [vmem:[#allocation1 + $0x28] sm:$0xff pattern:$0x73625140]  ;;  %v8530_v28 = vld.sshfl [vmem:[#allocation1 + $0x30] sm:$0xff pattern:$0x73625140] }
 0x556   : > { %v6660_v58 = vpop.f32.mrf.mxu3  ;;  %v12481_v52 = vadd.f32 %v6671_v47, %v12359_v46  ;;  %v12484_v49 = vadd.f32 %v6757_v44, %v12362_v42  ;;  %v7727_v46 = vsel %vm345_vm1, %v7716_v43, 0  ;;  %v8356_v42 = vld.sshfl [vmem:[#allocation1 + $0x18] sm:$0xff pattern:$0x73625140] }
 0x557   : > { %8372 = vrot.lane.b32.xlu1 %v8356_v42, %s9828_s22  ;;  %8514 = vst [vmem:[#allocation1] ss:$4 sm:$0xff] %v12161_v16  ;;  %v7871_v45 = vpop.permute.xlu2 %7870  ;;  %v12552_v42 = vld [vmem:[%s13170_s1 + $0xc4] sm:$0xf] }
 0x558   : > { %9678 = vmatmul.msk.bf16.vlgmr.msra.gmra.mxu0 %vm341_vm2, %v285_v9  ;;  %9679 = vmatmul.msk.bf16.vlgmr.msra.gmra.mxu1 %vm341_vm2, %v285_v9  ;;  %v8532_v24 = vld.sshfl [vmem:[#allocation1 + $0x38] sm:$0xff pattern:$0x73625140] }
 0x559   : > { %9680 = vmatmul.msk.bf16.vlgmr.msra.gmra.mxu2 %vm341_vm2, %v285_v9  ;;  %7642 = vmatpush.bf16.msra.mxu0 %v7575_v1  ;;  %v7711_v53 = vpop.permute.xlu1 %7710 }
 0x55a   : > { %7655 = vmatpush.bf16.msra.mxu1 %v7578_v54  ;;  %7668 = vmatpush.bf16.msra.mxu2 %v7581_v56  ;;  %v7720_v5 = vsel %vm7551_vm9, %v7709_v29, %v7711_v53  ;;  %v7721_v44 = vsel %vm7551_vm9, %v7711_v53, %v7713_v23 }
 0x55b   : > { %9681 = vmatmul.msk.bf16.vlgmr.msra.gmra.mxu3 %vm341_vm2, %v285_v9 }
 0x55c   : > { %7754 = vmatpush.bf16.msra.mxu3 %v7727_v46  ;;  %v6770_v62 = vpop.f32.mrf.mxu2  ;;  %8380 = vrot.lane.b32.xlu2 %v8364_v26, %s9828_s22 }
 0x55d   : > { %v12499_v59 = vadd.f32 %v6770_v62, %v12372_v27  ;;  %v6673_v31 = vpop.f32.mrf.mxu0  ;;  %v6759_v57 = vpop.f32.mrf.mxu1  ;;  %v8526_v62 = vld.sshfl [vmem:[#allocation1 + $0x20] sm:$0xff pattern:$0x73625140] }
 0x55e   : > { %v6783_v40 = vpop.f32.mrf.mxu3  ;;  %v8518_v6 = vld.sshfl [vmem:[#allocation1] sm:$0xff pattern:$0x73625140]  ;;  %v8520_v58 = vld.sshfl [vmem:[#allocation1 + $0x8] sm:$0xff pattern:$0x73625140] }
 0x55f   : > { %v12502_v37 = vadd.f32 %v6783_v40, %v12375_v3  ;;  %8378 = vrot.lane.b32.xlu1 %v8362_v11, %s9828_s22  ;;  %8534 = vrot.lane.b32.xlu0 %v8518_v6, %s9829_s28  ;;  %v8524_v19 = vld.sshfl [vmem:[#allocation1 + $0x18] sm:$0xff pattern:$0x73625140]  ;;  %v7742_v40 = vsel %vm345_vm1, %v7721_v44, 0  ;;  %8682 = vst [vmem:[#allocation1 + $0x20] ss:$4 sm:$0xff] %v12185_v13 }
 0x560   : > { %v8522_v21 = vld.sshfl [vmem:[#allocation1 + $0x10] sm:$0xff pattern:$0x73625140] }
 0x561   : > { %8680 = vst [vmem:[#allocation1] ss:$4 sm:$0xff] %v12161_v16 }
 0x564   : > { %v6772_v7 = vpop.f32.mrf.mxu2  ;;  %8538 = vrot.lane.b32.xlu2 %v8522_v21, %s9829_s28 }
 0x565   : > { %v6796_v27 = vpop.f32.mrf.mxu0  ;;  %v6809_v3 = vpop.f32.mrf.mxu1 }
 0x566   : > { %v6785_v9 = vpop.f32.mrf.mxu3  ;;  %v12514_v32 = vadd.f32 %v6796_v27, %v12398_v2  ;;  %v12517_v4 = vadd.f32 %v6809_v3, %v12401_v15  ;;  %v7739_v2 = vsel %vm345_vm1, %v7720_v5, 0  ;;  %v7715_v15 = vpop.permute.xlu0 %7714 }
 0x567   : > { %8536 = vrot.lane.b32.xlu1 %v8520_v58, %s9829_s28  ;;  %v7869_v48 = vpop.permute.xlu1 %7868  ;;  %v7722_v50 = vsel %vm7551_vm9, %v7713_v23, %v7715_v15  ;;  %8540 = vrot.lane.b32.xlu0 %v8524_v19, %s9829_s28  ;;  %v7877_v27 = vpop.permute.xlu2 %7876 }
 0x568   : > { %9682 = vmatmul.msk.bf16.vlgmr.msrb.gmra.mxu0 %vm341_vm2, %v259_v12  ;;  %9683 = vmatmul.msk.bf16.vlgmr.msrb.gmra.mxu1 %vm341_vm2, %v259_v12  ;;  %v7885_v43 = vsel %vm7884_vm10, %v7869_v48, %v7871_v45  ;;  %v7745_v31 = vsel %vm345_vm1, %v7722_v50, 0  ;;  %v8687_v48 = vld.sshfl [vmem:[#allocation1 + $0x10] sm:$0xff pattern:$0x73625140] }
 0x569   : > { %9684 = vmatmul.msk.bf16.vlgmr.msrb.gmra.mxu2 %vm341_vm2, %v259_v12  ;;  %7767 = vmatpush.bf16.msrb.mxu0 %v7730_v10 }
 0x56a   : > { %7780 = vmatpush.bf16.msrb.mxu1 %v7733_v35  ;;  %7793 = vmatpush.bf16.msrb.mxu2 %v7736_v25 }
 0x56b   : > { %9685 = vmatmul.msk.bf16.vlgmr.msrb.gmra.mxu3 %vm341_vm2, %v259_v12 }
 0x56c   : > { %7806 = vmatpush.bf16.msrb.mxu3 %v7739_v2  ;;  %v6822_v38 = vpop.f32.mrf.mxu2  ;;  %8544 = vrot.lane.b32.xlu2 %v8528_v63, %s9829_s28 }
 0x56d   : > { %v12530_v39 = vadd.f32 %v6822_v38, %v12412_v8  ;;  %v6798_v36 = vpop.f32.mrf.mxu0  ;;  %v6811_v30 = vpop.f32.mrf.mxu1 }
 0x56e   : > { %v6835_v18 = vpop.f32.mrf.mxu3  ;;  %v7873_v8 = vpop.permute.xlu0 %7872  ;;  %v8685_v36 = vld.sshfl [vmem:[#allocation1 + $0x8] sm:$0xff pattern:$0x73625140] }
 0x56f   : > { %v12533_v51 = vadd.f32 %v6835_v18, %v12415_v0  ;;  %v7886_v56 = vsel %vm7884_vm10, %v7871_v45, %v7873_v8  ;;  %8542 = vrot.lane.b32.xlu1 %v8526_v62, %s9829_s28  ;;  %v7875_v57 = vpop.permute.xlu1 %7874  ;;  %8546 = vrot.lane.b32.xlu0 %v8530_v28, %s9829_s28  ;;  %v7883_v18 = vpop.permute.xlu2 %7882  ;;  %v12621_v62 = vld [vmem:[%s13170_s1 + $0x5c] sm:$0xf] }
 0x574   : > { %v6824_v0 = vpop.f32.mrf.mxu2 }
 0x575   : > { %v6926_v1 = vpop.f32.mrf.mxu0  ;;  %v6939_v54 = vpop.f32.mrf.mxu1 }
 0x576   : > { %v6837_v47 = vpop.f32.mrf.mxu3  ;;  %v12544_v55 = vadd.f32 %v6926_v1, %v12433_v60  ;;  %v12547_v46 = vadd.f32 %v6939_v54, %v12436_v14  ;;  %v7896_v60 = vsel %vm345_vm1, %v7885_v43, 0  ;;  %v7899_v14 = vsel %vm345_vm1, %v7886_v56, 0  ;;  %v7879_v3 = vpop.permute.xlu0 %7878 }
 0x577   : > { %8548 = vrot.lane.b32.xlu1 %v8532_v24, %s9829_s28  ;;  %v7889_v25 = vsel %vm7884_vm10, %v7877_v27, %v7879_v3  ;;  %8701 = vrot.lane.b32.xlu0 %v8685_v36, %s9829_s28  ;;  %v8038_v0 = vpop.permute.xlu2 %8037  ;;  %v8691_v47 = vld.sshfl [vmem:[#allocation1 + $0x20] sm:$0xff pattern:$0x73625140] }
 0x578   : > { %9686 = vmatmul.msk.bf16.vlgmr.msra.gmra.mxu0 %vm341_vm2, %v259_v12  ;;  %9687 = vmatmul.msk.bf16.vlgmr.msra.gmra.mxu1 %vm341_vm2, %v259_v12  ;;  %v7908_v38 = vsel %vm345_vm1, %v7889_v25, 0 }
 0x579   : > { %9688 = vmatmul.msk.bf16.vlgmr.msra.gmra.mxu2 %vm341_vm2, %v259_v12  ;;  %7819 = vmatpush.bf16.msra.mxu0 %v7742_v40  ;;  %v7881_v12 = vpop.permute.xlu1 %7880 }
 0x57a   : > { %7832 = vmatpush.bf16.msra.mxu1 %v7745_v31  ;;  %7923 = vmatpush.bf16.msra.mxu2 %v7896_v60  ;;  %v7890_v2 = vsel %vm7884_vm10, %v7879_v3, %v7881_v12  ;;  %v8693_v31 = vld.sshfl [vmem:[#allocation1 + $0x28] sm:$0xff pattern:$0x73625140] }
 0x57b   : > { %9689 = vmatmul.msk.bf16.vlgmr.msra.gmra.mxu3 %vm341_vm2, %v12552_v42  ;;  %v7911_v16 = vsel %vm345_vm1, %v7890_v2, 0 }
 0x57c   : > { %7936 = vmatpush.bf16.msra.mxu3 %v7899_v14  ;;  %v6952_v61 = vpop.f32.mrf.mxu2 }
 0x57d   : > { %v12567_v11 = vadd.f32 %v6952_v61, %v12450_v34  ;;  %v6928_v7 = vpop.f32.mrf.mxu0  ;;  %v6941_v9 = vpop.f32.mrf.mxu1  ;;  %v7887_v34 = vsel %vm7884_vm10, %v7873_v8, %v7875_v57  ;;  %v8695_v61 = vld.sshfl [vmem:[#allocation1 + $0x30] sm:$0xff pattern:$0x73625140] }
 0x57e   : > { %v6965_v29 = vpop.f32.mrf.mxu3  ;;  %v7902_v15 = vsel %vm345_vm1, %v7887_v34, 0  ;;  %v8689_v9 = vld.sshfl [vmem:[#allocation1 + $0x18] sm:$0xff pattern:$0x73625140] }
 0x57f   : > { %v12570_v53 = vadd.f32 %v6965_v29, %v12453_v22  ;;  %v7888_v22 = vsel %vm7884_vm10, %v7875_v57, %v7877_v27  ;;  %8703 = vrot.lane.b32.xlu1 %v8687_v48, %s9829_s28  ;;  %8707 = vrot.lane.b32.xlu0 %v8691_v47, %s9829_s28  ;;  %v8044_v29 = vpop.permute.xlu2 %8043  ;;  %v8683_v34 = vld.sshfl [vmem:[#allocation1] sm:$0xff pattern:$0x73625140] }
 0x580   : > { %v7905_v26 = vsel %vm345_vm1, %v7888_v22, 0  ;;  %8699 = vrot.lane.b32.xlu2 %v8683_v34, %s9829_s28 }
 0x581   : > { %v8036_v45 = vpop.permute.xlu1 %8035 }
 0x582   : > { %v8050_v54 = vsel %vm7884_vm10, %v8036_v45, %v8038_v0 }
 0x584   : > { %v6954_v20 = vpop.f32.mrf.mxu2 }
 0x585   : > { %v6978_v10 = vpop.f32.mrf.mxu0  ;;  %v6991_v35 = vpop.f32.mrf.mxu1  ;;  %v12644_v20 = vld [vmem:[%s9876_s23 + $0xa] sm:$0xff] }
 0x586   : > { %v6967_v5 = vpop.f32.mrf.mxu3  ;;  %v12582_v13 = vadd.f32 %v6978_v10, %v12469_v17  ;;  %v12585_v23 = vadd.f32 %v6991_v35, %v12472_v41 }
 0x587   : > { %8709 = vrot.lane.b32.xlu1 %v8693_v31, %s9829_s28  ;;  %v12647_v5 = vld [vmem:[%s9876_s23 + $0x2] sm:$0xff]  ;;  %s9830_s23 = smov 34  }
 0x588   : > { %9690 = vmatmul.msk.bf16.vlgmr.msrb.gmra.mxu0 %vm341_vm2, %v12552_v42  ;;  %9691 = vmatmul.msk.bf16.vlgmr.msrb.gmra.mxu1 %vm341_vm2, %v12552_v42  ;;  %8847 = vst [vmem:[#allocation1] ss:$4 sm:$0xff] %v12647_v5 }
 0x589   : > { %9692 = vmatmul.msk.bf16.vlgmr.msrb.gmra.mxu2 %vm341_vm2, %v12552_v42  ;;  %7949 = vmatpush.bf16.msrb.mxu0 %v7902_v15  ;;  %v8034_v8 = vpop.permute.xlu0 %8033  ;;  %v8042_v63 = vpop.permute.xlu1 %8041 }
 0x58a   : > { %7962 = vmatpush.bf16.msrb.mxu1 %v7905_v26  ;;  %7975 = vmatpush.bf16.msrb.mxu2 %v7908_v38  ;;  %v8053_v35 = vsel %vm7884_vm10, %v8042_v63, %v8044_v29 }
 0x58b   : > { %9693 = vmatmul.msk.bf16.vlgmr.msrb.gmra.mxu3 %vm341_vm2, %v12552_v42  ;;  %v8072_v36 = vsel %vm345_vm1, %v8053_v35, 0  ;;  %8705 = vrot.lane.b32.xlu2 %v8689_v9, %s9829_s28 }
 0x58c   : > { %7988 = vmatpush.bf16.msrb.mxu3 %v7911_v16  ;;  %v7004_v17 = vpop.f32.mrf.mxu2 }
 0x58d   : > { %v12600_v30 = vadd.f32 %v7004_v17, %v12481_v52  ;;  %v6980_v6 = vpop.f32.mrf.mxu0  ;;  %v6993_v58 = vpop.f32.mrf.mxu1  ;;  %v7891_v52 = vsel %vm7884_vm10, %v7881_v12, %v7883_v18  ;;  %v8697_v12 = vld.sshfl [vmem:[#allocation1 + $0x38] sm:$0xff pattern:$0x73625140] }
 0x58e   : > { %v7090_v41 = vpop.f32.mrf.mxu3  ;;  %v7914_v60 = vsel %vm345_vm1, %v7891_v52, 0  ;;  %8850 = vst [vmem:[#allocation1 + $0x20] ss:$4 sm:$0xff] %v12644_v20  ;;  %8713 = vrot.lane.b32.xlu0 %v8697_v12, %s9829_s28  ;;  %v8202_v17 = vpop.permute.xlu2 %8201 }
 0x58f   : > { %v12603_v33 = vadd.f32 %v7090_v41, %v12484_v49  ;;  %v8049_v49 = vsel %vm7884_vm10, %v8034_v8, %v8036_v45  ;;  %v8851_v18 = vld.sshfl [vmem:[#allocation1] sm:$0xff pattern:$0x73625140]  ;;  %v8855_v58 = vld.sshfl [vmem:[#allocation1 + $0x10] sm:$0xff pattern:$0x73625140] }
 0x590   : > { %v8060_v14 = vsel %vm345_vm1, %v8049_v49, 0  ;;  %8867 = vrot.lane.b32.xlu1 %v8851_v18, %s9830_s23  ;;  %v8857_v45 = vld.sshfl [vmem:[#allocation1 + $0x18] sm:$0xff pattern:$0x73625140] }
 0x591   : > { %v8040_v40 = vpop.permute.xlu0 %8039  ;;  %v8853_v9 = vld.sshfl [vmem:[#allocation1 + $0x8] sm:$0xff pattern:$0x73625140] }
 0x592   : > { %v8051_v57 = vsel %vm7884_vm10, %v8038_v0, %v8040_v40  ;;  %v8052_v10 = vsel %vm7884_vm10, %v8040_v40, %v8042_v63  ;;  %9013 = vst [vmem:[#allocation1] ss:$4 sm:$0xff] %v12647_v5 }
 0x593   : > { %v8069_v41 = vsel %vm345_vm1, %v8052_v10, 0  ;;  %8711 = vrot.lane.b32.xlu2 %v8695_v61, %s9829_s28 }
 0x594   : > { %v7006_v44 = vpop.f32.mrf.mxu2 }
 0x595   : > { %v7103_v19 = vpop.f32.mrf.mxu0  ;;  %v7116_v1 = vpop.f32.mrf.mxu1  ;;  %v8863_v61 = vld.sshfl [vmem:[#allocation1 + $0x30] sm:$0xff pattern:$0x73625140]  ;;  %v8865_v10 = vld.sshfl [vmem:[#allocation1 + $0x38] sm:$0xff pattern:$0x73625140] }
 0x596   : > { %v7092_v50 = vpop.f32.mrf.mxu3  ;;  %v12613_v43 = vadd.f32 %v7103_v19, %v12499_v59  ;;  %v12616_v56 = vadd.f32 %v7116_v1, %v12502_v37  ;;  %v8063_v59 = vsel %vm345_vm1, %v8050_v54, 0  ;;  %v8066_v37 = vsel %vm345_vm1, %v8051_v57, 0  ;;  %8871 = vrot.lane.b32.xlu0 %v8855_v58, %s9830_s23  ;;  %v8208_v52 = vpop.permute.xlu2 %8207  ;;  %v8861_v19 = vld.sshfl [vmem:[#allocation1 + $0x28] sm:$0xff pattern:$0x73625140] }
 0x598   : > { %9694 = vmatmul.msk.bf16.vlgmr.msra.gmra.mxu0 %vm341_vm2, %v12552_v42  ;;  %9695 = vmatmul.msk.bf16.vlgmr.msra.gmra.mxu1 %vm341_vm2, %v12552_v42 }
 0x599   : > { %9696 = vmatmul.msk.bf16.vlgmr.msra.gmra.mxu2 %vm341_vm2, %v12621_v62  ;;  %8001 = vmatpush.bf16.msra.mxu0 %v7914_v60  ;;  %v8046_v22 = vpop.permute.xlu0 %8045  ;;  %v9016_v5 = vld.sshfl [vmem:[#allocation1] sm:$0xff pattern:$0x73625140] }
 0x59a   : > { %8087 = vmatpush.bf16.msra.mxu1 %v8060_v14  ;;  %8100 = vmatpush.bf16.msra.mxu2 %v8063_v59  ;;  %v8054_v15 = vsel %vm7884_vm10, %v8044_v29, %v8046_v22  ;;  %v287_v14 = vld [vmem:[%s13170_s1 + $0xc8] sm:$0xf] }
 0x59b   : > { %9697 = vmatmul.msk.bf16.vlgmr.msra.gmra.mxu3 %vm341_vm2, %v12621_v62  ;;  %8873 = vrot.lane.b32.xlu1 %v8857_v45, %s9830_s23 }
 0x59c   : > { %8113 = vmatpush.bf16.msra.mxu3 %v8066_v37  ;;  %v7129_v42 = vpop.f32.mrf.mxu2  ;;  %8869 = vrot.lane.b32.xlu2 %v8853_v9, %s9830_s23 }
 0x59d   : > { %v12638_v28 = vadd.f32 %v7129_v42, %v12514_v32  ;;  %v7105_v27 = vpop.f32.mrf.mxu0  ;;  %v7118_v3 = vpop.f32.mrf.mxu1 }
 0x59e   : > { %v7142_v7 = vpop.f32.mrf.mxu3  ;;  %v8048_v32 = vpop.permute.xlu1 %8047  ;;  %8877 = vrot.lane.b32.xlu0 %v8861_v19, %s9830_s23 }
 0x59f   : > { %v12641_v24 = vadd.f32 %v7142_v7, %v12517_v4  ;;  %v8055_v26 = vsel %vm7884_vm10, %v8046_v22, %v8048_v32 }
 0x5a1   : > { %v8204_v6 = vpop.permute.xlu0 %8203 }
 0x5a2   : > { %v8218_v31 = vsel %vm8217_vm11, %v8202_v17, %v8204_v6 }
 0x5a3   : > { %v8229_v29 = vsel %vm345_vm1, %v8218_v31, 0  ;;  %8879 = vrot.lane.b32.xlu1 %v8863_v61, %s9830_s23 }
 0x5a4   : > { %v7131_v4 = vpop.f32.mrf.mxu2 }
 0x5a5   : > { %v7155_v25 = vpop.f32.mrf.mxu0  ;;  %v7168_v2 = vpop.f32.mrf.mxu1 }
 0x5a6   : > { %v7144_v21 = vpop.f32.mrf.mxu3  ;;  %v12658_v38 = vadd.f32 %v7155_v25, %v12530_v39  ;;  %v12661_v16 = vadd.f32 %v7168_v2, %v12533_v51  ;;  %v8075_v39 = vsel %vm345_vm1, %v8054_v15, 0  ;;  %v8078_v51 = vsel %vm345_vm1, %v8055_v26, 0  ;;  %v8206_v49 = vpop.permute.xlu1 %8205  ;;  %9032 = vrot.lane.b32.xlu0 %v9016_v5, %s9830_s23  ;;  %v8859_v26 = vld.sshfl [vmem:[#allocation1 + $0x20] sm:$0xff pattern:$0x73625140] }
 0x5a7   : > { %v8220_v57 = vsel %vm8217_vm11, %v8206_v49, %v8208_v52  ;;  %v9018_v21 = vld.sshfl [vmem:[#allocation1 + $0x8] sm:$0xff pattern:$0x73625140]  ;;  %8875 = vrot.lane.b32.xlu2 %v8859_v26, %s9830_s23  ;;  %9015 = vst [vmem:[#allocation1 + $0x20] ss:$4 sm:$0xff] %v12644_v20 }
 0x5a8   : > { %9698 = vmatmul.msk.bf16.vlgmr.msrb.gmra.mxu0 %vm341_vm2, %v12621_v62  ;;  %9699 = vmatmul.msk.bf16.vlgmr.msrb.gmra.mxu1 %vm341_vm2, %v12621_v62  ;;  %v8235_v7 = vsel %vm345_vm1, %v8220_v57, 0  ;;  %v261_v57 = vld [vmem:[%s13170_s1 + $0x60] sm:$0xf] }
 0x5a9   : > { %9700 = vmatmul.msk.bf16.vlgmr.msrb.gmra.mxu2 %vm341_vm2, %v12621_v62  ;;  %8126 = vmatpush.bf16.msrb.mxu0 %v8069_v41  ;;  %v8210_v1 = vpop.permute.xlu0 %8209 }
 0x5aa   : > { %8139 = vmatpush.bf16.msrb.mxu1 %v8072_v36  ;;  %8152 = vmatpush.bf16.msrb.mxu2 %v8075_v39  ;;  %v8221_v59 = vsel %vm8217_vm11, %v8208_v52, %v8210_v1 }
 0x5ab   : > { %9701 = vmatmul.msk.bf16.vlgmr.msrb.gmra.mxu3 %vm341_vm2, %v12621_v62  ;;  %9034 = vrot.lane.b32.xlu1 %v9018_v21, %s9830_s23 }
 0x5ac   : > { %8165 = vmatpush.bf16.msrb.mxu3 %v8078_v51  ;;  %v7259_v48 = vpop.f32.mrf.mxu2 }
 0x5ad   : > { %v12679_v0 = vadd.f32 %v7259_v48, %v12544_v55  ;;  %v7157_v44 = vpop.f32.mrf.mxu0  ;;  %v7170_v50 = vpop.f32.mrf.mxu1  ;;  %v8219_v55 = vsel %vm8217_vm11, %v8204_v6, %v8206_v49 }
 0x5ae   : > { %v7272_v8 = vpop.f32.mrf.mxu3  ;;  %v8232_v42 = vsel %vm345_vm1, %v8219_v55, 0  ;;  %v8212_v27 = vpop.permute.xlu1 %8211  ;;  %v9024_v44 = vld.sshfl [vmem:[#allocation1 + $0x20] sm:$0xff pattern:$0x73625140] }
 0x5af   : > { %v12682_v47 = vadd.f32 %v7272_v8, %v12547_v46  ;;  %v8222_v15 = vsel %vm8217_vm11, %v8210_v1, %v8212_v27  ;;  %8881 = vrot.lane.b32.xlu2 %v8865_v10, %s9830_s23 }
 0x5b0   : > { %v8241_v51 = vsel %vm345_vm1, %v8222_v15, 0 }
 0x5b1   : > { %v8216_v4 = vpop.permute.xlu0 %8215 }
 0x5b3   : > { %9040 = vrot.lane.b32.xlu1 %v9024_v44, %s9830_s23 }
 0x5b4   : > { %v7261_v54 = vpop.f32.mrf.mxu2 }
 0x5b5   : > { %v7285_v46 = vpop.f32.mrf.mxu0  ;;  %v7298_v60 = vpop.f32.mrf.mxu1 }
 0x5b6   : > { %v7274_v40 = vpop.f32.mrf.mxu3  ;;  %v12695_v37 = vadd.f32 %v7285_v46, %v12567_v11  ;;  %v12698_v63 = vadd.f32 %v7298_v60, %v12570_v53  ;;  %v8238_v11 = vsel %vm345_vm1, %v8221_v59, 0  ;;  %v8214_v53 = vpop.permute.xlu2 %8213 }
 0x5b7   : > { %v8224_v17 = vsel %vm8217_vm11, %v8214_v53, %v8216_v4  ;;  %v8367_v39 = vpop.permute.xlu1 %8366  ;;  %v9028_v40 = vld.sshfl [vmem:[#allocation1 + $0x30] sm:$0xff pattern:$0x73625140] }
 0x5b8   : > { %9702 = vmatmul.msk.bf16.vlgmr.msra.gmra.mxu0 %vm341_vm2, %v12621_v62  ;;  %9703 = vmatmul.msk.bf16.vlgmr.msra.gmra.mxu1 %vm341_vm2, %v287_v14  ;;  %v8247_v48 = vsel %vm345_vm1, %v8224_v17, 0 }
 0x5b9   : > { %9704 = vmatmul.msk.bf16.vlgmr.msra.gmra.mxu2 %vm341_vm2, %v287_v14  ;;  %8256 = vmatpush.bf16.msra.mxu0 %v8229_v29  ;;  %v8371_v20 = vpop.permute.xlu0 %8370 }
 0x5ba   : > { %8269 = vmatpush.bf16.msra.mxu1 %v8232_v42  ;;  %8282 = vmatpush.bf16.msra.mxu2 %v8235_v7  ;;  %v9020_v7 = vld.sshfl [vmem:[#allocation1 + $0x10] sm:$0xff pattern:$0x73625140] }
 0x5bb   : > { %9705 = vmatmul.msk.bf16.vlgmr.msra.gmra.mxu3 %vm341_vm2, %v287_v14  ;;  %9036 = vrot.lane.b32.xlu2 %v9020_v7, %s9830_s23 }
 0x5bc   : > { %8295 = vmatpush.bf16.msra.mxu3 %v8238_v11  ;;  %v7311_v62 = vpop.f32.mrf.mxu2  ;;  %v9030_v11 = vld.sshfl [vmem:[#allocation1 + $0x38] sm:$0xff pattern:$0x73625140] }
 0x5bd   : > { %v12713_v12 = vadd.f32 %v7311_v62, %v12582_v13  ;;  %v7287_v22 = vpop.f32.mrf.mxu0  ;;  %v7300_v32 = vpop.f32.mrf.mxu1  ;;  %v8223_v13 = vsel %vm8217_vm11, %v8212_v27, %v8214_v53  ;;  %9046 = vrot.lane.b32.xlu1 %v9030_v11, %s9830_s23 }
 0x5be   : > { %v7324_v3 = vpop.f32.mrf.mxu3  ;;  %v8369_v35 = vpop.permute.xlu2 %8368  ;;  %v8244_v6 = vsel %vm345_vm1, %v8223_v13, 0 }
 0x5bf   : > { %v12716_v34 = vadd.f32 %v7324_v3, %v12585_v23  ;;  %v8382_v58 = vsel %vm8217_vm11, %v8367_v39, %v8369_v35  ;;  %v8383_v60 = vsel %vm8217_vm11, %v8369_v35, %v8371_v20 }
 0x5c0   : > { %v8396_v9 = vsel %vm345_vm1, %v8383_v60, 0 }
 0x5c1   : > { %v8377_v31 = vpop.permute.xlu0 %8376 }
 0x5c4   : > { %v7313_v25 = vpop.f32.mrf.mxu2 }
 0x5c5   : > { %v7337_v23 = vpop.f32.mrf.mxu0  ;;  %v7423_v18 = vpop.f32.mrf.mxu1 }
 0x5c6   : > { %v7326_v2 = vpop.f32.mrf.mxu3  ;;  %v12726_v41 = vadd.f32 %v7337_v23, %v12600_v30  ;;  %v12729_v36 = vadd.f32 %v7423_v18, %v12603_v33  ;;  %v8393_v30 = vsel %vm345_vm1, %v8382_v58, 0  ;;  %v9022_v33 = vld.sshfl [vmem:[#allocation1 + $0x18] sm:$0xff pattern:$0x73625140]  ;;  %v8375_v54 = vpop.permute.xlu2 %8374 }
 0x5c7   : > { %9038 = vrot.lane.b32.xlu0 %v9022_v33, %s9830_s23  ;;  %v8386_v61 = vsel %vm8217_vm11, %v8375_v54, %v8377_v31  ;;  %v9026_v23 = vld.sshfl [vmem:[#allocation1 + $0x28] sm:$0xff pattern:$0x73625140] }
 0x5c8   : > { %9706 = vmatmul.msk.bf16.vlgmr.msrb.gmra.mxu0 %vm341_vm2, %v287_v14  ;;  %9707 = vmatmul.msk.bf16.vlgmr.msrb.gmra.mxu1 %vm341_vm2, %v287_v14  ;;  %v8405_v27 = vsel %vm345_vm1, %v8386_v61, 0 }
 0x5c9   : > { %9708 = vmatmul.msk.bf16.vlgmr.msrb.gmra.mxu2 %vm341_vm2, %v287_v14  ;;  %8308 = vmatpush.bf16.msrb.mxu0 %v8241_v51  ;;  %v8373_v1 = vpop.permute.xlu1 %8372 }
 0x5ca   : > { %8321 = vmatpush.bf16.msrb.mxu1 %v8244_v6  ;;  %8334 = vmatpush.bf16.msrb.mxu2 %v8247_v48  ;;  %v8385_v59 = vsel %vm8217_vm11, %v8373_v1, %v8375_v54  ;;  %v12793_v6 = vld [vmem:[%s13170_s1 + $0xcc] sm:$0xf] }
 0x5cb   : > { %9709 = vmatmul.msk.bf16.vlgmr.msrb.gmra.mxu3 %vm341_vm2, %v287_v14  ;;  %9042 = vrot.lane.b32.xlu2 %v9026_v23, %s9830_s23 }
 0x5cc   : > { %8420 = vmatpush.bf16.msrb.mxu3 %v8393_v30  ;;  %v7436_v8 = vpop.f32.mrf.mxu2 }
 0x5cd   : > { %v12742_v50 = vadd.f32 %v7436_v8, %v12613_v43  ;;  %v7339_v49 = vpop.f32.mrf.mxu0  ;;  %v7425_v19 = vpop.f32.mrf.mxu1  ;;  %v8384_v43 = vsel %vm8217_vm11, %v8371_v20, %v8373_v1 }
 0x5ce   : > { %v7449_v45 = vpop.f32.mrf.mxu3  ;;  %v8399_v53 = vsel %vm345_vm1, %v8384_v43, 0  ;;  %v8381_v62 = vpop.permute.xlu2 %8380 }
 0x5cf   : > { %v12745_v52 = vadd.f32 %v7449_v45, %v12616_v56  ;;  %9044 = vrot.lane.b32.xlu0 %v9028_v40, %s9830_s23 }
 0x5d1   : > { %v8535_v10 = vpop.permute.xlu0 %8534 }
 0x5d4   : > { %v7438_v55 = vpop.f32.mrf.mxu2 }
 0x5d5   : > { %v7462_v56 = vpop.f32.mrf.mxu0  ;;  %v7475_v14 = vpop.f32.mrf.mxu1 }
 0x5d6   : > { %v7451_v46 = vpop.f32.mrf.mxu3  ;;  %v12758_v29 = vadd.f32 %v7462_v56, %v12638_v28  ;;  %v12761_v42 = vadd.f32 %v7475_v14, %v12641_v24  ;;  %v8402_v28 = vsel %vm345_vm1, %v8385_v59, 0  ;;  %v8379_v24 = vpop.permute.xlu1 %8378 }
 0x5d7   : > { %v8539_v35 = vpop.permute.xlu2 %8538  ;;  %v8387_v13 = vsel %vm8217_vm11, %v8377_v31, %v8379_v24  ;;  %v8388_v26 = vsel %vm8217_vm11, %v8379_v24, %v8381_v62 }
 0x5d8   : > { %9710 = vmatmul.msk.bf16.vlgmr.msra.gmra.mxu0 %vm341_vm2, %v261_v57  ;;  %9711 = vmatmul.msk.bf16.vlgmr.msra.gmra.mxu1 %vm341_vm2, %v261_v57  ;;  %v8408_v58 = vsel %vm345_vm1, %v8387_v13, 0  ;;  %v8411_v48 = vsel %vm345_vm1, %v8388_v26, 0  ;;  %v12851_v26 = vld [vmem:[%s13170_s1 + $0x64] sm:$0xf] }
 0x5d9   : > { %9712 = vmatmul.msk.bf16.vlgmr.msra.gmra.mxu2 %vm341_vm2, %v261_v57  ;;  %8433 = vmatpush.bf16.msra.mxu0 %v8396_v9 }
 0x5da   : > { %8446 = vmatpush.bf16.msra.mxu1 %v8399_v53  ;;  %8459 = vmatpush.bf16.msra.mxu2 %v8402_v28 }
 0x5db   : > { %9713 = vmatmul.msk.bf16.vlgmr.msra.gmra.mxu3 %vm341_vm2, %v261_v57 }
 0x5dc   : > { %8472 = vmatpush.bf16.msra.mxu3 %v8405_v27  ;;  %v7488_v3 = vpop.f32.mrf.mxu2 }
 0x5dd   : > { %v12774_v32 = vadd.f32 %v7488_v3, %v12658_v38  ;;  %v7464_v21 = vpop.f32.mrf.mxu0  ;;  %v7477_v5 = vpop.f32.mrf.mxu1 }
 0x5de   : > { %v7501_v22 = vpop.f32.mrf.mxu3  ;;  %v8537_v25 = vpop.permute.xlu1 %8536 }
 0x5df   : > { %v12777_v4 = vadd.f32 %v7501_v22, %v12661_v16  ;;  %v8551_v38 = vsel %vm8550_vm12, %v8535_v10, %v8537_v25  ;;  %v8552_v16 = vsel %vm8550_vm12, %v8537_v25, %v8539_v35  ;;  %v8545_v1 = vpop.permute.xlu2 %8544 }
 0x5e0   : > { %v8562_v20 = vsel %vm345_vm1, %v8551_v38, 0 }
 0x5e4   : > { %v7490_v2 = vpop.f32.mrf.mxu2 }
 0x5e5   : > { %v7592_v18 = vpop.f32.mrf.mxu0  ;;  %v7605_v17 = vpop.f32.mrf.mxu1 }
 0x5e6   : > { %v7503_v15 = vpop.f32.mrf.mxu3  ;;  %v12785_v39 = vadd.f32 %v7592_v18, %v12679_v0  ;;  %v12788_v51 = vadd.f32 %v7605_v17, %v12682_v47  ;;  %v8565_v0 = vsel %vm345_vm1, %v8552_v16, 0  ;;  %v8541_v47 = vpop.permute.xlu0 %8540 }
 0x5e7   : > { %v8543_v19 = vpop.permute.xlu1 %8542  ;;  %v8553_v55 = vsel %vm8550_vm12, %v8539_v35, %v8541_v47 }
 0x5e8   : > { %9714 = vmatmul.msk.bf16.vlgmr.msrb.gmra.mxu0 %vm341_vm2, %v261_v57  ;;  %9715 = vmatmul.msk.bf16.vlgmr.msrb.gmra.mxu1 %vm341_vm2, %v261_v57  ;;  %v8554_v46 = vsel %vm8550_vm12, %v8541_v47, %v8543_v19  ;;  %v8555_v56 = vsel %vm8550_vm12, %v8543_v19, %v8545_v1 }
 0x5e9   : > { %9716 = vmatmul.msk.bf16.vlgmr.msrb.gmra.mxu2 %vm341_vm2, %v261_v57  ;;  %8485 = vmatpush.bf16.msrb.mxu0 %v8408_v58  ;;  %v8568_v57 = vsel %vm345_vm1, %v8553_v55, 0  ;;  %v8571_v59 = vsel %vm345_vm1, %v8554_v46, 0  ;;  %v8574_v61 = vsel %vm345_vm1, %v8555_v56, 0 }
 0x5ea   : > { %8498 = vmatpush.bf16.msrb.mxu1 %v8411_v48  ;;  %8589 = vmatpush.bf16.msrb.mxu2 %v8562_v20 }
 0x5eb   : > { %9717 = vmatmul.msk.bf16.vlgmr.msrb.gmra.mxu3 %vm341_vm2, %v12793_v6 }
 0x5ec   : > { %8602 = vmatpush.bf16.msrb.mxu3 %v8565_v0  ;;  %v7618_v30 = vpop.f32.mrf.mxu2 }
 0x5ed   : > { %v12805_v8 = vadd.f32 %v7618_v30, %v12695_v37  ;;  %v7594_v44 = vpop.f32.mrf.mxu0  ;;  %v7607_v49 = vpop.f32.mrf.mxu1 }
 0x5ee   : > { %v7631_v33 = vpop.f32.mrf.mxu3  ;;  %v8547_v54 = vpop.permute.xlu0 %8546 }
 0x5ef   : > { %v12808_v45 = vadd.f32 %v7631_v33, %v12698_v63  ;;  %v8556_v37 = vsel %vm8550_vm12, %v8545_v1, %v8547_v54  ;;  %v8549_v11 = vpop.permute.xlu1 %8548 }
 0x5f0   : > { %v8577_v7 = vsel %vm345_vm1, %v8556_v37, 0  ;;  %v8557_v10 = vsel %vm8550_vm12, %v8547_v54, %v8549_v11 }
 0x5f1   : > { %v8580_v23 = vsel %vm345_vm1, %v8557_v10, 0 }
 0x5f4   : > { %v7620_v40 = vpop.f32.mrf.mxu2 }
 0x5f5   : > { %v7644_v60 = vpop.f32.mrf.mxu0  ;;  %v7657_v43 = vpop.f32.mrf.mxu1 }
 0x5f6   : > { %v7633_v31 = vpop.f32.mrf.mxu3  ;;  %v12815_v63 = vadd.f32 %v7644_v60, %v12713_v12  ;;  %v12818_v14 = vadd.f32 %v7657_v43, %v12716_v34  ;;  %v8700_v12 = vpop.permute.xlu2 %8699 }
 0x5f7   : > { %v8702_v62 = vpop.permute.xlu0 %8701  ;;  %v8704_v3 = vpop.permute.xlu1 %8703 }
 0x5f8   : > { %9718 = vmatmul.msk.bf16.vlgmr.msra.gmra.mxu0 %vm341_vm2, %v12793_v6  ;;  %9719 = vmatmul.msk.bf16.vlgmr.msra.gmra.mxu1 %vm341_vm2, %v12793_v6  ;;  %v8715_v35 = vsel %vm8550_vm12, %v8700_v12, %v8702_v62  ;;  %v8716_v15 = vsel %vm8550_vm12, %v8702_v62, %v8704_v3 }
 0x5f9   : > { %9720 = vmatmul.msk.bf16.vlgmr.msra.gmra.mxu2 %vm341_vm2, %v12793_v6  ;;  %8615 = vmatpush.bf16.msra.mxu0 %v8568_v57  ;;  %v8726_v18 = vsel %vm345_vm1, %v8715_v35, 0 }
 0x5fa   : > { %8628 = vmatpush.bf16.msra.mxu1 %v8571_v59  ;;  %8641 = vmatpush.bf16.msra.mxu2 %v8574_v61 }
 0x5fb   : > { %9721 = vmatmul.msk.bf16.vlgmr.msra.gmra.mxu3 %vm341_vm2, %v12793_v6 }
 0x5fc   : > { %8654 = vmatpush.bf16.msra.mxu3 %v8577_v7  ;;  %v7670_v34 = vpop.f32.mrf.mxu2 }
 0x5fd   : > { %v12833_v53 = vadd.f32 %v7670_v34, %v12726_v41  ;;  %v7646_v27 = vpop.f32.mrf.mxu0  ;;  %v7659_v24 = vpop.f32.mrf.mxu1 }
 0x5fe   : > { %v7756_v9 = vpop.f32.mrf.mxu3  ;;  %v8706_v22 = vpop.permute.xlu2 %8705 }
 0x5ff   : > { %v12836_v28 = vadd.f32 %v7756_v9, %v12729_v36  ;;  %v8717_v41 = vsel %vm8550_vm12, %v8704_v3, %v8706_v22  ;;  %v8708_v17 = vpop.permute.xlu0 %8707  ;;  %v8710_v47 = vpop.permute.xlu1 %8709 }
 0x600   : > { %v8718_v49 = vsel %vm8550_vm12, %v8706_v22, %v8708_v17  ;;  %v8719_v19 = vsel %vm8550_vm12, %v8708_v17, %v8710_v47 }
 0x601   : > { %v8735_v55 = vsel %vm345_vm1, %v8718_v49, 0  ;;  %v8738_v46 = vsel %vm345_vm1, %v8719_v19, 0 }
 0x604   : > { %v7672_v21 = vpop.f32.mrf.mxu2 }
 0x605   : > { %v7769_v25 = vpop.f32.mrf.mxu0  ;;  %v7782_v2 = vpop.f32.mrf.mxu1 }
 0x606   : > { %v7758_v5 = vpop.f32.mrf.mxu3  ;;  %v12843_v36 = vadd.f32 %v7769_v25, %v12742_v50  ;;  %v12846_v13 = vadd.f32 %v7782_v2, %v12745_v52  ;;  %v8729_v50 = vsel %vm345_vm1, %v8716_v15, 0  ;;  %v8732_v52 = vsel %vm345_vm1, %v8717_v41, 0  ;;  %v8712_v0 = vpop.permute.xlu2 %8711 }
 0x607   : > { %v8714_v30 = vpop.permute.xlu0 %8713  ;;  %v8720_v40 = vsel %vm8550_vm12, %v8710_v47, %v8712_v0 }
 0x608   : > { %9722 = vmatmul.msk.bf16.vlgmr.msrb.gmra.mxu0 %vm341_vm2, %v12793_v6  ;;  %9723 = vmatmul.msk.bf16.vlgmr.msrb.gmra.mxu1 %vm341_vm2, %v12793_v6  ;;  %v8741_v60 = vsel %vm345_vm1, %v8720_v40, 0 }
 0x609   : > { %9724 = vmatmul.msk.bf16.vlgmr.msrb.gmra.mxu2 %vm341_vm2, %v12851_v26  ;;  %8667 = vmatpush.bf16.msrb.mxu0 %v8580_v23 }
 0x60a   : > { %8753 = vmatpush.bf16.msrb.mxu1 %v8726_v18  ;;  %8766 = vmatpush.bf16.msrb.mxu2 %v8729_v50 }
 0x60b   : > { %9725 = vmatmul.msk.bf16.vlgmr.msrb.gmra.mxu3 %vm341_vm2, %v12851_v26 }
 0x60c   : > { %8779 = vmatpush.bf16.msrb.mxu3 %v8732_v52  ;;  %v7795_v38 = vpop.f32.mrf.mxu2 }
 0x60d   : > { %v12866_v58 = vadd.f32 %v7795_v38, %v12758_v29  ;;  %v7771_v48 = vpop.f32.mrf.mxu0  ;;  %v7784_v20 = vpop.f32.mrf.mxu1  ;;  %v8721_v29 = vsel %vm8550_vm12, %v8712_v0, %v8714_v30 }
 0x60e   : > { %v7808_v16 = vpop.f32.mrf.mxu3  ;;  %v8744_v43 = vsel %vm345_vm1, %v8721_v29, 0  ;;  %v8870_v56 = vpop.permute.xlu2 %8869 }
 0x60f   : > { %v12869_v6 = vadd.f32 %v7808_v16, %v12761_v42  ;;  %v8872_v11 = vpop.permute.xlu0 %8871 }
 0x610   : > { %v8885_v62 = vsel %vm8883_vm13, %v8870_v56, %v8872_v11 }
 0x611   : > { %v8898_v25 = vsel %vm345_vm1, %v8885_v62, 0 }
 0x614   : > { %v7797_v33 = vpop.f32.mrf.mxu2 }
 0x615   : > { %v7821_v1 = vpop.f32.mrf.mxu0  ;;  %v7834_v54 = vpop.f32.mrf.mxu1 }
 0x616   : > { %v7810_v44 = vpop.f32.mrf.mxu3  ;;  %v12876_v42 = vadd.f32 %v7821_v1, %v12774_v32  ;;  %v12879_v31 = vadd.f32 %v7834_v54, %v12777_v4  ;;  %v8868_v32 = vpop.permute.xlu1 %8867 }
 0x617   : > { %v8876_v34 = vpop.permute.xlu2 %8875  ;;  %v8884_v24 = vsel %vm8883_vm13, %v8868_v32, %v8870_v56 }
 0x618   : > { %9726 = vmatmul.msk.bf16.vlgmr.msra.gmra.mxu0 %vm341_vm2, %v12851_v26  ;;  %9727 = vmatmul.msk.bf16.vlgmr.msra.gmra.mxu1 %vm341_vm2, %v12851_v26  ;;  %v8895_v35 = vsel %vm345_vm1, %v8884_v24, 0 }
 0x619   : > { %9728 = vmatmul.msk.bf16.vlgmr.msra.gmra.mxu2 %vm341_vm2, %v12851_v26  ;;  %8792 = vmatpush.bf16.msra.mxu0 %v8735_v55 }
 0x61a   : > { %8805 = vmatpush.bf16.msra.mxu1 %v8738_v46  ;;  %8818 = vmatpush.bf16.msra.mxu2 %v8741_v60 }
 0x61b   : > { %9729 = vmatmul.msk.bf16.vlgmr.msra.gmra.mxu3 %vm341_vm2, %v12851_v26 }
 0x61c   : > { %8831 = vmatpush.bf16.msra.mxu3 %v8744_v43  ;;  %v7925_v4 = vpop.f32.mrf.mxu2 }
 0x61d   : > { %v12894_v57 = vadd.f32 %v7925_v4, %v12785_v39  ;;  %v7823_v61 = vpop.f32.mrf.mxu0  ;;  %v7836_v7 = vpop.f32.mrf.mxu1  ;;  %v289_v39 = vld [vmem:[%s13170_s1 + $0xd0] sm:$0xf] }
 0x61e   : > { %v7938_v37 = vpop.f32.mrf.mxu3  ;;  %v8874_v12 = vpop.permute.xlu1 %8873 }
 0x61f   : > { %v12897_v59 = vadd.f32 %v7938_v37, %v12788_v51  ;;  %v8886_v51 = vsel %vm8883_vm13, %v8872_v11, %v8874_v12  ;;  %v8887_v21 = vsel %vm8883_vm13, %v8874_v12, %v8876_v34  ;;  %v8882_v17 = vpop.permute.xlu2 %8881 }
 0x620   : > { %v8901_v2 = vsel %vm345_vm1, %v8886_v51, 0  ;;  %v8904_v15 = vsel %vm345_vm1, %v8887_v21, 0  ;;  %v9831_v21 = vmov 0  }
 0x621   : > { %9796 = vset.pattern.permute.xlu0 %v9831_v21  ;;  %9795 = vset.pattern.permute.xlu2 %v9831_v21 }
 0x624   : > { %v7927_v9 = vpop.f32.mrf.mxu2 }
 0x625   : > { %v7951_v3 = vpop.f32.mrf.mxu0  ;;  %v7964_v22 = vpop.f32.mrf.mxu1 }
 0x626   : > { %v7940_v27 = vpop.f32.mrf.mxu3  ;;  %v12907_v5 = vadd.f32 %v7951_v3, %v12805_v8  ;;  %v12910_v10 = vadd.f32 %v7964_v22, %v12808_v45  ;;  %v8878_v8 = vpop.permute.xlu0 %8877 }
 0x627   : > { %v8880_v45 = vpop.permute.xlu1 %8879  ;;  %v8888_v0 = vsel %vm8883_vm13, %v8876_v34, %v8878_v8  ;;  %v9037_v40 = vpop.permute.xlu2 %9036 }
 0x628   : > { %9730 = vmatmul.msk.bf16.vlgmr.msrb.gmra.mxu0 %vm341_vm2, %v12851_v26  ;;  %9731 = vmatmul.msk.bf16.vlgmr.msrb.gmra.mxu1 %vm341_vm2, %v289_v39  ;;  %v8889_v47 = vsel %vm8883_vm13, %v8878_v8, %v8880_v45  ;;  %v8890_v44 = vsel %vm8883_vm13, %v8880_v45, %v8882_v17  ;;  %v8907_v19 = vsel %vm345_vm1, %v8888_v0, 0  ;;  %v291_v8 = vld [vmem:[%s13171_s2] sm:$0xff] }
 0x629   : > { %9732 = vmatmul.msk.bf16.vlgmr.msrb.gmra.mxu2 %vm341_vm2, %v289_v39  ;;  %8922 = vmatpush.bf16.msrb.mxu0 %v8895_v35  ;;  %v8910_v1 = vsel %vm345_vm1, %v8889_v47, 0  ;;  %v8913_v54 = vsel %vm345_vm1, %v8890_v44, 0 }
 0x62a   : > { %8935 = vmatpush.bf16.msrb.mxu1 %v8898_v25  ;;  %8948 = vmatpush.bf16.msrb.mxu2 %v8901_v2 }
 0x62b   : > { %9733 = vmatmul.msk.bf16.vlgmr.msrb.gmra.mxu3 %vm341_vm2, %v289_v39  ;;  %9180 = vperm.xlu2 %9795, %v291_v8  }
 0x62c   : > { %8961 = vmatpush.bf16.msrb.mxu3 %v8904_v15  ;;  %v7977_v41 = vpop.f32.mrf.mxu2 }
 0x62d   : > { %v12922_v26 = vadd.f32 %v7977_v41, %v12815_v63  ;;  %v7953_v50 = vpop.f32.mrf.mxu0  ;;  %v7966_v52 = vpop.f32.mrf.mxu1 }
 0x62e   : > { %v7990_v23 = vpop.f32.mrf.mxu3  ;;  %v9033_v16 = vpop.permute.xlu0 %9032 }
 0x62f   : > { %v12925_v18 = vadd.f32 %v7990_v23, %v12818_v14  ;;  %v9035_v38 = vpop.permute.xlu1 %9034  ;;  %v9043_v4 = vpop.permute.xlu2 %9042 }
 0x630   : > { %v9048_v63 = vsel %vm8883_vm13, %v9033_v16, %v9035_v38  ;;  %v9049_v7 = vsel %vm8883_vm13, %v9035_v38, %v9037_v40 }
 0x631   : > { %v9059_v29 = vsel %vm345_vm1, %v9048_v63, 0  ;;  %v9062_v62 = vsel %vm345_vm1, %v9049_v7, 0 }
 0x634   : > { %v7979_v48 = vpop.f32.mrf.mxu2 }
 0x635   : > { %v8003_v30 = vpop.f32.mrf.mxu0  ;;  %v8089_v33 = vpop.f32.mrf.mxu1  ;;  %v290_v48 = vld [vmem:[%s13170_s1 + $0xd4] sm:$0xf] }
 0x636   : > { %v7992_v20 = vpop.f32.mrf.mxu3  ;;  %v12932_v14 = vadd.f32 %v8003_v30, %v12833_v53  ;;  %v12935_v49 = vadd.f32 %v8089_v33, %v12836_v28 }
 0x637   : > { %v9041_v32 = vpop.permute.xlu1 %9040 }
 0x638   : > { %9734 = vmatmul.msk.bf16.vlgmr.msra.gmra.mxu0 %vm341_vm2, %v289_v39  ;;  %9735 = vmatmul.msk.bf16.vlgmr.msra.gmra.mxu1 %vm341_vm2, %v289_v39  ;;  %v9052_v9 = vsel %vm8883_vm13, %v9041_v32, %v9043_v4 }
 0x639   : > { %9736 = vmatmul.msk.bf16.vlgmr.msra.gmra.mxu2 %vm341_vm2, %v289_v39  ;;  %8974 = vmatpush.bf16.msra.mxu0 %v8907_v19  ;;  %v9039_v56 = vpop.permute.xlu0 %9038 }
 0x63a   : > { %8987 = vmatpush.bf16.msra.mxu1 %v8910_v1  ;;  %9000 = vmatpush.bf16.msra.mxu2 %v8913_v54  ;;  %v9050_v11 = vsel %vm8883_vm13, %v9037_v40, %v9039_v56 }
 0x63b   : > { %9737 = vmatmul.msk.bf16.vlgmr.msra.gmra.mxu3 %vm341_vm2, %v289_v39  ;;  %v9065_v3 = vsel %vm345_vm1, %v9050_v11, 0  ;;  %v9071_v39 = vsel %vm345_vm1, %v9052_v9, 0 }
 0x63c   : > { %9086 = vmatpush.bf16.msra.mxu3 %v9059_v29  ;;  %v8102_v53 = vpop.f32.mrf.mxu2 }
 0x63d   : > { %v12946_v55 = vadd.f32 %v8102_v53, %v12843_v36  ;;  %v8005_v60 = vpop.f32.mrf.mxu0  ;;  %v8091_v43 = vpop.f32.mrf.mxu1  ;;  %v263_v36 = vld [vmem:[%s13170_s1 + $0x68] sm:$0xf] }
 0x63e   : > { %v8115_v28 = vpop.f32.mrf.mxu3 }
 0x63f   : > { %v12949_v46 = vadd.f32 %v8115_v28, %v12846_v13  ;;  %v9051_v13 = vsel %vm8883_vm13, %v9039_v56, %v9041_v32  ;;  %v9047_v41 = vpop.permute.xlu1 %9046 }
 0x640   : > { %v9068_v22 = vsel %vm345_vm1, %v9051_v13, 0 }
 0x641   : > { %v9045_v45 = vpop.permute.xlu0 %9044 }
 0x642   : > { %v9053_v52 = vsel %vm8883_vm13, %v9043_v4, %v9045_v45 }
 0x643   : > { %v9074_v20 = vsel %vm345_vm1, %v9053_v52, 0 }
 0x644   : > { %v8104_v37 = vpop.f32.mrf.mxu2 }
 0x645   : > { %v8128_v12 = vpop.f32.mrf.mxu0  ;;  %v8141_v34 = vpop.f32.mrf.mxu1 }
 0x646   : > { %v8117_v61 = vpop.f32.mrf.mxu3  ;;  %v12959_v27 = vadd.f32 %v8128_v12, %v12866_v58  ;;  %v12962_v24 = vadd.f32 %v8141_v34, %v12869_v6  ;;  %v292_v58 = vld [vmem:[%s13171_s2 + $0x8] sm:$0xff] }
 0x647   : > { %9229 = vperm.xlu0 %9796, %v292_v58  }
 0x648   : > { %9738 = vmatmul.msk.bf16.vlgmr.msrb.gmra.mxu0 %vm341_vm2, %v263_v36  ;;  %9739 = vmatmul.msk.bf16.vlgmr.msrb.gmra.mxu1 %vm341_vm2, %v263_v36 }
 0x649   : > { %9740 = vmatmul.msk.bf16.vlgmr.msrb.gmra.mxu2 %vm341_vm2, %v263_v36  ;;  %9099 = vmatpush.bf16.msrb.mxu0 %v9062_v62 }
 0x64a   : > { %9112 = vmatpush.bf16.msrb.mxu1 %v9065_v3  ;;  %9125 = vmatpush.bf16.msrb.mxu2 %v9068_v22 }
 0x64b   : > { %9741 = vmatmul.msk.bf16.vlgmr.msrb.gmra.mxu3 %vm341_vm2, %v263_v36 }
 0x64c   : > { %9138 = vmatpush.bf16.msrb.mxu3 %v9071_v39  ;;  %v8154_v6 = vpop.f32.mrf.mxu2 }
 0x64d   : > { %v12976_v35 = vadd.f32 %v8154_v6, %v12876_v42  ;;  %v8130_v2 = vpop.f32.mrf.mxu0  ;;  %v8143_v15 = vpop.f32.mrf.mxu1  ;;  %v9054_v42 = vsel %vm8883_vm13, %v9045_v45, %v9047_v41 }
 0x64e   : > { %v8167_v51 = vpop.f32.mrf.mxu3  ;;  %v9077_v0 = vsel %vm345_vm1, %v9054_v42, 0  ;;  %vm9278_vm1 = vcmask 7168  }
 0x64f   : > { %v12979_v25 = vadd.f32 %v8167_v51, %v12879_v31 }
 0x654   : > { %v8156_v23 = vpop.f32.mrf.mxu2 }
 0x655   : > { %v8258_v17 = vpop.f32.mrf.mxu0  ;;  %v8271_v38 = vpop.f32.mrf.mxu1 }
 0x656   : > { %v8169_v50 = vpop.f32.mrf.mxu3  ;;  %v12987_v31 = vadd.f32 %v8258_v17, %v12894_v57  ;;  %v12990_v16 = vadd.f32 %v8271_v38, %v12897_v59 }
 0x658   : > { %9742 = vmatmul.msk.bf16.vlgmr.msra.gmra.mxu0 %vm341_vm2, %v263_v36  ;;  %9743 = vmatmul.msk.bf16.vlgmr.msra.gmra.mxu1 %vm341_vm2, %v263_v36 }
 0x659   : > { %9744 = vmatmul.msk.bf16.vlgmr.msra.gmra.mxu2 %vm341_vm2, %v263_v36  ;;  %9151 = vmatpush.bf16.msra.mxu0 %v9074_v20 }
 0x65a   : > { %9164 = vmatpush.bf16.msra.mxu1 %v9077_v0 }
 0x65b   : > { %9745 = vmatmul.msk.bf16.vlgmr.msra.gmra.mxu3 %vm341_vm2, %v290_v48 }
 0x65c   : > { %v8284_v57 = vpop.f32.mrf.mxu2 }
 0x65d   : > { %v13002_v47 = vadd.f32 %v8284_v57, %v12907_v5  ;;  %v8260_v33 = vpop.f32.mrf.mxu0  ;;  %v8273_v44 = vpop.f32.mrf.mxu1 }
 0x65e   : > { %v8297_v59 = vpop.f32.mrf.mxu3 }
 0x65f   : > { %v13005_v30 = vadd.f32 %v8297_v59, %v12910_v10 }
 0x664   : > { %v8286_v63 = vpop.f32.mrf.mxu2 }
 0x665   : > { %v8310_v1 = vpop.f32.mrf.mxu0  ;;  %v8323_v54 = vpop.f32.mrf.mxu1 }
 0x666   : > { %v8299_v19 = vpop.f32.mrf.mxu3  ;;  %v13008_v40 = vadd.f32 %v8310_v1, %v12922_v26  ;;  %v13011_v29 = vadd.f32 %v8323_v54, %v12925_v18 }
 0x668   : > { %9746 = vmatmul.msk.bf16.vlgmr.msrb.gmra.mxu0 %vm341_vm2, %v290_v48  ;;  %9747 = vmatmul.msk.bf16.vlgmr.msrb.gmra.mxu1 %vm341_vm2, %v290_v48 }
 0x669   : > { %9748 = vmatmul.msk.bf16.vlgmr.msrb.gmra.mxu2 %vm341_vm2, %v290_v48 }
 0x66b   : > { %9749 = vmatmul.msk.bf16.vlgmr.msrb.gmra.mxu3 %vm341_vm2, %v290_v48 }
 0x66c   : > { %v8336_v5 = vpop.f32.mrf.mxu2 }
 0x66d   : > { %v13018_v53 = vadd.f32 %v8336_v5, %v12932_v14  ;;  %v8312_v26 = vpop.f32.mrf.mxu0  ;;  %v8325_v60 = vpop.f32.mrf.mxu1 }
 0x66e   : > { %v8422_v10 = vpop.f32.mrf.mxu3 }
 0x66f   : > { %v13021_v28 = vadd.f32 %v8422_v10, %v12935_v49  ;;  %v13066_v10 = vld [vmem:[%s13172_s3] sm:$0xff] }
 0x674   : > { %v8338_v18 = vpop.f32.mrf.mxu2 }
 0x675   : > { %v8435_v56 = vpop.f32.mrf.mxu0  ;;  %v8448_v32 = vpop.f32.mrf.mxu1 }
 0x676   : > { %v8424_v43 = vpop.f32.mrf.mxu3  ;;  %v13024_v4 = vadd.f32 %v8435_v56, %v12946_v55  ;;  %v13027_v37 = vadd.f32 %v8448_v32, %v12949_v46  ;;  %v9198_v56 = vperm.slane %v13066_v10, 0 }
 0x678   : > { %9750 = vmatmul.msk.bf16.vlgmr.msra.gmra.mxu0 %vm341_vm2, %v290_v48  ;;  %9751 = vmatmul.msk.bf16.vlgmr.msra.gmra.mxu1 %vm341_vm2, %v290_v48 }
 0x67c   : > { %v8461_v14 = vpop.f32.mrf.mxu2 }
 0x67d   : > { %v13032_v49 = vadd.f32 %v8461_v14, %v12959_v27  ;;  %v8437_v11 = vpop.f32.mrf.mxu0  ;;  %v8450_v12 = vpop.f32.mrf.mxu1 }
 0x67e   : > { %v8474_v61 = vpop.f32.mrf.mxu3 }
 0x67f   : > { %v13035_v7 = vadd.f32 %v8474_v61, %v12962_v24 }
 0x684   : > { %v8463_v34 = vpop.f32.mrf.mxu2 }
 0x685   : > { %v8487_v36 = vpop.f32.mrf.mxu0  ;;  %v8500_v13 = vpop.f32.mrf.mxu1 }
 0x686   : > { %v8476_v55 = vpop.f32.mrf.mxu3  ;;  %v13038_v46 = vadd.f32 %v8487_v36, %v12976_v35  ;;  %v13041_v9 = vadd.f32 %v8500_v13, %v12979_v25  ;;  %v13059_v33 = vpop.permute.xlu2 %9180 }
 0x68c   : > { %v8591_v62 = vpop.f32.mrf.mxu2 }
 0x68d   : > { %v8489_v22 = vpop.f32.mrf.mxu0  ;;  %v8502_v27 = vpop.f32.mrf.mxu1  ;;  %v8673_v44 = vadd.f32 %v8591_v62, %v12987_v31  ;;  %v9199_v31 = vperm.slane %v13066_v10, 1 }
 0x68e   : > { %v8604_v3 = vpop.f32.mrf.mxu3  ;;  %v9200_v22 = vperm.slane %v13066_v10, 2 }
 0x68f   : > { %v8674_v63 = vadd.f32 %v8604_v3, %v12990_v16 }
 0x694   : > { %v8593_v39 = vpop.f32.mrf.mxu2 }
 0x695   : > { %v8617_v24 = vpop.f32.mrf.mxu0  ;;  %v8630_v6 = vpop.f32.mrf.mxu1  ;;  %v9201_v39 = vperm.slane %v13066_v10, 3 }
 0x696   : > { %v8606_v58 = vpop.f32.mrf.mxu3  ;;  %v8675_v14 = vadd.f32 %v8617_v24, %v13002_v47  ;;  %v8676_v61 = vadd.f32 %v8630_v6, %v13005_v30 }
 0x69c   : > { %v8643_v51 = vpop.f32.mrf.mxu2 }
 0x69d   : > { %v8619_v2 = vpop.f32.mrf.mxu0  ;;  %v8632_v15 = vpop.f32.mrf.mxu1 }
 0x69e   : > { %v8656_v21 = vpop.f32.mrf.mxu3  ;;  %v8677_v15 = vadd.f32 %v8643_v51, %v13008_v40  ;;  %v9203_v40 = vperm.slane %v13066_v10, 5 }
 0x6a4   : > { %v8645_v8 = vpop.f32.mrf.mxu2 }
 0x6a5   : > { %v13043_v41 = vpop.f32.mrf.mxu0  ;;  %v13045_v35 = vpop.f32.mrf.mxu1  ;;  %v8678_v8 = vadd.f32 %v8656_v21, %v13011_v29 }
 0x6a6   : > { %v8658_v45 = vpop.f32.mrf.mxu3  ;;  %v8679_v21 = vadd.f32 %v13043_v41, %v13018_v53  ;;  %v9204_v41 = vperm.slane %v13066_v10, 6 }
 0x6ac   : > { %v13047_v25 = vpop.f32.mrf.mxu2 }
 0x6ad   : > { %v8671_v50 = vpop.f32.mrf.mxu0  ;;  %v8757_v52 = vpop.f32.mrf.mxu1 }
 0x6ae   : > { %v13049_v23 = vpop.f32.mrf.mxu3 }
 0x6b4   : > { %v8770_v42 = vpop.f32.mrf.mxu2 }
 0x6b5   : > { %v13051_v38 = vpop.f32.mrf.mxu0  ;;  %v13053_v48 = vpop.f32.mrf.mxu1 }
 0x6b6   : > { %v8783_v17 = vpop.f32.mrf.mxu3 }
 0x6bc   : > { %v13055_v20 = vpop.f32.mrf.mxu2 }
 0x6bd   : > { %v8796_v57 = vpop.f32.mrf.mxu0  ;;  %v8809_v59 = vpop.f32.mrf.mxu1 }
 0x6be   : > { %v13057_v0 = vpop.f32.mrf.mxu3 }
 0x6c4   : > { %v8822_v19 = vpop.f32.mrf.mxu2 }
 0x6c5   : > { %v8924_v54 = vpop.f32.mrf.mxu0  ;;  %v8937_v5 = vpop.f32.mrf.mxu1 }
 0x6c6   : > { %v8835_v1 = vpop.f32.mrf.mxu3  ;;  %v9006_v26 = vadd.f32 %v8924_v54, %v8673_v44  ;;  %v9007_v60 = vadd.f32 %v8937_v5, %v8674_v63  ;;  %v9202_v63 = vperm.slane %v13066_v10, 4  ;;  %v13109_v54 = vpop.permute.xlu0 %9229 }
 0x6c7   : > { %v8837_v1 = vadd.f32 %v13045_v35, %v13021_v28 }
 0x6c8   : > { %v9183_v18 = vadd.f32 %v13059_v33, %v9006_v26  ;;  %v9184_v43 = vadd.f32 %v13059_v33, %v9007_v60 }
 0x6ca   : > { %v9190_v16 = vmax.f32 %v9183_v18, 0.0  ;;  %v9191_v32 = vmax.f32 %v9184_v43, 0.0 }
 0x6cc   : > { %v8950_v11 = vpop.f32.mrf.mxu2  ;;  %v9212_v34 = vmul.f32 %v9198_v56, %v9190_v16  ;;  %v13077_v55 = vmul.f32 %v9199_v31, %v9191_v32 }
 0x6cd   : > { %v9008_v36 = vadd.f32 %v8950_v11, %v8675_v14  ;;  %v8926_v62 = vpop.f32.mrf.mxu0  ;;  %v8939_v3 = vpop.f32.mrf.mxu1 }
 0x6ce   : > { %v8963_v12 = vpop.f32.mrf.mxu3  ;;  %v9219_v47 = vpack.c.bf16 %v13077_v55, %v9212_v34  ;;  %v8839_v62 = vadd.f32 %v13049_v23, %v13027_v37  ;;  %v8840_v37 = vadd.f32 %v13051_v38, %v13032_v49 }
 0x6cf   : > { %v9009_v13 = vadd.f32 %v8963_v12, %v8676_v61  ;;  %v9185_v30 = vadd.f32 %v13059_v33, %v9008_v36 }
 0x6d0   : > { %9223 = vst [vmem:[%s13082_s8] sm:$0xff] %v9219_v47 }
 0x6d1   : > { %v9186_v27 = vadd.f32 %v13059_v33, %v9009_v13  ;;  %v9192_v58 = vmax.f32 %v9185_v30, 0.0  ;;  %v8838_v13 = vadd.f32 %v13047_v25, %v13024_v4  ;;  %v8841_v25 = vadd.f32 %v13053_v48, %v13035_v7 }
 0x6d3   : > { %v9193_v24 = vmax.f32 %v9186_v27, 0.0  ;;  %v13090_v6 = vmul.f32 %v9200_v22, %v9192_v58 }
 0x6d4   : > { %v8952_v45 = vpop.f32.mrf.mxu2 }
 0x6d5   : > { %v13094_v2 = vmul.f32 %v9201_v39, %v9193_v24  ;;  %v8976_v42 = vpop.f32.mrf.mxu0  ;;  %v8989_v17 = vpop.f32.mrf.mxu1 }
 0x6d6   : > { %v8965_v50 = vpop.f32.mrf.mxu3  ;;  %v9010_v57 = vadd.f32 %v8976_v42, %v8677_v15  ;;  %v9011_v59 = vadd.f32 %v8989_v17, %v8678_v8 }
 0x6d7   : > { %v9220_v52 = vpack.c.bf16 %v13094_v2, %v13090_v6 }
 0x6d8   : > { %v9187_v44 = vadd.f32 %v13059_v33, %v9010_v57  ;;  %v9188_v19 = vadd.f32 %v13059_v33, %v9011_v59 }
 0x6d9   : > { %9224 = vst [vmem:[%s13082_s8 + $0x8] sm:$0xff] %v9220_v52 }
 0x6da   : > { %v9194_v51 = vmax.f32 %v9187_v44, 0.0  ;;  %v9195_v29 = vmax.f32 %v9188_v19, 0.0 }
 0x6dc   : > { %v9216_v5 = vmul.f32 %v9202_v63, %v9194_v51  ;;  %v13113_v26 = vmul.f32 %v9203_v40, %v9195_v29  ;;  %v9002_v60 = vpop.f32.mrf.mxu2 }
 0x6dd   : > { %v9012_v43 = vadd.f32 %v9002_v60, %v8679_v21  ;;  %v8978_v32 = vpop.f32.mrf.mxu0  ;;  %v8991_v14 = vpop.f32.mrf.mxu1 }
 0x6de   : > { %v9088_v18 = vpop.f32.mrf.mxu3  ;;  %v9221_v61 = vpack.c.bf16 %v13113_v26, %v9216_v5 }
 0x6df   : > { %v9170_v16 = vadd.f32 %v9088_v18, %v8837_v1  ;;  %v9189_v53 = vadd.f32 %v13059_v33, %v9012_v43  ;;  %v8842_v1 = vadd.f32 %v13055_v20, %v13038_v46 }
 0x6e0   : > { %9225 = vst [vmem:[%s13082_s8 + $0x10] sm:$0xff] %v9221_v61 }
 0x6e1   : > { %v9232_v28 = vadd.f32 %v13109_v54, %v9170_v16  ;;  %v9196_v35 = vmax.f32 %v9189_v53, 0.0 }
 0x6e3   : > { %v9239_v11 = vmax.f32 %v9232_v28, 0.0  ;;  %v13122_v12 = vmul.f32 %v9204_v41, %v9196_v35 }
 0x6e4   : > { %v9004_v33 = vpop.f32.mrf.mxu2 }
 0x6e5   : > { %v9246_v36 = vmul.f32 %v9239_v11, %v9198_v56  ;;  %v9222_v47 = vpack.c.bf16 %v13122_v12, %v13122_v12  ;;  %v9101_v30 = vpop.f32.mrf.mxu0  ;;  %v9114_v58 = vpop.f32.mrf.mxu1 }
 0x6e6   : > { %v9090_v3 = vpop.f32.mrf.mxu3  ;;  %v9171_v24 = vadd.f32 %v9101_v30, %v8838_v13  ;;  %v9172_v15 = vadd.f32 %v9114_v58, %v8839_v62 }
 0x6e7   : > { %v9262_v27 = vadd.f32 %v9246_v36, %v9212_v34  ;;  %9226 = vst [vmem:[%s13082_s8 + $0x18] sm:$0xf] %v9222_v47 }
 0x6e8   : > { %v9233_v8 = vadd.f32 %v13109_v54, %v9171_v24  ;;  %v9234_v56 = vadd.f32 %v13109_v54, %v9172_v15 }
 0x6ea   : > { %v9240_v45 = vmax.f32 %v9233_v8, 0.0  ;;  %v9241_v4 = vmax.f32 %v9234_v56, 0.0 }
 0x6ec   : > { %v9247_v23 = vmul.f32 %v9240_v45, %v9199_v31  ;;  %v9248_v34 = vmul.f32 %v9241_v4, %v9200_v22  ;;  %v9127_v50 = vpop.f32.mrf.mxu2 }
 0x6ed   : > { %v9173_v42 = vadd.f32 %v9127_v50, %v8840_v37  ;;  %v9103_v57 = vpop.f32.mrf.mxu0  ;;  %v9116_v59 = vpop.f32.mrf.mxu1 }
 0x6ee   : > { %v9140_v52 = vpop.f32.mrf.mxu3  ;;  %v9253_v44 = vpack.c.bf16 %v9247_v23, %v9246_v36  ;;  %v9263_v19 = vadd.f32 %v9247_v23, %v13077_v55  ;;  %v9264_v51 = vadd.f32 %v9248_v34, %v13090_v6  ;;  %v8843_v55 = vadd.f32 %v13057_v0, %v13041_v9 }
 0x6ef   : > { %v9174_v17 = vadd.f32 %v9140_v52, %v8841_v25  ;;  %v9235_v49 = vadd.f32 %v13109_v54, %v9173_v42 }
 0x6f0   : > { %9752 = vst [vmem:[%s13082_s8 + $0x1c] sm:$0xff] %v9253_v44  ;;  %v9269_v7 = vadd.f32 %v9263_v19, %v9262_v27 }
 0x6f1   : > { %v9236_v38 = vadd.f32 %v13109_v54, %v9174_v17  ;;  %v9242_v48 = vmax.f32 %v9235_v49, 0.0 }
 0x6f2   : > { %v9270_v22 = vadd.f32 %v9269_v7, %v9264_v51 }
 0x6f3   : > { %v9243_v31 = vmax.f32 %v9236_v38, 0.0  ;;  %v9249_v29 = vmul.f32 %v9242_v48, %v9201_v39 }
 0x6f4   : > { %v9129_v6 = vpop.f32.mrf.mxu2 }
 0x6f5   : > { %v9250_v21 = vmul.f32 %v9243_v31, %v9202_v63  ;;  %v9254_v18 = vpack.c.bf16 %v9249_v29, %v9248_v34  ;;  %v9265_v43 = vadd.f32 %v9249_v29, %v13094_v2  ;;  %v9153_v32 = vpop.f32.mrf.mxu0  ;;  %v9166_v14 = vpop.f32.mrf.mxu1 }
 0x6f6   : > { %v9142_v60 = vpop.f32.mrf.mxu3  ;;  %v9175_v61 = vadd.f32 %v9153_v32, %v8842_v1  ;;  %v9176_v53 = vadd.f32 %v9166_v14, %v8843_v55 }
 0x6f7   : > { %v9266_v16 = vadd.f32 %v9250_v21, %v9216_v5  ;;  %9753 = vst [vmem:[%s13082_s8 + $0x24] sm:$0xff] %v9254_v18  ;;  %v9271_v39 = vadd.f32 %v9270_v22, %v9265_v43 }
 0x6f8   : > { %v9237_v63 = vadd.f32 %v13109_v54, %v9175_v61  ;;  %v9238_v46 = vadd.f32 %v13109_v54, %v9176_v53 }
 0x6f9   : > { %v9272_v20 = vadd.f32 %v9271_v39, %v9266_v16 }
 0x6fa   : > { %v9244_v9 = vmax.f32 %v9237_v63, 0.0  ;;  %v9245_v0 = vmax.f32 %v9238_v46, 0.0 }
 0x6fc   : > { %v9251_v2 = vmul.f32 %v9244_v9, %v9203_v40  ;;  %v9252_v5 = vmul.f32 %v9245_v0, %v9204_v41 }
 0x6fd   : > { %v9155_v28 = vpop.f32.mrf.mxu0  ;;  %v9168_v35 = vpop.f32.mrf.mxu1 }
 0x6fe   : > { %v9255_v11 = vpack.c.bf16 %v9251_v2, %v9250_v21  ;;  %v9267_v36 = vadd.f32 %v9251_v2, %v13113_v26  ;;  %v9256_v13 = vpack.c.bf16 %v9252_v5, %v9252_v5  ;;  %v9268_v62 = vadd.f32 %v9252_v5, %v13122_v12 }
 0x700   : > { %9754 = vst [vmem:[%s13082_s8 + $0x2c] sm:$0xff] %v9255_v11  ;;  %v9273_v54 = vadd.f32 %v9272_v20, %v9267_v36 }
 0x701   : > { %9755 = vst [vmem:[%s13082_s8 + $0x34] sm:$0xf] %v9256_v13 }
 0x702   : > { %v9274_v33 = vadd.f32 %v9273_v54, %v9268_v62 }
 0x704   : > { %9275 = vadd.xlane.f32.xlu1 %v9274_v33 }
 0x777   : > { %v9276_v10 = vpop.xlane.xlu1 %9275 }
 0x778   : > { %v9277_v40 = vmul.f32 0.001953125, %v9276_v10 }
 0x77a   : > { %9279 = vst.msk [vmem:[%s235_s12] sm:$0xff] %vm9278_vm1, %v9277_v40 }
 0x77b PF: > { %s16_s18 = sadd.s32 1, %s9803_s18  }
 0x77c   : > { %p13_p4 = scmp.ge.s32.totalorder %s16_s18, 4  }
 0x77e   :  { %15 = sbr.rel (!%p13_p4) target bundleno = 1 (0x1), region = 133 }

</bundles_post_ra>
